<compile_context>
chip_gen: v7x
topology: tpu7x:2x2x1
jax: 0.10.0
libtpu: 0.0.40
codegen_flags: <defaults>
</compile_context>

<pallas_src>
import functools

import jax
import jax.numpy as jnp
from jax.experimental import pallas as pl
from jax.experimental.pallas import tpu as pltpu

K = 4          # kernel size of every DCGAN generator layer
EPS = 1e-5     # nn.BatchNorm2d default eps

# Sub-pixel taps of the stride-2, pad-1, K=4 transposed conv:
# output row 2m+py gets kernel row ky applied at padded-input row m+ro for
# (ky, ro) in _TAPS[py]; identical decomposition along columns.
_TAPS = (((1, 1), (3, 0)),    # even output rows / cols
         ((0, 2), (2, 1)))    # odd  output rows / cols


def _round_up(x, m):
    return -(-x // m) * m


# ----------------------------------------------------------------------------
# Pallas kernels
# ----------------------------------------------------------------------------
def _input_gemm_kernel(z_ref, w_ref, y_ref):
    """Layer 1 (1x1 input): (N_pad, nz_pad) @ (nz_pad, C1*16), lane-dense."""
    y_ref[...] = jnp.dot(z_ref[...], w_ref[...],
                         preferred_element_type=jnp.float32).astype(y_ref.dtype)


def _convt2_kernel(x_ref, scale_ref, shift_ref, inmask_ref, outmask_ref, w_ref,
                   y_ref, sum_ref, sq_ref, *, offsets, lout, act):
    """One batch element of a stride-2 ConvTranspose2d (sub-pixel form).

    x_ref       : (Cin_pad, XPAD)   raw (pre-BN) previous activation, padded+flat
    scale/shift : (Cin_pad, 1)      previous layer's folded BN (ReLU'd on load)
    inmask      : (1, XPAD)         1 on interior pixels, 0 on the zero-pad ring
    outmask     : (1, LOUT)         1 on valid output lanes (lane = m*Wp + j, j<W)
    w_ref       : (16, CO_pad, Cin_pad)  per-(parity group, tap) weight matrices
    y_ref       : (4, CO_pad, LOUT)      raw conv output per parity group (bf16)
    sum/sq_ref  : (CO_pad, 1)            per-channel stats for THIS layer's BN
    """
    x = x_ref[...].astype(jnp.float32)
    # Previous layer's BatchNorm + ReLU applied on load (saves one HBM pass).
    # The zero-pad ring must stay zero after the affine map, hence the mask.
    x = jnp.maximum(x * scale_ref[...] + shift_ref[...], 0.0) * inmask_ref[...]
    x = x.astype(jnp.bfloat16)

    # 9 distinct shifted views of the flattened padded image serve all 16
    # (group, tap) matmuls: tap (ro, co) == contiguous slice at ro*Wp + co.
    views = {}
    for off in set(offsets):
        views[off] = x[:, off:off + lout]

    omask = outmask_ref[...]
    co_pad = w_ref.shape[1]
    tsum = jnp.zeros((co_pad, 1), jnp.float32)
    tsq = jnp.zeros((co_pad, 1), jnp.float32)
    for g in range(4):                                   # parity groups
        acc = jnp.zeros((co_pad, lout), jnp.float32)
        for t in range(4):                               # taps
            acc = acc + jnp.dot(w_ref[g * 4 + t], views[offsets[g * 4 + t]],
                                preferred_element_type=jnp.float32)
        accm = acc * omask                               # drop garbage lanes
        tsum = tsum + jnp.sum(accm, axis=-1, keepdims=True)
        tsq = tsq + jnp.sum(accm * accm, axis=-1, keepdims=True)
        if act == "tanh":
            acc = jnp.tanh(acc)
        y_ref[g] = acc.astype(y_ref.dtype)
    sum_ref[...] = tsum
    sq_ref[...] = tsq


# ----------------------------------------------------------------------------
# pallas_call wrappers
# ----------------------------------------------------------------------------
def _input_gemm_call(z2, w2):
    Np, NZp = z2.shape
    L = w2.shape[1]
    return pl.pallas_call(
        _input_gemm_kernel,
        grid=(1,),
        in_specs=[pl.BlockSpec((Np, NZp), lambda i: (0, 0)),
                  pl.BlockSpec((NZp, L), lambda i: (0, 0))],
        out_specs=pl.BlockSpec((Np, L), lambda i: (0, 0)),
        out_shape=jax.ShapeDtypeStruct((Np, L), jnp.bfloat16),
        compiler_params=pltpu.CompilerParams(
            dimension_semantics=("arbitrary",)),
    )(z2, w2)


def _convt2_call(xflat, scale, shift, inmask, outmask, wstk, *,
                 offsets, lout, act):
    N, CI_pad, XPAD = xflat.shape
    CO_pad = wstk.shape[1]
    kernel = functools.partial(_convt2_kernel, offsets=offsets, lout=lout,
                               act=act)
    return pl.pallas_call(
        kernel,
        grid=(N,),
        in_specs=[
            pl.BlockSpec((None, CI_pad, XPAD), lambda n: (n, 0, 0)),
            pl.BlockSpec((CI_pad, 1), lambda n: (0, 0)),
            pl.BlockSpec((CI_pad, 1), lambda n: (0, 0)),
            pl.BlockSpec((1, XPAD), lambda n: (0, 0)),
            pl.BlockSpec((1, lout), lambda n: (0, 0)),
            pl.BlockSpec((16, CO_pad, CI_pad), lambda n: (0, 0, 0)),
        ],
        out_specs=[
            pl.BlockSpec((None, 4, CO_pad, lout), lambda n: (n, 0, 0, 0)),
            pl.BlockSpec((None, CO_pad, 1), lambda n: (n, 0, 0)),
            pl.BlockSpec((None, CO_pad, 1), lambda n: (n, 0, 0)),
        ],
        out_shape=[
            jax.ShapeDtypeStruct((N, 4, CO_pad, lout), jnp.bfloat16),
            jax.ShapeDtypeStruct((N, CO_pad, 1), jnp.float32),
            jax.ShapeDtypeStruct((N, CO_pad, 1), jnp.float32),
        ],
        compiler_params=pltpu.CompilerParams(
            dimension_semantics=("parallel",)),
    )(xflat, scale, shift, inmask, outmask, wstk)


# ----------------------------------------------------------------------------
# JAX-level glue (pure layout plumbing + tiny per-channel math)
# ----------------------------------------------------------------------------
def _tap_weights_and_offsets(w, Wp, CO_pad, CI_pad):
    """w: (Cin, Cout, 4, 4) -> (16, CO_pad, CI_pad) bf16 + flat tap offsets."""
    Cin, Cout = w.shape[0], w.shape[1]
    mats, offs = [], []
    for py in range(2):
        for px in range(2):
            for (ky, ro) in _TAPS[py]:
                for (kx, co) in _TAPS[px]:
                    m = jnp.pad(w[:, :, ky, kx].T,
                                ((0, CO_pad - Cout), (0, CI_pad - Cin)))
                    mats.append(m)
                    offs.append(ro * Wp + co)
    return jnp.stack(mats).astype(jnp.bfloat16), tuple(offs)


def _masks(H, W):
    Hp, Wp = H + 2, W + 2
    xpad = Hp * Wp + 2          # room for the largest tap offset (2*Wp + 2)
    lout = H * Wp
    idx = jnp.arange(xpad)
    r, q = idx // Wp, idx % Wp
    inmask = ((r >= 1) & (r <= Hp - 2) & (q >= 1) & (q <= Wp - 2)
              & (idx < Hp * Wp)).astype(jnp.float32).reshape(1, xpad)
    oidx = jnp.arange(lout)
    outmask = (oidx % Wp < W).astype(jnp.float32).reshape(1, lout)
    return inmask, outmask, xpad, lout


def _flatten_padded(img, xpad):
    """img: (N, C, H, W) bf16 -> (N, C, xpad) zero-padded, row-flattened."""
    N, C, H, W = img.shape
    xp = jnp.pad(img, ((0, 0), (0, 0), (1, 1), (1, 1)))
    xf = xp.reshape(N, C, (H + 2) * (W + 2))
    return jnp.pad(xf, ((0, 0), (0, 0), (0, xpad - (H + 2) * (W + 2))))


def _interleave(y, H, W):
    """y: (N, 4, C_pad, H*(W+2)) -> (N, C_pad, 2H, 2W) (keeps channel pad)."""
    N = y.shape[0]
    Wp = W + 2
    t = y[..., :H * Wp].reshape(N, 2, 2, y.shape[2], H, Wp)[..., :W]
    t = t.transpose(0, 3, 4, 1, 5, 2)                  # (N, C, H, py, W, px)
    return t.reshape(N, y.shape[2], 2 * H, 2 * W)


def _bn_fold(ssum, ssq, count, gamma, beta, ci_pad):
    """Per-channel scale/shift for y -> gamma*(y-mean)/sqrt(var+eps)+beta."""
    C = gamma.shape[0]
    mean = ssum[:C] / count
    var = jnp.maximum(ssq[:C] / count - mean * mean, 0.0)
    scale = gamma * jax.lax.rsqrt(var + EPS)
    shift = beta - mean * scale
    scale = jnp.pad(scale, (0, ci_pad - C)).reshape(ci_pad, 1)
    shift = jnp.pad(shift, (0, ci_pad - C)).reshape(ci_pad, 1)
    return scale.astype(jnp.float32), shift.astype(jnp.float32)


# ----------------------------------------------------------------------------
# Generator: parameters + forward
# ----------------------------------------------------------------------------
def make_generator_params(key, nz, ngf, nc):
    """DCGAN-style init (weights ~ N(0, 0.02)); PyTorch ConvTranspose2d layout."""
    cfg = [(nz, ngf * 8), (ngf * 8, ngf * 4), (ngf * 4, ngf * 2),
           (ngf * 2, ngf), (ngf, nc)]
    params = []
    for (cin, cout) in cfg:
        key, wk = jax.random.split(key)
        params.append(dict(
            w=0.02 * jax.random.normal(wk, (cin, cout, K, K), jnp.float32),
            gamma=jnp.ones((cout,), jnp.float32),
            beta=jnp.zeros((cout,), jnp.float32)))
    return params


def generator_forward(params, z):
    """Train-mode forward of the DCGAN Generator.  z: (N, nz, 1, 1)."""
    N, nz = z.shape[0], z.shape[1]

    # ---- Layer 1: ConvTranspose2d(nz, ngf*8, 4, 1, 0) on 1x1 input ---------
    w1 = params[0]["w"]
    C1 = w1.shape[1]
    NZp, Np = _round_up(nz, 8), _round_up(N, 8)
    z2 = jnp.pad(z.reshape(N, nz),
                 ((0, Np - N), (0, NZp - nz))).astype(jnp.bfloat16)
    w1r = jnp.pad(w1.reshape(nz, C1 * K * K),
                  ((0, NZp - nz), (0, 0))).astype(jnp.bfloat16)
    y1 = _input_gemm_call(z2, w1r)[:N]                  # (N, C1*16) bf16, raw

    # Layer-1 BN statistics (tiny: N*C1*16 elems) -> folded into layer 2.
    y1f = y1.astype(jnp.float32).reshape(N, C1, K * K)
    mean1 = jnp.mean(y1f, axis=(0, 2))
    var1 = jnp.var(y1f, axis=(0, 2))
    scale = (params[0]["gamma"] * jax.lax.rsqrt(var1 + EPS))
    shift = params[0]["beta"] - mean1 * scale
    scale, shift = scale.reshape(C1, 1), shift.reshape(C1, 1)

    img = y1.reshape(N, C1, K, K)                       # (N, C1, 4, 4) raw
    H = W = K

    # ---- Layers 2..5: stride-2 ConvTranspose2d, prev BN+ReLU fused on load -
    for li in range(1, 5):
        w = params[li]["w"]
        Cout = w.shape[1]
        CI_pad = img.shape[1]                           # multiple of 8
        CO_pad = _round_up(Cout, 8)
        inmask, outmask, xpad, lout = _masks(H, W)
        wstk, offsets = _tap_weights_and_offsets(w, W + 2, CO_pad, CI_pad)
        xflat = _flatten_padded(img, xpad)
        act = "tanh" if li == 4 else "none"
        y, psum, psq = _convt2_call(xflat, scale, shift, inmask, outmask, wstk,
                                    offsets=offsets, lout=lout, act=act)
        OH, OW = 2 * H, 2 * W
        if li < 4:                                      # this layer has BN
            scale, shift = _bn_fold(jnp.sum(psum, axis=0)[:, 0],
                                    jnp.sum(psq, axis=0)[:, 0],
                                    float(N * OH * OW),
                                    params[li]["gamma"], params[li]["beta"],
                                    CO_pad)
        img = _interleave(y, H, W)                      # (N, CO_pad, OH, OW)
        H, W = OH, OW

    nc = params[4]["w"].shape[1]
    return img[:, :nc].astype(jnp.float32)              # tanh already applied


if __name__ == "__main__":
    # Small, module-consistent shapes: nz=16, ngf=16, nc=3, batch=2.
    nz, ngf, nc, batch = 16, 16, 3, 2

    key = jax.random.PRNGKey(0)
    key, zk = jax.random.split(key)
    z = jax.random.normal(zk, (batch, nz, 1, 1), jnp.float32)
    params = make_generator_params(key, nz, ngf, nc)

    fwd = jax.jit(functools.partial(generator_forward, params))
    out = jax.block_until_ready(fwd(z))

    assert out.shape == (batch, nc, 64, 64), out.shape
    assert bool(jnp.all(jnp.isfinite(out)))
    assert bool(jnp.all(jnp.abs(out) <= 1.0))  # tanh output range
    print("KERNEL_OK")
</pallas_src>

<mosaic_0001>
module attributes {stable_mosaic.version = 11 : i64} {
  func.func @_input_gemm_kernel(%arg0: i32, %arg1: memref<8x16xbf16, #tpu.memory_space<vmem>>, %arg2: memref<16x2048xbf16, #tpu.memory_space<vmem>>, %arg3: memref<8x2048xbf16, #tpu.memory_space<vmem>>) attributes {dimension_semantics = [#tpu.dimension_semantics<arbitrary>], iteration_bounds = array<i64: 1>, scalar_prefetch = 0 : i64, scratch_operands = 0 : i64, tpu.core_type = #tpu.core_type<tc>, window_params = [{pipeline_mode = #tpu.pipeline_mode<synchronous>, transform_indices = @transform_0, window_bounds = array<i64: 8, 16>}, {pipeline_mode = #tpu.pipeline_mode<synchronous>, transform_indices = @transform_1, window_bounds = array<i64: 16, 2048>}, {pipeline_mode = #tpu.pipeline_mode<synchronous>, transform_indices = @transform_2, window_bounds = array<i64: 8, 2048>}]} {
    %c0 = arith.constant 0 : index
    %c0_0 = arith.constant 0 : index
    %0 = vector.load %arg1[%c0, %c0_0] : memref<8x16xbf16, #tpu.memory_space<vmem>>, vector<8x16xbf16>
    %c0_1 = arith.constant 0 : index
    %c0_2 = arith.constant 0 : index
    %1 = vector.load %arg2[%c0_1, %c0_2] : memref<16x2048xbf16, #tpu.memory_space<vmem>>, vector<16x2048xbf16>
    %cst = arith.constant dense<0.000000e+00> : vector<8x2048xf32>
    %2 = tpu.matmul %0, %1, %cst {dimension_numbers = #tpu.dot_dimension_numbers<[1], [0], [0], [1], [0, 0, 1, 1], [], []>} : vector<8x16xbf16>, vector<16x2048xbf16>, vector<8x2048xf32> -> vector<8x2048xf32>
    %3 = arith.truncf %2 : vector<8x2048xf32> to vector<8x2048xbf16>
    %c0_3 = arith.constant 0 : index
    %c0_4 = arith.constant 0 : index
    %4 = vector.load %arg3[%c0_3, %c0_4] : memref<8x2048xbf16, #tpu.memory_space<vmem>>, vector<8x2048xbf16>
    tpu.vector_store %arg3[%c0_3, %c0_4], %3 {strides = array<i32>} : memref<8x2048xbf16, #tpu.memory_space<vmem>>, vector<8x2048xbf16>,
    return
  }
  func.func @transform_0(%arg0: i32) -> (i32, i32) {
    %c0_i32 = arith.constant 0 : i32
    %c0_i32_0 = arith.constant 0 : i32
    %c0_i32_1 = arith.constant 0 : i32
    return %c0_i32, %c0_i32_0 : i32, i32
  }
  func.func @transform_1(%arg0: i32) -> (i32, i32) {
    %c0_i32 = arith.constant 0 : i32
    %c0_i32_0 = arith.constant 0 : i32
    %c0_i32_1 = arith.constant 0 : i32
    return %c0_i32, %c0_i32_0 : i32, i32
  }
  func.func @transform_2(%arg0: i32) -> (i32, i32) {
    %c0_i32 = arith.constant 0 : i32
    %c0_i32_0 = arith.constant 0 : i32
    %c0_i32_1 = arith.constant 0 : i32
    return %c0_i32, %c0_i32_0 : i32, i32
  }
}

module attributes {stable_mosaic.version = 11 : i64} {
  func.func @_convt2_kernel(%arg0: i32, %arg1: memref<1x128x38xbf16, #tpu.memory_space<vmem>>, %arg2: memref<128x1xf32, #tpu.memory_space<vmem>>, %arg3: memref<128x1xf32, #tpu.memory_space<vmem>>, %arg4: memref<1x38xf32, #tpu.memory_space<vmem>>, %arg5: memref<1x24xf32, #tpu.memory_space<vmem>>, %arg6: memref<16x64x128xbf16, #tpu.memory_space<vmem>>, %arg7: memref<1x4x64x24xbf16, #tpu.memory_space<vmem>>, %arg8: memref<1x64x1xf32, #tpu.memory_space<vmem>>, %arg9: memref<1x64x1xf32, #tpu.memory_space<vmem>>) attributes {dimension_semantics = [#tpu.dimension_semantics<parallel>], iteration_bounds = array<i64: 2>, scalar_prefetch = 0 : i64, scratch_operands = 0 : i64, tpu.core_type = #tpu.core_type<tc>, window_params = [{transform_indices = @transform_0, window_bounds = array<i64: 1, 128, 38>}, {pipeline_mode = #tpu.pipeline_mode<synchronous>, transform_indices = @transform_1, window_bounds = array<i64: 128, 1>}, {pipeline_mode = #tpu.pipeline_mode<synchronous>, transform_indices = @transform_2, window_bounds = array<i64: 128, 1>}, {pipeline_mode = #tpu.pipeline_mode<synchronous>, transform_indices = @transform_3, window_bounds = array<i64: 1, 38>}, {pipeline_mode = #tpu.pipeline_mode<synchronous>, transform_indices = @transform_4, window_bounds = array<i64: 1, 24>}, {pipeline_mode = #tpu.pipeline_mode<synchronous>, transform_indices = @transform_5, window_bounds = array<i64: 16, 64, 128>}, {transform_indices = @transform_6, window_bounds = array<i64: 1, 4, 64, 24>}, {transform_indices = @transform_7, window_bounds = array<i64: 1, 64, 1>}, {transform_indices = @transform_8, window_bounds = array<i64: 1, 64, 1>}]} {
    %c0 = arith.constant 0 : index
    %c0_0 = arith.constant 0 : index
    %c0_1 = arith.constant 0 : index
    %0 = vector.load %arg1[%c0, %c0_0, %c0_1] : memref<1x128x38xbf16, #tpu.memory_space<vmem>>, vector<1x128x38xbf16>
    %1 = vector.shape_cast %0 : vector<1x128x38xbf16> to vector<128x38xbf16>
    %2 = arith.extf %1 : vector<128x38xbf16> to vector<128x38xf32>
    %c0_2 = arith.constant 0 : index
    %c0_3 = arith.constant 0 : index
    %3 = vector.load %arg2[%c0_2, %c0_3] : memref<128x1xf32, #tpu.memory_space<vmem>>, vector<128x1xf32>
    %4 = vector.broadcast %3 : vector<128x1xf32> to vector<128x38xf32>
    %5 = arith.mulf %2, %4 : vector<128x38xf32>
    %c0_4 = arith.constant 0 : index
    %c0_5 = arith.constant 0 : index
    %6 = vector.load %arg3[%c0_4, %c0_5] : memref<128x1xf32, #tpu.memory_space<vmem>>, vector<128x1xf32>
    %7 = vector.broadcast %6 : vector<128x1xf32> to vector<128x38xf32>
    %8 = arith.addf %5, %7 : vector<128x38xf32>
    %cst = arith.constant 0.000000e+00 : f32
    %9 = vector.broadcast %cst : f32 to vector<128x38xf32>
    %10 = arith.maximumf %8, %9 : vector<128x38xf32>
    %c0_6 = arith.constant 0 : index
    %c0_7 = arith.constant 0 : index
    %11 = vector.load %arg4[%c0_6, %c0_7] : memref<1x38xf32, #tpu.memory_space<vmem>>, vector<1x38xf32>
    %12 = vector.broadcast %11 : vector<1x38xf32> to vector<128x38xf32>
    %13 = arith.mulf %10, %12 : vector<128x38xf32>
    %14 = arith.truncf %13 : vector<128x38xf32> to vector<128x38xbf16>
    %15 = vector.extract_strided_slice %14 {offsets = [0, 0], sizes = [128, 24], strides = [1, 1]} : vector<128x38xbf16> to vector<128x24xbf16>
    %16 = vector.extract_strided_slice %14 {offsets = [0, 1], sizes = [128, 24], strides = [1, 1]} : vector<128x38xbf16> to vector<128x24xbf16>
    %17 = vector.extract_strided_slice %14 {offsets = [0, 2], sizes = [128, 24], strides = [1, 1]} : vector<128x38xbf16> to vector<128x24xbf16>
    %18 = vector.extract_strided_slice %14 {offsets = [0, 6], sizes = [128, 24], strides = [1, 1]} : vector<128x38xbf16> to vector<128x24xbf16>
    %19 = vector.extract_strided_slice %14 {offsets = [0, 7], sizes = [128, 24], strides = [1, 1]} : vector<128x38xbf16> to vector<128x24xbf16>
    %20 = vector.extract_strided_slice %14 {offsets = [0, 8], sizes = [128, 24], strides = [1, 1]} : vector<128x38xbf16> to vector<128x24xbf16>
    %21 = vector.extract_strided_slice %14 {offsets = [0, 12], sizes = [128, 24], strides = [1, 1]} : vector<128x38xbf16> to vector<128x24xbf16>
    %22 = vector.extract_strided_slice %14 {offsets = [0, 13], sizes = [128, 24], strides = [1, 1]} : vector<128x38xbf16> to vector<128x24xbf16>
    %23 = vector.extract_strided_slice %14 {offsets = [0, 14], sizes = [128, 24], strides = [1, 1]} : vector<128x38xbf16> to vector<128x24xbf16>
    %c0_8 = arith.constant 0 : index
    %c0_9 = arith.constant 0 : index
    %24 = vector.load %arg5[%c0_8, %c0_9] : memref<1x24xf32, #tpu.memory_space<vmem>>, vector<1x24xf32>
    %cst_10 = arith.constant 0.000000e+00 : f32
    %25 = vector.broadcast %cst_10 : f32 to vector<64x1xf32>
    %cst_11 = arith.constant 0.000000e+00 : f32
    %26 = vector.broadcast %cst_11 : f32 to vector<64x1xf32>
    %cst_12 = arith.constant 0.000000e+00 : f32
    %27 = vector.broadcast %cst_12 : f32 to vector<64x24xf32>
    %c0_13 = arith.constant 0 : index
    %c0_14 = arith.constant 0 : index
    %c0_15 = arith.constant 0 : index
    %28 = vector.load %arg6[%c0_13, %c0_14, %c0_15] : memref<16x64x128xbf16, #tpu.memory_space<vmem>>, vector<1x64x128xbf16>
    %29 = vector.shape_cast %28 : vector<1x64x128xbf16> to vector<64x128xbf16>
    %cst_16 = arith.constant dense<0.000000e+00> : vector<64x24xf32>
    %30 = tpu.matmul %29, %19, %cst_16 {dimension_numbers = #tpu.dot_dimension_numbers<[1], [0], [0], [1], [0, 0, 1, 1], [], []>} : vector<64x128xbf16>, vector<128x24xbf16>, vector<64x24xf32> -> vector<64x24xf32>
    %31 = arith.addf %27, %30 : vector<64x24xf32>
    %c1 = arith.constant 1 : index
    %c0_17 = arith.constant 0 : index
    %c0_18 = arith.constant 0 : index
    %32 = vector.load %arg6[%c1, %c0_17, %c0_18] : memref<16x64x128xbf16, #tpu.memory_space<vmem>>, vector<1x64x128xbf16>
    %33 = vector.shape_cast %32 : vector<1x64x128xbf16> to vector<64x128xbf16>
    %cst_19 = arith.constant dense<0.000000e+00> : vector<64x24xf32>
    %34 = tpu.matmul %33, %18, %cst_19 {dimension_numbers = #tpu.dot_dimension_numbers<[1], [0], [0], [1], [0, 0, 1, 1], [], []>} : vector<64x128xbf16>, vector<128x24xbf16>, vector<64x24xf32> -> vector<64x24xf32>
    %35 = arith.addf %31, %34 : vector<64x24xf32>
    %c2 = arith.constant 2 : index
    %c0_20 = arith.constant 0 : index
    %c0_21 = arith.constant 0 : index
    %36 = vector.load %arg6[%c2, %c0_20, %c0_21] : memref<16x64x128xbf16, #tpu.memory_space<vmem>>, vector<1x64x128xbf16>
    %37 = vector.shape_cast %36 : vector<1x64x128xbf16> to vector<64x128xbf16>
    %cst_22 = arith.constant dense<0.000000e+00> : vector<64x24xf32>
    %38 = tpu.matmul %37, %16, %cst_22 {dimension_numbers = #tpu.dot_dimension_numbers<[1], [0], [0], [1], [0, 0, 1, 1], [], []>} : vector<64x128xbf16>, vector<128x24xbf16>, vector<64x24xf32> -> vector<64x24xf32>
    %39 = arith.addf %35, %38 : vector<64x24xf32>
    %c3 = arith.constant 3 : index
    %c0_23 = arith.constant 0 : index
    %c0_24 = arith.constant 0 : index
    %40 = vector.load %arg6[%c3, %c0_23, %c0_24] : memref<16x64x128xbf16, #tpu.memory_space<vmem>>, vector<1x64x128xbf16>
    %41 = vector.shape_cast %40 : vector<1x64x128xbf16> to vector<64x128xbf16>
    %cst_25 = arith.constant dense<0.000000e+00> : vector<64x24xf32>
    %42 = tpu.matmul %41, %15, %cst_25 {dimension_numbers = #tpu.dot_dimension_numbers<[1], [0], [0], [1], [0, 0, 1, 1], [], []>} : vector<64x128xbf16>, vector<128x24xbf16>, vector<64x24xf32> -> vector<64x24xf32>
    %43 = arith.addf %39, %42 : vector<64x24xf32>
    %44 = vector.broadcast %24 : vector<1x24xf32> to vector<64x24xf32>
    %45 = arith.mulf %43, %44 : vector<64x24xf32>
    %cst_26 = arith.constant dense<0.000000e+00> : vector<64xf32>
    %46 = vector.multi_reduction <add>, %45, %cst_26 [1] : vector<64x24xf32> to vector<64xf32>
    %47 = vector.shape_cast %46 : vector<64xf32> to vector<64x1xf32>
    %48 = arith.addf %25, %47 : vector<64x1xf32>
    %49 = arith.mulf %45, %45 : vector<64x24xf32>
    %cst_27 = arith.constant dense<0.000000e+00> : vector<64xf32>
    %50 = vector.multi_reduction <add>, %49, %cst_27 [1] : vector<64x24xf32> to vector<64xf32>
    %51 = vector.shape_cast %50 : vector<64xf32> to vector<64x1xf32>
    %52 = arith.addf %26, %51 : vector<64x1xf32>
    %53 = arith.truncf %43 : vector<64x24xf32> to vector<64x24xbf16>
    %c0_28 = arith.constant 0 : index
    %c0_29 = arith.constant 0 : index
    %c0_30 = arith.constant 0 : index
    %c0_31 = arith.constant 0 : index
    %54 = vector.load %arg7[%c0_28, %c0_29, %c0_30, %c0_31] : memref<1x4x64x24xbf16, #tpu.memory_space<vmem>>, vector<1x1x64x24xbf16>
    %55 = vector.shape_cast %54 : vector<1x1x64x24xbf16> to vector<64x24xbf16>
    %56 = vector.shape_cast %53 : vector<64x24xbf16> to vector<1x1x64x24xbf16>
    tpu.vector_store %arg7[%c0_28, %c0_29, %c0_30, %c0_31], %56 {strides = array<i32>} : memref<1x4x64x24xbf16, #tpu.memory_space<vmem>>, vector<1x1x64x24xbf16>,
    %cst_32 = arith.constant 0.000000e+00 : f32
    %57 = vector.broadcast %cst_32 : f32 to vector<64x24xf32>
    %c4 = arith.constant 4 : index
    %c0_33 = arith.constant 0 : index
    %c0_34 = arith.constant 0 : index
    %58 = vector.load %arg6[%c4, %c0_33, %c0_34] : memref<16x64x128xbf16, #tpu.memory_space<vmem>>, vector<1x64x128xbf16>
    %59 = vector.shape_cast %58 : vector<1x64x128xbf16> to vector<64x128xbf16>
    %cst_35 = arith.constant dense<0.000000e+00> : vector<64x24xf32>
    %60 = tpu.matmul %59, %20, %cst_35 {dimension_numbers = #tpu.dot_dimension_numbers<[1], [0], [0], [1], [0, 0, 1, 1], [], []>} : vector<64x128xbf16>, vector<128x24xbf16>, vector<64x24xf32> -> vector<64x24xf32>
    %61 = arith.addf %57, %60 : vector<64x24xf32>
    %c5 = arith.constant 5 : index
    %c0_36 = arith.constant 0 : index
    %c0_37 = arith.constant 0 : index
    %62 = vector.load %arg6[%c5, %c0_36, %c0_37] : memref<16x64x128xbf16, #tpu.memory_space<vmem>>, vector<1x64x128xbf16>
    %63 = vector.shape_cast %62 : vector<1x64x128xbf16> to vector<64x128xbf16>
    %cst_38 = arith.constant dense<0.000000e+00> : vector<64x24xf32>
    %64 = tpu.matmul %63, %19, %cst_38 {dimension_numbers = #tpu.dot_dimension_numbers<[1], [0], [0], [1], [0, 0, 1, 1], [], []>} : vector<64x128xbf16>, vector<128x24xbf16>, vector<64x24xf32> -> vector<64x24xf32>
    %65 = arith.addf %61, %64 : vector<64x24xf32>
    %c6 = arith.constant 6 : index
    %c0_39 = arith.constant 0 : index
    %c0_40 = arith.constant 0 : index
    %66 = vector.load %arg6[%c6, %c0_39, %c0_40] : memref<16x64x128xbf16, #tpu.memory_space<vmem>>, vector<1x64x128xbf16>
    %67 = vector.shape_cast %66 : vector<1x64x128xbf16> to vector<64x128xbf16>
    %cst_41 = arith.constant dense<0.000000e+00> : vector<64x24xf32>
    %68 = tpu.matmul %67, %17, %cst_41 {dimension_numbers = #tpu.dot_dimension_numbers<[1], [0], [0], [1], [0, 0, 1, 1], [], []>} : vector<64x128xbf16>, vector<128x24xbf16>, vector<64x24xf32> -> vector<64x24xf32>
    %69 = arith.addf %65, %68 : vector<64x24xf32>
    %c7 = arith.constant 7 : index
    %c0_42 = arith.constant 0 : index
    %c0_43 = arith.constant 0 : index
    %70 = vector.load %arg6[%c7, %c0_42, %c0_43] : memref<16x64x128xbf16, #tpu.memory_space<vmem>>, vector<1x64x128xbf16>
    %71 = vector.shape_cast %70 : vector<1x64x128xbf16> to vector<64x128xbf16>
    %cst_44 = arith.constant dense<0.000000e+00> : vector<64x24xf32>
    %72 = tpu.matmul %71, %16, %cst_44 {dimension_numbers = #tpu.dot_dimension_numbers<[1], [0], [0], [1], [0, 0, 1, 1], [], []>} : vector<64x128xbf16>, vector<128x24xbf16>, vector<64x24xf32> -> vector<64x24xf32>
    %73 = arith.addf %69, %72 : vector<64x24xf32>
    %74 = vector.broadcast %24 : vector<1x24xf32> to vector<64x24xf32>
    %75 = arith.mulf %73, %74 : vector<64x24xf32>
    %cst_45 = arith.constant dense<0.000000e+00> : vector<64xf32>
    %76 = vector.multi_reduction <add>, %75, %cst_45 [1] : vector<64x24xf32> to vector<64xf32>
    %77 = vector.shape_cast %76 : vector<64xf32> to vector<64x1xf32>
    %78 = arith.addf %48, %77 : vector<64x1xf32>
    %79 = arith.mulf %75, %75 : vector<64x24xf32>
    %cst_46 = arith.constant dense<0.000000e+00> : vector<64xf32>
    %80 = vector.multi_reduction <add>, %79, %cst_46 [1] : vector<64x24xf32> to vector<64xf32>
    %81 = vector.shape_cast %80 : vector<64xf32> to vector<64x1xf32>
    %82 = arith.addf %52, %81 : vector<64x1xf32>
    %83 = arith.truncf %73 : vector<64x24xf32> to vector<64x24xbf16>
    %c0_47 = arith.constant 0 : index
    %c1_48 = arith.constant 1 : index
    %c0_49 = arith.constant 0 : index
    %c0_50 = arith.constant 0 : index
    %84 = vector.load %arg7[%c0_47, %c1_48, %c0_49, %c0_50] : memref<1x4x64x24xbf16, #tpu.memory_space<vmem>>, vector<1x1x64x24xbf16>
    %85 = vector.shape_cast %84 : vector<1x1x64x24xbf16> to vector<64x24xbf16>
    %86 = vector.shape_cast %83 : vector<64x24xbf16> to vector<1x1x64x24xbf16>
    tpu.vector_store %arg7[%c0_47, %c1_48, %c0_49, %c0_50], %86 {strides = array<i32>} : memref<1x4x64x24xbf16, #tpu.memory_space<vmem>>, vector<1x1x64x24xbf16>,
    %cst_51 = arith.constant 0.000000e+00 : f32
    %87 = vector.broadcast %cst_51 : f32 to vector<64x24xf32>
    %c8 = arith.constant 8 : index
    %c0_52 = arith.constant 0 : index
    %c0_53 = arith.constant 0 : index
    %88 = vector.load %arg6[%c8, %c0_52, %c0_53] : memref<16x64x128xbf16, #tpu.memory_space<vmem>>, vector<1x64x128xbf16>
    %89 = vector.shape_cast %88 : vector<1x64x128xbf16> to vector<64x128xbf16>
    %cst_54 = arith.constant dense<0.000000e+00> : vector<64x24xf32>
    %90 = tpu.matmul %89, %22, %cst_54 {dimension_numbers = #tpu.dot_dimension_numbers<[1], [0], [0], [1], [0, 0, 1, 1], [], []>} : vector<64x128xbf16>, vector<128x24xbf16>, vector<64x24xf32> -> vector<64x24xf32>
    %91 = arith.addf %87, %90 : vector<64x24xf32>
    %c9 = arith.constant 9 : index
    %c0_55 = arith.constant 0 : index
    %c0_56 = arith.constant 0 : index
    %92 = vector.load %arg6[%c9, %c0_55, %c0_56] : memref<16x64x128xbf16, #tpu.memory_space<vmem>>, vector<1x64x128xbf16>
    %93 = vector.shape_cast %92 : vector<1x64x128xbf16> to vector<64x128xbf16>
    %cst_57 = arith.constant dense<0.000000e+00> : vector<64x24xf32>
    %94 = tpu.matmul %93, %21, %cst_57 {dimension_numbers = #tpu.dot_dimension_numbers<[1], [0], [0], [1], [0, 0, 1, 1], [], []>} : vector<64x128xbf16>, vector<128x24xbf16>, vector<64x24xf32> -> vector<64x24xf32>
    %95 = arith.addf %91, %94 : vector<64x24xf32>
    %c10 = arith.constant 10 : index
    %c0_58 = arith.constant 0 : index
    %c0_59 = arith.constant 0 : index
    %96 = vector.load %arg6[%c10, %c0_58, %c0_59] : memref<16x64x128xbf16, #tpu.memory_space<vmem>>, vector<1x64x128xbf16>
    %97 = vector.shape_cast %96 : vector<1x64x128xbf16> to vector<64x128xbf16>
    %cst_60 = arith.constant dense<0.000000e+00> : vector<64x24xf32>
    %98 = tpu.matmul %97, %19, %cst_60 {dimension_numbers = #tpu.dot_dimension_numbers<[1], [0], [0], [1], [0, 0, 1, 1], [], []>} : vector<64x128xbf16>, vector<128x24xbf16>, vector<64x24xf32> -> vector<64x24xf32>
    %99 = arith.addf %95, %98 : vector<64x24xf32>
    %c11 = arith.constant 11 : index
    %c0_61 = arith.constant 0 : index
    %c0_62 = arith.constant 0 : index
    %100 = vector.load %arg6[%c11, %c0_61, %c0_62] : memref<16x64x128xbf16, #tpu.memory_space<vmem>>, vector<1x64x128xbf16>
    %101 = vector.shape_cast %100 : vector<1x64x128xbf16> to vector<64x128xbf16>
    %cst_63 = arith.constant dense<0.000000e+00> : vector<64x24xf32>
    %102 = tpu.matmul %101, %18, %cst_63 {dimension_numbers = #tpu.dot_dimension_numbers<[1], [0], [0], [1], [0, 0, 1, 1], [], []>} : vector<64x128xbf16>, vector<128x24xbf16>, vector<64x24xf32> -> vector<64x24xf32>
    %103 = arith.addf %99, %102 : vector<64x24xf32>
    %104 = vector.broadcast %24 : vector<1x24xf32> to vector<64x24xf32>
    %105 = arith.mulf %103, %104 : vector<64x24xf32>
    %cst_64 = arith.constant dense<0.000000e+00> : vector<64xf32>
    %106 = vector.multi_reduction <add>, %105, %cst_64 [1] : vector<64x24xf32> to vector<64xf32>
    %107 = vector.shape_cast %106 : vector<64xf32> to vector<64x1xf32>
    %108 = arith.addf %78, %107 : vector<64x1xf32>
    %109 = arith.mulf %105, %105 : vector<64x24xf32>
    %cst_65 = arith.constant dense<0.000000e+00> : vector<64xf32>
    %110 = vector.multi_reduction <add>, %109, %cst_65 [1] : vector<64x24xf32> to vector<64xf32>
    %111 = vector.shape_cast %110 : vector<64xf32> to vector<64x1xf32>
    %112 = arith.addf %82, %111 : vector<64x1xf32>
    %113 = arith.truncf %103 : vector<64x24xf32> to vector<64x24xbf16>
    %c0_66 = arith.constant 0 : index
    %c2_67 = arith.constant 2 : index
    %c0_68 = arith.constant 0 : index
    %c0_69 = arith.constant 0 : index
    %114 = vector.load %arg7[%c0_66, %c2_67, %c0_68, %c0_69] : memref<1x4x64x24xbf16, #tpu.memory_space<vmem>>, vector<1x1x64x24xbf16>
    %115 = vector.shape_cast %114 : vector<1x1x64x24xbf16> to vector<64x24xbf16>
    %116 = vector.shape_cast %113 : vector<64x24xbf16> to vector<1x1x64x24xbf16>
    tpu.vector_store %arg7[%c0_66, %c2_67, %c0_68, %c0_69], %116 {strides = array<i32>} : memref<1x4x64x24xbf16, #tpu.memory_space<vmem>>, vector<1x1x64x24xbf16>,
    %cst_70 = arith.constant 0.000000e+00 : f32
    %117 = vector.broadcast %cst_70 : f32 to vector<64x24xf32>
    %c12 = arith.constant 12 : index
    %c0_71 = arith.constant 0 : index
    %c0_72 = arith.constant 0 : index
    %118 = vector.load %arg6[%c12, %c0_71, %c0_72] : memref<16x64x128xbf16, #tpu.memory_space<vmem>>, vector<1x64x128xbf16>
    %119 = vector.shape_cast %118 : vector<1x64x128xbf16> to vector<64x128xbf16>
    %cst_73 = arith.constant dense<0.000000e+00> : vector<64x24xf32>
    %120 = tpu.matmul %119, %23, %cst_73 {dimension_numbers = #tpu.dot_dimension_numbers<[1], [0], [0], [1], [0, 0, 1, 1], [], []>} : vector<64x128xbf16>, vector<128x24xbf16>, vector<64x24xf32> -> vector<64x24xf32>
    %121 = arith.addf %117, %120 : vector<64x24xf32>
    %c13 = arith.constant 13 : index
    %c0_74 = arith.constant 0 : index
    %c0_75 = arith.constant 0 : index
    %122 = vector.load %arg6[%c13, %c0_74, %c0_75] : memref<16x64x128xbf16, #tpu.memory_space<vmem>>, vector<1x64x128xbf16>
    %123 = vector.shape_cast %122 : vector<1x64x128xbf16> to vector<64x128xbf16>
    %cst_76 = arith.constant dense<0.000000e+00> : vector<64x24xf32>
    %124 = tpu.matmul %123, %22, %cst_76 {dimension_numbers = #tpu.dot_dimension_numbers<[1], [0], [0], [1], [0, 0, 1, 1], [], []>} : vector<64x128xbf16>, vector<128x24xbf16>, vector<64x24xf32> -> vector<64x24xf32>
    %125 = arith.addf %121, %124 : vector<64x24xf32>
    %c14 = arith.constant 14 : index
    %c0_77 = arith.constant 0 : index
    %c0_78 = arith.constant 0 : index
    %126 = vector.load %arg6[%c14, %c0_77, %c0_78] : memref<16x64x128xbf16, #tpu.memory_space<vmem>>, vector<1x64x128xbf16>
    %127 = vector.shape_cast %126 : vector<1x64x128xbf16> to vector<64x128xbf16>
    %cst_79 = arith.constant dense<0.000000e+00> : vector<64x24xf32>
    %128 = tpu.matmul %127, %20, %cst_79 {dimension_numbers = #tpu.dot_dimension_numbers<[1], [0], [0], [1], [0, 0, 1, 1], [], []>} : vector<64x128xbf16>, vector<128x24xbf16>, vector<64x24xf32> -> vector<64x24xf32>
    %129 = arith.addf %125, %128 : vector<64x24xf32>
    %c15 = arith.constant 15 : index
    %c0_80 = arith.constant 0 : index
    %c0_81 = arith.constant 0 : index
    %130 = vector.load %arg6[%c15, %c0_80, %c0_81] : memref<16x64x128xbf16, #tpu.memory_space<vmem>>, vector<1x64x128xbf16>
    %131 = vector.shape_cast %130 : vector<1x64x128xbf16> to vector<64x128xbf16>
    %cst_82 = arith.constant dense<0.000000e+00> : vector<64x24xf32>
    %132 = tpu.matmul %131, %19, %cst_82 {dimension_numbers = #tpu.dot_dimension_numbers<[1], [0], [0], [1], [0, 0, 1, 1], [], []>} : vector<64x128xbf16>, vector<128x24xbf16>, vector<64x24xf32> -> vector<64x24xf32>
    %133 = arith.addf %129, %132 : vector<64x24xf32>
    %134 = vector.broadcast %24 : vector<1x24xf32> to vector<64x24xf32>
    %135 = arith.mulf %133, %134 : vector<64x24xf32>
    %cst_83 = arith.constant dense<0.000000e+00> : vector<64xf32>
    %136 = vector.multi_reduction <add>, %135, %cst_83 [1] : vector<64x24xf32> to vector<64xf32>
    %137 = vector.shape_cast %136 : vector<64xf32> to vector<64x1xf32>
    %138 = arith.addf %108, %137 : vector<64x1xf32>
    %139 = arith.mulf %135, %135 : vector<64x24xf32>
    %cst_84 = arith.constant dense<0.000000e+00> : vector<64xf32>
    %140 = vector.multi_reduction <add>, %139, %cst_84 [1] : vector<64x24xf32> to vector<64xf32>
    %141 = vector.shape_cast %140 : vector<64xf32> to vector<64x1xf32>
    %142 = arith.addf %112, %141 : vector<64x1xf32>
    %143 = arith.truncf %133 : vector<64x24xf32> to vector<64x24xbf16>
    %c0_85 = arith.constant 0 : index
    %c3_86 = arith.constant 3 : index
    %c0_87 = arith.constant 0 : index
    %c0_88 = arith.constant 0 : index
    %144 = vector.load %arg7[%c0_85, %c3_86, %c0_87, %c0_88] : memref<1x4x64x24xbf16, #tpu.memory_space<vmem>>, vector<1x1x64x24xbf16>
    %145 = vector.shape_cast %144 : vector<1x1x64x24xbf16> to vector<64x24xbf16>
    %146 = vector.shape_cast %143 : vector<64x24xbf16> to vector<1x1x64x24xbf16>
    tpu.vector_store %arg7[%c0_85, %c3_86, %c0_87, %c0_88], %146 {strides = array<i32>} : memref<1x4x64x24xbf16, #tpu.memory_space<vmem>>, vector<1x1x64x24xbf16>,
    %c0_89 = arith.constant 0 : index
    %c0_90 = arith.constant 0 : index
    %c0_91 = arith.constant 0 : index
    %147 = vector.load %arg8[%c0_89, %c0_90, %c0_91] : memref<1x64x1xf32, #tpu.memory_space<vmem>>, vector<1x64x1xf32>
    %148 = vector.shape_cast %147 : vector<1x64x1xf32> to vector<64x1xf32>
    %149 = vector.shape_cast %138 : vector<64x1xf32> to vector<1x64x1xf32>
    tpu.vector_store %arg8[%c0_89, %c0_90, %c0_91], %149 {strides = array<i32>} : memref<1x64x1xf32, #tpu.memory_space<vmem>>, vector<1x64x1xf32>,
    %c0_92 = arith.constant 0 : index
    %c0_93 = arith.constant 0 : index
    %c0_94 = arith.constant 0 : index
    %150 = vector.load %arg9[%c0_92, %c0_93, %c0_94] : memref<1x64x1xf32, #tpu.memory_space<vmem>>, vector<1x64x1xf32>
    %151 = vector.shape_cast %150 : vector<1x64x1xf32> to vector<64x1xf32>
    %152 = vector.shape_cast %142 : vector<64x1xf32> to vector<1x64x1xf32>
    tpu.vector_store %arg9[%c0_92, %c0_93, %c0_94], %152 {strides = array<i32>} : memref<1x64x1xf32, #tpu.memory_space<vmem>>, vector<1x64x1xf32>,
    return
  }
  func.func @transform_0(%arg0: i32) -> (i32, i32, i32) {
    %c0_i32 = arith.constant 0 : i32
    %c0_i32_0 = arith.constant 0 : i32
    %c0_i32_1 = arith.constant 0 : i32
    return %arg0, %c0_i32, %c0_i32_0 : i32, i32, i32
  }
  func.func @transform_1(%arg0: i32) -> (i32, i32) {
    %c0_i32 = arith.constant 0 : i32
    %c0_i32_0 = arith.constant 0 : i32
    %c0_i32_1 = arith.constant 0 : i32
    return %c0_i32, %c0_i32_0 : i32, i32
  }
  func.func @transform_2(%arg0: i32) -> (i32, i32) {
    %c0_i32 = arith.constant 0 : i32
    %c0_i32_0 = arith.constant 0 : i32
    %c0_i32_1 = arith.constant 0 : i32
    return %c0_i32, %c0_i32_0 : i32, i32
  }
  func.func @transform_3(%arg0: i32) -> (i32, i32) {
    %c0_i32 = arith.constant 0 : i32
    %c0_i32_0 = arith.constant 0 : i32
    %c0_i32_1 = arith.constant 0 : i32
    return %c0_i32, %c0_i32_0 : i32, i32
  }
  func.func @transform_4(%arg0: i32) -> (i32, i32) {
    %c0_i32 = arith.constant 0 : i32
    %c0_i32_0 = arith.constant 0 : i32
    %c0_i32_1 = arith.constant 0 : i32
    return %c0_i32, %c0_i32_0 : i32, i32
  }
  func.func @transform_5(%arg0: i32) -> (i32, i32, i32) {
    %c0_i32 = arith.constant 0 : i32
    %c0_i32_0 = arith.constant 0 : i32
    %c0_i32_1 = arith.constant 0 : i32
    %c0_i32_2 = arith.constant 0 : i32
    return %c0_i32, %c0_i32_0, %c0_i32_1 : i32, i32, i32
  }
  func.func @transform_6(%arg0: i32) -> (i32, i32, i32, i32) {
    %c0_i32 = arith.constant 0 : i32
    %c0_i32_0 = arith.constant 0 : i32
    %c0_i32_1 = arith.constant 0 : i32
    %c0_i32_2 = arith.constant 0 : i32
    return %arg0, %c0_i32, %c0_i32_0, %c0_i32_1 : i32, i32, i32, i32
  }
  func.func @transform_7(%arg0: i32) -> (i32, i32, i32) {
    %c0_i32 = arith.constant 0 : i32
    %c0_i32_0 = arith.constant 0 : i32
    %c0_i32_1 = arith.constant 0 : i32
    return %arg0, %c0_i32, %c0_i32_0 : i32, i32, i32
  }
  func.func @transform_8(%arg0: i32) -> (i32, i32, i32) {
    %c0_i32 = arith.constant 0 : i32
    %c0_i32_0 = arith.constant 0 : i32
    %c0_i32_1 = arith.constant 0 : i32
    return %arg0, %c0_i32, %c0_i32_0 : i32, i32, i32
  }
}

module attributes {stable_mosaic.version = 11 : i64} {
  func.func @_convt2_kernel(%arg0: i32, %arg1: memref<1x64x102xbf16, #tpu.memory_space<vmem>>, %arg2: memref<64x1xf32, #tpu.memory_space<vmem>>, %arg3: memref<64x1xf32, #tpu.memory_space<vmem>>, %arg4: memref<1x102xf32, #tpu.memory_space<vmem>>, %arg5: memref<1x80xf32, #tpu.memory_space<vmem>>, %arg6: memref<16x32x64xbf16, #tpu.memory_space<vmem>>, %arg7: memref<1x4x32x80xbf16, #tpu.memory_space<vmem>>, %arg8: memref<1x32x1xf32, #tpu.memory_space<vmem>>, %arg9: memref<1x32x1xf32, #tpu.memory_space<vmem>>) attributes {dimension_semantics = [#tpu.dimension_semantics<parallel>], iteration_bounds = array<i64: 2>, scalar_prefetch = 0 : i64, scratch_operands = 0 : i64, tpu.core_type = #tpu.core_type<tc>, window_params = [{transform_indices = @transform_0, window_bounds = array<i64: 1, 64, 102>}, {pipeline_mode = #tpu.pipeline_mode<synchronous>, transform_indices = @transform_1, window_bounds = array<i64: 64, 1>}, {pipeline_mode = #tpu.pipeline_mode<synchronous>, transform_indices = @transform_2, window_bounds = array<i64: 64, 1>}, {pipeline_mode = #tpu.pipeline_mode<synchronous>, transform_indices = @transform_3, window_bounds = array<i64: 1, 102>}, {pipeline_mode = #tpu.pipeline_mode<synchronous>, transform_indices = @transform_4, window_bounds = array<i64: 1, 80>}, {pipeline_mode = #tpu.pipeline_mode<synchronous>, transform_indices = @transform_5, window_bounds = array<i64: 16, 32, 64>}, {transform_indices = @transform_6, window_bounds = array<i64: 1, 4, 32, 80>}, {transform_indices = @transform_7, window_bounds = array<i64: 1, 32, 1>}, {transform_indices = @transform_8, window_bounds = array<i64: 1, 32, 1>}]} {
    %c0 = arith.constant 0 : index
    %c0_0 = arith.constant 0 : index
    %c0_1 = arith.constant 0 : index
    %0 = vector.load %arg1[%c0, %c0_0, %c0_1] : memref<1x64x102xbf16, #tpu.memory_space<vmem>>, vector<1x64x102xbf16>
    %1 = vector.shape_cast %0 : vector<1x64x102xbf16> to vector<64x102xbf16>
    %2 = arith.extf %1 : vector<64x102xbf16> to vector<64x102xf32>
    %c0_2 = arith.constant 0 : index
    %c0_3 = arith.constant 0 : index
    %3 = vector.load %arg2[%c0_2, %c0_3] : memref<64x1xf32, #tpu.memory_space<vmem>>, vector<64x1xf32>
    %4 = vector.broadcast %3 : vector<64x1xf32> to vector<64x102xf32>
    %5 = arith.mulf %2, %4 : vector<64x102xf32>
    %c0_4 = arith.constant 0 : index
    %c0_5 = arith.constant 0 : index
    %6 = vector.load %arg3[%c0_4, %c0_5] : memref<64x1xf32, #tpu.memory_space<vmem>>, vector<64x1xf32>
    %7 = vector.broadcast %6 : vector<64x1xf32> to vector<64x102xf32>
    %8 = arith.addf %5, %7 : vector<64x102xf32>
    %cst = arith.constant 0.000000e+00 : f32
    %9 = vector.broadcast %cst : f32 to vector<64x102xf32>
    %10 = arith.maximumf %8, %9 : vector<64x102xf32>
    %c0_6 = arith.constant 0 : index
    %c0_7 = arith.constant 0 : index
    %11 = vector.load %arg4[%c0_6, %c0_7] : memref<1x102xf32, #tpu.memory_space<vmem>>, vector<1x102xf32>
    %12 = vector.broadcast %11 : vector<1x102xf32> to vector<64x102xf32>
    %13 = arith.mulf %10, %12 : vector<64x102xf32>
    %14 = arith.truncf %13 : vector<64x102xf32> to vector<64x102xbf16>
    %15 = vector.extract_strided_slice %14 {offsets = [0, 0], sizes = [64, 80], strides = [1, 1]} : vector<64x102xbf16> to vector<64x80xbf16>
    %16 = vector.extract_strided_slice %14 {offsets = [0, 1], sizes = [64, 80], strides = [1, 1]} : vector<64x102xbf16> to vector<64x80xbf16>
    %17 = vector.extract_strided_slice %14 {offsets = [0, 2], sizes = [64, 80], strides = [1, 1]} : vector<64x102xbf16> to vector<64x80xbf16>
    %18 = vector.extract_strided_slice %14 {offsets = [0, 10], sizes = [64, 80], strides = [1, 1]} : vector<64x102xbf16> to vector<64x80xbf16>
    %19 = vector.extract_strided_slice %14 {offsets = [0, 11], sizes = [64, 80], strides = [1, 1]} : vector<64x102xbf16> to vector<64x80xbf16>
    %20 = vector.extract_strided_slice %14 {offsets = [0, 12], sizes = [64, 80], strides = [1, 1]} : vector<64x102xbf16> to vector<64x80xbf16>
    %21 = vector.extract_strided_slice %14 {offsets = [0, 20], sizes = [64, 80], strides = [1, 1]} : vector<64x102xbf16> to vector<64x80xbf16>
    %22 = vector.extract_strided_slice %14 {offsets = [0, 21], sizes = [64, 80], strides = [1, 1]} : vector<64x102xbf16> to vector<64x80xbf16>
    %23 = vector.extract_strided_slice %14 {offsets = [0, 22], sizes = [64, 80], strides = [1, 1]} : vector<64x102xbf16> to vector<64x80xbf16>
    %c0_8 = arith.constant 0 : index
    %c0_9 = arith.constant 0 : index
    %24 = vector.load %arg5[%c0_8, %c0_9] : memref<1x80xf32, #tpu.memory_space<vmem>>, vector<1x80xf32>
    %cst_10 = arith.constant 0.000000e+00 : f32
    %25 = vector.broadcast %cst_10 : f32 to vector<32x1xf32>
    %cst_11 = arith.constant 0.000000e+00 : f32
    %26 = vector.broadcast %cst_11 : f32 to vector<32x1xf32>
    %cst_12 = arith.constant 0.000000e+00 : f32
    %27 = vector.broadcast %cst_12 : f32 to vector<32x80xf32>
    %c0_13 = arith.constant 0 : index
    %c0_14 = arith.constant 0 : index
    %c0_15 = arith.constant 0 : index
    %28 = vector.load %arg6[%c0_13, %c0_14, %c0_15] : memref<16x32x64xbf16, #tpu.memory_space<vmem>>, vector<1x32x64xbf16>
    %29 = vector.shape_cast %28 : vector<1x32x64xbf16> to vector<32x64xbf16>
    %cst_16 = arith.constant dense<0.000000e+00> : vector<32x80xf32>
    %30 = tpu.matmul %29, %19, %cst_16 {dimension_numbers = #tpu.dot_dimension_numbers<[1], [0], [0], [1], [0, 0, 1, 1], [], []>} : vector<32x64xbf16>, vector<64x80xbf16>, vector<32x80xf32> -> vector<32x80xf32>
    %31 = arith.addf %27, %30 : vector<32x80xf32>
    %c1 = arith.constant 1 : index
    %c0_17 = arith.constant 0 : index
    %c0_18 = arith.constant 0 : index
    %32 = vector.load %arg6[%c1, %c0_17, %c0_18] : memref<16x32x64xbf16, #tpu.memory_space<vmem>>, vector<1x32x64xbf16>
    %33 = vector.shape_cast %32 : vector<1x32x64xbf16> to vector<32x64xbf16>
    %cst_19 = arith.constant dense<0.000000e+00> : vector<32x80xf32>
    %34 = tpu.matmul %33, %18, %cst_19 {dimension_numbers = #tpu.dot_dimension_numbers<[1], [0], [0], [1], [0, 0, 1, 1], [], []>} : vector<32x64xbf16>, vector<64x80xbf16>, vector<32x80xf32> -> vector<32x80xf32>
    %35 = arith.addf %31, %34 : vector<32x80xf32>
    %c2 = arith.constant 2 : index
    %c0_20 = arith.constant 0 : index
    %c0_21 = arith.constant 0 : index
    %36 = vector.load %arg6[%c2, %c0_20, %c0_21] : memref<16x32x64xbf16, #tpu.memory_space<vmem>>, vector<1x32x64xbf16>
    %37 = vector.shape_cast %36 : vector<1x32x64xbf16> to vector<32x64xbf16>
    %cst_22 = arith.constant dense<0.000000e+00> : vector<32x80xf32>
    %38 = tpu.matmul %37, %16, %cst_22 {dimension_numbers = #tpu.dot_dimension_numbers<[1], [0], [0], [1], [0, 0, 1, 1], [], []>} : vector<32x64xbf16>, vector<64x80xbf16>, vector<32x80xf32> -> vector<32x80xf32>
    %39 = arith.addf %35, %38 : vector<32x80xf32>
    %c3 = arith.constant 3 : index
    %c0_23 = arith.constant 0 : index
    %c0_24 = arith.constant 0 : index
    %40 = vector.load %arg6[%c3, %c0_23, %c0_24] : memref<16x32x64xbf16, #tpu.memory_space<vmem>>, vector<1x32x64xbf16>
    %41 = vector.shape_cast %40 : vector<1x32x64xbf16> to vector<32x64xbf16>
    %cst_25 = arith.constant dense<0.000000e+00> : vector<32x80xf32>
    %42 = tpu.matmul %41, %15, %cst_25 {dimension_numbers = #tpu.dot_dimension_numbers<[1], [0], [0], [1], [0, 0, 1, 1], [], []>} : vector<32x64xbf16>, vector<64x80xbf16>, vector<32x80xf32> -> vector<32x80xf32>
    %43 = arith.addf %39, %42 : vector<32x80xf32>
    %44 = vector.broadcast %24 : vector<1x80xf32> to vector<32x80xf32>
    %45 = arith.mulf %43, %44 : vector<32x80xf32>
    %cst_26 = arith.constant dense<0.000000e+00> : vector<32xf32>
    %46 = vector.multi_reduction <add>, %45, %cst_26 [1] : vector<32x80xf32> to vector<32xf32>
    %47 = vector.shape_cast %46 : vector<32xf32> to vector<32x1xf32>
    %48 = arith.addf %25, %47 : vector<32x1xf32>
    %49 = arith.mulf %45, %45 : vector<32x80xf32>
    %cst_27 = arith.constant dense<0.000000e+00> : vector<32xf32>
    %50 = vector.multi_reduction <add>, %49, %cst_27 [1] : vector<32x80xf32> to vector<32xf32>
    %51 = vector.shape_cast %50 : vector<32xf32> to vector<32x1xf32>
    %52 = arith.addf %26, %51 : vector<32x1xf32>
    %53 = arith.truncf %43 : vector<32x80xf32> to vector<32x80xbf16>
    %c0_28 = arith.constant 0 : index
    %c0_29 = arith.constant 0 : index
    %c0_30 = arith.constant 0 : index
    %c0_31 = arith.constant 0 : index
    %54 = vector.load %arg7[%c0_28, %c0_29, %c0_30, %c0_31] : memref<1x4x32x80xbf16, #tpu.memory_space<vmem>>, vector<1x1x32x80xbf16>
    %55 = vector.shape_cast %54 : vector<1x1x32x80xbf16> to vector<32x80xbf16>
    %56 = vector.shape_cast %53 : vector<32x80xbf16> to vector<1x1x32x80xbf16>
    tpu.vector_store %arg7[%c0_28, %c0_29, %c0_30, %c0_31], %56 {strides = array<i32>} : memref<1x4x32x80xbf16, #tpu.memory_space<vmem>>, vector<1x1x32x80xbf16>,
    %cst_32 = arith.constant 0.000000e+00 : f32
    %57 = vector.broadcast %cst_32 : f32 to vector<32x80xf32>
    %c4 = arith.constant 4 : index
    %c0_33 = arith.constant 0 : index
    %c0_34 = arith.constant 0 : index
    %58 = vector.load %arg6[%c4, %c0_33, %c0_34] : memref<16x32x64xbf16, #tpu.memory_space<vmem>>, vector<1x32x64xbf16>
    %59 = vector.shape_cast %58 : vector<1x32x64xbf16> to vector<32x64xbf16>
    %cst_35 = arith.constant dense<0.000000e+00> : vector<32x80xf32>
    %60 = tpu.matmul %59, %20, %cst_35 {dimension_numbers = #tpu.dot_dimension_numbers<[1], [0], [0], [1], [0, 0, 1, 1], [], []>} : vector<32x64xbf16>, vector<64x80xbf16>, vector<32x80xf32> -> vector<32x80xf32>
    %61 = arith.addf %57, %60 : vector<32x80xf32>
    %c5 = arith.constant 5 : index
    %c0_36 = arith.constant 0 : index
    %c0_37 = arith.constant 0 : index
    %62 = vector.load %arg6[%c5, %c0_36, %c0_37] : memref<16x32x64xbf16, #tpu.memory_space<vmem>>, vector<1x32x64xbf16>
    %63 = vector.shape_cast %62 : vector<1x32x64xbf16> to vector<32x64xbf16>
    %cst_38 = arith.constant dense<0.000000e+00> : vector<32x80xf32>
    %64 = tpu.matmul %63, %19, %cst_38 {dimension_numbers = #tpu.dot_dimension_numbers<[1], [0], [0], [1], [0, 0, 1, 1], [], []>} : vector<32x64xbf16>, vector<64x80xbf16>, vector<32x80xf32> -> vector<32x80xf32>
    %65 = arith.addf %61, %64 : vector<32x80xf32>
    %c6 = arith.constant 6 : index
    %c0_39 = arith.constant 0 : index
    %c0_40 = arith.constant 0 : index
    %66 = vector.load %arg6[%c6, %c0_39, %c0_40] : memref<16x32x64xbf16, #tpu.memory_space<vmem>>, vector<1x32x64xbf16>
    %67 = vector.shape_cast %66 : vector<1x32x64xbf16> to vector<32x64xbf16>
    %cst_41 = arith.constant dense<0.000000e+00> : vector<32x80xf32>
    %68 = tpu.matmul %67, %17, %cst_41 {dimension_numbers = #tpu.dot_dimension_numbers<[1], [0], [0], [1], [0, 0, 1, 1], [], []>} : vector<32x64xbf16>, vector<64x80xbf16>, vector<32x80xf32> -> vector<32x80xf32>
    %69 = arith.addf %65, %68 : vector<32x80xf32>
    %c7 = arith.constant 7 : index
    %c0_42 = arith.constant 0 : index
    %c0_43 = arith.constant 0 : index
    %70 = vector.load %arg6[%c7, %c0_42, %c0_43] : memref<16x32x64xbf16, #tpu.memory_space<vmem>>, vector<1x32x64xbf16>
    %71 = vector.shape_cast %70 : vector<1x32x64xbf16> to vector<32x64xbf16>
    %cst_44 = arith.constant dense<0.000000e+00> : vector<32x80xf32>
    %72 = tpu.matmul %71, %16, %cst_44 {dimension_numbers = #tpu.dot_dimension_numbers<[1], [0], [0], [1], [0, 0, 1, 1], [], []>} : vector<32x64xbf16>, vector<64x80xbf16>, vector<32x80xf32> -> vector<32x80xf32>
    %73 = arith.addf %69, %72 : vector<32x80xf32>
    %74 = vector.broadcast %24 : vector<1x80xf32> to vector<32x80xf32>
    %75 = arith.mulf %73, %74 : vector<32x80xf32>
    %cst_45 = arith.constant dense<0.000000e+00> : vector<32xf32>
    %76 = vector.multi_reduction <add>, %75, %cst_45 [1] : vector<32x80xf32> to vector<32xf32>
    %77 = vector.shape_cast %76 : vector<32xf32> to vector<32x1xf32>
    %78 = arith.addf %48, %77 : vector<32x1xf32>
    %79 = arith.mulf %75, %75 : vector<32x80xf32>
    %cst_46 = arith.constant dense<0.000000e+00> : vector<32xf32>
    %80 = vector.multi_reduction <add>, %79, %cst_46 [1] : vector<32x80xf32> to vector<32xf32>
    %81 = vector.shape_cast %80 : vector<32xf32> to vector<32x1xf32>
    %82 = arith.addf %52, %81 : vector<32x1xf32>
    %83 = arith.truncf %73 : vector<32x80xf32> to vector<32x80xbf16>
    %c0_47 = arith.constant 0 : index
    %c1_48 = arith.constant 1 : index
    %c0_49 = arith.constant 0 : index
    %c0_50 = arith.constant 0 : index
    %84 = vector.load %arg7[%c0_47, %c1_48, %c0_49, %c0_50] : memref<1x4x32x80xbf16, #tpu.memory_space<vmem>>, vector<1x1x32x80xbf16>
    %85 = vector.shape_cast %84 : vector<1x1x32x80xbf16> to vector<32x80xbf16>
    %86 = vector.shape_cast %83 : vector<32x80xbf16> to vector<1x1x32x80xbf16>
    tpu.vector_store %arg7[%c0_47, %c1_48, %c0_49, %c0_50], %86 {strides = array<i32>} : memref<1x4x32x80xbf16, #tpu.memory_space<vmem>>, vector<1x1x32x80xbf16>,
    %cst_51 = arith.constant 0.000000e+00 : f32
    %87 = vector.broadcast %cst_51 : f32 to vector<32x80xf32>
    %c8 = arith.constant 8 : index
    %c0_52 = arith.constant 0 : index
    %c0_53 = arith.constant 0 : index
    %88 = vector.load %arg6[%c8, %c0_52, %c0_53] : memref<16x32x64xbf16, #tpu.memory_space<vmem>>, vector<1x32x64xbf16>
    %89 = vector.shape_cast %88 : vector<1x32x64xbf16> to vector<32x64xbf16>
    %cst_54 = arith.constant dense<0.000000e+00> : vector<32x80xf32>
    %90 = tpu.matmul %89, %22, %cst_54 {dimension_numbers = #tpu.dot_dimension_numbers<[1], [0], [0], [1], [0, 0, 1, 1], [], []>} : vector<32x64xbf16>, vector<64x80xbf16>, vector<32x80xf32> -> vector<32x80xf32>
    %91 = arith.addf %87, %90 : vector<32x80xf32>
    %c9 = arith.constant 9 : index
    %c0_55 = arith.constant 0 : index
    %c0_56 = arith.constant 0 : index
    %92 = vector.load %arg6[%c9, %c0_55, %c0_56] : memref<16x32x64xbf16, #tpu.memory_space<vmem>>, vector<1x32x64xbf16>
    %93 = vector.shape_cast %92 : vector<1x32x64xbf16> to vector<32x64xbf16>
    %cst_57 = arith.constant dense<0.000000e+00> : vector<32x80xf32>
    %94 = tpu.matmul %93, %21, %cst_57 {dimension_numbers = #tpu.dot_dimension_numbers<[1], [0], [0], [1], [0, 0, 1, 1], [], []>} : vector<32x64xbf16>, vector<64x80xbf16>, vector<32x80xf32> -> vector<32x80xf32>
    %95 = arith.addf %91, %94 : vector<32x80xf32>
    %c10 = arith.constant 10 : index
    %c0_58 = arith.constant 0 : index
    %c0_59 = arith.constant 0 : index
    %96 = vector.load %arg6[%c10, %c0_58, %c0_59] : memref<16x32x64xbf16, #tpu.memory_space<vmem>>, vector<1x32x64xbf16>
    %97 = vector.shape_cast %96 : vector<1x32x64xbf16> to vector<32x64xbf16>
    %cst_60 = arith.constant dense<0.000000e+00> : vector<32x80xf32>
    %98 = tpu.matmul %97, %19, %cst_60 {dimension_numbers = #tpu.dot_dimension_numbers<[1], [0], [0], [1], [0, 0, 1, 1], [], []>} : vector<32x64xbf16>, vector<64x80xbf16>, vector<32x80xf32> -> vector<32x80xf32>
    %99 = arith.addf %95, %98 : vector<32x80xf32>
    %c11 = arith.constant 11 : index
    %c0_61 = arith.constant 0 : index
    %c0_62 = arith.constant 0 : index
    %100 = vector.load %arg6[%c11, %c0_61, %c0_62] : memref<16x32x64xbf16, #tpu.memory_space<vmem>>, vector<1x32x64xbf16>
    %101 = vector.shape_cast %100 : vector<1x32x64xbf16> to vector<32x64xbf16>
    %cst_63 = arith.constant dense<0.000000e+00> : vector<32x80xf32>
    %102 = tpu.matmul %101, %18, %cst_63 {dimension_numbers = #tpu.dot_dimension_numbers<[1], [0], [0], [1], [0, 0, 1, 1], [], []>} : vector<32x64xbf16>, vector<64x80xbf16>, vector<32x80xf32> -> vector<32x80xf32>
    %103 = arith.addf %99, %102 : vector<32x80xf32>
    %104 = vector.broadcast %24 : vector<1x80xf32> to vector<32x80xf32>
    %105 = arith.mulf %103, %104 : vector<32x80xf32>
    %cst_64 = arith.constant dense<0.000000e+00> : vector<32xf32>
    %106 = vector.multi_reduction <add>, %105, %cst_64 [1] : vector<32x80xf32> to vector<32xf32>
    %107 = vector.shape_cast %106 : vector<32xf32> to vector<32x1xf32>
    %108 = arith.addf %78, %107 : vector<32x1xf32>
    %109 = arith.mulf %105, %105 : vector<32x80xf32>
    %cst_65 = arith.constant dense<0.000000e+00> : vector<32xf32>
    %110 = vector.multi_reduction <add>, %109, %cst_65 [1] : vector<32x80xf32> to vector<32xf32>
    %111 = vector.shape_cast %110 : vector<32xf32> to vector<32x1xf32>
    %112 = arith.addf %82, %111 : vector<32x1xf32>
    %113 = arith.truncf %103 : vector<32x80xf32> to vector<32x80xbf16>
    %c0_66 = arith.constant 0 : index
    %c2_67 = arith.constant 2 : index
    %c0_68 = arith.constant 0 : index
    %c0_69 = arith.constant 0 : index
    %114 = vector.load %arg7[%c0_66, %c2_67, %c0_68, %c0_69] : memref<1x4x32x80xbf16, #tpu.memory_space<vmem>>, vector<1x1x32x80xbf16>
    %115 = vector.shape_cast %114 : vector<1x1x32x80xbf16> to vector<32x80xbf16>
    %116 = vector.shape_cast %113 : vector<32x80xbf16> to vector<1x1x32x80xbf16>
    tpu.vector_store %arg7[%c0_66, %c2_67, %c0_68, %c0_69], %116 {strides = array<i32>} : memref<1x4x32x80xbf16, #tpu.memory_space<vmem>>, vector<1x1x32x80xbf16>,
    %cst_70 = arith.constant 0.000000e+00 : f32
    %117 = vector.broadcast %cst_70 : f32 to vector<32x80xf32>
    %c12 = arith.constant 12 : index
    %c0_71 = arith.constant 0 : index
    %c0_72 = arith.constant 0 : index
    %118 = vector.load %arg6[%c12, %c0_71, %c0_72] : memref<16x32x64xbf16, #tpu.memory_space<vmem>>, vector<1x32x64xbf16>
    %119 = vector.shape_cast %118 : vector<1x32x64xbf16> to vector<32x64xbf16>
    %cst_73 = arith.constant dense<0.000000e+00> : vector<32x80xf32>
    %120 = tpu.matmul %119, %23, %cst_73 {dimension_numbers = #tpu.dot_dimension_numbers<[1], [0], [0], [1], [0, 0, 1, 1], [], []>} : vector<32x64xbf16>, vector<64x80xbf16>, vector<32x80xf32> -> vector<32x80xf32>
    %121 = arith.addf %117, %120 : vector<32x80xf32>
    %c13 = arith.constant 13 : index
    %c0_74 = arith.constant 0 : index
    %c0_75 = arith.constant 0 : index
    %122 = vector.load %arg6[%c13, %c0_74, %c0_75] : memref<16x32x64xbf16, #tpu.memory_space<vmem>>, vector<1x32x64xbf16>
    %123 = vector.shape_cast %122 : vector<1x32x64xbf16> to vector<32x64xbf16>
    %cst_76 = arith.constant dense<0.000000e+00> : vector<32x80xf32>
    %124 = tpu.matmul %123, %22, %cst_76 {dimension_numbers = #tpu.dot_dimension_numbers<[1], [0], [0], [1], [0, 0, 1, 1], [], []>} : vector<32x64xbf16>, vector<64x80xbf16>, vector<32x80xf32> -> vector<32x80xf32>
    %125 = arith.addf %121, %124 : vector<32x80xf32>
    %c14 = arith.constant 14 : index
    %c0_77 = arith.constant 0 : index
    %c0_78 = arith.constant 0 : index
    %126 = vector.load %arg6[%c14, %c0_77, %c0_78] : memref<16x32x64xbf16, #tpu.memory_space<vmem>>, vector<1x32x64xbf16>
    %127 = vector.shape_cast %126 : vector<1x32x64xbf16> to vector<32x64xbf16>
    %cst_79 = arith.constant dense<0.000000e+00> : vector<32x80xf32>
    %128 = tpu.matmul %127, %20, %cst_79 {dimension_numbers = #tpu.dot_dimension_numbers<[1], [0], [0], [1], [0, 0, 1, 1], [], []>} : vector<32x64xbf16>, vector<64x80xbf16>, vector<32x80xf32> -> vector<32x80xf32>
    %129 = arith.addf %125, %128 : vector<32x80xf32>
    %c15 = arith.constant 15 : index
    %c0_80 = arith.constant 0 : index
    %c0_81 = arith.constant 0 : index
    %130 = vector.load %arg6[%c15, %c0_80, %c0_81] : memref<16x32x64xbf16, #tpu.memory_space<vmem>>, vector<1x32x64xbf16>
    %131 = vector.shape_cast %130 : vector<1x32x64xbf16> to vector<32x64xbf16>
    %cst_82 = arith.constant dense<0.000000e+00> : vector<32x80xf32>
    %132 = tpu.matmul %131, %19, %cst_82 {dimension_numbers = #tpu.dot_dimension_numbers<[1], [0], [0], [1], [0, 0, 1, 1], [], []>} : vector<32x64xbf16>, vector<64x80xbf16>, vector<32x80xf32> -> vector<32x80xf32>
    %133 = arith.addf %129, %132 : vector<32x80xf32>
    %134 = vector.broadcast %24 : vector<1x80xf32> to vector<32x80xf32>
    %135 = arith.mulf %133, %134 : vector<32x80xf32>
    %cst_83 = arith.constant dense<0.000000e+00> : vector<32xf32>
    %136 = vector.multi_reduction <add>, %135, %cst_83 [1] : vector<32x80xf32> to vector<32xf32>
    %137 = vector.shape_cast %136 : vector<32xf32> to vector<32x1xf32>
    %138 = arith.addf %108, %137 : vector<32x1xf32>
    %139 = arith.mulf %135, %135 : vector<32x80xf32>
    %cst_84 = arith.constant dense<0.000000e+00> : vector<32xf32>
    %140 = vector.multi_reduction <add>, %139, %cst_84 [1] : vector<32x80xf32> to vector<32xf32>
    %141 = vector.shape_cast %140 : vector<32xf32> to vector<32x1xf32>
    %142 = arith.addf %112, %141 : vector<32x1xf32>
    %143 = arith.truncf %133 : vector<32x80xf32> to vector<32x80xbf16>
    %c0_85 = arith.constant 0 : index
    %c3_86 = arith.constant 3 : index
    %c0_87 = arith.constant 0 : index
    %c0_88 = arith.constant 0 : index
    %144 = vector.load %arg7[%c0_85, %c3_86, %c0_87, %c0_88] : memref<1x4x32x80xbf16, #tpu.memory_space<vmem>>, vector<1x1x32x80xbf16>
    %145 = vector.shape_cast %144 : vector<1x1x32x80xbf16> to vector<32x80xbf16>
    %146 = vector.shape_cast %143 : vector<32x80xbf16> to vector<1x1x32x80xbf16>
    tpu.vector_store %arg7[%c0_85, %c3_86, %c0_87, %c0_88], %146 {strides = array<i32>} : memref<1x4x32x80xbf16, #tpu.memory_space<vmem>>, vector<1x1x32x80xbf16>,
    %c0_89 = arith.constant 0 : index
    %c0_90 = arith.constant 0 : index
    %c0_91 = arith.constant 0 : index
    %147 = vector.load %arg8[%c0_89, %c0_90, %c0_91] : memref<1x32x1xf32, #tpu.memory_space<vmem>>, vector<1x32x1xf32>
    %148 = vector.shape_cast %147 : vector<1x32x1xf32> to vector<32x1xf32>
    %149 = vector.shape_cast %138 : vector<32x1xf32> to vector<1x32x1xf32>
    tpu.vector_store %arg8[%c0_89, %c0_90, %c0_91], %149 {strides = array<i32>} : memref<1x32x1xf32, #tpu.memory_space<vmem>>, vector<1x32x1xf32>,
    %c0_92 = arith.constant 0 : index
    %c0_93 = arith.constant 0 : index
    %c0_94 = arith.constant 0 : index
    %150 = vector.load %arg9[%c0_92, %c0_93, %c0_94] : memref<1x32x1xf32, #tpu.memory_space<vmem>>, vector<1x32x1xf32>
    %151 = vector.shape_cast %150 : vector<1x32x1xf32> to vector<32x1xf32>
    %152 = vector.shape_cast %142 : vector<32x1xf32> to vector<1x32x1xf32>
    tpu.vector_store %arg9[%c0_92, %c0_93, %c0_94], %152 {strides = array<i32>} : memref<1x32x1xf32, #tpu.memory_space<vmem>>, vector<1x32x1xf32>,
    return
  }
  func.func @transform_0(%arg0: i32) -> (i32, i32, i32) {
    %c0_i32 = arith.constant 0 : i32
    %c0_i32_0 = arith.constant 0 : i32
    %c0_i32_1 = arith.constant 0 : i32
    return %arg0, %c0_i32, %c0_i32_0 : i32, i32, i32
  }
  func.func @transform_1(%arg0: i32) -> (i32, i32) {
    %c0_i32 = arith.constant 0 : i32
    %c0_i32_0 = arith.constant 0 : i32
    %c0_i32_1 = arith.constant 0 : i32
    return %c0_i32, %c0_i32_0 : i32, i32
  }
  func.func @transform_2(%arg0: i32) -> (i32, i32) {
    %c0_i32 = arith.constant 0 : i32
    %c0_i32_0 = arith.constant 0 : i32
    %c0_i32_1 = arith.constant 0 : i32
    return %c0_i32, %c0_i32_0 : i32, i32
  }
  func.func @transform_3(%arg0: i32) -> (i32, i32) {
    %c0_i32 = arith.constant 0 : i32
    %c0_i32_0 = arith.constant 0 : i32
    %c0_i32_1 = arith.constant 0 : i32
    return %c0_i32, %c0_i32_0 : i32, i32
  }
  func.func @transform_4(%arg0: i32) -> (i32, i32) {
    %c0_i32 = arith.constant 0 : i32
    %c0_i32_0 = arith.constant 0 : i32
    %c0_i32_1 = arith.constant 0 : i32
    return %c0_i32, %c0_i32_0 : i32, i32
  }
  func.func @transform_5(%arg0: i32) -> (i32, i32, i32) {
    %c0_i32 = arith.constant 0 : i32
    %c0_i32_0 = arith.constant 0 : i32
    %c0_i32_1 = arith.constant 0 : i32
    %c0_i32_2 = arith.constant 0 : i32
    return %c0_i32, %c0_i32_0, %c0_i32_1 : i32, i32, i32
  }
  func.func @transform_6(%arg0: i32) -> (i32, i32, i32, i32) {
    %c0_i32 = arith.constant 0 : i32
    %c0_i32_0 = arith.constant 0 : i32
    %c0_i32_1 = arith.constant 0 : i32
    %c0_i32_2 = arith.constant 0 : i32
    return %arg0, %c0_i32, %c0_i32_0, %c0_i32_1 : i32, i32, i32, i32
  }
  func.func @transform_7(%arg0: i32) -> (i32, i32, i32) {
    %c0_i32 = arith.constant 0 : i32
    %c0_i32_0 = arith.constant 0 : i32
    %c0_i32_1 = arith.constant 0 : i32
    return %arg0, %c0_i32, %c0_i32_0 : i32, i32, i32
  }
  func.func @transform_8(%arg0: i32) -> (i32, i32, i32) {
    %c0_i32 = arith.constant 0 : i32
    %c0_i32_0 = arith.constant 0 : i32
    %c0_i32_1 = arith.constant 0 : i32
    return %arg0, %c0_i32, %c0_i32_0 : i32, i32, i32
  }
}

module attributes {stable_mosaic.version = 11 : i64} {
  func.func @_convt2_kernel(%arg0: i32, %arg1: memref<1x32x326xbf16, #tpu.memory_space<vmem>>, %arg2: memref<32x1xf32, #tpu.memory_space<vmem>>, %arg3: memref<32x1xf32, #tpu.memory_space<vmem>>, %arg4: memref<1x326xf32, #tpu.memory_space<vmem>>, %arg5: memref<1x288xf32, #tpu.memory_space<vmem>>, %arg6: memref<16x16x32xbf16, #tpu.memory_space<vmem>>, %arg7: memref<1x4x16x288xbf16, #tpu.memory_space<vmem>>, %arg8: memref<1x16x1xf32, #tpu.memory_space<vmem>>, %arg9: memref<1x16x1xf32, #tpu.memory_space<vmem>>) attributes {dimension_semantics = [#tpu.dimension_semantics<parallel>], iteration_bounds = array<i64: 2>, scalar_prefetch = 0 : i64, scratch_operands = 0 : i64, tpu.core_type = #tpu.core_type<tc>, window_params = [{transform_indices = @transform_0, window_bounds = array<i64: 1, 32, 326>}, {pipeline_mode = #tpu.pipeline_mode<synchronous>, transform_indices = @transform_1, window_bounds = array<i64: 32, 1>}, {pipeline_mode = #tpu.pipeline_mode<synchronous>, transform_indices = @transform_2, window_bounds = array<i64: 32, 1>}, {pipeline_mode = #tpu.pipeline_mode<synchronous>, transform_indices = @transform_3, window_bounds = array<i64: 1, 326>}, {pipeline_mode = #tpu.pipeline_mode<synchronous>, transform_indices = @transform_4, window_bounds = array<i64: 1, 288>}, {pipeline_mode = #tpu.pipeline_mode<synchronous>, transform_indices = @transform_5, window_bounds = array<i64: 16, 16, 32>}, {transform_indices = @transform_6, window_bounds = array<i64: 1, 4, 16, 288>}, {transform_indices = @transform_7, window_bounds = array<i64: 1, 16, 1>}, {transform_indices = @transform_8, window_bounds = array<i64: 1, 16, 1>}]} {
    %c0 = arith.constant 0 : index
    %c0_0 = arith.constant 0 : index
    %c0_1 = arith.constant 0 : index
    %0 = vector.load %arg1[%c0, %c0_0, %c0_1] : memref<1x32x326xbf16, #tpu.memory_space<vmem>>, vector<1x32x326xbf16>
    %1 = vector.shape_cast %0 : vector<1x32x326xbf16> to vector<32x326xbf16>
    %2 = arith.extf %1 : vector<32x326xbf16> to vector<32x326xf32>
    %c0_2 = arith.constant 0 : index
    %c0_3 = arith.constant 0 : index
    %3 = vector.load %arg2[%c0_2, %c0_3] : memref<32x1xf32, #tpu.memory_space<vmem>>, vector<32x1xf32>
    %4 = vector.broadcast %3 : vector<32x1xf32> to vector<32x326xf32>
    %5 = arith.mulf %2, %4 : vector<32x326xf32>
    %c0_4 = arith.constant 0 : index
    %c0_5 = arith.constant 0 : index
    %6 = vector.load %arg3[%c0_4, %c0_5] : memref<32x1xf32, #tpu.memory_space<vmem>>, vector<32x1xf32>
    %7 = vector.broadcast %6 : vector<32x1xf32> to vector<32x326xf32>
    %8 = arith.addf %5, %7 : vector<32x326xf32>
    %cst = arith.constant 0.000000e+00 : f32
    %9 = vector.broadcast %cst : f32 to vector<32x326xf32>
    %10 = arith.maximumf %8, %9 : vector<32x326xf32>
    %c0_6 = arith.constant 0 : index
    %c0_7 = arith.constant 0 : index
    %11 = vector.load %arg4[%c0_6, %c0_7] : memref<1x326xf32, #tpu.memory_space<vmem>>, vector<1x326xf32>
    %12 = vector.broadcast %11 : vector<1x326xf32> to vector<32x326xf32>
    %13 = arith.mulf %10, %12 : vector<32x326xf32>
    %14 = arith.truncf %13 : vector<32x326xf32> to vector<32x326xbf16>
    %15 = vector.extract_strided_slice %14 {offsets = [0, 0], sizes = [32, 288], strides = [1, 1]} : vector<32x326xbf16> to vector<32x288xbf16>
    %16 = vector.extract_strided_slice %14 {offsets = [0, 1], sizes = [32, 288], strides = [1, 1]} : vector<32x326xbf16> to vector<32x288xbf16>
    %17 = vector.extract_strided_slice %14 {offsets = [0, 2], sizes = [32, 288], strides = [1, 1]} : vector<32x326xbf16> to vector<32x288xbf16>
    %18 = vector.extract_strided_slice %14 {offsets = [0, 36], sizes = [32, 288], strides = [1, 1]} : vector<32x326xbf16> to vector<32x288xbf16>
    %19 = vector.extract_strided_slice %14 {offsets = [0, 37], sizes = [32, 288], strides = [1, 1]} : vector<32x326xbf16> to vector<32x288xbf16>
    %20 = vector.extract_strided_slice %14 {offsets = [0, 38], sizes = [32, 288], strides = [1, 1]} : vector<32x326xbf16> to vector<32x288xbf16>
    %21 = vector.extract_strided_slice %14 {offsets = [0, 18], sizes = [32, 288], strides = [1, 1]} : vector<32x326xbf16> to vector<32x288xbf16>
    %22 = vector.extract_strided_slice %14 {offsets = [0, 19], sizes = [32, 288], strides = [1, 1]} : vector<32x326xbf16> to vector<32x288xbf16>
    %23 = vector.extract_strided_slice %14 {offsets = [0, 20], sizes = [32, 288], strides = [1, 1]} : vector<32x326xbf16> to vector<32x288xbf16>
    %c0_8 = arith.constant 0 : index
    %c0_9 = arith.constant 0 : index
    %24 = vector.load %arg5[%c0_8, %c0_9] : memref<1x288xf32, #tpu.memory_space<vmem>>, vector<1x288xf32>
    %cst_10 = arith.constant 0.000000e+00 : f32
    %25 = vector.broadcast %cst_10 : f32 to vector<16x1xf32>
    %cst_11 = arith.constant 0.000000e+00 : f32
    %26 = vector.broadcast %cst_11 : f32 to vector<16x1xf32>
    %cst_12 = arith.constant 0.000000e+00 : f32
    %27 = vector.broadcast %cst_12 : f32 to vector<16x288xf32>
    %c0_13 = arith.constant 0 : index
    %c0_14 = arith.constant 0 : index
    %c0_15 = arith.constant 0 : index
    %28 = vector.load %arg6[%c0_13, %c0_14, %c0_15] : memref<16x16x32xbf16, #tpu.memory_space<vmem>>, vector<1x16x32xbf16>
    %29 = vector.shape_cast %28 : vector<1x16x32xbf16> to vector<16x32xbf16>
    %cst_16 = arith.constant dense<0.000000e+00> : vector<16x288xf32>
    %30 = tpu.matmul %29, %22, %cst_16 {dimension_numbers = #tpu.dot_dimension_numbers<[1], [0], [0], [1], [0, 0, 1, 1], [], []>} : vector<16x32xbf16>, vector<32x288xbf16>, vector<16x288xf32> -> vector<16x288xf32>
    %31 = arith.addf %27, %30 : vector<16x288xf32>
    %c1 = arith.constant 1 : index
    %c0_17 = arith.constant 0 : index
    %c0_18 = arith.constant 0 : index
    %32 = vector.load %arg6[%c1, %c0_17, %c0_18] : memref<16x16x32xbf16, #tpu.memory_space<vmem>>, vector<1x16x32xbf16>
    %33 = vector.shape_cast %32 : vector<1x16x32xbf16> to vector<16x32xbf16>
    %cst_19 = arith.constant dense<0.000000e+00> : vector<16x288xf32>
    %34 = tpu.matmul %33, %21, %cst_19 {dimension_numbers = #tpu.dot_dimension_numbers<[1], [0], [0], [1], [0, 0, 1, 1], [], []>} : vector<16x32xbf16>, vector<32x288xbf16>, vector<16x288xf32> -> vector<16x288xf32>
    %35 = arith.addf %31, %34 : vector<16x288xf32>
    %c2 = arith.constant 2 : index
    %c0_20 = arith.constant 0 : index
    %c0_21 = arith.constant 0 : index
    %36 = vector.load %arg6[%c2, %c0_20, %c0_21] : memref<16x16x32xbf16, #tpu.memory_space<vmem>>, vector<1x16x32xbf16>
    %37 = vector.shape_cast %36 : vector<1x16x32xbf16> to vector<16x32xbf16>
    %cst_22 = arith.constant dense<0.000000e+00> : vector<16x288xf32>
    %38 = tpu.matmul %37, %16, %cst_22 {dimension_numbers = #tpu.dot_dimension_numbers<[1], [0], [0], [1], [0, 0, 1, 1], [], []>} : vector<16x32xbf16>, vector<32x288xbf16>, vector<16x288xf32> -> vector<16x288xf32>
    %39 = arith.addf %35, %38 : vector<16x288xf32>
    %c3 = arith.constant 3 : index
    %c0_23 = arith.constant 0 : index
    %c0_24 = arith.constant 0 : index
    %40 = vector.load %arg6[%c3, %c0_23, %c0_24] : memref<16x16x32xbf16, #tpu.memory_space<vmem>>, vector<1x16x32xbf16>
    %41 = vector.shape_cast %40 : vector<1x16x32xbf16> to vector<16x32xbf16>
    %cst_25 = arith.constant dense<0.000000e+00> : vector<16x288xf32>
    %42 = tpu.matmul %41, %15, %cst_25 {dimension_numbers = #tpu.dot_dimension_numbers<[1], [0], [0], [1], [0, 0, 1, 1], [], []>} : vector<16x32xbf16>, vector<32x288xbf16>, vector<16x288xf32> -> vector<16x288xf32>
    %43 = arith.addf %39, %42 : vector<16x288xf32>
    %44 = vector.broadcast %24 : vector<1x288xf32> to vector<16x288xf32>
    %45 = arith.mulf %43, %44 : vector<16x288xf32>
    %cst_26 = arith.constant dense<0.000000e+00> : vector<16xf32>
    %46 = vector.multi_reduction <add>, %45, %cst_26 [1] : vector<16x288xf32> to vector<16xf32>
    %47 = vector.shape_cast %46 : vector<16xf32> to vector<16x1xf32>
    %48 = arith.addf %25, %47 : vector<16x1xf32>
    %49 = arith.mulf %45, %45 : vector<16x288xf32>
    %cst_27 = arith.constant dense<0.000000e+00> : vector<16xf32>
    %50 = vector.multi_reduction <add>, %49, %cst_27 [1] : vector<16x288xf32> to vector<16xf32>
    %51 = vector.shape_cast %50 : vector<16xf32> to vector<16x1xf32>
    %52 = arith.addf %26, %51 : vector<16x1xf32>
    %53 = arith.truncf %43 : vector<16x288xf32> to vector<16x288xbf16>
    %c0_28 = arith.constant 0 : index
    %c0_29 = arith.constant 0 : index
    %c0_30 = arith.constant 0 : index
    %c0_31 = arith.constant 0 : index
    %54 = vector.load %arg7[%c0_28, %c0_29, %c0_30, %c0_31] : memref<1x4x16x288xbf16, #tpu.memory_space<vmem>>, vector<1x1x16x288xbf16>
    %55 = vector.shape_cast %54 : vector<1x1x16x288xbf16> to vector<16x288xbf16>
    %56 = vector.shape_cast %53 : vector<16x288xbf16> to vector<1x1x16x288xbf16>
    tpu.vector_store %arg7[%c0_28, %c0_29, %c0_30, %c0_31], %56 {strides = array<i32>} : memref<1x4x16x288xbf16, #tpu.memory_space<vmem>>, vector<1x1x16x288xbf16>,
    %cst_32 = arith.constant 0.000000e+00 : f32
    %57 = vector.broadcast %cst_32 : f32 to vector<16x288xf32>
    %c4 = arith.constant 4 : index
    %c0_33 = arith.constant 0 : index
    %c0_34 = arith.constant 0 : index
    %58 = vector.load %arg6[%c4, %c0_33, %c0_34] : memref<16x16x32xbf16, #tpu.memory_space<vmem>>, vector<1x16x32xbf16>
    %59 = vector.shape_cast %58 : vector<1x16x32xbf16> to vector<16x32xbf16>
    %cst_35 = arith.constant dense<0.000000e+00> : vector<16x288xf32>
    %60 = tpu.matmul %59, %23, %cst_35 {dimension_numbers = #tpu.dot_dimension_numbers<[1], [0], [0], [1], [0, 0, 1, 1], [], []>} : vector<16x32xbf16>, vector<32x288xbf16>, vector<16x288xf32> -> vector<16x288xf32>
    %61 = arith.addf %57, %60 : vector<16x288xf32>
    %c5 = arith.constant 5 : index
    %c0_36 = arith.constant 0 : index
    %c0_37 = arith.constant 0 : index
    %62 = vector.load %arg6[%c5, %c0_36, %c0_37] : memref<16x16x32xbf16, #tpu.memory_space<vmem>>, vector<1x16x32xbf16>
    %63 = vector.shape_cast %62 : vector<1x16x32xbf16> to vector<16x32xbf16>
    %cst_38 = arith.constant dense<0.000000e+00> : vector<16x288xf32>
    %64 = tpu.matmul %63, %22, %cst_38 {dimension_numbers = #tpu.dot_dimension_numbers<[1], [0], [0], [1], [0, 0, 1, 1], [], []>} : vector<16x32xbf16>, vector<32x288xbf16>, vector<16x288xf32> -> vector<16x288xf32>
    %65 = arith.addf %61, %64 : vector<16x288xf32>
    %c6 = arith.constant 6 : index
    %c0_39 = arith.constant 0 : index
    %c0_40 = arith.constant 0 : index
    %66 = vector.load %arg6[%c6, %c0_39, %c0_40] : memref<16x16x32xbf16, #tpu.memory_space<vmem>>, vector<1x16x32xbf16>
    %67 = vector.shape_cast %66 : vector<1x16x32xbf16> to vector<16x32xbf16>
    %cst_41 = arith.constant dense<0.000000e+00> : vector<16x288xf32>
    %68 = tpu.matmul %67, %17, %cst_41 {dimension_numbers = #tpu.dot_dimension_numbers<[1], [0], [0], [1], [0, 0, 1, 1], [], []>} : vector<16x32xbf16>, vector<32x288xbf16>, vector<16x288xf32> -> vector<16x288xf32>
    %69 = arith.addf %65, %68 : vector<16x288xf32>
    %c7 = arith.constant 7 : index
    %c0_42 = arith.constant 0 : index
    %c0_43 = arith.constant 0 : index
    %70 = vector.load %arg6[%c7, %c0_42, %c0_43] : memref<16x16x32xbf16, #tpu.memory_space<vmem>>, vector<1x16x32xbf16>
    %71 = vector.shape_cast %70 : vector<1x16x32xbf16> to vector<16x32xbf16>
    %cst_44 = arith.constant dense<0.000000e+00> : vector<16x288xf32>
    %72 = tpu.matmul %71, %16, %cst_44 {dimension_numbers = #tpu.dot_dimension_numbers<[1], [0], [0], [1], [0, 0, 1, 1], [], []>} : vector<16x32xbf16>, vector<32x288xbf16>, vector<16x288xf32> -> vector<16x288xf32>
    %73 = arith.addf %69, %72 : vector<16x288xf32>
    %74 = vector.broadcast %24 : vector<1x288xf32> to vector<16x288xf32>
    %75 = arith.mulf %73, %74 : vector<16x288xf32>
    %cst_45 = arith.constant dense<0.000000e+00> : vector<16xf32>
    %76 = vector.multi_reduction <add>, %75, %cst_45 [1] : vector<16x288xf32> to vector<16xf32>
    %77 = vector.shape_cast %76 : vector<16xf32> to vector<16x1xf32>
    %78 = arith.addf %48, %77 : vector<16x1xf32>
    %79 = arith.mulf %75, %75 : vector<16x288xf32>
    %cst_46 = arith.constant dense<0.000000e+00> : vector<16xf32>
    %80 = vector.multi_reduction <add>, %79, %cst_46 [1] : vector<16x288xf32> to vector<16xf32>
    %81 = vector.shape_cast %80 : vector<16xf32> to vector<16x1xf32>
    %82 = arith.addf %52, %81 : vector<16x1xf32>
    %83 = arith.truncf %73 : vector<16x288xf32> to vector<16x288xbf16>
    %c0_47 = arith.constant 0 : index
    %c1_48 = arith.constant 1 : index
    %c0_49 = arith.constant 0 : index
    %c0_50 = arith.constant 0 : index
    %84 = vector.load %arg7[%c0_47, %c1_48, %c0_49, %c0_50] : memref<1x4x16x288xbf16, #tpu.memory_space<vmem>>, vector<1x1x16x288xbf16>
    %85 = vector.shape_cast %84 : vector<1x1x16x288xbf16> to vector<16x288xbf16>
    %86 = vector.shape_cast %83 : vector<16x288xbf16> to vector<1x1x16x288xbf16>
    tpu.vector_store %arg7[%c0_47, %c1_48, %c0_49, %c0_50], %86 {strides = array<i32>} : memref<1x4x16x288xbf16, #tpu.memory_space<vmem>>, vector<1x1x16x288xbf16>,
    %cst_51 = arith.constant 0.000000e+00 : f32
    %87 = vector.broadcast %cst_51 : f32 to vector<16x288xf32>
    %c8 = arith.constant 8 : index
    %c0_52 = arith.constant 0 : index
    %c0_53 = arith.constant 0 : index
    %88 = vector.load %arg6[%c8, %c0_52, %c0_53] : memref<16x16x32xbf16, #tpu.memory_space<vmem>>, vector<1x16x32xbf16>
    %89 = vector.shape_cast %88 : vector<1x16x32xbf16> to vector<16x32xbf16>
    %cst_54 = arith.constant dense<0.000000e+00> : vector<16x288xf32>
    %90 = tpu.matmul %89, %19, %cst_54 {dimension_numbers = #tpu.dot_dimension_numbers<[1], [0], [0], [1], [0, 0, 1, 1], [], []>} : vector<16x32xbf16>, vector<32x288xbf16>, vector<16x288xf32> -> vector<16x288xf32>
    %91 = arith.addf %87, %90 : vector<16x288xf32>
    %c9 = arith.constant 9 : index
    %c0_55 = arith.constant 0 : index
    %c0_56 = arith.constant 0 : index
    %92 = vector.load %arg6[%c9, %c0_55, %c0_56] : memref<16x16x32xbf16, #tpu.memory_space<vmem>>, vector<1x16x32xbf16>
    %93 = vector.shape_cast %92 : vector<1x16x32xbf16> to vector<16x32xbf16>
    %cst_57 = arith.constant dense<0.000000e+00> : vector<16x288xf32>
    %94 = tpu.matmul %93, %18, %cst_57 {dimension_numbers = #tpu.dot_dimension_numbers<[1], [0], [0], [1], [0, 0, 1, 1], [], []>} : vector<16x32xbf16>, vector<32x288xbf16>, vector<16x288xf32> -> vector<16x288xf32>
    %95 = arith.addf %91, %94 : vector<16x288xf32>
    %c10 = arith.constant 10 : index
    %c0_58 = arith.constant 0 : index
    %c0_59 = arith.constant 0 : index
    %96 = vector.load %arg6[%c10, %c0_58, %c0_59] : memref<16x16x32xbf16, #tpu.memory_space<vmem>>, vector<1x16x32xbf16>
    %97 = vector.shape_cast %96 : vector<1x16x32xbf16> to vector<16x32xbf16>
    %cst_60 = arith.constant dense<0.000000e+00> : vector<16x288xf32>
    %98 = tpu.matmul %97, %22, %cst_60 {dimension_numbers = #tpu.dot_dimension_numbers<[1], [0], [0], [1], [0, 0, 1, 1], [], []>} : vector<16x32xbf16>, vector<32x288xbf16>, vector<16x288xf32> -> vector<16x288xf32>
    %99 = arith.addf %95, %98 : vector<16x288xf32>
    %c11 = arith.constant 11 : index
    %c0_61 = arith.constant 0 : index
    %c0_62 = arith.constant 0 : index
    %100 = vector.load %arg6[%c11, %c0_61, %c0_62] : memref<16x16x32xbf16, #tpu.memory_space<vmem>>, vector<1x16x32xbf16>
    %101 = vector.shape_cast %100 : vector<1x16x32xbf16> to vector<16x32xbf16>
    %cst_63 = arith.constant dense<0.000000e+00> : vector<16x288xf32>
    %102 = tpu.matmul %101, %21, %cst_63 {dimension_numbers = #tpu.dot_dimension_numbers<[1], [0], [0], [1], [0, 0, 1, 1], [], []>} : vector<16x32xbf16>, vector<32x288xbf16>, vector<16x288xf32> -> vector<16x288xf32>
    %103 = arith.addf %99, %102 : vector<16x288xf32>
    %104 = vector.broadcast %24 : vector<1x288xf32> to vector<16x288xf32>
    %105 = arith.mulf %103, %104 : vector<16x288xf32>
    %cst_64 = arith.constant dense<0.000000e+00> : vector<16xf32>
    %106 = vector.multi_reduction <add>, %105, %cst_64 [1] : vector<16x288xf32> to vector<16xf32>
    %107 = vector.shape_cast %106 : vector<16xf32> to vector<16x1xf32>
    %108 = arith.addf %78, %107 : vector<16x1xf32>
    %109 = arith.mulf %105, %105 : vector<16x288xf32>
    %cst_65 = arith.constant dense<0.000000e+00> : vector<16xf32>
    %110 = vector.multi_reduction <add>, %109, %cst_65 [1] : vector<16x288xf32> to vector<16xf32>
    %111 = vector.shape_cast %110 : vector<16xf32> to vector<16x1xf32>
    %112 = arith.addf %82, %111 : vector<16x1xf32>
    %113 = arith.truncf %103 : vector<16x288xf32> to vector<16x288xbf16>
    %c0_66 = arith.constant 0 : index
    %c2_67 = arith.constant 2 : index
    %c0_68 = arith.constant 0 : index
    %c0_69 = arith.constant 0 : index
    %114 = vector.load %arg7[%c0_66, %c2_67, %c0_68, %c0_69] : memref<1x4x16x288xbf16, #tpu.memory_space<vmem>>, vector<1x1x16x288xbf16>
    %115 = vector.shape_cast %114 : vector<1x1x16x288xbf16> to vector<16x288xbf16>
    %116 = vector.shape_cast %113 : vector<16x288xbf16> to vector<1x1x16x288xbf16>
    tpu.vector_store %arg7[%c0_66, %c2_67, %c0_68, %c0_69], %116 {strides = array<i32>} : memref<1x4x16x288xbf16, #tpu.memory_space<vmem>>, vector<1x1x16x288xbf16>,
    %cst_70 = arith.constant 0.000000e+00 : f32
    %117 = vector.broadcast %cst_70 : f32 to vector<16x288xf32>
    %c12 = arith.constant 12 : index
    %c0_71 = arith.constant 0 : index
    %c0_72 = arith.constant 0 : index
    %118 = vector.load %arg6[%c12, %c0_71, %c0_72] : memref<16x16x32xbf16, #tpu.memory_space<vmem>>, vector<1x16x32xbf16>
    %119 = vector.shape_cast %118 : vector<1x16x32xbf16> to vector<16x32xbf16>
    %cst_73 = arith.constant dense<0.000000e+00> : vector<16x288xf32>
    %120 = tpu.matmul %119, %20, %cst_73 {dimension_numbers = #tpu.dot_dimension_numbers<[1], [0], [0], [1], [0, 0, 1, 1], [], []>} : vector<16x32xbf16>, vector<32x288xbf16>, vector<16x288xf32> -> vector<16x288xf32>
    %121 = arith.addf %117, %120 : vector<16x288xf32>
    %c13 = arith.constant 13 : index
    %c0_74 = arith.constant 0 : index
    %c0_75 = arith.constant 0 : index
    %122 = vector.load %arg6[%c13, %c0_74, %c0_75] : memref<16x16x32xbf16, #tpu.memory_space<vmem>>, vector<1x16x32xbf16>
    %123 = vector.shape_cast %122 : vector<1x16x32xbf16> to vector<16x32xbf16>
    %cst_76 = arith.constant dense<0.000000e+00> : vector<16x288xf32>
    %124 = tpu.matmul %123, %19, %cst_76 {dimension_numbers = #tpu.dot_dimension_numbers<[1], [0], [0], [1], [0, 0, 1, 1], [], []>} : vector<16x32xbf16>, vector<32x288xbf16>, vector<16x288xf32> -> vector<16x288xf32>
    %125 = arith.addf %121, %124 : vector<16x288xf32>
    %c14 = arith.constant 14 : index
    %c0_77 = arith.constant 0 : index
    %c0_78 = arith.constant 0 : index
    %126 = vector.load %arg6[%c14, %c0_77, %c0_78] : memref<16x16x32xbf16, #tpu.memory_space<vmem>>, vector<1x16x32xbf16>
    %127 = vector.shape_cast %126 : vector<1x16x32xbf16> to vector<16x32xbf16>
    %cst_79 = arith.constant dense<0.000000e+00> : vector<16x288xf32>
    %128 = tpu.matmul %127, %23, %cst_79 {dimension_numbers = #tpu.dot_dimension_numbers<[1], [0], [0], [1], [0, 0, 1, 1], [], []>} : vector<16x32xbf16>, vector<32x288xbf16>, vector<16x288xf32> -> vector<16x288xf32>
    %129 = arith.addf %125, %128 : vector<16x288xf32>
    %c15 = arith.constant 15 : index
    %c0_80 = arith.constant 0 : index
    %c0_81 = arith.constant 0 : index
    %130 = vector.load %arg6[%c15, %c0_80, %c0_81] : memref<16x16x32xbf16, #tpu.memory_space<vmem>>, vector<1x16x32xbf16>
    %131 = vector.shape_cast %130 : vector<1x16x32xbf16> to vector<16x32xbf16>
    %cst_82 = arith.constant dense<0.000000e+00> : vector<16x288xf32>
    %132 = tpu.matmul %131, %22, %cst_82 {dimension_numbers = #tpu.dot_dimension_numbers<[1], [0], [0], [1], [0, 0, 1, 1], [], []>} : vector<16x32xbf16>, vector<32x288xbf16>, vector<16x288xf32> -> vector<16x288xf32>
    %133 = arith.addf %129, %132 : vector<16x288xf32>
    %134 = vector.broadcast %24 : vector<1x288xf32> to vector<16x288xf32>
    %135 = arith.mulf %133, %134 : vector<16x288xf32>
    %cst_83 = arith.constant dense<0.000000e+00> : vector<16xf32>
    %136 = vector.multi_reduction <add>, %135, %cst_83 [1] : vector<16x288xf32> to vector<16xf32>
    %137 = vector.shape_cast %136 : vector<16xf32> to vector<16x1xf32>
    %138 = arith.addf %108, %137 : vector<16x1xf32>
    %139 = arith.mulf %135, %135 : vector<16x288xf32>
    %cst_84 = arith.constant dense<0.000000e+00> : vector<16xf32>
    %140 = vector.multi_reduction <add>, %139, %cst_84 [1] : vector<16x288xf32> to vector<16xf32>
    %141 = vector.shape_cast %140 : vector<16xf32> to vector<16x1xf32>
    %142 = arith.addf %112, %141 : vector<16x1xf32>
    %143 = arith.truncf %133 : vector<16x288xf32> to vector<16x288xbf16>
    %c0_85 = arith.constant 0 : index
    %c3_86 = arith.constant 3 : index
    %c0_87 = arith.constant 0 : index
    %c0_88 = arith.constant 0 : index
    %144 = vector.load %arg7[%c0_85, %c3_86, %c0_87, %c0_88] : memref<1x4x16x288xbf16, #tpu.memory_space<vmem>>, vector<1x1x16x288xbf16>
    %145 = vector.shape_cast %144 : vector<1x1x16x288xbf16> to vector<16x288xbf16>
    %146 = vector.shape_cast %143 : vector<16x288xbf16> to vector<1x1x16x288xbf16>
    tpu.vector_store %arg7[%c0_85, %c3_86, %c0_87, %c0_88], %146 {strides = array<i32>} : memref<1x4x16x288xbf16, #tpu.memory_space<vmem>>, vector<1x1x16x288xbf16>,
    %c0_89 = arith.constant 0 : index
    %c0_90 = arith.constant 0 : index
    %c0_91 = arith.constant 0 : index
    %147 = vector.load %arg8[%c0_89, %c0_90, %c0_91] : memref<1x16x1xf32, #tpu.memory_space<vmem>>, vector<1x16x1xf32>
    %148 = vector.shape_cast %147 : vector<1x16x1xf32> to vector<16x1xf32>
    %149 = vector.shape_cast %138 : vector<16x1xf32> to vector<1x16x1xf32>
    tpu.vector_store %arg8[%c0_89, %c0_90, %c0_91], %149 {strides = array<i32>} : memref<1x16x1xf32, #tpu.memory_space<vmem>>, vector<1x16x1xf32>,
    %c0_92 = arith.constant 0 : index
    %c0_93 = arith.constant 0 : index
    %c0_94 = arith.constant 0 : index
    %150 = vector.load %arg9[%c0_92, %c0_93, %c0_94] : memref<1x16x1xf32, #tpu.memory_space<vmem>>, vector<1x16x1xf32>
    %151 = vector.shape_cast %150 : vector<1x16x1xf32> to vector<16x1xf32>
    %152 = vector.shape_cast %142 : vector<16x1xf32> to vector<1x16x1xf32>
    tpu.vector_store %arg9[%c0_92, %c0_93, %c0_94], %152 {strides = array<i32>} : memref<1x16x1xf32, #tpu.memory_space<vmem>>, vector<1x16x1xf32>,
    return
  }
  func.func @transform_0(%arg0: i32) -> (i32, i32, i32) {
    %c0_i32 = arith.constant 0 : i32
    %c0_i32_0 = arith.constant 0 : i32
    %c0_i32_1 = arith.constant 0 : i32
    return %arg0, %c0_i32, %c0_i32_0 : i32, i32, i32
  }
  func.func @transform_1(%arg0: i32) -> (i32, i32) {
    %c0_i32 = arith.constant 0 : i32
    %c0_i32_0 = arith.constant 0 : i32
    %c0_i32_1 = arith.constant 0 : i32
    return %c0_i32, %c0_i32_0 : i32, i32
  }
  func.func @transform_2(%arg0: i32) -> (i32, i32) {
    %c0_i32 = arith.constant 0 : i32
    %c0_i32_0 = arith.constant 0 : i32
    %c0_i32_1 = arith.constant 0 : i32
    return %c0_i32, %c0_i32_0 : i32, i32
  }
  func.func @transform_3(%arg0: i32) -> (i32, i32) {
    %c0_i32 = arith.constant 0 : i32
    %c0_i32_0 = arith.constant 0 : i32
    %c0_i32_1 = arith.constant 0 : i32
    return %c0_i32, %c0_i32_0 : i32, i32
  }
  func.func @transform_4(%arg0: i32) -> (i32, i32) {
    %c0_i32 = arith.constant 0 : i32
    %c0_i32_0 = arith.constant 0 : i32
    %c0_i32_1 = arith.constant 0 : i32
    return %c0_i32, %c0_i32_0 : i32, i32
  }
  func.func @transform_5(%arg0: i32) -> (i32, i32, i32) {
    %c0_i32 = arith.constant 0 : i32
    %c0_i32_0 = arith.constant 0 : i32
    %c0_i32_1 = arith.constant 0 : i32
    %c0_i32_2 = arith.constant 0 : i32
    return %c0_i32, %c0_i32_0, %c0_i32_1 : i32, i32, i32
  }
  func.func @transform_6(%arg0: i32) -> (i32, i32, i32, i32) {
    %c0_i32 = arith.constant 0 : i32
    %c0_i32_0 = arith.constant 0 : i32
    %c0_i32_1 = arith.constant 0 : i32
    %c0_i32_2 = arith.constant 0 : i32
    return %arg0, %c0_i32, %c0_i32_0, %c0_i32_1 : i32, i32, i32, i32
  }
  func.func @transform_7(%arg0: i32) -> (i32, i32, i32) {
    %c0_i32 = arith.constant 0 : i32
    %c0_i32_0 = arith.constant 0 : i32
    %c0_i32_1 = arith.constant 0 : i32
    return %arg0, %c0_i32, %c0_i32_0 : i32, i32, i32
  }
  func.func @transform_8(%arg0: i32) -> (i32, i32, i32) {
    %c0_i32 = arith.constant 0 : i32
    %c0_i32_0 = arith.constant 0 : i32
    %c0_i32_1 = arith.constant 0 : i32
    return %arg0, %c0_i32, %c0_i32_0 : i32, i32, i32
  }
}

module attributes {stable_mosaic.version = 11 : i64} {
  func.func @_convt2_kernel(%arg0: i32, %arg1: memref<1x16x1158xbf16, #tpu.memory_space<vmem>>, %arg2: memref<16x1xf32, #tpu.memory_space<vmem>>, %arg3: memref<16x1xf32, #tpu.memory_space<vmem>>, %arg4: memref<1x1158xf32, #tpu.memory_space<vmem>>, %arg5: memref<1x1088xf32, #tpu.memory_space<vmem>>, %arg6: memref<16x8x16xbf16, #tpu.memory_space<vmem>>, %arg7: memref<1x4x8x1088xbf16, #tpu.memory_space<vmem>>, %arg8: memref<1x8x1xf32, #tpu.memory_space<vmem>>, %arg9: memref<1x8x1xf32, #tpu.memory_space<vmem>>) attributes {dimension_semantics = [#tpu.dimension_semantics<parallel>], iteration_bounds = array<i64: 2>, scalar_prefetch = 0 : i64, scratch_operands = 0 : i64, tpu.core_type = #tpu.core_type<tc>, window_params = [{transform_indices = @transform_0, window_bounds = array<i64: 1, 16, 1158>}, {pipeline_mode = #tpu.pipeline_mode<synchronous>, transform_indices = @transform_1, window_bounds = array<i64: 16, 1>}, {pipeline_mode = #tpu.pipeline_mode<synchronous>, transform_indices = @transform_2, window_bounds = array<i64: 16, 1>}, {pipeline_mode = #tpu.pipeline_mode<synchronous>, transform_indices = @transform_3, window_bounds = array<i64: 1, 1158>}, {pipeline_mode = #tpu.pipeline_mode<synchronous>, transform_indices = @transform_4, window_bounds = array<i64: 1, 1088>}, {pipeline_mode = #tpu.pipeline_mode<synchronous>, transform_indices = @transform_5, window_bounds = array<i64: 16, 8, 16>}, {transform_indices = @transform_6, window_bounds = array<i64: 1, 4, 8, 1088>}, {transform_indices = @transform_7, window_bounds = array<i64: 1, 8, 1>}, {transform_indices = @transform_8, window_bounds = array<i64: 1, 8, 1>}]} {
    %c0 = arith.constant 0 : index
    %c0_0 = arith.constant 0 : index
    %c0_1 = arith.constant 0 : index
    %0 = vector.load %arg1[%c0, %c0_0, %c0_1] : memref<1x16x1158xbf16, #tpu.memory_space<vmem>>, vector<1x16x1158xbf16>
    %1 = vector.shape_cast %0 : vector<1x16x1158xbf16> to vector<16x1158xbf16>
    %2 = arith.extf %1 : vector<16x1158xbf16> to vector<16x1158xf32>
    %c0_2 = arith.constant 0 : index
    %c0_3 = arith.constant 0 : index
    %3 = vector.load %arg2[%c0_2, %c0_3] : memref<16x1xf32, #tpu.memory_space<vmem>>, vector<16x1xf32>
    %4 = vector.broadcast %3 : vector<16x1xf32> to vector<16x1158xf32>
    %5 = arith.mulf %2, %4 : vector<16x1158xf32>
    %c0_4 = arith.constant 0 : index
    %c0_5 = arith.constant 0 : index
    %6 = vector.load %arg3[%c0_4, %c0_5] : memref<16x1xf32, #tpu.memory_space<vmem>>, vector<16x1xf32>
    %7 = vector.broadcast %6 : vector<16x1xf32> to vector<16x1158xf32>
    %8 = arith.addf %5, %7 : vector<16x1158xf32>
    %cst = arith.constant 0.000000e+00 : f32
    %9 = vector.broadcast %cst : f32 to vector<16x1158xf32>
    %10 = arith.maximumf %8, %9 : vector<16x1158xf32>
    %c0_6 = arith.constant 0 : index
    %c0_7 = arith.constant 0 : index
    %11 = vector.load %arg4[%c0_6, %c0_7] : memref<1x1158xf32, #tpu.memory_space<vmem>>, vector<1x1158xf32>
    %12 = vector.broadcast %11 : vector<1x1158xf32> to vector<16x1158xf32>
    %13 = arith.mulf %10, %12 : vector<16x1158xf32>
    %14 = arith.truncf %13 : vector<16x1158xf32> to vector<16x1158xbf16>
    %15 = vector.extract_strided_slice %14 {offsets = [0, 0], sizes = [16, 1088], strides = [1, 1]} : vector<16x1158xbf16> to vector<16x1088xbf16>
    %16 = vector.extract_strided_slice %14 {offsets = [0, 1], sizes = [16, 1088], strides = [1, 1]} : vector<16x1158xbf16> to vector<16x1088xbf16>
    %17 = vector.extract_strided_slice %14 {offsets = [0, 34], sizes = [16, 1088], strides = [1, 1]} : vector<16x1158xbf16> to vector<16x1088xbf16>
    %18 = vector.extract_strided_slice %14 {offsets = [0, 35], sizes = [16, 1088], strides = [1, 1]} : vector<16x1158xbf16> to vector<16x1088xbf16>
    %19 = vector.extract_strided_slice %14 {offsets = [0, 36], sizes = [16, 1088], strides = [1, 1]} : vector<16x1158xbf16> to vector<16x1088xbf16>
    %20 = vector.extract_strided_slice %14 {offsets = [0, 2], sizes = [16, 1088], strides = [1, 1]} : vector<16x1158xbf16> to vector<16x1088xbf16>
    %21 = vector.extract_strided_slice %14 {offsets = [0, 69], sizes = [16, 1088], strides = [1, 1]} : vector<16x1158xbf16> to vector<16x1088xbf16>
    %22 = vector.extract_strided_slice %14 {offsets = [0, 68], sizes = [16, 1088], strides = [1, 1]} : vector<16x1158xbf16> to vector<16x1088xbf16>
    %23 = vector.extract_strided_slice %14 {offsets = [0, 70], sizes = [16, 1088], strides = [1, 1]} : vector<16x1158xbf16> to vector<16x1088xbf16>
    %c0_8 = arith.constant 0 : index
    %c0_9 = arith.constant 0 : index
    %24 = vector.load %arg5[%c0_8, %c0_9] : memref<1x1088xf32, #tpu.memory_space<vmem>>, vector<1x1088xf32>
    %cst_10 = arith.constant 0.000000e+00 : f32
    %25 = vector.broadcast %cst_10 : f32 to vector<8x1xf32>
    %cst_11 = arith.constant 0.000000e+00 : f32
    %26 = vector.broadcast %cst_11 : f32 to vector<8x1xf32>
    %cst_12 = arith.constant 0.000000e+00 : f32
    %27 = vector.broadcast %cst_12 : f32 to vector<8x1088xf32>
    %c0_13 = arith.constant 0 : index
    %c0_14 = arith.constant 0 : index
    %c0_15 = arith.constant 0 : index
    %28 = vector.load %arg6[%c0_13, %c0_14, %c0_15] : memref<16x8x16xbf16, #tpu.memory_space<vmem>>, vector<1x8x16xbf16>
    %29 = vector.shape_cast %28 : vector<1x8x16xbf16> to vector<8x16xbf16>
    %cst_16 = arith.constant dense<0.000000e+00> : vector<8x1088xf32>
    %30 = tpu.matmul %29, %18, %cst_16 {dimension_numbers = #tpu.dot_dimension_numbers<[1], [0], [0], [1], [0, 0, 1, 1], [], []>} : vector<8x16xbf16>, vector<16x1088xbf16>, vector<8x1088xf32> -> vector<8x1088xf32>
    %31 = arith.addf %27, %30 : vector<8x1088xf32>
    %c1 = arith.constant 1 : index
    %c0_17 = arith.constant 0 : index
    %c0_18 = arith.constant 0 : index
    %32 = vector.load %arg6[%c1, %c0_17, %c0_18] : memref<16x8x16xbf16, #tpu.memory_space<vmem>>, vector<1x8x16xbf16>
    %33 = vector.shape_cast %32 : vector<1x8x16xbf16> to vector<8x16xbf16>
    %cst_19 = arith.constant dense<0.000000e+00> : vector<8x1088xf32>
    %34 = tpu.matmul %33, %17, %cst_19 {dimension_numbers = #tpu.dot_dimension_numbers<[1], [0], [0], [1], [0, 0, 1, 1], [], []>} : vector<8x16xbf16>, vector<16x1088xbf16>, vector<8x1088xf32> -> vector<8x1088xf32>
    %35 = arith.addf %31, %34 : vector<8x1088xf32>
    %c2 = arith.constant 2 : index
    %c0_20 = arith.constant 0 : index
    %c0_21 = arith.constant 0 : index
    %36 = vector.load %arg6[%c2, %c0_20, %c0_21] : memref<16x8x16xbf16, #tpu.memory_space<vmem>>, vector<1x8x16xbf16>
    %37 = vector.shape_cast %36 : vector<1x8x16xbf16> to vector<8x16xbf16>
    %cst_22 = arith.constant dense<0.000000e+00> : vector<8x1088xf32>
    %38 = tpu.matmul %37, %16, %cst_22 {dimension_numbers = #tpu.dot_dimension_numbers<[1], [0], [0], [1], [0, 0, 1, 1], [], []>} : vector<8x16xbf16>, vector<16x1088xbf16>, vector<8x1088xf32> -> vector<8x1088xf32>
    %39 = arith.addf %35, %38 : vector<8x1088xf32>
    %c3 = arith.constant 3 : index
    %c0_23 = arith.constant 0 : index
    %c0_24 = arith.constant 0 : index
    %40 = vector.load %arg6[%c3, %c0_23, %c0_24] : memref<16x8x16xbf16, #tpu.memory_space<vmem>>, vector<1x8x16xbf16>
    %41 = vector.shape_cast %40 : vector<1x8x16xbf16> to vector<8x16xbf16>
    %cst_25 = arith.constant dense<0.000000e+00> : vector<8x1088xf32>
    %42 = tpu.matmul %41, %15, %cst_25 {dimension_numbers = #tpu.dot_dimension_numbers<[1], [0], [0], [1], [0, 0, 1, 1], [], []>} : vector<8x16xbf16>, vector<16x1088xbf16>, vector<8x1088xf32> -> vector<8x1088xf32>
    %43 = arith.addf %39, %42 : vector<8x1088xf32>
    %44 = vector.broadcast %24 : vector<1x1088xf32> to vector<8x1088xf32>
    %45 = arith.mulf %43, %44 : vector<8x1088xf32>
    %cst_26 = arith.constant dense<0.000000e+00> : vector<8xf32>
    %46 = vector.multi_reduction <add>, %45, %cst_26 [1] : vector<8x1088xf32> to vector<8xf32>
    %47 = vector.shape_cast %46 : vector<8xf32> to vector<8x1xf32>
    %48 = arith.addf %25, %47 : vector<8x1xf32>
    %49 = arith.mulf %45, %45 : vector<8x1088xf32>
    %cst_27 = arith.constant dense<0.000000e+00> : vector<8xf32>
    %50 = vector.multi_reduction <add>, %49, %cst_27 [1] : vector<8x1088xf32> to vector<8xf32>
    %51 = vector.shape_cast %50 : vector<8xf32> to vector<8x1xf32>
    %52 = arith.addf %26, %51 : vector<8x1xf32>
    %53 = math.tanh %43 : vector<8x1088xf32>
    %54 = arith.truncf %53 : vector<8x1088xf32> to vector<8x1088xbf16>
    %c0_28 = arith.constant 0 : index
    %c0_29 = arith.constant 0 : index
    %c0_30 = arith.constant 0 : index
    %c0_31 = arith.constant 0 : index
    %55 = vector.load %arg7[%c0_28, %c0_29, %c0_30, %c0_31] : memref<1x4x8x1088xbf16, #tpu.memory_space<vmem>>, vector<1x1x8x1088xbf16>
    %56 = vector.shape_cast %55 : vector<1x1x8x1088xbf16> to vector<8x1088xbf16>
    %57 = vector.shape_cast %54 : vector<8x1088xbf16> to vector<1x1x8x1088xbf16>
    tpu.vector_store %arg7[%c0_28, %c0_29, %c0_30, %c0_31], %57 {strides = array<i32>} : memref<1x4x8x1088xbf16, #tpu.memory_space<vmem>>, vector<1x1x8x1088xbf16>,
    %cst_32 = arith.constant 0.000000e+00 : f32
    %58 = vector.broadcast %cst_32 : f32 to vector<8x1088xf32>
    %c4 = arith.constant 4 : index
    %c0_33 = arith.constant 0 : index
    %c0_34 = arith.constant 0 : index
    %59 = vector.load %arg6[%c4, %c0_33, %c0_34] : memref<16x8x16xbf16, #tpu.memory_space<vmem>>, vector<1x8x16xbf16>
    %60 = vector.shape_cast %59 : vector<1x8x16xbf16> to vector<8x16xbf16>
    %cst_35 = arith.constant dense<0.000000e+00> : vector<8x1088xf32>
    %61 = tpu.matmul %60, %19, %cst_35 {dimension_numbers = #tpu.dot_dimension_numbers<[1], [0], [0], [1], [0, 0, 1, 1], [], []>} : vector<8x16xbf16>, vector<16x1088xbf16>, vector<8x1088xf32> -> vector<8x1088xf32>
    %62 = arith.addf %58, %61 : vector<8x1088xf32>
    %c5 = arith.constant 5 : index
    %c0_36 = arith.constant 0 : index
    %c0_37 = arith.constant 0 : index
    %63 = vector.load %arg6[%c5, %c0_36, %c0_37] : memref<16x8x16xbf16, #tpu.memory_space<vmem>>, vector<1x8x16xbf16>
    %64 = vector.shape_cast %63 : vector<1x8x16xbf16> to vector<8x16xbf16>
    %cst_38 = arith.constant dense<0.000000e+00> : vector<8x1088xf32>
    %65 = tpu.matmul %64, %18, %cst_38 {dimension_numbers = #tpu.dot_dimension_numbers<[1], [0], [0], [1], [0, 0, 1, 1], [], []>} : vector<8x16xbf16>, vector<16x1088xbf16>, vector<8x1088xf32> -> vector<8x1088xf32>
    %66 = arith.addf %62, %65 : vector<8x1088xf32>
    %c6 = arith.constant 6 : index
    %c0_39 = arith.constant 0 : index
    %c0_40 = arith.constant 0 : index
    %67 = vector.load %arg6[%c6, %c0_39, %c0_40] : memref<16x8x16xbf16, #tpu.memory_space<vmem>>, vector<1x8x16xbf16>
    %68 = vector.shape_cast %67 : vector<1x8x16xbf16> to vector<8x16xbf16>
    %cst_41 = arith.constant dense<0.000000e+00> : vector<8x1088xf32>
    %69 = tpu.matmul %68, %20, %cst_41 {dimension_numbers = #tpu.dot_dimension_numbers<[1], [0], [0], [1], [0, 0, 1, 1], [], []>} : vector<8x16xbf16>, vector<16x1088xbf16>, vector<8x1088xf32> -> vector<8x1088xf32>
    %70 = arith.addf %66, %69 : vector<8x1088xf32>
    %c7 = arith.constant 7 : index
    %c0_42 = arith.constant 0 : index
    %c0_43 = arith.constant 0 : index
    %71 = vector.load %arg6[%c7, %c0_42, %c0_43] : memref<16x8x16xbf16, #tpu.memory_space<vmem>>, vector<1x8x16xbf16>
    %72 = vector.shape_cast %71 : vector<1x8x16xbf16> to vector<8x16xbf16>
    %cst_44 = arith.constant dense<0.000000e+00> : vector<8x1088xf32>
    %73 = tpu.matmul %72, %16, %cst_44 {dimension_numbers = #tpu.dot_dimension_numbers<[1], [0], [0], [1], [0, 0, 1, 1], [], []>} : vector<8x16xbf16>, vector<16x1088xbf16>, vector<8x1088xf32> -> vector<8x1088xf32>
    %74 = arith.addf %70, %73 : vector<8x1088xf32>
    %75 = vector.broadcast %24 : vector<1x1088xf32> to vector<8x1088xf32>
    %76 = arith.mulf %74, %75 : vector<8x1088xf32>
    %cst_45 = arith.constant dense<0.000000e+00> : vector<8xf32>
    %77 = vector.multi_reduction <add>, %76, %cst_45 [1] : vector<8x1088xf32> to vector<8xf32>
    %78 = vector.shape_cast %77 : vector<8xf32> to vector<8x1xf32>
    %79 = arith.addf %48, %78 : vector<8x1xf32>
    %80 = arith.mulf %76, %76 : vector<8x1088xf32>
    %cst_46 = arith.constant dense<0.000000e+00> : vector<8xf32>
    %81 = vector.multi_reduction <add>, %80, %cst_46 [1] : vector<8x1088xf32> to vector<8xf32>
    %82 = vector.shape_cast %81 : vector<8xf32> to vector<8x1xf32>
    %83 = arith.addf %52, %82 : vector<8x1xf32>
    %84 = math.tanh %74 : vector<8x1088xf32>
    %85 = arith.truncf %84 : vector<8x1088xf32> to vector<8x1088xbf16>
    %c0_47 = arith.constant 0 : index
    %c1_48 = arith.constant 1 : index
    %c0_49 = arith.constant 0 : index
    %c0_50 = arith.constant 0 : index
    %86 = vector.load %arg7[%c0_47, %c1_48, %c0_49, %c0_50] : memref<1x4x8x1088xbf16, #tpu.memory_space<vmem>>, vector<1x1x8x1088xbf16>
    %87 = vector.shape_cast %86 : vector<1x1x8x1088xbf16> to vector<8x1088xbf16>
    %88 = vector.shape_cast %85 : vector<8x1088xbf16> to vector<1x1x8x1088xbf16>
    tpu.vector_store %arg7[%c0_47, %c1_48, %c0_49, %c0_50], %88 {strides = array<i32>} : memref<1x4x8x1088xbf16, #tpu.memory_space<vmem>>, vector<1x1x8x1088xbf16>,
    %cst_51 = arith.constant 0.000000e+00 : f32
    %89 = vector.broadcast %cst_51 : f32 to vector<8x1088xf32>
    %c8 = arith.constant 8 : index
    %c0_52 = arith.constant 0 : index
    %c0_53 = arith.constant 0 : index
    %90 = vector.load %arg6[%c8, %c0_52, %c0_53] : memref<16x8x16xbf16, #tpu.memory_space<vmem>>, vector<1x8x16xbf16>
    %91 = vector.shape_cast %90 : vector<1x8x16xbf16> to vector<8x16xbf16>
    %cst_54 = arith.constant dense<0.000000e+00> : vector<8x1088xf32>
    %92 = tpu.matmul %91, %21, %cst_54 {dimension_numbers = #tpu.dot_dimension_numbers<[1], [0], [0], [1], [0, 0, 1, 1], [], []>} : vector<8x16xbf16>, vector<16x1088xbf16>, vector<8x1088xf32> -> vector<8x1088xf32>
    %93 = arith.addf %89, %92 : vector<8x1088xf32>
    %c9 = arith.constant 9 : index
    %c0_55 = arith.constant 0 : index
    %c0_56 = arith.constant 0 : index
    %94 = vector.load %arg6[%c9, %c0_55, %c0_56] : memref<16x8x16xbf16, #tpu.memory_space<vmem>>, vector<1x8x16xbf16>
    %95 = vector.shape_cast %94 : vector<1x8x16xbf16> to vector<8x16xbf16>
    %cst_57 = arith.constant dense<0.000000e+00> : vector<8x1088xf32>
    %96 = tpu.matmul %95, %22, %cst_57 {dimension_numbers = #tpu.dot_dimension_numbers<[1], [0], [0], [1], [0, 0, 1, 1], [], []>} : vector<8x16xbf16>, vector<16x1088xbf16>, vector<8x1088xf32> -> vector<8x1088xf32>
    %97 = arith.addf %93, %96 : vector<8x1088xf32>
    %c10 = arith.constant 10 : index
    %c0_58 = arith.constant 0 : index
    %c0_59 = arith.constant 0 : index
    %98 = vector.load %arg6[%c10, %c0_58, %c0_59] : memref<16x8x16xbf16, #tpu.memory_space<vmem>>, vector<1x8x16xbf16>
    %99 = vector.shape_cast %98 : vector<1x8x16xbf16> to vector<8x16xbf16>
    %cst_60 = arith.constant dense<0.000000e+00> : vector<8x1088xf32>
    %100 = tpu.matmul %99, %18, %cst_60 {dimension_numbers = #tpu.dot_dimension_numbers<[1], [0], [0], [1], [0, 0, 1, 1], [], []>} : vector<8x16xbf16>, vector<16x1088xbf16>, vector<8x1088xf32> -> vector<8x1088xf32>
    %101 = arith.addf %97, %100 : vector<8x1088xf32>
    %c11 = arith.constant 11 : index
    %c0_61 = arith.constant 0 : index
    %c0_62 = arith.constant 0 : index
    %102 = vector.load %arg6[%c11, %c0_61, %c0_62] : memref<16x8x16xbf16, #tpu.memory_space<vmem>>, vector<1x8x16xbf16>
    %103 = vector.shape_cast %102 : vector<1x8x16xbf16> to vector<8x16xbf16>
    %cst_63 = arith.constant dense<0.000000e+00> : vector<8x1088xf32>
    %104 = tpu.matmul %103, %17, %cst_63 {dimension_numbers = #tpu.dot_dimension_numbers<[1], [0], [0], [1], [0, 0, 1, 1], [], []>} : vector<8x16xbf16>, vector<16x1088xbf16>, vector<8x1088xf32> -> vector<8x1088xf32>
    %105 = arith.addf %101, %104 : vector<8x1088xf32>
    %106 = vector.broadcast %24 : vector<1x1088xf32> to vector<8x1088xf32>
    %107 = arith.mulf %105, %106 : vector<8x1088xf32>
    %cst_64 = arith.constant dense<0.000000e+00> : vector<8xf32>
    %108 = vector.multi_reduction <add>, %107, %cst_64 [1] : vector<8x1088xf32> to vector<8xf32>
    %109 = vector.shape_cast %108 : vector<8xf32> to vector<8x1xf32>
    %110 = arith.addf %79, %109 : vector<8x1xf32>
    %111 = arith.mulf %107, %107 : vector<8x1088xf32>
    %cst_65 = arith.constant dense<0.000000e+00> : vector<8xf32>
    %112 = vector.multi_reduction <add>, %111, %cst_65 [1] : vector<8x1088xf32> to vector<8xf32>
    %113 = vector.shape_cast %112 : vector<8xf32> to vector<8x1xf32>
    %114 = arith.addf %83, %113 : vector<8x1xf32>
    %115 = math.tanh %105 : vector<8x1088xf32>
    %116 = arith.truncf %115 : vector<8x1088xf32> to vector<8x1088xbf16>
    %c0_66 = arith.constant 0 : index
    %c2_67 = arith.constant 2 : index
    %c0_68 = arith.constant 0 : index
    %c0_69 = arith.constant 0 : index
    %117 = vector.load %arg7[%c0_66, %c2_67, %c0_68, %c0_69] : memref<1x4x8x1088xbf16, #tpu.memory_space<vmem>>, vector<1x1x8x1088xbf16>
    %118 = vector.shape_cast %117 : vector<1x1x8x1088xbf16> to vector<8x1088xbf16>
    %119 = vector.shape_cast %116 : vector<8x1088xbf16> to vector<1x1x8x1088xbf16>
    tpu.vector_store %arg7[%c0_66, %c2_67, %c0_68, %c0_69], %119 {strides = array<i32>} : memref<1x4x8x1088xbf16, #tpu.memory_space<vmem>>, vector<1x1x8x1088xbf16>,
    %cst_70 = arith.constant 0.000000e+00 : f32
    %120 = vector.broadcast %cst_70 : f32 to vector<8x1088xf32>
    %c12 = arith.constant 12 : index
    %c0_71 = arith.constant 0 : index
    %c0_72 = arith.constant 0 : index
    %121 = vector.load %arg6[%c12, %c0_71, %c0_72] : memref<16x8x16xbf16, #tpu.memory_space<vmem>>, vector<1x8x16xbf16>
    %122 = vector.shape_cast %121 : vector<1x8x16xbf16> to vector<8x16xbf16>
    %cst_73 = arith.constant dense<0.000000e+00> : vector<8x1088xf32>
    %123 = tpu.matmul %122, %23, %cst_73 {dimension_numbers = #tpu.dot_dimension_numbers<[1], [0], [0], [1], [0, 0, 1, 1], [], []>} : vector<8x16xbf16>, vector<16x1088xbf16>, vector<8x1088xf32> -> vector<8x1088xf32>
    %124 = arith.addf %120, %123 : vector<8x1088xf32>
    %c13 = arith.constant 13 : index
    %c0_74 = arith.constant 0 : index
    %c0_75 = arith.constant 0 : index
    %125 = vector.load %arg6[%c13, %c0_74, %c0_75] : memref<16x8x16xbf16, #tpu.memory_space<vmem>>, vector<1x8x16xbf16>
    %126 = vector.shape_cast %125 : vector<1x8x16xbf16> to vector<8x16xbf16>
    %cst_76 = arith.constant dense<0.000000e+00> : vector<8x1088xf32>
    %127 = tpu.matmul %126, %21, %cst_76 {dimension_numbers = #tpu.dot_dimension_numbers<[1], [0], [0], [1], [0, 0, 1, 1], [], []>} : vector<8x16xbf16>, vector<16x1088xbf16>, vector<8x1088xf32> -> vector<8x1088xf32>
    %128 = arith.addf %124, %127 : vector<8x1088xf32>
    %c14 = arith.constant 14 : index
    %c0_77 = arith.constant 0 : index
    %c0_78 = arith.constant 0 : index
    %129 = vector.load %arg6[%c14, %c0_77, %c0_78] : memref<16x8x16xbf16, #tpu.memory_space<vmem>>, vector<1x8x16xbf16>
    %130 = vector.shape_cast %129 : vector<1x8x16xbf16> to vector<8x16xbf16>
    %cst_79 = arith.constant dense<0.000000e+00> : vector<8x1088xf32>
    %131 = tpu.matmul %130, %19, %cst_79 {dimension_numbers = #tpu.dot_dimension_numbers<[1], [0], [0], [1], [0, 0, 1, 1], [], []>} : vector<8x16xbf16>, vector<16x1088xbf16>, vector<8x1088xf32> -> vector<8x1088xf32>
    %132 = arith.addf %128, %131 : vector<8x1088xf32>
    %c15 = arith.constant 15 : index
    %c0_80 = arith.constant 0 : index
    %c0_81 = arith.constant 0 : index
    %133 = vector.load %arg6[%c15, %c0_80, %c0_81] : memref<16x8x16xbf16, #tpu.memory_space<vmem>>, vector<1x8x16xbf16>
    %134 = vector.shape_cast %133 : vector<1x8x16xbf16> to vector<8x16xbf16>
    %cst_82 = arith.constant dense<0.000000e+00> : vector<8x1088xf32>
    %135 = tpu.matmul %134, %18, %cst_82 {dimension_numbers = #tpu.dot_dimension_numbers<[1], [0], [0], [1], [0, 0, 1, 1], [], []>} : vector<8x16xbf16>, vector<16x1088xbf16>, vector<8x1088xf32> -> vector<8x1088xf32>
    %136 = arith.addf %132, %135 : vector<8x1088xf32>
    %137 = vector.broadcast %24 : vector<1x1088xf32> to vector<8x1088xf32>
    %138 = arith.mulf %136, %137 : vector<8x1088xf32>
    %cst_83 = arith.constant dense<0.000000e+00> : vector<8xf32>
    %139 = vector.multi_reduction <add>, %138, %cst_83 [1] : vector<8x1088xf32> to vector<8xf32>
    %140 = vector.shape_cast %139 : vector<8xf32> to vector<8x1xf32>
    %141 = arith.addf %110, %140 : vector<8x1xf32>
    %142 = arith.mulf %138, %138 : vector<8x1088xf32>
    %cst_84 = arith.constant dense<0.000000e+00> : vector<8xf32>
    %143 = vector.multi_reduction <add>, %142, %cst_84 [1] : vector<8x1088xf32> to vector<8xf32>
    %144 = vector.shape_cast %143 : vector<8xf32> to vector<8x1xf32>
    %145 = arith.addf %114, %144 : vector<8x1xf32>
    %146 = math.tanh %136 : vector<8x1088xf32>
    %147 = arith.truncf %146 : vector<8x1088xf32> to vector<8x1088xbf16>
    %c0_85 = arith.constant 0 : index
    %c3_86 = arith.constant 3 : index
    %c0_87 = arith.constant 0 : index
    %c0_88 = arith.constant 0 : index
    %148 = vector.load %arg7[%c0_85, %c3_86, %c0_87, %c0_88] : memref<1x4x8x1088xbf16, #tpu.memory_space<vmem>>, vector<1x1x8x1088xbf16>
    %149 = vector.shape_cast %148 : vector<1x1x8x1088xbf16> to vector<8x1088xbf16>
    %150 = vector.shape_cast %147 : vector<8x1088xbf16> to vector<1x1x8x1088xbf16>
    tpu.vector_store %arg7[%c0_85, %c3_86, %c0_87, %c0_88], %150 {strides = array<i32>} : memref<1x4x8x1088xbf16, #tpu.memory_space<vmem>>, vector<1x1x8x1088xbf16>,
    %c0_89 = arith.constant 0 : index
    %c0_90 = arith.constant 0 : index
    %c0_91 = arith.constant 0 : index
    %151 = vector.load %arg8[%c0_89, %c0_90, %c0_91] : memref<1x8x1xf32, #tpu.memory_space<vmem>>, vector<1x8x1xf32>
    %152 = vector.shape_cast %151 : vector<1x8x1xf32> to vector<8x1xf32>
    %153 = vector.shape_cast %141 : vector<8x1xf32> to vector<1x8x1xf32>
    tpu.vector_store %arg8[%c0_89, %c0_90, %c0_91], %153 {strides = array<i32>} : memref<1x8x1xf32, #tpu.memory_space<vmem>>, vector<1x8x1xf32>,
    %c0_92 = arith.constant 0 : index
    %c0_93 = arith.constant 0 : index
    %c0_94 = arith.constant 0 : index
    %154 = vector.load %arg9[%c0_92, %c0_93, %c0_94] : memref<1x8x1xf32, #tpu.memory_space<vmem>>, vector<1x8x1xf32>
    %155 = vector.shape_cast %154 : vector<1x8x1xf32> to vector<8x1xf32>
    %156 = vector.shape_cast %145 : vector<8x1xf32> to vector<1x8x1xf32>
    tpu.vector_store %arg9[%c0_92, %c0_93, %c0_94], %156 {strides = array<i32>} : memref<1x8x1xf32, #tpu.memory_space<vmem>>, vector<1x8x1xf32>,
    return
  }
  func.func @transform_0(%arg0: i32) -> (i32, i32, i32) {
    %c0_i32 = arith.constant 0 : i32
    %c0_i32_0 = arith.constant 0 : i32
    %c0_i32_1 = arith.constant 0 : i32
    return %arg0, %c0_i32, %c0_i32_0 : i32, i32, i32
  }
  func.func @transform_1(%arg0: i32) -> (i32, i32) {
    %c0_i32 = arith.constant 0 : i32
    %c0_i32_0 = arith.constant 0 : i32
    %c0_i32_1 = arith.constant 0 : i32
    return %c0_i32, %c0_i32_0 : i32, i32
  }
  func.func @transform_2(%arg0: i32) -> (i32, i32) {
    %c0_i32 = arith.constant 0 : i32
    %c0_i32_0 = arith.constant 0 : i32
    %c0_i32_1 = arith.constant 0 : i32
    return %c0_i32, %c0_i32_0 : i32, i32
  }
  func.func @transform_3(%arg0: i32) -> (i32, i32) {
    %c0_i32 = arith.constant 0 : i32
    %c0_i32_0 = arith.constant 0 : i32
    %c0_i32_1 = arith.constant 0 : i32
    return %c0_i32, %c0_i32_0 : i32, i32
  }
  func.func @transform_4(%arg0: i32) -> (i32, i32) {
    %c0_i32 = arith.constant 0 : i32
    %c0_i32_0 = arith.constant 0 : i32
    %c0_i32_1 = arith.constant 0 : i32
    return %c0_i32, %c0_i32_0 : i32, i32
  }
  func.func @transform_5(%arg0: i32) -> (i32, i32, i32) {
    %c0_i32 = arith.constant 0 : i32
    %c0_i32_0 = arith.constant 0 : i32
    %c0_i32_1 = arith.constant 0 : i32
    %c0_i32_2 = arith.constant 0 : i32
    return %c0_i32, %c0_i32_0, %c0_i32_1 : i32, i32, i32
  }
  func.func @transform_6(%arg0: i32) -> (i32, i32, i32, i32) {
    %c0_i32 = arith.constant 0 : i32
    %c0_i32_0 = arith.constant 0 : i32
    %c0_i32_1 = arith.constant 0 : i32
    %c0_i32_2 = arith.constant 0 : i32
    return %arg0, %c0_i32, %c0_i32_0, %c0_i32_1 : i32, i32, i32, i32
  }
  func.func @transform_7(%arg0: i32) -> (i32, i32, i32) {
    %c0_i32 = arith.constant 0 : i32
    %c0_i32_0 = arith.constant 0 : i32
    %c0_i32_1 = arith.constant 0 : i32
    return %arg0, %c0_i32, %c0_i32_0 : i32, i32, i32
  }
  func.func @transform_8(%arg0: i32) -> (i32, i32, i32) {
    %c0_i32 = arith.constant 0 : i32
    %c0_i32_0 = arith.constant 0 : i32
    %c0_i32_1 = arith.constant 0 : i32
    return %arg0, %c0_i32, %c0_i32_0 : i32, i32, i32
  }
}

</mosaic_0001>

<bundles_post_ra>
// kernel: generator_forward.5
= control target key start
LH: loop header
LB: loop body
LE: loop exit
PB: predicated region body
PF: predicated region fallthrough
CT: control target
= control target key end

     0   :  { %v558_v3 = vmov 0   ;;  %vm109_vm0 = vcmask 130048   ;;  %s657_s1 = inlined_call_operand.vmem [shape: bf16[16,2048], index: 1, kind: input, shape index: {}]   ;;  %s658_s0 = inlined_call_operand.vmem [shape: bf16[8,16], index: 0, kind: input, shape index: {}]   ;;  %s659_s2 = inlined_call_operand.vmem [shape: bf16[8,2048], index: 2, kind: output, shape index: {}]  }
   0x1   :  { %v13_v0 = vld [vmem:[%s657_s1] sm:$0xff]  ;;  %v14_v2 = vld [vmem:[%s657_s1 + $0x8] sm:$0xff]  ;;  %145 = vmatprep.mubr.bf16.mxu0 %v558_v3  ;;  %186 = vmatprep.mubr.bf16.mxu1 %v558_v3  ;;  %v15_v7 = vld [vmem:[%s657_s1 + $0x10] sm:$0xff] }
   0x2   :  { %v21_v1 = vld [vmem:[%s657_s1 + $0x40] sm:$0xff]  ;;  %v22_v5 = vld [vmem:[%s657_s1 + $0x48] sm:$0xff]  ;;  %v23_v10 = vld [vmem:[%s657_s1 + $0x50] sm:$0xff] }
   0x3   :  { %v518_v4 = vcombine.high %v13_v0, %v21_v1  ;;  %v517_v6 = vcombine.low %v13_v0, %v21_v1  ;;  %v520_v8 = vcombine.high %v14_v2, %v22_v5  ;;  %v519_v9 = vcombine.low %v14_v2, %v22_v5  ;;  %v16_v11 = vld [vmem:[%s657_s1 + $0x18] sm:$0xff]  ;;  %v17_v15 = vld [vmem:[%s657_s1 + $0x20] sm:$0xff]  ;;  %v18_v19 = vld [vmem:[%s657_s1 + $0x28] sm:$0xff] }
   0x4   :  { %v24_v12 = vld [vmem:[%s657_s1 + $0x58] sm:$0xff]  ;;  %v522_v13 = vcombine.high %v15_v7, %v23_v10  ;;  %v25_v16 = vld [vmem:[%s657_s1 + $0x60] sm:$0xff]  ;;  %v521_v18 = vcombine.low %v15_v7, %v23_v10  ;;  %v26_v20 = vld [vmem:[%s657_s1 + $0x68] sm:$0xff] }
   0x5   :  { %113 = vmatprep.subr.bf16.mxu0 %v518_v4  ;;  %v524_v14 = vcombine.high %v16_v11, %v24_v12  ;;  %154 = vmatprep.subr.bf16.mxu1 %v520_v8  ;;  %v12_v17 = vld [vmem:[%s658_s0] sm:$0xf]  ;;  %v523_v21 = vcombine.low %v16_v11, %v24_v12  ;;  %v526_v22 = vcombine.high %v17_v15, %v25_v16  ;;  %v19_v24 = vld [vmem:[%s657_s1 + $0x30] sm:$0xff]  ;;  %v20_v27 = vld [vmem:[%s657_s1 + $0x38] sm:$0xff] }
   0x6   :  { %114 = vmatpush1.bf16.msra.mxu0 %v517_v6  ;;  %155 = vmatpush1.bf16.msra.mxu1 %v519_v9  ;;  %v528_v23 = vcombine.high %v18_v19, %v26_v20  ;;  %v27_v25 = vld [vmem:[%s657_s1 + $0x70] sm:$0xff]  ;;  %v525_v26 = vcombine.low %v17_v15, %v25_v16  ;;  %v28_v28 = vld [vmem:[%s657_s1 + $0x78] sm:$0xff]  ;;  %v527_v29 = vcombine.low %v18_v19, %v26_v20 }
   0x7   :  { %195 = vmatprep.subr.bf16.mxu0 %v522_v13  ;;  %236 = vmatprep.subr.bf16.mxu1 %v524_v14  ;;  %v530_v30 = vcombine.high %v19_v24, %v27_v25  ;;  %v532_v31 = vcombine.high %v20_v27, %v28_v28  ;;  %v529_v32 = vcombine.low %v19_v24, %v27_v25 }
   0x8   :  { %v531_v33 = vcombine.low %v20_v27, %v28_v28 }
   0x9   :  { %533 = vmatmul.mubr.msk.bf16.vlgmr.msra.gmra.mrb[0].mxu0 %vm109_vm0, %v12_v17  ;;  %534 = vmatmul.mubr.msk.bf16.vlgmr.msra.gmra.mrb[0].mxu1 %vm109_vm0, %v12_v17 }
   0xa   :  { %196 = vmatpush1.bf16.msra.mxu0 %v521_v18  ;;  %237 = vmatpush1.bf16.msra.mxu1 %v523_v21 }
   0xb   :  { %227 = vmatprep.mubr.bf16.mxu0 %v558_v3  ;;  %268 = vmatprep.mubr.bf16.mxu1 %v558_v3 }
   0xc   :  { %277 = vmatprep.subr.bf16.mxu0 %v526_v22  ;;  %318 = vmatprep.subr.bf16.mxu1 %v528_v23 }
  0x11   :  { %535 = vmatmul.mubr.msk.bf16.vlgmr.msra.gmra.mrb[4].mxu0 %vm109_vm0, %v12_v17  ;;  %536 = vmatmul.mubr.msk.bf16.vlgmr.msra.gmra.mrb[4].mxu1 %vm109_vm0, %v12_v17 }
  0x12   :  { %278 = vmatpush1.bf16.msra.mxu0 %v525_v26  ;;  %319 = vmatpush1.bf16.msra.mxu1 %v527_v29 }
  0x13   :  { %309 = vmatprep.mubr.bf16.mxu0 %v558_v3  ;;  %350 = vmatprep.mubr.bf16.mxu1 %v558_v3 }
  0x14   :  { %359 = vmatprep.subr.bf16.mxu0 %v530_v30  ;;  %400 = vmatprep.subr.bf16.mxu1 %v532_v31 }
  0x19   :  { %537 = vmatmul.mubr.msk.bf16.vlgmr.msra.gmra.mrb[8].mxu0 %vm109_vm0, %v12_v17  ;;  %538 = vmatmul.mubr.msk.bf16.vlgmr.msra.gmra.mrb[8].mxu1 %vm109_vm0, %v12_v17 }
  0x1a   :  { %360 = vmatpush1.bf16.msra.mxu0 %v529_v32  ;;  %401 = vmatpush1.bf16.msra.mxu1 %v531_v33 }
  0x1b   :  { %391 = vmatprep.mubr.bf16.mxu0 %v558_v3  ;;  %432 = vmatprep.mubr.bf16.mxu1 %v558_v3 }
  0x21   :  { %539 = vmatmul.mubr.msk.bf16.vlgmr.msra.gmra.mrb[12].mxu0 %vm109_vm0, %v12_v17  ;;  %540 = vmatmul.mubr.msk.bf16.vlgmr.msra.gmra.mrb[12].mxu1 %vm109_vm0, %v12_v17 }
  0xdc   :  { %v147_v34 = vpop.f32.mrb[0].mxu0  ;;  %v188_v35 = vpop.f32.mrb[0].mxu1 }
  0xdd   :  { %v149_v36 = vpop.f32.mrb[1].mxu0  ;;  %v190_v38 = vpop.f32.mrb[1].mxu1 }
  0xde   :  { %v549_v37 = vpack.c.bf16 %v149_v36, %v147_v34  ;;  %v151_v39 = vpop.f32.mrb[2].mxu0  ;;  %v550_v40 = vpack.c.bf16 %v190_v38, %v188_v35  ;;  %v192_v41 = vpop.f32.mrb[2].mxu1 }
  0xdf   :  { %v152_v42 = vpop.f32.mrb[3].mxu0  ;;  %v193_v43 = vpop.f32.mrb[3].mxu1 }
  0xe0   :  { %505 = vst [vmem:[%s659_s2] sm:$0xff] %v549_v37  ;;  %506 = vst [vmem:[%s659_s2 + $0x8] sm:$0xff] %v550_v40 }
  0xe4   :  { %v229_v44 = vpop.f32.mrb[4].mxu0  ;;  %v270_v45 = vpop.f32.mrb[4].mxu1 }
  0xe5   :  { %v231_v46 = vpop.f32.mrb[5].mxu0  ;;  %v272_v48 = vpop.f32.mrb[5].mxu1 }
  0xe6   :  { %v551_v47 = vpack.c.bf16 %v231_v46, %v229_v44  ;;  %v233_v49 = vpop.f32.mrb[6].mxu0  ;;  %v552_v50 = vpack.c.bf16 %v272_v48, %v270_v45  ;;  %v274_v51 = vpop.f32.mrb[6].mxu1 }
  0xe7   :  { %v234_v52 = vpop.f32.mrb[7].mxu0  ;;  %v275_v53 = vpop.f32.mrb[7].mxu1 }
  0xe8   :  { %507 = vst [vmem:[%s659_s2 + $0x10] sm:$0xff] %v551_v47  ;;  %508 = vst [vmem:[%s659_s2 + $0x18] sm:$0xff] %v552_v50 }
  0xec   :  { %v311_v54 = vpop.f32.mrb[8].mxu0  ;;  %v352_v55 = vpop.f32.mrb[8].mxu1 }
  0xed   :  { %v313_v56 = vpop.f32.mrb[9].mxu0  ;;  %v354_v58 = vpop.f32.mrb[9].mxu1 }
  0xee   :  { %v553_v57 = vpack.c.bf16 %v313_v56, %v311_v54  ;;  %v315_v59 = vpop.f32.mrb[10].mxu0  ;;  %v554_v60 = vpack.c.bf16 %v354_v58, %v352_v55  ;;  %v356_v61 = vpop.f32.mrb[10].mxu1 }
  0xef   :  { %v316_v62 = vpop.f32.mrb[11].mxu0  ;;  %v357_v63 = vpop.f32.mrb[11].mxu1 }
  0xf0   :  { %509 = vst [vmem:[%s659_s2 + $0x20] sm:$0xff] %v553_v57  ;;  %510 = vst [vmem:[%s659_s2 + $0x28] sm:$0xff] %v554_v60 }
  0xf4   :  { %v393_v0 = vpop.f32.mrb[12].mxu0  ;;  %v434_v1 = vpop.f32.mrb[12].mxu1 }
  0xf5   :  { %v395_v2 = vpop.f32.mrb[13].mxu0  ;;  %v436_v4 = vpop.f32.mrb[13].mxu1 }
  0xf6   :  { %v555_v3 = vpack.c.bf16 %v395_v2, %v393_v0  ;;  %v397_v5 = vpop.f32.mrb[14].mxu0  ;;  %v556_v6 = vpack.c.bf16 %v436_v4, %v434_v1  ;;  %v438_v7 = vpop.f32.mrb[14].mxu1 }
  0xf7   :  { %v398_v8 = vpop.f32.mrb[15].mxu0  ;;  %v439_v9 = vpop.f32.mrb[15].mxu1 }
  0xf8   :  { %511 = vst [vmem:[%s659_s2 + $0x30] sm:$0xff] %v555_v3  ;;  %512 = vst [vmem:[%s659_s2 + $0x38] sm:$0xff] %v556_v6 }

// kernel: generator_forward.7
= control target key start
LH: loop header
LB: loop body
LE: loop exit
PB: predicated region body
PF: predicated region fallthrough
CT: control target
= control target key end

     0   :  { %s2778_s27 = smov 0   ;;  %s3238_s0 = inlined_call_operand.vmem [shape: bf16[2,64,102], index: 0, kind: input, shape index: {}]   ;;  %s3239_s1 = inlined_call_operand.vmem [shape: f32[64,1], index: 1, kind: input, shape index: {}]   ;;  %s3240_s2 = inlined_call_operand.vmem [shape: f32[64,1], index: 2, kind: input, shape index: {}]   ;;  %s3241_s3 = inlined_call_operand.vmem [shape: f32[1,102], index: 3, kind: input, shape index: {}]   ;;  %s3242_s4 = inlined_call_operand.vmem [shape: f32[1,80], index: 4, kind: input, shape index: {}]   ;;  %s3243_s5 = inlined_call_operand.vmem [shape: bf16[16,32,64], index: 5, kind: input, shape index: {}]   ;;  %s3244_s6 = inlined_call_operand.vmem [shape: bf16[2,4,32,80], index: 6, kind: output, shape index: {0}]   ;;  %s3245_s7 = inlined_call_operand.vmem [shape: f32[2,32,1], index: 7, kind: output, shape index: {1}]   ;;  %s3246_s8 = inlined_call_operand.vmem [shape: f32[2,32,1], index: 8, kind: output, shape index: {2}]  }
   0x1 LB: > { %s2121_s28 = sadd.s32 4294967295, %s2722_s27   ;;  %p2125_p0 = scmp.ge.s32.totalorder %s2722_s27, 1  ;;  %s2722_s27 = sphi %s2778_s27, %s19_s27  }
   0x2   : > { %p267_p1 = scmp.lt.s32.totalorder %s2722_s27, 3 }
   0x4   : > { %p268_p2 = pnand %p2125_p0, %p267_p1 }
   0x5   : > { %v404_v0 = vld [vmem:[%s3240_s2] sm:$0xff] (!%p268_p2)  ;;  %v2724_v2 = vmov (!%p268_p2), 0   ;;  %v405_v3 = vld [vmem:[%s3240_s2 + $0x8] sm:$0xff] (!%p268_p2)  ;;  %v351_v5 = vld [vmem:[%s3239_s1 + $0x18] sm:$0xff] (!%p268_p2)  ;;  %p311_p3 = scmp.lt.s32.totalorder (!%p268_p2), %s2121_s28, 1  ;;  %s2725_s25 = smov (!%p268_p2), 117  }
   0x6   : > { %271 = sbr.rel (%p268_p2) target bundleno = 792 (0x318), region = 44  ;;  %v348_v1 = vld [vmem:[%s3239_s1] sm:$0xff] (!%p268_p2)  ;;  %2683 = vset.pattern.permute.xlu1 (!%p268_p2), %v2724_v2  ;;  %2682 = vset.pattern.permute.xlu0 (!%p268_p2), %v2724_v2  ;;  %v349_v4 = vld [vmem:[%s3239_s1 + $0x8] sm:$0xff] (!%p268_p2)  ;;  %v350_v6 = vld [vmem:[%s3239_s1 + $0x10] sm:$0xff] (!%p268_p2)  ;;  %s2726_s26 = smov (!%p268_p2), 118   ;;  %vm523_vm0 = vcmask (!%p268_p2), 523264  }
   0x7   : > { %414 = vperm.xlu1 (!%p268_p2), %2683, %v404_v0   ;;  %358 = vperm.xlu0 (!%p268_p2), %2682, %v348_v1   ;;  %v407_v7 = vld [vmem:[%s3240_s2 + $0x18] sm:$0xff] (!%p268_p2)  ;;  %v406_v8 = vld [vmem:[%s3240_s2 + $0x10] sm:$0xff] (!%p268_p2)  ;;  %v353_v9 = vld [vmem:[%s3239_s1 + $0x28] sm:$0xff] (!%p268_p2)  ;;  %s2727_s11 = smov (!%p268_p2), 116   ;;  %s2728_s12 = smov (!%p268_p2), 126   ;;  %vm879_vm1 = vcmask (!%p268_p2), 650240  }
   0x8   : > { %v352_v10 = vld [vmem:[%s3239_s1 + $0x20] sm:$0xff] (!%p268_p2)  ;;  %v409_v11 = vld [vmem:[%s3240_s2 + $0x28] sm:$0xff] (!%p268_p2)  ;;  %v355_v13 = vld [vmem:[%s3239_s1 + $0x38] sm:$0xff] (!%p268_p2)  ;;  %s2729_s13 = smov (!%p268_p2), 127   ;;  %s2730_s14 = smov (!%p268_p2), 107   ;;  %vm826_vm2 = vcmask (!%p268_p2), 654336  }
   0x9   : > { %v408_v12 = vld [vmem:[%s3240_s2 + $0x20] sm:$0xff] (!%p268_p2)  ;;  %v354_v14 = vld [vmem:[%s3239_s1 + $0x30] sm:$0xff] (!%p268_p2)  ;;  %v411_v15 = vld [vmem:[%s3240_s2 + $0x38] sm:$0xff] (!%p268_p2)  ;;  %s2731_s15 = smov (!%p268_p2), 108   ;;  %s2732_s16 = smov (!%p268_p2), 106   ;;  %vm1991_vm3 = vcmask (!%p268_p2), 7168  }
   0xa   : > { %v410_v16 = vld [vmem:[%s3240_s2 + $0x30] sm:$0xff] (!%p268_p2)  ;;  %v2134_v32 = vld [vmem:[%s3241_s3] ss:$0 sm:$0xff] (!%p268_p2) }
   0xb   : > { %419 = vperm.xlu1 (!%p268_p2), %2683, %v405_v3   ;;  %363 = vperm.xlu0 (!%p268_p2), %2682, %v349_v4  }
   0xd   : > { %s3248_s28 = smov (!%p311_p3, %s2121_s28), 1 }
   0xe   : > { %s2841_s19 = sshll.u32 %s3248_s28, 5  ;;  %s2291_s21 = sshll.u32 %s3248_s28, 6 }
   0xf   : > { %373 = vperm.xlu1 %2683, %v351_v5   ;;  %368 = vperm.xlu0 %2682, %v350_v6   ;;  %s2847_s22 = scalar_lea.vmem %s3238_s0, %s2841_s19  ;;  %v2684_v6 = vld [vmem:[%s3243_s5 + $0x10] sm:$0xff]   ;;  %s325_s30 = scalar_lea.vmem %s3245_s7, %s2841_s19 }
  0x10   : > { %v2311_v17 = vld [vmem:[%s2847_s22] sm:$0xff]   ;;  %v2326_v26 = vld [vmem:[%s2847_s22 + $0x8] sm:$0xff]   ;;  %v2327_v42 = vld [vmem:[%s2847_s22 + $0x10] sm:$0xff]   ;;  %2433 = vmatprep.mubr.msk.bf16.mxu0 %vm523_vm0, %v2684_v6 }
  0x11   : > { %v2312_v18 = vunpack.c.l.bf16 %v2311_v17  ;;  %v2313_v22 = vunpack.c.h.bf16 %v2311_v17  ;;  %v2317_v30 = vunpack.c.h.bf16 %v2326_v26  ;;  %v2316_v31 = vunpack.c.l.bf16 %v2326_v26  ;;  %v2328_v59 = vld [vmem:[%s2847_s22 + $0x18] sm:$0xff]  }
  0x12   : > { %v2321_v48 = vunpack.c.h.bf16 %v2327_v42  ;;  %v2320_v49 = vunpack.c.l.bf16 %v2327_v42  ;;  %v2325_v0 = vunpack.c.h.bf16 %v2328_v59  ;;  %v2324_v1 = vunpack.c.l.bf16 %v2328_v59  ;;  %v2692_v42 = vld [vmem:[%s3243_s5 + $0x20] sm:$0xff]   ;;  %v2701_v59 = vld [vmem:[%s3243_s5 + $0xd0] sm:$0xff]  }
  0x13   : > { %429 = vperm.xlu1 %2683, %v407_v7   ;;  %424 = vperm.xlu0 %2682, %v406_v8   ;;  %v2685_v7 = vld [vmem:[%s3243_s5 + $0x50] sm:$0xff]  }
  0x14   : > { %2481 = vmatprep.mubr.msk.bf16.mxu1 %vm523_vm0, %v2685_v7 }
  0x17   : > { %383 = vperm.xlu1 %2683, %v353_v9   ;;  %378 = vperm.xlu0 %2682, %v352_v10  }
  0x1b   : > { %439 = vperm.xlu1 %2683, %v409_v11   ;;  %434 = vperm.xlu0 %2682, %v408_v12  }
  0x1f   : > { %393 = vperm.xlu1 %2683, %v355_v13   ;;  %388 = vperm.xlu0 %2682, %v354_v14  }
  0x23   : > { %449 = vperm.xlu1 %2683, %v411_v15   ;;  %444 = vperm.xlu0 %2682, %v410_v16  }
  0x86   : > { %v415_v19 = vpop.permute.xlu1 %414  ;;  %v359_v20 = vpop.permute.xlu0 %358 }
  0x87   : > { %v396_v21 = vmul.f32 %v2312_v18, %v359_v20 }
  0x89   : > { %v452_v23 = vadd.f32 %v415_v19, %v396_v21 }
  0x8a   : > { %v420_v24 = vpop.permute.xlu1 %419  ;;  %v364_v25 = vpop.permute.xlu0 %363 }
  0x8b   : > { %v397_v27 = vmul.f32 %v2313_v22, %v364_v25  ;;  %v460_v28 = vmax.f32 %v452_v23, 0.0 }
  0x8d   : > { %v453_v29 = vadd.f32 %v420_v24, %v397_v27  ;;  %v475_v36 = vmul.f32 %v2134_v32, %v460_v28  ;;  %v2686_v28 = vld [vmem:[%s3243_s5 + $0x18] sm:$0xff]  }
  0x8e   : > { %v374_v33 = vpop.permute.xlu1 %373  ;;  %v369_v34 = vpop.permute.xlu0 %368 }
  0x8f   : > { %v461_v35 = vmax.f32 %v453_v29, 0.0  ;;  %v399_v38 = vmul.f32 %v2317_v30, %v374_v33  ;;  %v398_v39 = vmul.f32 %v2316_v31, %v369_v34  ;;  %v2687_v29 = vld [vmem:[%s3243_s5 + $0x58] sm:$0xff]   ;;  %v2689_v33 = vld [vmem:[%s3243_s5 + $0x40] sm:$0xff]  }
  0x91   : > { %v476_v37 = vmul.f32 %v2134_v32, %v461_v35 }
  0x92   : > { %v430_v40 = vpop.permute.xlu1 %429  ;;  %v425_v41 = vpop.permute.xlu0 %424 }
  0x93   : > { %v2855_v43 = vpack.c.bf16 %v476_v37, %v475_v36  ;;  %v455_v44 = vadd.f32 %v430_v40, %v399_v38  ;;  %v454_v45 = vadd.f32 %v425_v41, %v398_v39  ;;  %v2690_v38 = vld [vmem:[%s3243_s5 + $0x8] sm:$0xff]  }
  0x94   : > { %v2691_v40 = vld [vmem:[%s3243_s5 + $0x48] sm:$0xff]  }
  0x95   : > { %v463_v46 = vmax.f32 %v455_v44, 0.0  ;;  %v462_v47 = vmax.f32 %v454_v45, 0.0  ;;  %589 = vrot.lane.b32.xlu1 %v2855_v43, %s2725_s25  ;;  %511 = vrot.lane.b32.xlu0 %v2855_v43, %s2726_s26  ;;  %v2693_v44 = vld [vmem:[%s3243_s5 + $0x60] sm:$0xff]  }
  0x96   : > { %v384_v50 = vpop.permute.xlu1 %383  ;;  %v379_v51 = vpop.permute.xlu0 %378 }
  0x97   : > { %v478_v52 = vmul.f32 %v2134_v32, %v463_v46  ;;  %v477_v53 = vmul.f32 %v2134_v32, %v462_v47  ;;  %v401_v55 = vmul.f32 %v2321_v48, %v384_v50  ;;  %v400_v56 = vmul.f32 %v2320_v49, %v379_v51  ;;  %v2694_v49 = vld [vmem:[%s3243_s5 + $0x28] sm:$0xff]   ;;  %v2696_v51 = vld [vmem:[%s3243_s5 + $0x30] sm:$0xff]  }
  0x98   : > { %v2695_v50 = vld [vmem:[%s3243_s5 + $0x68] sm:$0xff]  }
  0x99   : > { %v2861_v54 = vpack.c.bf16 %v478_v52, %v477_v53  ;;  %v2697_v52 = vld [vmem:[%s3243_s5 + $0x70] sm:$0xff]  }
  0x9a   : > { %v440_v57 = vpop.permute.xlu1 %439  ;;  %v435_v58 = vpop.permute.xlu0 %434 }
  0x9b   : > { %v457_v60 = vadd.f32 %v440_v57, %v401_v55  ;;  %v456_v61 = vadd.f32 %v435_v58, %v400_v56  ;;  %591 = vrot.lane.b32.xlu1 %v2861_v54, %s2725_s25  ;;  %513 = vrot.lane.b32.xlu0 %v2861_v54, %s2726_s26  ;;  %v2698_v56 = vld [vmem:[%s3243_s5 + $0x38] sm:$0xff]   ;;  %v2700_v58 = vld [vmem:[%s3243_s5 + $0x90] sm:$0xff]  }
  0x9d   : > { %v465_v62 = vmax.f32 %v457_v60, 0.0  ;;  %v464_v63 = vmax.f32 %v456_v61, 0.0 }
  0x9e   : > { %v394_v2 = vpop.permute.xlu1 %393  ;;  %v389_v3 = vpop.permute.xlu0 %388 }
  0x9f   : > { %v480_v4 = vmul.f32 %v2134_v32, %v465_v62  ;;  %v479_v5 = vmul.f32 %v2134_v32, %v464_v63  ;;  %v403_v9 = vmul.f32 %v2325_v0, %v394_v2  ;;  %v402_v10 = vmul.f32 %v2324_v1, %v389_v3  ;;  %v2702_v0 = vld [vmem:[%s3243_s5 + $0x98] sm:$0xff]   ;;  %v2704_v3 = vld [vmem:[%s3243_s5 + $0x80] sm:$0xff]  }
  0xa0   : > { %v2703_v1 = vld [vmem:[%s3243_s5 + $0xd8] sm:$0xff]  }
  0xa1   : > { %v2874_v8 = vpack.c.bf16 %v480_v4, %v479_v5  ;;  %v2705_v4 = vld [vmem:[%s3243_s5 + $0xc0] sm:$0xff]  }
  0xa2   : > { %v450_v11 = vpop.permute.xlu1 %449  ;;  %v445_v12 = vpop.permute.xlu0 %444 }
  0xa3   : > { %v459_v13 = vadd.f32 %v450_v11, %v403_v9  ;;  %v458_v14 = vadd.f32 %v445_v12, %v402_v10  ;;  %593 = vrot.lane.b32.xlu1 %v2874_v8, %s2725_s25  ;;  %515 = vrot.lane.b32.xlu0 %v2874_v8, %s2726_s26  ;;  %v2707_v9 = vld [vmem:[%s3243_s5 + $0xc8] sm:$0xff]   ;;  %v2708_v10 = vld [vmem:[%s3243_s5 + $0xa0] sm:$0xff]  }
  0xa4   : > { %v2709_v11 = vld [vmem:[%s3243_s5 + $0xe0] sm:$0xff]   ;;  %v2710_v12 = vld [vmem:[%s3243_s5 + $0xa8] sm:$0xff]  }
  0xa5   : > { %v467_v15 = vmax.f32 %v459_v13, 0.0  ;;  %v466_v16 = vmax.f32 %v458_v14, 0.0  ;;  %v2711_v13 = vld [vmem:[%s3243_s5 + $0xe8] sm:$0xff]   ;;  %v2712_v14 = vld [vmem:[%s3243_s5 + $0xb0] sm:$0xff]  }
  0xa7   : > { %v482_v17 = vmul.f32 %v2134_v32, %v467_v15  ;;  %v481_v18 = vmul.f32 %v2134_v32, %v466_v16  ;;  %v2688_v32 = vld [vmem:[%s3243_s5] sm:$0xff]   ;;  %v2713_v15 = vld [vmem:[%s3243_s5 + $0xf0] sm:$0xff]   ;;  %v2714_v16 = vld [vmem:[%s3243_s5 + $0xb8] sm:$0xff]  }
  0xa9   : > { %v2882_v19 = vpack.c.bf16 %v482_v17, %v481_v18  ;;  %v2715_v17 = vld [vmem:[%s3243_s5 + $0xf8] sm:$0xff]   ;;  %v3132_v18 = vld [vmem:[%s3242_s4] ss:$0 sm:$0xff] }
  0xab   : > { %595 = vrot.lane.b32.xlu1 %v2882_v19, %s2725_s25  ;;  %517 = vrot.lane.b32.xlu0 %v2882_v19, %s2726_s26  ;;  %s3137_s26 = scalar_lea.vmem %s3244_s6, %s2291_s21 }
  0xaf   : > { %971 = vrot.lane.b32.xlu1 %v2861_v54, %s2727_s11  ;;  %969 = vrot.lane.b32.xlu0 %v2855_v43, %s2727_s11 }
  0xb3   : > { %975 = vrot.lane.b32.xlu1 %v2882_v19, %s2727_s11  ;;  %973 = vrot.lane.b32.xlu0 %v2874_v8, %s2727_s11  ;;  %s330_s11 = scalar_lea.vmem %s3246_s8, %s2841_s19 }
  0xb7   : > { %1051 = vrot.lane.b32.xlu1 %v2855_v43, %s2728_s12  ;;  %671 = vrot.lane.b32.xlu0 %v2855_v43, %s2729_s13 }
  0xbb   : > { %1053 = vrot.lane.b32.xlu1 %v2861_v54, %s2728_s12  ;;  %673 = vrot.lane.b32.xlu0 %v2861_v54, %s2729_s13 }
  0xbf   : > { %1055 = vrot.lane.b32.xlu1 %v2874_v8, %s2728_s12  ;;  %675 = vrot.lane.b32.xlu0 %v2874_v8, %s2729_s13 }
  0xc3   : > { %1057 = vrot.lane.b32.xlu1 %v2882_v19, %s2728_s12  ;;  %677 = vrot.lane.b32.xlu0 %v2882_v19, %s2729_s13 }
  0xc7   : > { %1354 = vrot.lane.b32.xlu1 %v2855_v43, %s2730_s14  ;;  %1277 = vrot.lane.b32.xlu0 %v2855_v43, %s2731_s15 }
  0xcb   : > { %1356 = vrot.lane.b32.xlu1 %v2861_v54, %s2730_s14  ;;  %1279 = vrot.lane.b32.xlu0 %v2861_v54, %s2731_s15 }
  0xcf   : > { %1358 = vrot.lane.b32.xlu1 %v2874_v8, %s2730_s14  ;;  %1281 = vrot.lane.b32.xlu0 %v2874_v8, %s2731_s15 }
  0xd3   : > { %1360 = vrot.lane.b32.xlu1 %v2882_v19, %s2730_s14  ;;  %1283 = vrot.lane.b32.xlu0 %v2882_v19, %s2731_s15 }
  0xd7   : > { %1717 = vrot.lane.b32.xlu1 %v2861_v54, %s2732_s16  ;;  %1715 = vrot.lane.b32.xlu0 %v2855_v43, %s2732_s16 }
  0xdb   : > { %1721 = vrot.lane.b32.xlu1 %v2882_v19, %s2732_s16  ;;  %1719 = vrot.lane.b32.xlu0 %v2874_v8, %s2732_s16 }
 0x107   : > { %v2912_v20 = vpop.permute.xlu1 %589  ;;  %v2914_v21 = vpop.permute.xlu0 %511 }
 0x108   : > { %2425 = vmatprep.subr.bf16.mxu0 %v2914_v21  ;;  %2473 = vmatprep.subr.bf16.mxu1 %v2912_v20 }
 0x109   : > { %2426 = vmatpush3.bf16.msra.mxu0 %v2914_v21  ;;  %2474 = vmatpush3.bf16.msra.mxu1 %v2912_v20 }
 0x10d   : > { %v2920_v22 = vpop.permute.xlu1 %591  ;;  %v2922_v23 = vpop.permute.xlu0 %513 }
 0x10e   : > { %2427 = vmatprep.subr.bf16.mxu0 %v2922_v23  ;;  %2475 = vmatprep.subr.bf16.mxu1 %v2920_v22 }
 0x10f   : > { %2428 = vmatpush3.bf16.msra.mxu0 %v2922_v23  ;;  %2476 = vmatpush3.bf16.msra.mxu1 %v2920_v22 }
 0x115   : > { %v2928_v24 = vpop.permute.xlu1 %593  ;;  %v2930_v25 = vpop.permute.xlu0 %515 }
 0x116   : > { %2429 = vmatprep.subr.bf16.mxu0 %v2930_v25  ;;  %2477 = vmatprep.subr.bf16.mxu1 %v2928_v24 }
 0x117   : > { %2430 = vmatpush3.bf16.msra.mxu0 %v2930_v25  ;;  %2478 = vmatpush3.bf16.msra.mxu1 %v2928_v24 }
 0x11d   : > { %v2936_v26 = vpop.permute.xlu1 %595  ;;  %v2938_v27 = vpop.permute.xlu0 %517 }
 0x11e   : > { %2431 = vmatprep.subr.bf16.mxu0 %v2938_v27  ;;  %2479 = vmatprep.subr.bf16.mxu1 %v2936_v26 }
 0x11f   : > { %2432 = vmatpush3.bf16.msra.mxu0 %v2938_v27  ;;  %2480 = vmatpush3.bf16.msra.mxu1 %v2936_v26 }
 0x120   : > { %2437 = vmatprep.subr.bf16.mxu0 %v2912_v20 }
 0x121   : > { %v2951_v30 = vpop.permute.xlu1 %971  ;;  %v2953_v31 = vpop.permute.xlu0 %969 }
 0x122   : > { %2485 = vmatprep.subr.bf16.mxu1 %v2953_v31  ;;  %2434 = vmatmul.mubr.msk.bf16.vlgmr.msra.gmra.mrb[0].mxu0 %vm523_vm0, %v2686_v28 }
 0x123   : > { %2438 = vmatpush3.bf16.msra.mxu0 %v2912_v20  ;;  %2482 = vmatmul.mubr.msk.bf16.vlgmr.msra.gmra.mrb[0].mxu1 %vm523_vm0, %v2687_v29 }
 0x124   : > { %2486 = vmatpush3.bf16.msra.mxu1 %v2953_v31  ;;  %2439 = vmatprep.subr.bf16.mxu0 %v2920_v22 }
 0x125   : > { %2487 = vmatprep.subr.bf16.mxu1 %v2951_v30  ;;  %v2968_v34 = vpop.permute.xlu1 %975  ;;  %v2970_v35 = vpop.permute.xlu0 %973  ;;  %2445 = vmatprep.mubr.msk.bf16.mxu0 %vm523_vm0, %v2688_v32 }
 0x126   : > { %2493 = vmatprep.mubr.msk.bf16.mxu1 %vm523_vm0, %v2689_v33 }
 0x127   : > { %2440 = vmatpush3.bf16.msra.mxu0 %v2920_v22 }
 0x128   : > { %2488 = vmatpush3.bf16.msra.mxu1 %v2951_v30  ;;  %2441 = vmatprep.subr.bf16.mxu0 %v2928_v24 }
 0x129   : > { %2489 = vmatprep.subr.bf16.mxu1 %v2970_v35  ;;  %v672_v36 = vpop.permute.xlu0 %671  ;;  %v1052_v37 = vpop.permute.xlu1 %1051 }
 0x12b   : > { %2442 = vmatpush3.bf16.msra.mxu0 %v2928_v24 }
 0x12c   : > { %2490 = vmatpush3.bf16.msra.mxu1 %v2970_v35  ;;  %2443 = vmatprep.subr.bf16.mxu0 %v2936_v26 }
 0x12d   : > { %2491 = vmatprep.subr.bf16.mxu1 %v2968_v34  ;;  %v674_v39 = vpop.permute.xlu0 %673  ;;  %v1054_v41 = vpop.permute.xlu1 %1053 }
 0x12f   : > { %2444 = vmatpush3.bf16.msra.mxu0 %v2936_v26 }
 0x130   : > { %2492 = vmatpush3.bf16.msra.mxu1 %v2968_v34  ;;  %2449 = vmatprep.subr.bf16.mxu0 %v672_v36 }
 0x131   : > { %2497 = vmatprep.subr.bf16.mxu1 %v1052_v37  ;;  %v676_v45 = vpop.permute.xlu0 %675  ;;  %v1056_v46 = vpop.permute.xlu1 %1055 }
 0x132   : > { %2446 = vmatmul.mubr.msk.bf16.vlgmr.msra.gmra.mrb[0].mxu0 %vm523_vm0, %v2690_v38 }
 0x133   : > { %2450 = vmatpush3.bf16.msra.mxu0 %v672_v36  ;;  %2494 = vmatmul.mubr.msk.bf16.vlgmr.msra.gmra.mrb[0].mxu1 %vm523_vm0, %v2691_v40 }
 0x134   : > { %2498 = vmatpush3.bf16.msra.mxu1 %v1052_v37  ;;  %2451 = vmatprep.subr.bf16.mxu0 %v674_v39 }
 0x135   : > { %2499 = vmatprep.subr.bf16.mxu1 %v1054_v41  ;;  %2457 = vmatprep.mubr.msk.bf16.mxu0 %vm523_vm0, %v2692_v42  ;;  %v678_v47 = vpop.permute.xlu0 %677  ;;  %v1058_v48 = vpop.permute.xlu1 %1057 }
 0x136   : > { %2505 = vmatprep.mubr.msk.bf16.mxu1 %vm523_vm0, %v2693_v44 }
 0x137   : > { %2452 = vmatpush3.bf16.msra.mxu0 %v674_v39 }
 0x138   : > { %2500 = vmatpush3.bf16.msra.mxu1 %v1054_v41  ;;  %2453 = vmatprep.subr.bf16.mxu0 %v676_v45 }
 0x139   : > { %2501 = vmatprep.subr.bf16.mxu1 %v1056_v46  ;;  %v1278_v53 = vpop.permute.xlu0 %1277  ;;  %v1355_v55 = vpop.permute.xlu1 %1354 }
 0x13b   : > { %2454 = vmatpush3.bf16.msra.mxu0 %v676_v45 }
 0x13c   : > { %2502 = vmatpush3.bf16.msra.mxu1 %v1056_v46  ;;  %2455 = vmatprep.subr.bf16.mxu0 %v678_v47 }
 0x13d   : > { %2503 = vmatprep.subr.bf16.mxu1 %v1058_v48  ;;  %v1357_v57 = vpop.permute.xlu1 %1356 }
 0x13f   : > { %2456 = vmatpush3.bf16.msra.mxu0 %v678_v47 }
 0x140   : > { %2504 = vmatpush3.bf16.msra.mxu1 %v1058_v48  ;;  %2461 = vmatprep.subr.bf16.mxu0 %v2855_v43 }
 0x141   : > { %2509 = vmatprep.subr.bf16.mxu1 %v672_v36  ;;  %v1359_v61 = vpop.permute.xlu1 %1358 }
 0x142   : > { %2458 = vmatmul.mubr.msk.bf16.vlgmr.msra.gmra.mrb[0].mxu0 %vm523_vm0, %v2694_v49 }
 0x143   : > { %2462 = vmatpush3.bf16.msra.mxu0 %v2855_v43  ;;  %2506 = vmatmul.mubr.msk.bf16.vlgmr.msra.gmra.mrb[0].mxu1 %vm523_vm0, %v2695_v50  ;;  %v1280_v43 = vpop.permute.xlu0 %1279 }
 0x144   : > { %2510 = vmatpush3.bf16.msra.mxu1 %v672_v36  ;;  %2463 = vmatprep.subr.bf16.mxu0 %v2861_v54 }
 0x145   : > { %2511 = vmatprep.subr.bf16.mxu1 %v674_v39  ;;  %2469 = vmatprep.mubr.msk.bf16.mxu0 %vm523_vm0, %v2696_v51  ;;  %v1361_v63 = vpop.permute.xlu1 %1360 }
 0x146   : > { %2517 = vmatprep.mubr.msk.bf16.mxu1 %vm523_vm0, %v2697_v52 }
 0x147   : > { %2464 = vmatpush3.bf16.msra.mxu0 %v2861_v54  ;;  %v2699_v54 = vld [vmem:[%s3243_s5 + $0x78] sm:$0xff]   ;;  %v1282_v60 = vpop.permute.xlu0 %1281 }
 0x148   : > { %2512 = vmatpush3.bf16.msra.mxu1 %v674_v39  ;;  %2465 = vmatprep.subr.bf16.mxu0 %v2874_v8 }
 0x149   : > { %2513 = vmatprep.subr.bf16.mxu1 %v676_v45  ;;  %v1718_v5 = vpop.permute.xlu1 %1717 }
 0x14b   : > { %2466 = vmatpush3.bf16.msra.mxu0 %v2874_v8  ;;  %v1284_v62 = vpop.permute.xlu0 %1283  ;;  %v2706_v8 = vld [vmem:[%s3243_s5 + $0x88] sm:$0xff]  }
 0x14c   : > { %2514 = vmatpush3.bf16.msra.mxu1 %v676_v45  ;;  %2467 = vmatprep.subr.bf16.mxu0 %v2882_v19 }
 0x14d   : > { %2515 = vmatprep.subr.bf16.mxu1 %v678_v47  ;;  %v1722_v7 = vpop.permute.xlu1 %1721 }
 0x14f   : > { %2468 = vmatpush3.bf16.msra.mxu0 %v2882_v19  ;;  %v1716_v2 = vpop.permute.xlu0 %1715 }
 0x150   : > { %2516 = vmatpush3.bf16.msra.mxu1 %v678_v47  ;;  %2521 = vmatprep.subr.bf16.mxu0 %v1278_v53 }
 0x151   : > { %2569 = vmatprep.subr.bf16.mxu1 %v1355_v55 }
 0x152   : > { %2470 = vmatmul.mubr.msk.bf16.vlgmr.msra.gmra.mrb[0].mxu0 %vm523_vm0, %v2698_v56 }
 0x153   : > { %2518 = vmatmul.mubr.msk.bf16.vlgmr.msra.gmra.mrb[0].mxu1 %vm523_vm0, %v2699_v54  ;;  %2522 = vmatpush3.bf16.msra.mxu0 %v1278_v53  ;;  %v1720_v6 = vpop.permute.xlu0 %1719 }
 0x154   : > { %2570 = vmatpush3.bf16.msra.mxu1 %v1355_v55  ;;  %2523 = vmatprep.subr.bf16.mxu0 %v1280_v43 }
 0x155   : > { %2571 = vmatprep.subr.bf16.mxu1 %v1357_v57  ;;  %2529 = vmatprep.mubr.msk.bf16.mxu0 %vm523_vm0, %v2700_v58 }
 0x156   : > { %2577 = vmatprep.mubr.msk.bf16.mxu1 %vm523_vm0, %v2701_v59 }
 0x157   : > { %2524 = vmatpush3.bf16.msra.mxu0 %v1280_v43 }
 0x158   : > { %2572 = vmatpush3.bf16.msra.mxu1 %v1357_v57  ;;  %2525 = vmatprep.subr.bf16.mxu0 %v1282_v60 }
 0x159   : > { %2573 = vmatprep.subr.bf16.mxu1 %v1359_v61 }
 0x15b   : > { %2526 = vmatpush3.bf16.msra.mxu0 %v1282_v60 }
 0x15c   : > { %2574 = vmatpush3.bf16.msra.mxu1 %v1359_v61  ;;  %2527 = vmatprep.subr.bf16.mxu0 %v1284_v62 }
 0x15d   : > { %2575 = vmatprep.subr.bf16.mxu1 %v1361_v63 }
 0x15f   : > { %2528 = vmatpush3.bf16.msra.mxu0 %v1284_v62 }
 0x160   : > { %2576 = vmatpush3.bf16.msra.mxu1 %v1361_v63  ;;  %2533 = vmatprep.subr.bf16.mxu0 %v1355_v55 }
 0x161   : > { %2581 = vmatprep.subr.bf16.mxu1 %v1716_v2 }
 0x162   : > { %2530 = vmatmul.mubr.msk.bf16.vlgmr.msra.gmra.mrb[4].mxu0 %vm523_vm0, %v2702_v0 }
 0x163   : > { %2534 = vmatpush3.bf16.msra.mxu0 %v1355_v55  ;;  %2578 = vmatmul.mubr.msk.bf16.vlgmr.msra.gmra.mrb[4].mxu1 %vm523_vm0, %v2703_v1 }
 0x164   : > { %2582 = vmatpush3.bf16.msra.mxu1 %v1716_v2  ;;  %2535 = vmatprep.subr.bf16.mxu0 %v1357_v57 }
 0x165   : > { %2583 = vmatprep.subr.bf16.mxu1 %v1718_v5  ;;  %2541 = vmatprep.mubr.msk.bf16.mxu0 %vm523_vm0, %v2704_v3 }
 0x166   : > { %2589 = vmatprep.mubr.msk.bf16.mxu1 %vm523_vm0, %v2705_v4 }
 0x167   : > { %2536 = vmatpush3.bf16.msra.mxu0 %v1357_v57 }
 0x168   : > { %2584 = vmatpush3.bf16.msra.mxu1 %v1718_v5  ;;  %2537 = vmatprep.subr.bf16.mxu0 %v1359_v61 }
 0x169   : > { %2585 = vmatprep.subr.bf16.mxu1 %v1720_v6 }
 0x16b   : > { %2538 = vmatpush3.bf16.msra.mxu0 %v1359_v61 }
 0x16c   : > { %2586 = vmatpush3.bf16.msra.mxu1 %v1720_v6  ;;  %2539 = vmatprep.subr.bf16.mxu0 %v1361_v63 }
 0x16d   : > { %2587 = vmatprep.subr.bf16.mxu1 %v1722_v7 }
 0x16f   : > { %2540 = vmatpush3.bf16.msra.mxu0 %v1361_v63 }
 0x170   : > { %2588 = vmatpush3.bf16.msra.mxu1 %v1722_v7  ;;  %2545 = vmatprep.subr.bf16.mxu0 %v2912_v20 }
 0x171   : > { %2593 = vmatprep.subr.bf16.mxu1 %v2953_v31 }
 0x172   : > { %2542 = vmatmul.mubr.msk.bf16.vlgmr.msra.gmra.mrb[4].mxu0 %vm523_vm0, %v2706_v8 }
 0x173   : > { %2546 = vmatpush3.bf16.msra.mxu0 %v2912_v20  ;;  %2590 = vmatmul.mubr.msk.bf16.vlgmr.msra.gmra.mrb[4].mxu1 %vm523_vm0, %v2707_v9 }
 0x174   : > { %2594 = vmatpush3.bf16.msra.mxu1 %v2953_v31  ;;  %2547 = vmatprep.subr.bf16.mxu0 %v2920_v22 }
 0x175   : > { %2595 = vmatprep.subr.bf16.mxu1 %v2951_v30  ;;  %2553 = vmatprep.mubr.msk.bf16.mxu0 %vm523_vm0, %v2708_v10 }
 0x176   : > { %2601 = vmatprep.mubr.msk.bf16.mxu1 %vm523_vm0, %v2709_v11 }
 0x177   : > { %2548 = vmatpush3.bf16.msra.mxu0 %v2920_v22 }
 0x178   : > { %2596 = vmatpush3.bf16.msra.mxu1 %v2951_v30  ;;  %2549 = vmatprep.subr.bf16.mxu0 %v2928_v24 }
 0x179   : > { %2597 = vmatprep.subr.bf16.mxu1 %v2970_v35 }
 0x17b   : > { %2550 = vmatpush3.bf16.msra.mxu0 %v2928_v24 }
 0x17c   : > { %2598 = vmatpush3.bf16.msra.mxu1 %v2970_v35  ;;  %2551 = vmatprep.subr.bf16.mxu0 %v2936_v26 }
 0x17d   : > { %2599 = vmatprep.subr.bf16.mxu1 %v2968_v34 }
 0x17f   : > { %2552 = vmatpush3.bf16.msra.mxu0 %v2936_v26 }
 0x180   : > { %2600 = vmatpush3.bf16.msra.mxu1 %v2968_v34  ;;  %2557 = vmatprep.subr.bf16.mxu0 %v2914_v21 }
 0x181   : > { %2605 = vmatprep.subr.bf16.mxu1 %v2912_v20 }
 0x182   : > { %2554 = vmatmul.mubr.msk.bf16.vlgmr.msra.gmra.mrb[4].mxu0 %vm523_vm0, %v2710_v12 }
 0x183   : > { %2558 = vmatpush3.bf16.msra.mxu0 %v2914_v21  ;;  %2602 = vmatmul.mubr.msk.bf16.vlgmr.msra.gmra.mrb[4].mxu1 %vm523_vm0, %v2711_v13 }
 0x184   : > { %2606 = vmatpush3.bf16.msra.mxu1 %v2912_v20  ;;  %2559 = vmatprep.subr.bf16.mxu0 %v2922_v23 }
 0x185   : > { %2607 = vmatprep.subr.bf16.mxu1 %v2920_v22  ;;  %2565 = vmatprep.mubr.msk.bf16.mxu0 %vm523_vm0, %v2712_v14 }
 0x186   : > { %2613 = vmatprep.mubr.msk.bf16.mxu1 %vm523_vm0, %v2713_v15 }
 0x187   : > { %2560 = vmatpush3.bf16.msra.mxu0 %v2922_v23 }
 0x188   : > { %2608 = vmatpush3.bf16.msra.mxu1 %v2920_v22  ;;  %2561 = vmatprep.subr.bf16.mxu0 %v2930_v25 }
 0x189   : > { %2609 = vmatprep.subr.bf16.mxu1 %v2928_v24 }
 0x18b   : > { %2562 = vmatpush3.bf16.msra.mxu0 %v2930_v25 }
 0x18c   : > { %2610 = vmatpush3.bf16.msra.mxu1 %v2928_v24  ;;  %2563 = vmatprep.subr.bf16.mxu0 %v2938_v27 }
 0x18d   : > { %2611 = vmatprep.subr.bf16.mxu1 %v2936_v26 }
 0x18f   : > { %2564 = vmatpush3.bf16.msra.mxu0 %v2938_v27 }
 0x190   : > { %2612 = vmatpush3.bf16.msra.mxu1 %v2936_v26 }
 0x192   : > { %2566 = vmatmul.mubr.msk.bf16.vlgmr.msra.gmra.mrb[4].mxu0 %vm523_vm0, %v2714_v16 }
 0x193   : > { %2614 = vmatmul.mubr.msk.bf16.vlgmr.msra.gmra.mrb[4].mxu1 %vm523_vm0, %v2715_v17 }
 0x225   : > { %v2471_v19 = vpop.f32.mrb[0].mxu0 }
 0x226   : > { %v824_v20 = vmul.f32 %v2471_v19, %v3132_v18  ;;  %v2296_v21 = vpack.c.bf16 %v2471_v19, %v2471_v19  ;;  %v2519_v22 = vpop.f32.mrb[0].mxu1  ;;  %v797_v23 = vpop.f32.mrb[1].mxu0 }
 0x227   : > { %v1198_v24 = vmul.f32 %v2519_v22, %v3132_v18  ;;  %v2300_v25 = vpack.c.bf16 %v2519_v22, %v2519_v22  ;;  %v2294_v26 = vpack.c.bf16 %v797_v23, %v797_v23  ;;  %v1177_v27 = vpop.f32.mrb[1].mxu1  ;;  %v2472_v28 = vpop.f32.mrb[2].mxu0  ;;  %v822_v33 = vmul.f32 %v3132_v18, %v797_v23 }
 0x228   : > { %882 = vst.msk [vmem:[%s3137_s26 + $0x8] sm:$0xf] %vm879_vm1, %v2296_v21  ;;  %v2298_v29 = vpack.c.bf16 %v1177_v27, %v1177_v27  ;;  %v2297_v30 = vpack.c.bf16 %v2472_v28, %v2472_v28  ;;  %v2520_v31 = vpop.f32.mrb[2].mxu1  ;;  %v800_v32 = vpop.f32.mrb[3].mxu0  ;;  %v1196_v37 = vmul.f32 %v3132_v18, %v1177_v27  ;;  %v833_v40 = vsel %vm826_vm2, %v824_v20, 0.0 }
 0x229   : > { %2206 = vst.msk [vmem:[%s3137_s26 + $0x18] sm:$0xf] %vm879_vm1, %v2300_v25  ;;  %880 = vst.msk [vmem:[%s3137_s26] sm:$0xf] %vm879_vm1, %v2294_v26  ;;  %v2301_v34 = vpack.c.bf16 %v2520_v31, %v2520_v31  ;;  %v2295_v35 = vpack.c.bf16 %v800_v32, %v800_v32  ;;  %v1180_v36 = vpop.f32.mrb[3].mxu1  ;;  %v1206_v39 = vsel %vm826_vm2, %v1198_v24, 0.0  ;;  %834 = vadd.xlane.f32.xlu0 %v833_v40 }
 0x22a   : > { %2204 = vst.msk [vmem:[%s3137_s26 + $0x10] sm:$0xf] %vm879_vm1, %v2298_v29  ;;  %883 = vst.msk [vmem:[%s3137_s26 + $0xc] sm:$0xf] %vm879_vm1, %v2297_v30  ;;  %v2299_v38 = vpack.c.bf16 %v1180_v36, %v1180_v36  ;;  %1207 = vadd.xlane.f32.xlu1 %v1206_v39  ;;  %v825_v41 = vmul.f32 %v2472_v28, %v3132_v18  ;;  %v1200_v42 = vsel %vm826_vm2, %v1196_v37, 0.0  ;;  %v827_v44 = vsel %vm826_vm2, %v822_v33, 0.0 }
 0x22b   : > { %2207 = vst.msk [vmem:[%s3137_s26 + $0x1c] sm:$0xf] %vm879_vm1, %v2301_v34  ;;  %881 = vst.msk [vmem:[%s3137_s26 + $0x4] sm:$0xf] %vm879_vm1, %v2295_v35  ;;  %v845_v45 = vmul.f32 %v824_v20, %v824_v20  ;;  %v1199_v46 = vmul.f32 %v2520_v31, %v3132_v18  ;;  %v1218_v49 = vmul.f32 %v1198_v24, %v1198_v24 }
 0x22c   : > { %2205 = vst.msk [vmem:[%s3137_s26 + $0x14] sm:$0xf] %vm879_vm1, %v2299_v38  ;;  %v836_v48 = vsel %vm826_vm2, %v825_v41, 0.0  ;;  %v823_v50 = vmul.f32 %v3132_v18, %v800_v32  ;;  %v1197_v51 = vmul.f32 %v3132_v18, %v1180_v36  ;;  %v846_v56 = vmul.f32 %v825_v41, %v825_v41 }
 0x22d   : > { %828 = vadd.xlane.f32.xlu0 %v827_v44  ;;  %v853_v47 = vsel %vm826_vm2, %v845_v45, 0.0  ;;  %v1226_v52 = vsel %vm826_vm2, %v1218_v49, 0.0  ;;  %v1209_v53 = vsel %vm826_vm2, %v1199_v46, 0.0  ;;  %v843_v54 = vmul.f32 %v822_v33, %v822_v33 }
 0x22e   : > { %1201 = vadd.xlane.f32.xlu1 %v1200_v42  ;;  %v1203_v55 = vsel %vm826_vm2, %v1197_v51, 0.0  ;;  %v830_v43 = vsel %vm826_vm2, %v823_v50, 0.0  ;;  %v856_v57 = vsel %vm826_vm2, %v846_v56, 0.0  ;;  %v1219_v59 = vmul.f32 %v1199_v46, %v1199_v46 }
 0x22f   : > { %v847_v58 = vsel %vm826_vm2, %v843_v54, 0.0  ;;  %v1216_v60 = vmul.f32 %v1196_v37, %v1196_v37  ;;  %v844_v63 = vmul.f32 %v823_v50, %v823_v50  ;;  %v1217_v1 = vmul.f32 %v1197_v51, %v1197_v51 }
 0x230   : > { %v1229_v61 = vsel %vm826_vm2, %v1219_v59, 0.0 }
 0x231   : > { %837 = vadd.xlane.f32.xlu0 %v836_v48  ;;  %v1220_v62 = vsel %vm826_vm2, %v1216_v60, 0.0  ;;  %v850_v0 = vsel %vm826_vm2, %v844_v63, 0.0  ;;  %v1223_v2 = vsel %vm826_vm2, %v1217_v1, 0.0 }
 0x232   : > { %854 = vadd.xlane.f32.xlu1 %v853_v47 }
 0x235   : > { %1210 = vadd.xlane.f32.xlu0 %v1209_v53 }
 0x236   : > { %1227 = vadd.xlane.f32.xlu1 %v1226_v52 }
 0x239   : > { %1204 = vadd.xlane.f32.xlu0 %v1203_v55 }
 0x23a   : > { %831 = vadd.xlane.f32.xlu1 %v830_v43 }
 0x23d   : > { %857 = vadd.xlane.f32.xlu0 %v856_v57 }
 0x23e   : > { %848 = vadd.xlane.f32.xlu1 %v847_v58 }
 0x241   : > { %1230 = vadd.xlane.f32.xlu0 %v1229_v61 }
 0x242   : > { %1221 = vadd.xlane.f32.xlu1 %v1220_v62 }
 0x245   : > { %851 = vadd.xlane.f32.xlu0 %v850_v0 }
 0x249   : > { %1224 = vadd.xlane.f32.xlu0 %v1223_v2 }
 0x265   : > { %v2567_v3 = vpop.f32.mrb[4].mxu0 }
 0x266   : > { %v1571_v4 = vmul.f32 %v2567_v3, %v3132_v18  ;;  %v2304_v5 = vpack.c.bf16 %v2567_v3, %v2567_v3  ;;  %v2615_v6 = vpop.f32.mrb[4].mxu1  ;;  %v1550_v7 = vpop.f32.mrb[5].mxu0 }
 0x267   : > { %v2308_v8 = vpack.c.bf16 %v2615_v6, %v2615_v6  ;;  %v2302_v9 = vpack.c.bf16 %v1550_v7, %v1550_v7  ;;  %v1911_v10 = vpop.f32.mrb[5].mxu1  ;;  %v2568_v11 = vpop.f32.mrb[6].mxu0  ;;  %v1932_v17 = vmul.f32 %v2615_v6, %v3132_v18  ;;  %v1569_v26 = vmul.f32 %v3132_v18, %v1550_v7 }
 0x268   : > { %2246 = vst.msk [vmem:[%s3137_s26 + $0x28] sm:$0xf] %vm879_vm1, %v2304_v5  ;;  %v2306_v12 = vpack.c.bf16 %v1911_v10, %v1911_v10  ;;  %v1572_v13 = vmul.f32 %v2568_v11, %v3132_v18  ;;  %v2305_v14 = vpack.c.bf16 %v2568_v11, %v2568_v11  ;;  %v2616_v15 = vpop.f32.mrb[6].mxu1  ;;  %v1553_v16 = vpop.f32.mrb[7].mxu0  ;;  %v1579_v24 = vsel %vm826_vm2, %v1571_v4, 0.0 }
 0x269   : > { %2286 = vst.msk [vmem:[%s3137_s26 + $0x38] sm:$0xf] %vm879_vm1, %v2308_v8  ;;  %2244 = vst.msk [vmem:[%s3137_s26 + $0x20] sm:$0xf] %vm879_vm1, %v2302_v9  ;;  %v2309_v19 = vpack.c.bf16 %v2616_v15, %v2616_v15  ;;  %v2303_v20 = vpack.c.bf16 %v1553_v16, %v1553_v16  ;;  %v1914_v21 = vpop.f32.mrb[7].mxu1  ;;  %v1933_v22 = vmul.f32 %v2616_v15, %v3132_v18  ;;  %1580 = vadd.xlane.f32.xlu1 %v1579_v24 }
 0x26a   : > { %2284 = vst.msk [vmem:[%s3137_s26 + $0x30] sm:$0xf] %vm879_vm1, %v2306_v12  ;;  %2247 = vst.msk [vmem:[%s3137_s26 + $0x2c] sm:$0xf] %vm879_vm1, %v2305_v14  ;;  %v2307_v23 = vpack.c.bf16 %v1914_v21, %v1914_v21  ;;  %v1582_v25 = vsel %vm826_vm2, %v1572_v13, 0.0  ;;  %v1570_v27 = vmul.f32 %v3132_v18, %v1553_v16  ;;  %v1940_v28 = vsel %vm826_vm2, %v1932_v17, 0.0 }
 0x26b   : > { %2287 = vst.msk [vmem:[%s3137_s26 + $0x3c] sm:$0xf] %vm879_vm1, %v2309_v19  ;;  %2245 = vst.msk [vmem:[%s3137_s26 + $0x24] sm:$0xf] %vm879_vm1, %v2303_v20  ;;  %1583 = vadd.xlane.f32.xlu0 %v1582_v25  ;;  %v1943_v29 = vsel %vm826_vm2, %v1933_v22, 0.0  ;;  %v1930_v30 = vmul.f32 %v3132_v18, %v1911_v10  ;;  %v1931_v31 = vmul.f32 %v3132_v18, %v1914_v21  ;;  %v1573_v32 = vsel %vm826_vm2, %v1569_v26, 0.0 }
 0x26c   : > { %2285 = vst.msk [vmem:[%s3137_s26 + $0x34] sm:$0xf] %vm879_vm1, %v2307_v23  ;;  %v1576_v33 = vsel %vm826_vm2, %v1570_v27, 0.0  ;;  %v1591_v36 = vmul.f32 %v1571_v4, %v1571_v4  ;;  %v1592_v37 = vmul.f32 %v1572_v13, %v1572_v13  ;;  %v1589_v40 = vmul.f32 %v1569_v26, %v1569_v26 }
 0x26d   : > { %1941 = vadd.xlane.f32.xlu1 %v1940_v28  ;;  %v1934_v34 = vsel %vm826_vm2, %v1930_v30, 0.0  ;;  %v1937_v35 = vsel %vm826_vm2, %v1931_v31, 0.0  ;;  %v1590_v18 = vmul.f32 %v1570_v27, %v1570_v27  ;;  %v1950_v44 = vmul.f32 %v1930_v30, %v1930_v30 }
 0x26e   : > { %v1599_v38 = vsel %vm826_vm2, %v1591_v36, 0.0  ;;  %v1602_v39 = vsel %vm826_vm2, %v1592_v37, 0.0  ;;  %v1593_v41 = vsel %vm826_vm2, %v1589_v40, 0.0  ;;  %v1951_v45 = vmul.f32 %v1931_v31, %v1931_v31 }
 0x26f   : > { %1944 = vadd.xlane.f32.xlu0 %v1943_v29  ;;  %v1596_v42 = vsel %vm826_vm2, %v1590_v18, 0.0  ;;  %v1954_v46 = vsel %vm826_vm2, %v1950_v44, 0.0  ;;  %v1952_v48 = vmul.f32 %v1932_v17, %v1932_v17  ;;  %v1953_v49 = vmul.f32 %v1933_v22, %v1933_v22 }
 0x270   : > { %v1957_v47 = vsel %vm826_vm2, %v1951_v45, 0.0 }
 0x271   : > { %1574 = vadd.xlane.f32.xlu1 %v1573_v32  ;;  %v1960_v50 = vsel %vm826_vm2, %v1952_v48, 0.0  ;;  %v1963_v51 = vsel %vm826_vm2, %v1953_v49, 0.0 }
 0x273   : > { %1577 = vadd.xlane.f32.xlu0 %v1576_v33 }
 0x275   : > { %1935 = vadd.xlane.f32.xlu1 %v1934_v34 }
 0x277   : > { %1938 = vadd.xlane.f32.xlu0 %v1937_v35 }
 0x279   : > { %1600 = vadd.xlane.f32.xlu1 %v1599_v38 }
 0x27b   : > { %1603 = vadd.xlane.f32.xlu0 %v1602_v39 }
 0x27d   : > { %1594 = vadd.xlane.f32.xlu1 %v1593_v41 }
 0x27f   : > { %1597 = vadd.xlane.f32.xlu0 %v1596_v42 }
 0x281   : > { %1955 = vadd.xlane.f32.xlu1 %v1954_v46 }
 0x283   : > { %1958 = vadd.xlane.f32.xlu0 %v1957_v47 }
 0x285   : > { %1961 = vadd.xlane.f32.xlu1 %v1960_v50 }
 0x287   : > { %1964 = vadd.xlane.f32.xlu0 %v1963_v51 }
 0x2b6   : > { %v835_v52 = vpop.xlane.xlu0 %834 }
 0x2b7   : > { %v1208_v55 = vpop.xlane.xlu1 %1207 }
 0x2b8   : > { %v1214_v5 = vadd.f32 %v1208_v55, %v835_v52 }
 0x2ba   : > { %v829_v53 = vpop.xlane.xlu0 %828 }
 0x2bb   : > { %v1202_v56 = vpop.xlane.xlu1 %1201 }
 0x2bc   : > { %v1212_v15 = vadd.f32 %v1202_v56, %v829_v53 }
 0x2be   : > { %v838_v43 = vpop.xlane.xlu0 %837 }
 0x2bf   : > { %v855_v57 = vpop.xlane.xlu1 %854 }
 0x2c2   : > { %v1211_v54 = vpop.xlane.xlu0 %1210 }
 0x2c3   : > { %v1228_v59 = vpop.xlane.xlu1 %1227  ;;  %v1215_v6 = vadd.f32 %v1211_v54, %v838_v43 }
 0x2c4   : > { %v1234_v34 = vadd.f32 %v1228_v59, %v855_v57 }
 0x2c6   : > { %v1205_v58 = vpop.xlane.xlu0 %1204 }
 0x2c7   : > { %v832_v61 = vpop.xlane.xlu1 %831 }
 0x2c8   : > { %v1213_v16 = vadd.f32 %v1205_v58, %v832_v61 }
 0x2ca   : > { %v858_v60 = vpop.xlane.xlu0 %857 }
 0x2cb   : > { %v849_v63 = vpop.xlane.xlu1 %848 }
 0x2ce   : > { %v1231_v62 = vpop.xlane.xlu0 %1230 }
 0x2cf   : > { %v1222_v1 = vpop.xlane.xlu1 %1221  ;;  %v1235_v35 = vadd.f32 %v1231_v62, %v858_v60 }
 0x2d0   : > { %v1232_v28 = vadd.f32 %v1222_v1, %v849_v63 }
 0x2d2   : > { %v852_v0 = vpop.xlane.xlu0 %851 }
 0x2d6   : > { %v1225_v2 = vpop.xlane.xlu0 %1224 }
 0x2d7   : > { %v1233_v29 = vadd.f32 %v1225_v2, %v852_v0 }
 0x2f6   : > { %v1581_v3 = vpop.xlane.xlu1 %1580 }
 0x2f7   : > { %v1587_v7 = vadd.f32 %v1581_v3, %v1214_v5 }
 0x2f8   : > { %v1584_v4 = vpop.xlane.xlu0 %1583 }
 0x2f9   : > { %v1588_v8 = vadd.f32 %v1584_v4, %v1215_v6 }
 0x2fa   : > { %v1942_v9 = vpop.xlane.xlu1 %1941 }
 0x2fb   : > { %v1948_v11 = vadd.f32 %v1942_v9, %v1587_v7 }
 0x2fc   : > { %v1945_v10 = vpop.xlane.xlu0 %1944 }
 0x2fd   : > { %v1949_v12 = vadd.f32 %v1945_v10, %v1588_v8  ;;  %1994 = vst.msk [vmem:[%s325_s30 + $0x10] sm:$0xff] %vm1991_vm3, %v1948_v11 }
 0x2fe   : > { %v1575_v13 = vpop.xlane.xlu1 %1574 }
 0x2ff   : > { %1995 = vst.msk [vmem:[%s325_s30 + $0x18] sm:$0xff] %vm1991_vm3, %v1949_v12  ;;  %v1585_v17 = vadd.f32 %v1575_v13, %v1212_v15 }
 0x300   : > { %v1578_v14 = vpop.xlane.xlu0 %1577 }
 0x301   : > { %v1586_v19 = vadd.f32 %v1578_v14, %v1213_v16 }
 0x302   : > { %v1936_v20 = vpop.xlane.xlu1 %1935 }
 0x303   : > { %v1946_v22 = vadd.f32 %v1936_v20, %v1585_v17 }
 0x304   : > { %v1939_v21 = vpop.xlane.xlu0 %1938 }
 0x305   : > { %v1947_v23 = vadd.f32 %v1939_v21, %v1586_v19  ;;  %1992 = vst.msk [vmem:[%s325_s30] sm:$0xff] %vm1991_vm3, %v1946_v22 }
 0x306   : > { %v1601_v24 = vpop.xlane.xlu1 %1600 }
 0x307   : > { %1993 = vst.msk [vmem:[%s325_s30 + $0x8] sm:$0xff] %vm1991_vm3, %v1947_v23  ;;  %v1607_v38 = vadd.f32 %v1601_v24, %v1234_v34 }
 0x308   : > { %v1604_v25 = vpop.xlane.xlu0 %1603 }
 0x309   : > { %v1608_v39 = vadd.f32 %v1604_v25, %v1235_v35 }
 0x30a   : > { %v1595_v26 = vpop.xlane.xlu1 %1594 }
 0x30b   : > { %v1605_v30 = vadd.f32 %v1595_v26, %v1232_v28 }
 0x30c   : > { %v1598_v27 = vpop.xlane.xlu0 %1597 }
 0x30d   : > { %v1606_v31 = vadd.f32 %v1598_v27, %v1233_v29 }
 0x30e   : > { %v1956_v32 = vpop.xlane.xlu1 %1955 }
 0x30f   : > { %v1966_v36 = vadd.f32 %v1956_v32, %v1605_v30 }
 0x310   : > { %v1959_v33 = vpop.xlane.xlu0 %1958 }
 0x311   : > { %v1967_v37 = vadd.f32 %v1959_v33, %v1606_v31  ;;  %1996 = vst.msk [vmem:[%s330_s11] sm:$0xff] %vm1991_vm3, %v1966_v36 }
 0x312   : > { %v1962_v40 = vpop.xlane.xlu1 %1961 }
 0x313   : > { %1997 = vst.msk [vmem:[%s330_s11 + $0x8] sm:$0xff] %vm1991_vm3, %v1967_v37  ;;  %v1968_v41 = vadd.f32 %v1962_v40, %v1607_v38 }
 0x314   : > { %v1965_v18 = vpop.xlane.xlu0 %1964 }
 0x315   : > { %v1969_v42 = vadd.f32 %v1965_v18, %v1608_v39  ;;  %1998 = vst.msk [vmem:[%s330_s11 + $0x10] sm:$0xff] %vm1991_vm3, %v1968_v41 }
 0x317   : > { %1999 = vst.msk [vmem:[%s330_s11 + $0x18] sm:$0xff] %vm1991_vm3, %v1969_v42 }
 0x318 PF: > { %s19_s27 = sadd.s32 1, %s2722_s27  }
 0x319   : > { %p16_p4 = scmp.ge.s32.totalorder %s19_s27, 4  }
 0x31b   :  { %18 = sbr.rel (!%p16_p4) target bundleno = 1 (0x1), region = 116 }

// kernel: generator_forward.6
= control target key start
LH: loop header
LB: loop body
LE: loop exit
PB: predicated region body
PF: predicated region fallthrough
CT: control target
= control target key end

     0   :  { %14 = vsyncpa [#allocation3], 0  ;;  %s4202_s27 = smov 0   ;;  %s5103_s0 = inlined_call_operand.vmem [shape: bf16[2,128,38], index: 0, kind: input, shape index: {}]   ;;  %s5104_s1 = inlined_call_operand.vmem [shape: f32[128,1], index: 1, kind: input, shape index: {}]   ;;  %s5105_s2 = inlined_call_operand.vmem [shape: f32[128,1], index: 2, kind: input, shape index: {}]   ;;  %s5106_s3 = inlined_call_operand.vmem [shape: f32[1,38], index: 3, kind: input, shape index: {}]   ;;  %s5107_s4 = inlined_call_operand.vmem [shape: f32[1,24], index: 4, kind: input, shape index: {}]   ;;  %s5108_s5 = inlined_call_operand.hbm [shape: bf16[16,64,128], index: 5, kind: input, shape index: {}]   ;;  %s5109_s6 = inlined_call_operand.vmem [shape: bf16[2,4,64,24], index: 6, kind: output, shape index: {0}]   ;;  %s5110_s7 = inlined_call_operand.vmem [shape: f32[2,64,1], index: 7, kind: output, shape index: {1}]   ;;  %s5111_s8 = inlined_call_operand.vmem [shape: f32[2,64,1], index: 8, kind: output, shape index: {2}]  }
   0x1 LB: > { %s4208_s28 = sadd.s32 4294967295, %s4143_s27   ;;  %p3125_p0 = scmp.ge.s32.totalorder %s4143_s27, 1  ;;  %s4143_s27 = sphi %s4202_s27, %s20_s27  }
   0x2   : > { %p234_p1 = scmp.lt.s32.totalorder %s4143_s27, 3  ;;  %s4145_s29 = smov [#allocation2]  }
   0x3   : > { %s258_s30 = sshll.u32 %s4145_s29, 4  ;;  %p5112_p3 = scmp.eq.s32.totalorder %s4208_s28, 0  ;;  %s259_s30 = int_to_ptr.vmem [resolvable:$true] %s258_s30 }
   0x4   : > { %p4212_p2 = pnand %p3125_p0, %p234_p1  ;;  %s4105_s13 = scalar_lea.hbm %s5108_s5, 8192 }
   0x5   : > { %p4106_p6 = scmp.ne.s32.totalorder %s5108_s5, %s4105_s13  ;;  %p4112_p10 = scmp.lt.u32.totalorder %s4105_s13, %s5108_s5 }
   0x6   : > { %s5114_s9 = scalar_select %p4212_p2, 1, 0 }
   0x7   : > { %p4013_p4 = pneg %p4212_p2 }
   0x9   : > { %p4221_p5 = pnand %p5112_p3, %p4013_p4 }
   0xb   : > { %p4107_p7 = pneg %p4221_p5 }
   0xd   : > { %p4108_p8 = pnand %p4107_p7, %p4106_p6 }
   0xf   : > { %p4109_p9 = pneg %p4108_p8 }
  0x11   : > { %p4114_p11 = pnand %p4112_p10, %p4109_p9 }
  0x13   : > { %4117 = shalt.err (!%p4114_p11)
}
  0x14   : > { %s4118_s18 = scalar_lea.vmem %s259_s30, 8192  ;;  %p4126_p1 = scmp.lt.s32.totalorder %s259_s30, %s259_s30 }
  0x15   : > { %p4119_p12 = scmp.ne.s32.totalorder %s259_s30, %s4118_s18  ;;  %p4127_p4 = scmp.lt.s32.totalorder %s4118_s18, %s4118_s18 }
  0x17   : > { %p4121_p13 = pnand %p4119_p12, %p4107_p7  ;;  %p4128_p3 = por %p4127_p4, %p4126_p1 }
  0x19   : > { %p4122_p0 = pneg %p4121_p13 }
  0x1b   : > { %p4129_p2 = pnand %p4128_p3, %p4122_p0 }
  0x1d   : > { %4132 = shalt.err (!%p4129_p2)
}
  0x1e   : > { %s4146_s19 = smov 64   ;;  %s4147_s20 = smov 4  }
  0x1f   : > { %4016 = dma.hbm_to_vmem [thread:$0]  (!%p4221_p5), %s5108_s5, 8192, %s259_s30, [#allocation3], %s4146_s19, %s4146_s19, %s4147_s20  }
  0x20   : > { %p5116_p6 = scmp.ne.s32.totalorder %s5114_s9, 0 }
  0x21   : > { %p5117_p8 = scmp.eq.s32.totalorder (!%p5116_p6), %s4208_s28, 0 }
  0x22   : > { %282 = sbr.rel (%p5116_p6) target bundleno = 1005 (0x3ed), region = 44 }
  0x29   : > { %4138 = dma.done.wait (%p5117_p8), [#allocation3], 8192   ;;  %p5118_p7 = pmov %p5117_p8 }
  0x2a   : > { %v4148_v0 = vmov 0   ;;  %v491_v1 = vld [vmem:[%s5105_s2] sm:$0xff]  ;;  %v492_v3 = vld [vmem:[%s5105_s2 + $0x8] sm:$0xff]  ;;  %v382_v5 = vld [vmem:[%s5104_s1 + $0x18] sm:$0xff]  ;;  %p326_p2 = scmp.lt.s32.totalorder %s4208_s28, 1  ;;  %s4149_s13 = smov 121  }
  0x2b   : > { %4140 = vsyncadd (%p5118_p7), [#allocation3], 4294959104  ;;  %4040 = vset.pattern.permute.xlu1 %v4148_v0  ;;  %4039 = vset.pattern.permute.xlu0 %v4148_v0  ;;  %v379_v2 = vld [vmem:[%s5104_s1] sm:$0xff]  ;;  %v380_v4 = vld [vmem:[%s5104_s1 + $0x8] sm:$0xff]  ;;  %s4150_s14 = smov 122   ;;  %s4151_s15 = smov 120  }
  0x2c   : > { %509 = vperm.xlu1 %4040, %v491_v1   ;;  %397 = vperm.xlu0 %4039, %v379_v2   ;;  %v381_v6 = vld [vmem:[%s5104_s1 + $0x10] sm:$0xff]  ;;  %v494_v7 = vld [vmem:[%s5105_s2 + $0x18] sm:$0xff]  ;;  %v384_v9 = vld [vmem:[%s5104_s1 + $0x28] sm:$0xff]  ;;  %s5120_s28 = smov (!%p326_p2, %s4208_s28), 1  ;;  %s4152_s16 = smov 126   ;;  %vm1257_vm0 = vcmask 191488  }
  0x2d   : > { %v493_v8 = vld [vmem:[%s5105_s2 + $0x10] sm:$0xff]  ;;  %v383_v10 = vld [vmem:[%s5104_s1 + $0x20] sm:$0xff]  ;;  %v496_v11 = vld [vmem:[%s5105_s2 + $0x28] sm:$0xff]  ;;  %s4348_s29 = sshll.u32 %s5120_s28, 6  ;;  %s4153_s17 = smov 127   ;;  %vm1152_vm1 = vcmask 195584  }
  0x2e   : > { %v495_v12 = vld [vmem:[%s5105_s2 + $0x20] sm:$0xff]  ;;  %v386_v13 = vld [vmem:[%s5104_s1 + $0x38] sm:$0xff]  ;;  %v385_v14 = vld [vmem:[%s5104_s1 + $0x30] sm:$0xff]  ;;  %s4354_s10 = scalar_lea.vmem %s5103_s0, %s4348_s29  ;;  %s4154_s18 = smov 115   ;;  %vm2973_vm2 = vcmask 7168  }
  0x2f   : > { %v498_v15 = vld [vmem:[%s5105_s2 + $0x38] sm:$0xff]  ;;  %v497_v16 = vld [vmem:[%s5105_s2 + $0x30] sm:$0xff]  ;;  %v388_v17 = vld [vmem:[%s5104_s1 + $0x48] sm:$0xff]  ;;  %s4155_s19 = smov 116   ;;  %s4156_s20 = smov 114  }
  0x30   : > { %514 = vperm.xlu1 %4040, %v492_v3   ;;  %402 = vperm.xlu0 %4039, %v380_v4   ;;  %v387_v18 = vld [vmem:[%s5104_s1 + $0x40] sm:$0xff]  ;;  %v500_v19 = vld [vmem:[%s5105_s2 + $0x48] sm:$0xff]  ;;  %v390_v21 = vld [vmem:[%s5104_s1 + $0x58] sm:$0xff]  ;;  %s3263_s21 = sshll.u32 %s5120_s28, 7  ;;  %s5036_s9 = scalar_lea.vmem %s5110_s7, %s4348_s29 }
  0x31   : > { %v499_v20 = vld [vmem:[%s5105_s2 + $0x40] sm:$0xff]  ;;  %v389_v22 = vld [vmem:[%s5104_s1 + $0x50] sm:$0xff]  ;;  %v502_v23 = vld [vmem:[%s5105_s2 + $0x58] sm:$0xff]  ;;  %s4770_s26 = scalar_lea.vmem %s5109_s6, %s3263_s21  ;;  %s5056_s12 = scalar_lea.vmem %s5111_s8, %s4348_s29 }
  0x32   : > { %v501_v24 = vld [vmem:[%s5105_s2 + $0x50] sm:$0xff]  ;;  %v392_v25 = vld [vmem:[%s5104_s1 + $0x68] sm:$0xff]  ;;  %v391_v26 = vld [vmem:[%s5104_s1 + $0x60] sm:$0xff] }
  0x33   : > { %v504_v27 = vld [vmem:[%s5105_s2 + $0x68] sm:$0xff]  ;;  %v503_v28 = vld [vmem:[%s5105_s2 + $0x60] sm:$0xff]  ;;  %v394_v29 = vld [vmem:[%s5104_s1 + $0x78] sm:$0xff] }
  0x34   : > { %412 = vperm.xlu1 %4040, %v382_v5   ;;  %407 = vperm.xlu0 %4039, %v381_v6   ;;  %v393_v30 = vld [vmem:[%s5104_s1 + $0x70] sm:$0xff]  ;;  %v506_v31 = vld [vmem:[%s5105_s2 + $0x78] sm:$0xff]  ;;  %v3299_v33 = vld [vmem:[%s4354_s10] sm:$0xff]  }
  0x35   : > { %v505_v32 = vld [vmem:[%s5105_s2 + $0x70] sm:$0xff]  ;;  %v3300_v34 = vunpack.c.l.bf16 %v3299_v33  ;;  %v3301_v38 = vunpack.c.h.bf16 %v3299_v33  ;;  %v3330_v42 = vld [vmem:[%s4354_s10 + $0x8] sm:$0xff]   ;;  %v4361_v48 = vld [vmem:[%s5106_s3] ss:$0 sm:$0xff] }
  0x36   : > { %v3305_v46 = vunpack.c.h.bf16 %v3330_v42  ;;  %v3304_v47 = vunpack.c.l.bf16 %v3330_v42  ;;  %v3331_v58 = vld [vmem:[%s4354_s10 + $0x10] sm:$0xff]  }
  0x37   : > { %v3309_v0 = vunpack.c.h.bf16 %v3331_v58  ;;  %v3308_v1 = vunpack.c.l.bf16 %v3331_v58 }
  0x38   : > { %524 = vperm.xlu1 %4040, %v494_v7   ;;  %519 = vperm.xlu0 %4039, %v493_v8  }
  0x3c   : > { %422 = vperm.xlu1 %4040, %v384_v9   ;;  %417 = vperm.xlu0 %4039, %v383_v10  }
  0x40   : > { %534 = vperm.xlu1 %4040, %v496_v11   ;;  %529 = vperm.xlu0 %4039, %v495_v12   ;;  %v3332_v11 = vld [vmem:[%s4354_s10 + $0x18] sm:$0xff]  }
  0x44   : > { %432 = vperm.xlu1 %4040, %v386_v13   ;;  %427 = vperm.xlu0 %4039, %v385_v14  }
  0x48   : > { %544 = vperm.xlu1 %4040, %v498_v15   ;;  %539 = vperm.xlu0 %4039, %v497_v16   ;;  %v3313_v16 = vunpack.c.h.bf16 %v3332_v11 }
  0x4c   : > { %442 = vperm.xlu1 %4040, %v388_v17   ;;  %437 = vperm.xlu0 %4039, %v387_v18   ;;  %v3312_v17 = vunpack.c.l.bf16 %v3332_v11 }
  0x50   : > { %554 = vperm.xlu1 %4040, %v500_v19   ;;  %549 = vperm.xlu0 %4039, %v499_v20  }
  0x54   : > { %452 = vperm.xlu1 %4040, %v390_v21   ;;  %447 = vperm.xlu0 %4039, %v389_v22  }
  0x58   : > { %564 = vperm.xlu1 %4040, %v502_v23   ;;  %559 = vperm.xlu0 %4039, %v501_v24  }
  0x5c   : > { %462 = vperm.xlu1 %4040, %v392_v25   ;;  %457 = vperm.xlu0 %4039, %v391_v26  }
  0x60   : > { %574 = vperm.xlu1 %4040, %v504_v27   ;;  %569 = vperm.xlu0 %4039, %v503_v28   ;;  %v3333_v27 = vld [vmem:[%s4354_s10 + $0x20] sm:$0xff]  }
  0x61   : > { %v3316_v33 = vunpack.c.l.bf16 %v3333_v27 }
  0x64   : > { %472 = vperm.xlu1 %4040, %v394_v29   ;;  %467 = vperm.xlu0 %4039, %v393_v30  }
  0x68   : > { %584 = vperm.xlu1 %4040, %v506_v31   ;;  %579 = vperm.xlu0 %4039, %v505_v32   ;;  %v3317_v32 = vunpack.c.h.bf16 %v3333_v27 }
  0xab   : > { %v510_v35 = vpop.permute.xlu1 %509  ;;  %v398_v36 = vpop.permute.xlu0 %397 }
  0xac   : > { %v475_v37 = vmul.f32 %v3300_v34, %v398_v36 }
  0xae   : > { %v587_v39 = vadd.f32 %v510_v35, %v475_v37 }
  0xaf   : > { %v515_v40 = vpop.permute.xlu1 %514  ;;  %v403_v41 = vpop.permute.xlu0 %402 }
  0xb0   : > { %v476_v43 = vmul.f32 %v3301_v38, %v403_v41  ;;  %v603_v44 = vmax.f32 %v587_v39, 0.0 }
  0xb2   : > { %v588_v45 = vadd.f32 %v515_v40, %v476_v43  ;;  %v626_v52 = vmul.f32 %v4361_v48, %v603_v44  ;;  %v3334_v43 = vld [vmem:[%s4354_s10 + $0x28] sm:$0xff]  }
  0xb3   : > { %v413_v49 = vpop.permute.xlu1 %412  ;;  %v408_v50 = vpop.permute.xlu0 %407 }
  0xb4   : > { %v604_v51 = vmax.f32 %v588_v45, 0.0  ;;  %v478_v54 = vmul.f32 %v3305_v46, %v413_v49  ;;  %v477_v55 = vmul.f32 %v3304_v47, %v408_v50  ;;  %v3321_v49 = vunpack.c.h.bf16 %v3334_v43 }
  0xb5   : > { %v3320_v50 = vunpack.c.l.bf16 %v3334_v43 }
  0xb6   : > { %v627_v53 = vmul.f32 %v4361_v48, %v604_v51 }
  0xb7   : > { %v525_v56 = vpop.permute.xlu1 %524  ;;  %v520_v57 = vpop.permute.xlu0 %519 }
  0xb8   : > { %v4366_v59 = vpack.c.bf16 %v627_v53, %v626_v52  ;;  %v590_v60 = vadd.f32 %v525_v56, %v478_v54  ;;  %v589_v61 = vadd.f32 %v520_v57, %v477_v55 }
  0xba   : > { %v606_v62 = vmax.f32 %v590_v60, 0.0  ;;  %v605_v63 = vmax.f32 %v589_v61, 0.0  ;;  %813 = vrot.lane.b32.xlu1 %v4366_v59, %s4149_s13  ;;  %700 = vrot.lane.b32.xlu0 %v4366_v59, %s4150_s14  ;;  %v3335_v61 = vld [vmem:[%s4354_s10 + $0x30] sm:$0xff]  }
  0xbb   : > { %v423_v2 = vpop.permute.xlu1 %422  ;;  %v418_v3 = vpop.permute.xlu0 %417 }
  0xbc   : > { %v629_v4 = vmul.f32 %v4361_v48, %v606_v62  ;;  %v628_v5 = vmul.f32 %v4361_v48, %v605_v63  ;;  %v480_v7 = vmul.f32 %v3309_v0, %v423_v2  ;;  %v479_v8 = vmul.f32 %v3308_v1, %v418_v3 }
  0xbd   : > { %v3325_v2 = vunpack.c.h.bf16 %v3335_v61  ;;  %v3324_v3 = vunpack.c.l.bf16 %v3335_v61 }
  0xbe   : > { %v4374_v6 = vpack.c.bf16 %v629_v4, %v628_v5 }
  0xbf   : > { %v535_v9 = vpop.permute.xlu1 %534  ;;  %v530_v10 = vpop.permute.xlu0 %529 }
  0xc0   : > { %v592_v12 = vadd.f32 %v535_v9, %v480_v7  ;;  %v591_v13 = vadd.f32 %v530_v10, %v479_v8  ;;  %815 = vrot.lane.b32.xlu1 %v4374_v6, %s4149_s13  ;;  %702 = vrot.lane.b32.xlu0 %v4374_v6, %s4150_s14 }
  0xc2   : > { %v608_v14 = vmax.f32 %v592_v12, 0.0  ;;  %v607_v15 = vmax.f32 %v591_v13, 0.0 }
  0xc3   : > { %v433_v18 = vpop.permute.xlu1 %432  ;;  %v428_v19 = vpop.permute.xlu0 %427 }
  0xc4   : > { %v631_v20 = vmul.f32 %v4361_v48, %v608_v14  ;;  %v630_v21 = vmul.f32 %v4361_v48, %v607_v15  ;;  %v482_v23 = vmul.f32 %v3313_v16, %v433_v18  ;;  %v481_v24 = vmul.f32 %v3312_v17, %v428_v19  ;;  %v3336_v14 = vld [vmem:[%s4354_s10 + $0x38] sm:$0xff]  }
  0xc5   : > { %v3329_v19 = vunpack.c.h.bf16 %v3336_v14 }
  0xc6   : > { %v4383_v22 = vpack.c.bf16 %v631_v20, %v630_v21  ;;  %v3328_v20 = vunpack.c.l.bf16 %v3336_v14 }
  0xc7   : > { %v545_v25 = vpop.permute.xlu1 %544  ;;  %v540_v26 = vpop.permute.xlu0 %539 }
  0xc8   : > { %v594_v28 = vadd.f32 %v545_v25, %v482_v23  ;;  %v593_v29 = vadd.f32 %v540_v26, %v481_v24  ;;  %817 = vrot.lane.b32.xlu1 %v4383_v22, %s4149_s13  ;;  %704 = vrot.lane.b32.xlu0 %v4383_v22, %s4150_s14 }
  0xca   : > { %v610_v30 = vmax.f32 %v594_v28, 0.0  ;;  %v609_v31 = vmax.f32 %v593_v29, 0.0  ;;  %v4041_v29 = vld [vmem:[#allocation2 + $0x20] sm:$0xff]  }
  0xcb   : > { %v443_v34 = vpop.permute.xlu1 %442  ;;  %v438_v35 = vpop.permute.xlu0 %437  ;;  %3545 = vmatprep.mubr.bf16.mxu0 %v4041_v29 }
  0xcc   : > { %v633_v36 = vmul.f32 %v4361_v48, %v610_v30  ;;  %v632_v37 = vmul.f32 %v4361_v48, %v609_v31  ;;  %v484_v39 = vmul.f32 %v3317_v32, %v443_v34  ;;  %v483_v40 = vmul.f32 %v3316_v33, %v438_v35  ;;  %v4042_v30 = vld [vmem:[#allocation2 + $0xa0] sm:$0xff]  }
  0xcd   : > { %3641 = vmatprep.mubr.bf16.mxu1 %v4042_v30  ;;  %v4057_v30 = vld [vmem:[#allocation2 + $0x40] sm:$0xff]  }
  0xce   : > { %v4392_v38 = vpack.c.bf16 %v633_v36, %v632_v37 }
  0xcf   : > { %v555_v41 = vpop.permute.xlu1 %554  ;;  %v550_v42 = vpop.permute.xlu0 %549 }
  0xd0   : > { %v596_v44 = vadd.f32 %v555_v41, %v484_v39  ;;  %v595_v45 = vadd.f32 %v550_v42, %v483_v40  ;;  %819 = vrot.lane.b32.xlu1 %v4392_v38, %s4149_s13  ;;  %706 = vrot.lane.b32.xlu0 %v4392_v38, %s4150_s14 }
  0xd2   : > { %v612_v46 = vmax.f32 %v596_v44, 0.0  ;;  %v611_v47 = vmax.f32 %v595_v45, 0.0 }
  0xd3   : > { %v453_v51 = vpop.permute.xlu1 %452  ;;  %v448_v52 = vpop.permute.xlu0 %447 }
  0xd4   : > { %v635_v53 = vmul.f32 %v4361_v48, %v612_v46  ;;  %v634_v54 = vmul.f32 %v4361_v48, %v611_v47  ;;  %v486_v56 = vmul.f32 %v3321_v49, %v453_v51  ;;  %v485_v57 = vmul.f32 %v3320_v50, %v448_v52 }
  0xd6   : > { %v4401_v55 = vpack.c.bf16 %v635_v53, %v634_v54 }
  0xd7   : > { %v565_v58 = vpop.permute.xlu1 %564  ;;  %v560_v60 = vpop.permute.xlu0 %559 }
  0xd8   : > { %v598_v62 = vadd.f32 %v565_v58, %v486_v56  ;;  %v597_v63 = vadd.f32 %v560_v60, %v485_v57  ;;  %821 = vrot.lane.b32.xlu1 %v4401_v55, %s4149_s13  ;;  %708 = vrot.lane.b32.xlu0 %v4401_v55, %s4150_s14  ;;  %v4043_v58 = vld [vmem:[#allocation2 + $0x28] sm:$0xff]  }
  0xd9   : > { %v4044_v60 = vld [vmem:[#allocation2 + $0xa8] sm:$0xff]  }
  0xda   : > { %v614_v0 = vmax.f32 %v598_v62, 0.0  ;;  %v613_v1 = vmax.f32 %v597_v63, 0.0  ;;  %v4045_v63 = vld [vmem:[#allocation2 + $0x30] sm:$0xff]  }
  0xdb   : > { %v463_v4 = vpop.permute.xlu1 %462  ;;  %v458_v5 = vpop.permute.xlu0 %457 }
  0xdc   : > { %v637_v7 = vmul.f32 %v4361_v48, %v614_v0  ;;  %v636_v8 = vmul.f32 %v4361_v48, %v613_v1  ;;  %v488_v10 = vmul.f32 %v3325_v2, %v463_v4  ;;  %v487_v11 = vmul.f32 %v3324_v3, %v458_v5  ;;  %v4046_v0 = vld [vmem:[#allocation2 + $0xb0] sm:$0xff]   ;;  %v4047_v3 = vld [vmem:[#allocation2 + $0x38] sm:$0xff]  }
  0xdd   : > { %v4048_v4 = vld [vmem:[#allocation2 + $0xb8] sm:$0xff]  }
  0xde   : > { %v4410_v9 = vpack.c.bf16 %v637_v7, %v636_v8  ;;  %v4049_v8 = vld [vmem:[#allocation2] sm:$0xff]  }
  0xdf   : > { %v575_v12 = vpop.permute.xlu1 %574  ;;  %v570_v13 = vpop.permute.xlu0 %569 }
  0xe0   : > { %v600_v15 = vadd.f32 %v575_v12, %v488_v10  ;;  %v599_v16 = vadd.f32 %v570_v13, %v487_v11  ;;  %823 = vrot.lane.b32.xlu1 %v4410_v9, %s4149_s13  ;;  %710 = vrot.lane.b32.xlu0 %v4410_v9, %s4150_s14  ;;  %v4050_v10 = vld [vmem:[#allocation2 + $0x80] sm:$0xff]  }
  0xe2   : > { %v616_v17 = vmax.f32 %v600_v15, 0.0  ;;  %v615_v18 = vmax.f32 %v599_v16, 0.0 }
  0xe3   : > { %v473_v21 = vpop.permute.xlu1 %472  ;;  %v468_v23 = vpop.permute.xlu0 %467 }
  0xe4   : > { %v639_v24 = vmul.f32 %v4361_v48, %v616_v17  ;;  %v638_v25 = vmul.f32 %v4361_v48, %v615_v18  ;;  %v490_v27 = vmul.f32 %v3329_v19, %v473_v21  ;;  %v489_v28 = vmul.f32 %v3328_v20, %v468_v23  ;;  %v4051_v19 = vld [vmem:[#allocation2 + $0x8] sm:$0xff]   ;;  %v4053_v21 = vld [vmem:[#allocation2 + $0x10] sm:$0xff]  }
  0xe5   : > { %v4052_v20 = vld [vmem:[#allocation2 + $0x88] sm:$0xff]   ;;  %v4054_v23 = vld [vmem:[#allocation2 + $0x90] sm:$0xff]  }
  0xe6   : > { %v4419_v26 = vpack.c.bf16 %v639_v24, %v638_v25 }
  0xe7   : > { %v585_v31 = vpop.permute.xlu1 %584  ;;  %v580_v32 = vpop.permute.xlu0 %579 }
  0xe8   : > { %v602_v33 = vadd.f32 %v585_v31, %v490_v27  ;;  %v601_v34 = vadd.f32 %v580_v32, %v489_v28  ;;  %825 = vrot.lane.b32.xlu1 %v4419_v26, %s4149_s13  ;;  %712 = vrot.lane.b32.xlu0 %v4419_v26, %s4150_s14  ;;  %v4055_v27 = vld [vmem:[#allocation2 + $0x18] sm:$0xff]   ;;  %v4058_v32 = vld [vmem:[#allocation2 + $0xc0] sm:$0xff]  }
  0xe9   : > { %v4056_v28 = vld [vmem:[#allocation2 + $0x98] sm:$0xff]  }
  0xea   : > { %v618_v35 = vmax.f32 %v602_v33, 0.0  ;;  %v617_v36 = vmax.f32 %v601_v34, 0.0 }
  0xec   : > { %v641_v37 = vmul.f32 %v4361_v48, %v618_v35  ;;  %v640_v39 = vmul.f32 %v4361_v48, %v617_v36 }
  0xee   : > { %v4427_v40 = vpack.c.bf16 %v641_v37, %v640_v39 }
  0xf0   : > { %827 = vrot.lane.b32.xlu1 %v4427_v40, %s4149_s13  ;;  %714 = vrot.lane.b32.xlu0 %v4427_v40, %s4150_s14 }
  0xf4   : > { %1399 = vrot.lane.b32.xlu1 %v4374_v6, %s4151_s15  ;;  %1397 = vrot.lane.b32.xlu0 %v4366_v59, %s4151_s15 }
  0xf8   : > { %1403 = vrot.lane.b32.xlu1 %v4392_v38, %s4151_s15  ;;  %1401 = vrot.lane.b32.xlu0 %v4383_v22, %s4151_s15 }
  0xfc   : > { %1407 = vrot.lane.b32.xlu1 %v4410_v9, %s4151_s15  ;;  %1405 = vrot.lane.b32.xlu0 %v4401_v55, %s4151_s15 }
 0x100   : > { %1411 = vrot.lane.b32.xlu1 %v4427_v40, %s4151_s15  ;;  %1409 = vrot.lane.b32.xlu0 %v4419_v26, %s4151_s15 }
 0x104   : > { %1519 = vrot.lane.b32.xlu1 %v4366_v59, %s4152_s16  ;;  %935 = vrot.lane.b32.xlu0 %v4366_v59, %s4153_s17 }
 0x108   : > { %1521 = vrot.lane.b32.xlu1 %v4374_v6, %s4152_s16  ;;  %937 = vrot.lane.b32.xlu0 %v4374_v6, %s4153_s17 }
 0x10c   : > { %1523 = vrot.lane.b32.xlu1 %v4383_v22, %s4152_s16  ;;  %939 = vrot.lane.b32.xlu0 %v4383_v22, %s4153_s17 }
 0x110   : > { %1525 = vrot.lane.b32.xlu1 %v4392_v38, %s4152_s16  ;;  %941 = vrot.lane.b32.xlu0 %v4392_v38, %s4153_s17 }
 0x114   : > { %1527 = vrot.lane.b32.xlu1 %v4401_v55, %s4152_s16  ;;  %943 = vrot.lane.b32.xlu0 %v4401_v55, %s4153_s17 }
 0x118   : > { %1529 = vrot.lane.b32.xlu1 %v4410_v9, %s4152_s16  ;;  %945 = vrot.lane.b32.xlu0 %v4410_v9, %s4153_s17 }
 0x11c   : > { %1531 = vrot.lane.b32.xlu1 %v4419_v26, %s4152_s16  ;;  %947 = vrot.lane.b32.xlu0 %v4419_v26, %s4153_s17 }
 0x120   : > { %1533 = vrot.lane.b32.xlu1 %v4427_v40, %s4152_s16  ;;  %949 = vrot.lane.b32.xlu0 %v4427_v40, %s4153_s17 }
 0x124   : > { %1998 = vrot.lane.b32.xlu1 %v4366_v59, %s4154_s18  ;;  %1885 = vrot.lane.b32.xlu0 %v4366_v59, %s4155_s19 }
 0x128   : > { %2000 = vrot.lane.b32.xlu1 %v4374_v6, %s4154_s18  ;;  %1887 = vrot.lane.b32.xlu0 %v4374_v6, %s4155_s19 }
 0x12c   : > { %2002 = vrot.lane.b32.xlu1 %v4383_v22, %s4154_s18  ;;  %v4467_v48 = vpop.permute.xlu1 %813  ;;  %1889 = vrot.lane.b32.xlu0 %v4383_v22, %s4155_s19  ;;  %v4471_v41 = vpop.permute.xlu0 %700 }
 0x12d   : > { %3529 = vmatprep.subr.bf16.mxu0 %v4471_v41  ;;  %3625 = vmatprep.subr.bf16.mxu1 %v4467_v48 }
 0x12e   : > { %3530 = vmatpush3.bf16.msra.mxu0 %v4471_v41  ;;  %3626 = vmatpush3.bf16.msra.mxu1 %v4467_v48 }
 0x130   : > { %2004 = vrot.lane.b32.xlu1 %v4392_v38, %s4154_s18  ;;  %1891 = vrot.lane.b32.xlu0 %v4392_v38, %s4155_s19 }
 0x132   : > { %v4481_v42 = vpop.permute.xlu1 %815  ;;  %v4483_v43 = vpop.permute.xlu0 %702 }
 0x133   : > { %3531 = vmatprep.subr.bf16.mxu0 %v4483_v43  ;;  %3627 = vmatprep.subr.bf16.mxu1 %v4481_v42 }
 0x134   : > { %2006 = vrot.lane.b32.xlu1 %v4401_v55, %s4154_s18  ;;  %3628 = vmatpush3.bf16.msra.mxu1 %v4481_v42 }
 0x135   : > { %1893 = vrot.lane.b32.xlu0 %v4401_v55, %s4155_s19  ;;  %3532 = vmatpush3.bf16.msra.mxu0 %v4483_v43 }
 0x138   : > { %2008 = vrot.lane.b32.xlu1 %v4410_v9, %s4154_s18 }
 0x139   : > { %1895 = vrot.lane.b32.xlu0 %v4410_v9, %s4155_s19 }
 0x13a   : > { %v4497_v44 = vpop.permute.xlu1 %817  ;;  %v4499_v45 = vpop.permute.xlu0 %704 }
 0x13b   : > { %3533 = vmatprep.subr.bf16.mxu0 %v4499_v45  ;;  %3629 = vmatprep.subr.bf16.mxu1 %v4497_v44 }
 0x13c   : > { %2010 = vrot.lane.b32.xlu1 %v4419_v26, %s4154_s18  ;;  %3630 = vmatpush3.bf16.msra.mxu1 %v4497_v44 }
 0x13d   : > { %1897 = vrot.lane.b32.xlu0 %v4419_v26, %s4155_s19  ;;  %3534 = vmatpush3.bf16.msra.mxu0 %v4499_v45 }
 0x140   : > { %2012 = vrot.lane.b32.xlu1 %v4427_v40, %s4154_s18 }
 0x141   : > { %1899 = vrot.lane.b32.xlu0 %v4427_v40, %s4155_s19 }
 0x142   : > { %v4513_v46 = vpop.permute.xlu1 %819  ;;  %v4515_v47 = vpop.permute.xlu0 %706 }
 0x143   : > { %3535 = vmatprep.subr.bf16.mxu0 %v4515_v47  ;;  %3631 = vmatprep.subr.bf16.mxu1 %v4513_v46 }
 0x144   : > { %2553 = vrot.lane.b32.xlu1 %v4374_v6, %s4156_s20  ;;  %3632 = vmatpush3.bf16.msra.mxu1 %v4513_v46 }
 0x145   : > { %2551 = vrot.lane.b32.xlu0 %v4366_v59, %s4156_s20  ;;  %3536 = vmatpush3.bf16.msra.mxu0 %v4515_v47 }
 0x148   : > { %2557 = vrot.lane.b32.xlu1 %v4392_v38, %s4156_s20 }
 0x149   : > { %2555 = vrot.lane.b32.xlu0 %v4383_v22, %s4156_s20 }
 0x14a   : > { %v4525_v49 = vpop.permute.xlu1 %821  ;;  %v4527_v50 = vpop.permute.xlu0 %708 }
 0x14b   : > { %3537 = vmatprep.subr.bf16.mxu0 %v4527_v50  ;;  %3633 = vmatprep.subr.bf16.mxu1 %v4525_v49 }
 0x14c   : > { %2561 = vrot.lane.b32.xlu1 %v4410_v9, %s4156_s20  ;;  %3634 = vmatpush3.bf16.msra.mxu1 %v4525_v49 }
 0x14d   : > { %2559 = vrot.lane.b32.xlu0 %v4401_v55, %s4156_s20  ;;  %3538 = vmatpush3.bf16.msra.mxu0 %v4527_v50 }
 0x150   : > { %2565 = vrot.lane.b32.xlu1 %v4427_v40, %s4156_s20 }
 0x151   : > { %2563 = vrot.lane.b32.xlu0 %v4419_v26, %s4156_s20 }
 0x152   : > { %v4537_v51 = vpop.permute.xlu1 %823  ;;  %v4539_v52 = vpop.permute.xlu0 %710 }
 0x153   : > { %3539 = vmatprep.subr.bf16.mxu0 %v4539_v52  ;;  %3635 = vmatprep.subr.bf16.mxu1 %v4537_v51 }
 0x154   : > { %3540 = vmatpush3.bf16.msra.mxu0 %v4539_v52  ;;  %3636 = vmatpush3.bf16.msra.mxu1 %v4537_v51 }
 0x15a   : > { %v4545_v53 = vpop.permute.xlu1 %825  ;;  %v4547_v54 = vpop.permute.xlu0 %712 }
 0x15b   : > { %3541 = vmatprep.subr.bf16.mxu0 %v4547_v54  ;;  %3637 = vmatprep.subr.bf16.mxu1 %v4545_v53 }
 0x15c   : > { %3542 = vmatpush3.bf16.msra.mxu0 %v4547_v54  ;;  %3638 = vmatpush3.bf16.msra.mxu1 %v4545_v53 }
 0x162   : > { %v4553_v56 = vpop.permute.xlu1 %827  ;;  %v4555_v57 = vpop.permute.xlu0 %714 }
 0x163   : > { %3543 = vmatprep.subr.bf16.mxu0 %v4555_v57  ;;  %3639 = vmatprep.subr.bf16.mxu1 %v4553_v56 }
 0x164   : > { %3544 = vmatpush3.bf16.msra.mxu0 %v4555_v57  ;;  %3640 = vmatpush3.bf16.msra.mxu1 %v4553_v56 }
 0x165   : > { %3553 = vmatprep.subr.bf16.mxu0 %v4467_v48 }
 0x166   : > { %v4562_v61 = vpop.permute.xlu1 %1399  ;;  %v4564_v62 = vpop.permute.xlu0 %1397 }
 0x167   : > { %3649 = vmatprep.subr.bf16.mxu1 %v4564_v62  ;;  %3546 = vmatmul.mubr.bf16.vlgmr.msra.gmra.mrb[0].mxu0 %v4043_v58  ;;  %v4059_v58 = vld [vmem:[#allocation2 + $0x48] sm:$0xff]  }
 0x168   : > { %3554 = vmatpush3.bf16.msra.mxu0 %v4467_v48  ;;  %3642 = vmatmul.mubr.bf16.vlgmr.msra.gmra.mrb[0].mxu1 %v4044_v60  ;;  %v4060_v60 = vld [vmem:[#allocation2 + $0xc8] sm:$0xff]  }
 0x169   : > { %3650 = vmatpush3.bf16.msra.mxu1 %v4564_v62  ;;  %3555 = vmatprep.subr.bf16.mxu0 %v4481_v42 }
 0x16a   : > { %3651 = vmatprep.subr.bf16.mxu1 %v4562_v61  ;;  %v4571_v1 = vpop.permute.xlu1 %1403  ;;  %v4573_v2 = vpop.permute.xlu0 %1401  ;;  %3549 = vmatprep.mubr.bf16.mxu0 %v4045_v63  ;;  %v4061_v63 = vld [vmem:[#allocation2 + $0x50] sm:$0xff]  }
 0x16b   : > { %3645 = vmatprep.mubr.bf16.mxu1 %v4046_v0  ;;  %v4062_v0 = vld [vmem:[#allocation2 + $0xd0] sm:$0xff]  }
 0x16c   : > { %3556 = vmatpush3.bf16.msra.mxu0 %v4481_v42 }
 0x16d   : > { %3652 = vmatpush3.bf16.msra.mxu1 %v4562_v61  ;;  %3557 = vmatprep.subr.bf16.mxu0 %v4497_v44 }
 0x16e   : > { %3653 = vmatprep.subr.bf16.mxu1 %v4573_v2  ;;  %v4579_v5 = vpop.permute.xlu1 %1407  ;;  %v4581_v7 = vpop.permute.xlu0 %1405 }
 0x16f   : > { %3550 = vmatmul.mubr.bf16.gmra.mrb[4].mxu0 %v4047_v3  ;;  %v4063_v3 = vld [vmem:[#allocation2 + $0x58] sm:$0xff]  }
 0x170   : > { %3558 = vmatpush3.bf16.msra.mxu0 %v4497_v44  ;;  %3646 = vmatmul.mubr.bf16.gmra.mrb[4].mxu1 %v4048_v4  ;;  %v4064_v4 = vld [vmem:[#allocation2 + $0xd8] sm:$0xff]  }
 0x171   : > { %3654 = vmatpush3.bf16.msra.mxu1 %v4573_v2  ;;  %3559 = vmatprep.subr.bf16.mxu0 %v4513_v46 }
 0x172   : > { %3655 = vmatprep.subr.bf16.mxu1 %v4571_v1  ;;  %v4587_v11 = vpop.permute.xlu1 %1411  ;;  %v4589_v12 = vpop.permute.xlu0 %1409  ;;  %3569 = vmatprep.mubr.bf16.mxu0 %v4049_v8  ;;  %v4066_v8 = vld [vmem:[#allocation2 + $0xe0] sm:$0xff]  }
 0x173   : > { %3665 = vmatprep.mubr.bf16.mxu1 %v4050_v10 }
 0x174   : > { %3560 = vmatpush3.bf16.msra.mxu0 %v4513_v46 }
 0x175   : > { %3656 = vmatpush3.bf16.msra.mxu1 %v4571_v1  ;;  %3561 = vmatprep.subr.bf16.mxu0 %v4525_v49 }
 0x176   : > { %3657 = vmatprep.subr.bf16.mxu1 %v4581_v7  ;;  %v4595_v13 = vpop.permute.xlu0 %935  ;;  %v1520_v14 = vpop.permute.xlu1 %1519 }
 0x178   : > { %3562 = vmatpush3.bf16.msra.mxu0 %v4525_v49 }
 0x179   : > { %3658 = vmatpush3.bf16.msra.mxu1 %v4581_v7  ;;  %3563 = vmatprep.subr.bf16.mxu0 %v4537_v51 }
 0x17a   : > { %3659 = vmatprep.subr.bf16.mxu1 %v4579_v5  ;;  %v4601_v15 = vpop.permute.xlu0 %937  ;;  %v1522_v16 = vpop.permute.xlu1 %1521 }
 0x17c   : > { %3564 = vmatpush3.bf16.msra.mxu0 %v4537_v51 }
 0x17d   : > { %3660 = vmatpush3.bf16.msra.mxu1 %v4579_v5  ;;  %3565 = vmatprep.subr.bf16.mxu0 %v4545_v53 }
 0x17e   : > { %3661 = vmatprep.subr.bf16.mxu1 %v4589_v12  ;;  %v4610_v17 = vpop.permute.xlu0 %939  ;;  %v1524_v18 = vpop.permute.xlu1 %1523 }
 0x180   : > { %3566 = vmatpush3.bf16.msra.mxu0 %v4545_v53 }
 0x181   : > { %3662 = vmatpush3.bf16.msra.mxu1 %v4589_v12  ;;  %3567 = vmatprep.subr.bf16.mxu0 %v4553_v56 }
 0x182   : > { %3663 = vmatprep.subr.bf16.mxu1 %v4587_v11  ;;  %v4616_v24 = vpop.permute.xlu0 %941  ;;  %v1526_v25 = vpop.permute.xlu1 %1525 }
 0x184   : > { %3568 = vmatpush3.bf16.msra.mxu0 %v4553_v56 }
 0x185   : > { %3664 = vmatpush3.bf16.msra.mxu1 %v4587_v11  ;;  %3577 = vmatprep.subr.bf16.mxu0 %v4595_v13 }
 0x186   : > { %3673 = vmatprep.subr.bf16.mxu1 %v1520_v14  ;;  %v4622_v29 = vpop.permute.xlu0 %943  ;;  %v1528_v31 = vpop.permute.xlu1 %1527 }
 0x187   : > { %3570 = vmatmul.mubr.bf16.vlgmr.msra.gmra.mrb[0].mxu0 %v4051_v19 }
 0x188   : > { %3578 = vmatpush3.bf16.msra.mxu0 %v4595_v13  ;;  %3666 = vmatmul.mubr.bf16.vlgmr.msra.gmra.mrb[0].mxu1 %v4052_v20  ;;  %v4073_v20 = vld [vmem:[#allocation2 + $0x120] sm:$0xff]  }
 0x189   : > { %3674 = vmatpush3.bf16.msra.mxu1 %v1520_v14  ;;  %3579 = vmatprep.subr.bf16.mxu0 %v4601_v15  ;;  %v4067_v14 = vld [vmem:[#allocation2 + $0x68] sm:$0xff]  }
 0x18a   : > { %3675 = vmatprep.subr.bf16.mxu1 %v1522_v16  ;;  %3573 = vmatprep.mubr.bf16.mxu0 %v4053_v21  ;;  %v4626_v33 = vpop.permute.xlu0 %945  ;;  %v1530_v34 = vpop.permute.xlu1 %1529 }
 0x18b   : > { %3669 = vmatprep.mubr.bf16.mxu1 %v4054_v23  ;;  %v4074_v23 = vld [vmem:[#allocation2 + $0x1a0] sm:$0xff]  }
 0x18c   : > { %3580 = vmatpush3.bf16.msra.mxu0 %v4601_v15 }
 0x18d   : > { %3676 = vmatpush3.bf16.msra.mxu1 %v1522_v16  ;;  %3581 = vmatprep.subr.bf16.mxu0 %v4610_v17 }
 0x18e   : > { %3677 = vmatprep.subr.bf16.mxu1 %v1524_v18  ;;  %v948_v35 = vpop.permute.xlu0 %947  ;;  %v1532_v36 = vpop.permute.xlu1 %1531 }
 0x18f   : > { %3574 = vmatmul.mubr.bf16.gmra.mrb[4].mxu0 %v4055_v27 }
 0x190   : > { %3582 = vmatpush3.bf16.msra.mxu0 %v4610_v17  ;;  %3670 = vmatmul.mubr.bf16.gmra.mrb[4].mxu1 %v4056_v28 }
 0x191   : > { %3678 = vmatpush3.bf16.msra.mxu1 %v1524_v18  ;;  %3583 = vmatprep.subr.bf16.mxu0 %v4616_v24  ;;  %v4072_v18 = vld [vmem:[#allocation2 + $0xf8] sm:$0xff]  }
 0x192   : > { %3679 = vmatprep.subr.bf16.mxu1 %v1526_v25  ;;  %3593 = vmatprep.mubr.bf16.mxu0 %v4057_v30  ;;  %v950_v37 = vpop.permute.xlu0 %949  ;;  %v1534_v39 = vpop.permute.xlu1 %1533 }
 0x193   : > { %3689 = vmatprep.mubr.bf16.mxu1 %v4058_v32  ;;  %v4076_v32 = vld [vmem:[#allocation2 + $0x1a8] sm:$0xff]  }
 0x194   : > { %3584 = vmatpush3.bf16.msra.mxu0 %v4616_v24 }
 0x195   : > { %3680 = vmatpush3.bf16.msra.mxu1 %v1526_v25  ;;  %3585 = vmatprep.subr.bf16.mxu0 %v4622_v29 }
 0x196   : > { %3681 = vmatprep.subr.bf16.mxu1 %v1528_v31  ;;  %v4651_v10 = vpop.permute.xlu1 %1998 }
 0x198   : > { %3586 = vmatpush3.bf16.msra.mxu0 %v4622_v29 }
 0x199   : > { %3682 = vmatpush3.bf16.msra.mxu1 %v1528_v31  ;;  %3587 = vmatprep.subr.bf16.mxu0 %v4626_v33  ;;  %v4075_v31 = vld [vmem:[#allocation2 + $0x128] sm:$0xff]  }
 0x19a   : > { %3683 = vmatprep.subr.bf16.mxu1 %v1530_v34 }
 0x19c   : > { %3588 = vmatpush3.bf16.msra.mxu0 %v4626_v33 }
 0x19d   : > { %3684 = vmatpush3.bf16.msra.mxu1 %v1530_v34  ;;  %3589 = vmatprep.subr.bf16.mxu0 %v948_v35  ;;  %v4077_v34 = vld [vmem:[#allocation2 + $0x130] sm:$0xff]  }
 0x19e   : > { %3685 = vmatprep.subr.bf16.mxu1 %v1532_v36 }
 0x1a0   : > { %3590 = vmatpush3.bf16.msra.mxu0 %v948_v35 }
 0x1a1   : > { %3686 = vmatpush3.bf16.msra.mxu1 %v1532_v36  ;;  %3591 = vmatprep.subr.bf16.mxu0 %v950_v37 }
 0x1a2   : > { %3687 = vmatprep.subr.bf16.mxu1 %v1534_v39 }
 0x1a4   : > { %3592 = vmatpush3.bf16.msra.mxu0 %v950_v37 }
 0x1a5   : > { %3688 = vmatpush3.bf16.msra.mxu1 %v1534_v39  ;;  %3601 = vmatprep.subr.bf16.mxu0 %v4366_v59  ;;  %v4080_v39 = vld [vmem:[#allocation2 + $0x1b8] sm:$0xff]  }
 0x1a6   : > { %3697 = vmatprep.subr.bf16.mxu1 %v4595_v13 }
 0x1a7   : > { %3594 = vmatmul.mubr.bf16.vlgmr.msra.gmra.mrb[0].mxu0 %v4059_v58 }
 0x1a8   : > { %3602 = vmatpush3.bf16.msra.mxu0 %v4366_v59  ;;  %3690 = vmatmul.mubr.bf16.vlgmr.msra.gmra.mrb[0].mxu1 %v4060_v60  ;;  %v4065_v59 = vld [vmem:[#allocation2 + $0x60] sm:$0xff]  }
 0x1a9   : > { %3698 = vmatpush3.bf16.msra.mxu1 %v4595_v13  ;;  %3603 = vmatprep.subr.bf16.mxu0 %v4374_v6  ;;  %v4081_v60 = vld [vmem:[#allocation2 + $0x100] sm:$0xff]  }
 0x1aa   : > { %3699 = vmatprep.subr.bf16.mxu1 %v4601_v15  ;;  %3597 = vmatprep.mubr.bf16.mxu0 %v4061_v63  ;;  %v4082_v63 = vld [vmem:[#allocation2 + $0x180] sm:$0xff]  }
 0x1ab   : > { %3693 = vmatprep.mubr.bf16.mxu1 %v4062_v0 }
 0x1ac   : > { %3604 = vmatpush3.bf16.msra.mxu0 %v4374_v6  ;;  %v1886_v6 = vpop.permute.xlu0 %1885 }
 0x1ad   : > { %3700 = vmatpush3.bf16.msra.mxu1 %v4601_v15  ;;  %3605 = vmatprep.subr.bf16.mxu0 %v4383_v22  ;;  %v4069_v15 = vld [vmem:[#allocation2 + $0x70] sm:$0xff]  }
 0x1ae   : > { %3701 = vmatprep.subr.bf16.mxu1 %v4610_v17 }
 0x1af   : > { %3598 = vmatmul.mubr.bf16.gmra.mrb[4].mxu0 %v4063_v3 }
 0x1b0   : > { %3606 = vmatpush3.bf16.msra.mxu0 %v4383_v22  ;;  %3694 = vmatmul.mubr.bf16.gmra.mrb[4].mxu1 %v4064_v4  ;;  %v1888_v22 = vpop.permute.xlu0 %1887 }
 0x1b1   : > { %3702 = vmatpush3.bf16.msra.mxu1 %v4610_v17  ;;  %3607 = vmatprep.subr.bf16.mxu0 %v4392_v38  ;;  %v4070_v17 = vld [vmem:[#allocation2 + $0xf0] sm:$0xff]  }
 0x1b2   : > { %3703 = vmatprep.subr.bf16.mxu1 %v4616_v24  ;;  %3617 = vmatprep.mubr.bf16.mxu0 %v4065_v59 }
 0x1b3   : > { %3713 = vmatprep.mubr.bf16.mxu1 %v4066_v8 }
 0x1b4   : > { %3608 = vmatpush3.bf16.msra.mxu0 %v4392_v38  ;;  %v4658_v38 = vpop.permute.xlu1 %2000  ;;  %v1890_v13 = vpop.permute.xlu0 %1889 }
 0x1b5   : > { %3704 = vmatpush3.bf16.msra.mxu1 %v4616_v24  ;;  %3609 = vmatprep.subr.bf16.mxu0 %v4401_v55 }
 0x1b6   : > { %3705 = vmatprep.subr.bf16.mxu1 %v4622_v29 }
 0x1b8   : > { %3610 = vmatpush3.bf16.msra.mxu0 %v4401_v55  ;;  %v4664_v55 = vpop.permute.xlu1 %2002  ;;  %v1892_v16 = vpop.permute.xlu0 %1891 }
 0x1b9   : > { %3706 = vmatpush3.bf16.msra.mxu1 %v4622_v29  ;;  %3611 = vmatprep.subr.bf16.mxu0 %v4410_v9 }
 0x1ba   : > { %3707 = vmatprep.subr.bf16.mxu1 %v4626_v33 }
 0x1bc   : > { %3612 = vmatpush3.bf16.msra.mxu0 %v4410_v9  ;;  %v4068_v9 = vld [vmem:[#allocation2 + $0xe8] sm:$0xff]   ;;  %v1894_v19 = vpop.permute.xlu0 %1893 }
 0x1bd   : > { %3708 = vmatpush3.bf16.msra.mxu1 %v4626_v33  ;;  %3613 = vmatprep.subr.bf16.mxu0 %v4419_v26 }
 0x1be   : > { %3709 = vmatprep.subr.bf16.mxu1 %v948_v35 }
 0x1c0   : > { %3614 = vmatpush3.bf16.msra.mxu0 %v4419_v26  ;;  %v4668_v26 = vpop.permute.xlu1 %2004  ;;  %v1896_v24 = vpop.permute.xlu0 %1895 }
 0x1c1   : > { %3710 = vmatpush3.bf16.msra.mxu1 %v948_v35  ;;  %3615 = vmatprep.subr.bf16.mxu0 %v4427_v40  ;;  %v4078_v35 = vld [vmem:[#allocation2 + $0x1b0] sm:$0xff]  }
 0x1c2   : > { %3711 = vmatprep.subr.bf16.mxu1 %v950_v37 }
 0x1c4   : > { %3616 = vmatpush3.bf16.msra.mxu0 %v4427_v40  ;;  %v4071_v40 = vld [vmem:[#allocation2 + $0x78] sm:$0xff]   ;;  %v4674_v21 = vpop.permute.xlu1 %2006  ;;  %v1898_v27 = vpop.permute.xlu0 %1897 }
 0x1c5   : > { %3712 = vmatpush3.bf16.msra.mxu1 %v950_v37  ;;  %3721 = vmatprep.subr.bf16.mxu0 %v1886_v6  ;;  %v4079_v37 = vld [vmem:[#allocation2 + $0x138] sm:$0xff]  }
 0x1c6   : > { %3817 = vmatprep.subr.bf16.mxu1 %v4651_v10 }
 0x1c7   : > { %3618 = vmatmul.mubr.bf16.vlgmr.msra.gmra.mrb[0].mxu0 %v4067_v14  ;;  %v4089_v14 = vld [vmem:[#allocation2 + $0x140] sm:$0xff]  }
 0x1c8   : > { %3714 = vmatmul.mubr.bf16.vlgmr.msra.gmra.mrb[0].mxu1 %v4068_v9  ;;  %3722 = vmatpush3.bf16.msra.mxu0 %v1886_v6  ;;  %v4678_v25 = vpop.permute.xlu1 %2008  ;;  %v1900_v29 = vpop.permute.xlu0 %1899  ;;  %v4083_v6 = vld [vmem:[#allocation2 + $0x108] sm:$0xff]   ;;  %v4090_v9 = vld [vmem:[#allocation2 + $0x1c0] sm:$0xff]  }
 0x1c9   : > { %3818 = vmatpush3.bf16.msra.mxu1 %v4651_v10  ;;  %3723 = vmatprep.subr.bf16.mxu0 %v1888_v22 }
 0x1ca   : > { %3819 = vmatprep.subr.bf16.mxu1 %v4658_v38  ;;  %3621 = vmatprep.mubr.bf16.mxu0 %v4069_v15 }
 0x1cb   : > { %3717 = vmatprep.mubr.bf16.mxu1 %v4070_v17 }
 0x1cc   : > { %3724 = vmatpush3.bf16.msra.mxu0 %v1888_v22  ;;  %v2011_v28 = vpop.permute.xlu1 %2010  ;;  %v2552_v33 = vpop.permute.xlu0 %2551  ;;  %v4085_v22 = vld [vmem:[#allocation2 + $0x110] sm:$0xff]  }
 0x1cd   : > { %3820 = vmatpush3.bf16.msra.mxu1 %v4658_v38  ;;  %3725 = vmatprep.subr.bf16.mxu0 %v1890_v13 }
 0x1ce   : > { %3821 = vmatprep.subr.bf16.mxu1 %v4664_v55 }
 0x1cf   : > { %3622 = vmatmul.mubr.bf16.gmra.mrb[4].mxu0 %v4071_v40 }
 0x1d0   : > { %3718 = vmatmul.mubr.bf16.gmra.mrb[4].mxu1 %v4072_v18  ;;  %3726 = vmatpush3.bf16.msra.mxu0 %v1890_v13  ;;  %v2013_v30 = vpop.permute.xlu1 %2012  ;;  %v2556_v58 = vpop.permute.xlu0 %2555  ;;  %v4087_v13 = vld [vmem:[#allocation2 + $0x118] sm:$0xff]  }
 0x1d1   : > { %3822 = vmatpush3.bf16.msra.mxu1 %v4664_v55  ;;  %3727 = vmatprep.subr.bf16.mxu0 %v1892_v16 }
 0x1d2   : > { %3823 = vmatprep.subr.bf16.mxu1 %v4668_v26  ;;  %3737 = vmatprep.mubr.bf16.mxu0 %v4073_v20 }
 0x1d3   : > { %3833 = vmatprep.mubr.bf16.mxu1 %v4074_v23 }
 0x1d4   : > { %3728 = vmatpush3.bf16.msra.mxu0 %v1892_v16  ;;  %v2554_v36 = vpop.permute.xlu1 %2553  ;;  %v2560_v3 = vpop.permute.xlu0 %2559 }
 0x1d5   : > { %3824 = vmatpush3.bf16.msra.mxu1 %v4668_v26  ;;  %3729 = vmatprep.subr.bf16.mxu0 %v1894_v19 }
 0x1d6   : > { %3825 = vmatprep.subr.bf16.mxu1 %v4674_v21 }
 0x1d8   : > { %3730 = vmatpush3.bf16.msra.mxu0 %v1894_v19  ;;  %v2558_v0 = vpop.permute.xlu1 %2557  ;;  %v2564_v59 = vpop.permute.xlu0 %2563 }
 0x1d9   : > { %3826 = vmatpush3.bf16.msra.mxu1 %v4674_v21  ;;  %3731 = vmatprep.subr.bf16.mxu0 %v1896_v24 }
 0x1da   : > { %3827 = vmatprep.subr.bf16.mxu1 %v4678_v25 }
 0x1dc   : > { %3732 = vmatpush3.bf16.msra.mxu0 %v1896_v24  ;;  %v2562_v4 = vpop.permute.xlu1 %2561 }
 0x1dd   : > { %3828 = vmatpush3.bf16.msra.mxu1 %v4678_v25  ;;  %3733 = vmatprep.subr.bf16.mxu0 %v1898_v27 }
 0x1de   : > { %3829 = vmatprep.subr.bf16.mxu1 %v2011_v28 }
 0x1e0   : > { %3734 = vmatpush3.bf16.msra.mxu0 %v1898_v27  ;;  %v2566_v8 = vpop.permute.xlu1 %2565 }
 0x1e1   : > { %3830 = vmatpush3.bf16.msra.mxu1 %v2011_v28  ;;  %3735 = vmatprep.subr.bf16.mxu0 %v1900_v29 }
 0x1e2   : > { %3831 = vmatprep.subr.bf16.mxu1 %v2013_v30 }
 0x1e4   : > { %3736 = vmatpush3.bf16.msra.mxu0 %v1900_v29 }
 0x1e5   : > { %3832 = vmatpush3.bf16.msra.mxu1 %v2013_v30  ;;  %3745 = vmatprep.subr.bf16.mxu0 %v4651_v10 }
 0x1e6   : > { %3841 = vmatprep.subr.bf16.mxu1 %v2552_v33 }
 0x1e7   : > { %3738 = vmatmul.mubr.bf16.vlgmr.msra.gmra.mrb[8].mxu0 %v4075_v31 }
 0x1e8   : > { %3746 = vmatpush3.bf16.msra.mxu0 %v4651_v10  ;;  %3834 = vmatmul.mubr.bf16.vlgmr.msra.gmra.mrb[8].mxu1 %v4076_v32  ;;  %v4084_v10 = vld [vmem:[#allocation2 + $0x188] sm:$0xff]  }
 0x1e9   : > { %3842 = vmatpush3.bf16.msra.mxu1 %v2552_v33  ;;  %3747 = vmatprep.subr.bf16.mxu0 %v4658_v38 }
 0x1ea   : > { %3843 = vmatprep.subr.bf16.mxu1 %v2554_v36  ;;  %3741 = vmatprep.mubr.bf16.mxu0 %v4077_v34 }
 0x1eb   : > { %3837 = vmatprep.mubr.bf16.mxu1 %v4078_v35 }
 0x1ec   : > { %3748 = vmatpush3.bf16.msra.mxu0 %v4658_v38  ;;  %v4086_v38 = vld [vmem:[#allocation2 + $0x190] sm:$0xff]  }
 0x1ed   : > { %3844 = vmatpush3.bf16.msra.mxu1 %v2554_v36  ;;  %3749 = vmatprep.subr.bf16.mxu0 %v4664_v55 }
 0x1ee   : > { %3845 = vmatprep.subr.bf16.mxu1 %v2556_v58 }
 0x1ef   : > { %3742 = vmatmul.mubr.bf16.gmra.mrb[12].mxu0 %v4079_v37 }
 0x1f0   : > { %3750 = vmatpush3.bf16.msra.mxu0 %v4664_v55  ;;  %3838 = vmatmul.mubr.bf16.gmra.mrb[12].mxu1 %v4080_v39  ;;  %v4088_v55 = vld [vmem:[#allocation2 + $0x198] sm:$0xff]  }
 0x1f1   : > { %3846 = vmatpush3.bf16.msra.mxu1 %v2556_v58  ;;  %3751 = vmatprep.subr.bf16.mxu0 %v4668_v26 }
 0x1f2   : > { %3847 = vmatprep.subr.bf16.mxu1 %v2558_v0  ;;  %3761 = vmatprep.mubr.bf16.mxu0 %v4081_v60 }
 0x1f3   : > { %3857 = vmatprep.mubr.bf16.mxu1 %v4082_v63 }
 0x1f4   : > { %3752 = vmatpush3.bf16.msra.mxu0 %v4668_v26 }
 0x1f5   : > { %3848 = vmatpush3.bf16.msra.mxu1 %v2558_v0  ;;  %3753 = vmatprep.subr.bf16.mxu0 %v4674_v21 }
 0x1f6   : > { %3849 = vmatprep.subr.bf16.mxu1 %v2560_v3 }
 0x1f8   : > { %3754 = vmatpush3.bf16.msra.mxu0 %v4674_v21 }
 0x1f9   : > { %3850 = vmatpush3.bf16.msra.mxu1 %v2560_v3  ;;  %3755 = vmatprep.subr.bf16.mxu0 %v4678_v25 }
 0x1fa   : > { %3851 = vmatprep.subr.bf16.mxu1 %v2562_v4 }
 0x1fc   : > { %3756 = vmatpush3.bf16.msra.mxu0 %v4678_v25 }
 0x1fd   : > { %3852 = vmatpush3.bf16.msra.mxu1 %v2562_v4  ;;  %3757 = vmatprep.subr.bf16.mxu0 %v2011_v28 }
 0x1fe   : > { %3853 = vmatprep.subr.bf16.mxu1 %v2564_v59 }
 0x200   : > { %3758 = vmatpush3.bf16.msra.mxu0 %v2011_v28 }
 0x201   : > { %3854 = vmatpush3.bf16.msra.mxu1 %v2564_v59  ;;  %3759 = vmatprep.subr.bf16.mxu0 %v2013_v30 }
 0x202   : > { %3855 = vmatprep.subr.bf16.mxu1 %v2566_v8 }
 0x204   : > { %3760 = vmatpush3.bf16.msra.mxu0 %v2013_v30 }
 0x205   : > { %3856 = vmatpush3.bf16.msra.mxu1 %v2566_v8  ;;  %3769 = vmatprep.subr.bf16.mxu0 %v4467_v48 }
 0x206   : > { %3865 = vmatprep.subr.bf16.mxu1 %v4564_v62 }
 0x207   : > { %3762 = vmatmul.mubr.bf16.vlgmr.msra.gmra.mrb[8].mxu0 %v4083_v6 }
 0x208   : > { %3770 = vmatpush3.bf16.msra.mxu0 %v4467_v48  ;;  %3858 = vmatmul.mubr.bf16.vlgmr.msra.gmra.mrb[8].mxu1 %v4084_v10 }
 0x209   : > { %3866 = vmatpush3.bf16.msra.mxu1 %v4564_v62  ;;  %3771 = vmatprep.subr.bf16.mxu0 %v4481_v42  ;;  %v4092_v62 = vld [vmem:[#allocation2 + $0x1c8] sm:$0xff]  }
 0x20a   : > { %3867 = vmatprep.subr.bf16.mxu1 %v4562_v61  ;;  %3765 = vmatprep.mubr.bf16.mxu0 %v4085_v22 }
 0x20b   : > { %3861 = vmatprep.mubr.bf16.mxu1 %v4086_v38 }
 0x20c   : > { %3772 = vmatpush3.bf16.msra.mxu0 %v4481_v42 }
 0x20d   : > { %3868 = vmatpush3.bf16.msra.mxu1 %v4562_v61  ;;  %3773 = vmatprep.subr.bf16.mxu0 %v4497_v44  ;;  %v4091_v61 = vld [vmem:[#allocation2 + $0x148] sm:$0xff]  }
 0x20e   : > { %3869 = vmatprep.subr.bf16.mxu1 %v4573_v2 }
 0x20f   : > { %3766 = vmatmul.mubr.bf16.gmra.mrb[12].mxu0 %v4087_v13 }
 0x210   : > { %3774 = vmatpush3.bf16.msra.mxu0 %v4497_v44  ;;  %3862 = vmatmul.mubr.bf16.gmra.mrb[12].mxu1 %v4088_v55 }
 0x211   : > { %3870 = vmatpush3.bf16.msra.mxu1 %v4573_v2  ;;  %3775 = vmatprep.subr.bf16.mxu0 %v4513_v46  ;;  %v4094_v2 = vld [vmem:[#allocation2 + $0x1d0] sm:$0xff]  }
 0x212   : > { %3871 = vmatprep.subr.bf16.mxu1 %v4571_v1  ;;  %3785 = vmatprep.mubr.bf16.mxu0 %v4089_v14 }
 0x213   : > { %3881 = vmatprep.mubr.bf16.mxu1 %v4090_v9 }
 0x214   : > { %3776 = vmatpush3.bf16.msra.mxu0 %v4513_v46 }
 0x215   : > { %3872 = vmatpush3.bf16.msra.mxu1 %v4571_v1  ;;  %3777 = vmatprep.subr.bf16.mxu0 %v4525_v49  ;;  %v4093_v1 = vld [vmem:[#allocation2 + $0x150] sm:$0xff]  }
 0x216   : > { %3873 = vmatprep.subr.bf16.mxu1 %v4581_v7 }
 0x218   : > { %3778 = vmatpush3.bf16.msra.mxu0 %v4525_v49 }
 0x219   : > { %3874 = vmatpush3.bf16.msra.mxu1 %v4581_v7  ;;  %3779 = vmatprep.subr.bf16.mxu0 %v4537_v51  ;;  %v4096_v7 = vld [vmem:[#allocation2 + $0x1d8] sm:$0xff]  }
 0x21a   : > { %3875 = vmatprep.subr.bf16.mxu1 %v4579_v5 }
 0x21c   : > { %3780 = vmatpush3.bf16.msra.mxu0 %v4537_v51 }
 0x21d   : > { %3876 = vmatpush3.bf16.msra.mxu1 %v4579_v5  ;;  %3781 = vmatprep.subr.bf16.mxu0 %v4545_v53  ;;  %v4095_v5 = vld [vmem:[#allocation2 + $0x158] sm:$0xff]  }
 0x21e   : > { %3877 = vmatprep.subr.bf16.mxu1 %v4589_v12 }
 0x220   : > { %3782 = vmatpush3.bf16.msra.mxu0 %v4545_v53 }
 0x221   : > { %3878 = vmatpush3.bf16.msra.mxu1 %v4589_v12  ;;  %3783 = vmatprep.subr.bf16.mxu0 %v4553_v56 }
 0x222   : > { %3879 = vmatprep.subr.bf16.mxu1 %v4587_v11 }
 0x224   : > { %3784 = vmatpush3.bf16.msra.mxu0 %v4553_v56 }
 0x225   : > { %3880 = vmatpush3.bf16.msra.mxu1 %v4587_v11  ;;  %3793 = vmatprep.subr.bf16.mxu0 %v4471_v41  ;;  %v4098_v11 = vld [vmem:[#allocation2 + $0x1e0] sm:$0xff]  }
 0x226   : > { %3889 = vmatprep.subr.bf16.mxu1 %v4467_v48 }
 0x227   : > { %3786 = vmatmul.mubr.bf16.vlgmr.msra.gmra.mrb[8].mxu0 %v4091_v61 }
 0x228   : > { %3794 = vmatpush3.bf16.msra.mxu0 %v4471_v41  ;;  %3882 = vmatmul.mubr.bf16.vlgmr.msra.gmra.mrb[8].mxu1 %v4092_v62  ;;  %v4097_v41 = vld [vmem:[#allocation2 + $0x160] sm:$0xff]  }
 0x229   : > { %3890 = vmatpush3.bf16.msra.mxu1 %v4467_v48  ;;  %3795 = vmatprep.subr.bf16.mxu0 %v4483_v43  ;;  %v4099_v48 = vld [vmem:[#allocation2 + $0x168] sm:$0xff]  }
 0x22a   : > { %3891 = vmatprep.subr.bf16.mxu1 %v4481_v42  ;;  %3789 = vmatprep.mubr.bf16.mxu0 %v4093_v1 }
 0x22b   : > { %3885 = vmatprep.mubr.bf16.mxu1 %v4094_v2 }
 0x22c   : > { %3796 = vmatpush3.bf16.msra.mxu0 %v4483_v43  ;;  %v4101_v43 = vld [vmem:[#allocation2 + $0x170] sm:$0xff]  }
 0x22d   : > { %3892 = vmatpush3.bf16.msra.mxu1 %v4481_v42  ;;  %3797 = vmatprep.subr.bf16.mxu0 %v4499_v45  ;;  %v4100_v42 = vld [vmem:[#allocation2 + $0x1e8] sm:$0xff]  }
 0x22e   : > { %3893 = vmatprep.subr.bf16.mxu1 %v4497_v44 }
 0x22f   : > { %3790 = vmatmul.mubr.bf16.gmra.mrb[12].mxu0 %v4095_v5 }
 0x230   : > { %3798 = vmatpush3.bf16.msra.mxu0 %v4499_v45  ;;  %3886 = vmatmul.mubr.bf16.gmra.mrb[12].mxu1 %v4096_v7  ;;  %v4103_v45 = vld [vmem:[#allocation2 + $0x178] sm:$0xff]  }
 0x231   : > { %3894 = vmatpush3.bf16.msra.mxu1 %v4497_v44  ;;  %3799 = vmatprep.subr.bf16.mxu0 %v4515_v47  ;;  %v4102_v44 = vld [vmem:[#allocation2 + $0x1f0] sm:$0xff]  }
 0x232   : > { %3895 = vmatprep.subr.bf16.mxu1 %v4513_v46  ;;  %3809 = vmatprep.mubr.bf16.mxu0 %v4097_v41 }
 0x233   : > { %3905 = vmatprep.mubr.bf16.mxu1 %v4098_v11 }
 0x234   : > { %3800 = vmatpush3.bf16.msra.mxu0 %v4515_v47  ;;  %v4765_v47 = vld [vmem:[%s5107_s4] ss:$0 sm:$0xff] }
 0x235   : > { %3896 = vmatpush3.bf16.msra.mxu1 %v4513_v46  ;;  %3801 = vmatprep.subr.bf16.mxu0 %v4527_v50  ;;  %v4104_v46 = vld [vmem:[#allocation2 + $0x1f8] sm:$0xff]  }
 0x236   : > { %3897 = vmatprep.subr.bf16.mxu1 %v4525_v49 }
 0x238   : > { %3802 = vmatpush3.bf16.msra.mxu0 %v4527_v50 }
 0x239   : > { %3898 = vmatpush3.bf16.msra.mxu1 %v4525_v49  ;;  %3803 = vmatprep.subr.bf16.mxu0 %v4539_v52 }
 0x23a   : > { %3899 = vmatprep.subr.bf16.mxu1 %v4537_v51 }
 0x23c   : > { %3804 = vmatpush3.bf16.msra.mxu0 %v4539_v52 }
 0x23d   : > { %3900 = vmatpush3.bf16.msra.mxu1 %v4537_v51  ;;  %3805 = vmatprep.subr.bf16.mxu0 %v4547_v54 }
 0x23e   : > { %3901 = vmatprep.subr.bf16.mxu1 %v4545_v53 }
 0x240   : > { %3806 = vmatpush3.bf16.msra.mxu0 %v4547_v54 }
 0x241   : > { %3902 = vmatpush3.bf16.msra.mxu1 %v4545_v53  ;;  %3807 = vmatprep.subr.bf16.mxu0 %v4555_v57 }
 0x242   : > { %3903 = vmatprep.subr.bf16.mxu1 %v4553_v56 }
 0x244   : > { %3808 = vmatpush3.bf16.msra.mxu0 %v4555_v57 }
 0x245   : > { %3904 = vmatpush3.bf16.msra.mxu1 %v4553_v56 }
 0x247   : > { %3810 = vmatmul.mubr.bf16.vlgmr.msra.gmra.mrb[8].mxu0 %v4099_v48 }
 0x248   : > { %3906 = vmatmul.mubr.bf16.vlgmr.msra.gmra.mrb[8].mxu1 %v4100_v42  ;;  %3813 = vmatprep.mubr.bf16.mxu0 %v4101_v43 }
 0x249   : > { %3909 = vmatprep.mubr.bf16.mxu1 %v4102_v44 }
 0x24f   : > { %3814 = vmatmul.mubr.bf16.gmra.mrb[12].mxu0 %v4103_v45 }
 0x250   : > { %3910 = vmatmul.mubr.bf16.gmra.mrb[12].mxu1 %v4104_v46 }
 0x29a   : > { %v3619_v49 = vpop.f32.mrb[0].mxu0 }
 0x29b   : > { %v1146_v50 = vmul.f32 %v3619_v49, %v4765_v47  ;;  %v3268_v51 = vpack.c.bf16 %v3619_v49, %v3619_v49  ;;  %v3715_v52 = vpop.f32.mrb[0].mxu1  ;;  %v1099_v53 = vpop.f32.mrb[1].mxu0 }
 0x29c   : > { %v1724_v54 = vmul.f32 %v3715_v52, %v4765_v47  ;;  %v3276_v56 = vpack.c.bf16 %v3715_v52, %v3715_v52  ;;  %v3266_v57 = vpack.c.bf16 %v1099_v53, %v1099_v53  ;;  %v1683_v12 = vpop.f32.mrb[1].mxu1  ;;  %v3620_v15 = vpop.f32.mrb[2].mxu0  ;;  %v1144_v18 = vmul.f32 %v4765_v47, %v1099_v53 }
 0x29d   : > { %1260 = vst.msk [vmem:[%s4770_s26 + $0x8] sm:$0xf] %vm1257_vm0, %v3268_v51  ;;  %v3274_v16 = vpack.c.bf16 %v1683_v12, %v1683_v12  ;;  %v3269_v17 = vpack.c.bf16 %v3620_v15, %v3620_v15  ;;  %v3716_v26 = vpop.f32.mrb[2].mxu1  ;;  %v1102_v40 = vpop.f32.mrb[3].mxu0  ;;  %v1722_v23 = vmul.f32 %v4765_v47, %v1683_v12  ;;  %v1159_v27 = vsel %vm1152_vm1, %v1146_v50, 0.0 }
 0x29e   : > { %3190 = vst.msk [vmem:[%s4770_s26 + $0x28] sm:$0xf] %vm1257_vm0, %v3276_v56  ;;  %1258 = vst.msk [vmem:[%s4770_s26] sm:$0xf] %vm1257_vm0, %v3266_v57  ;;  %v3277_v19 = vpack.c.bf16 %v3716_v26, %v3716_v26  ;;  %v3267_v20 = vpack.c.bf16 %v1102_v40, %v1102_v40  ;;  %v1686_v21 = vpop.f32.mrb[3].mxu1  ;;  %v1736_v25 = vsel %vm1152_vm1, %v1724_v54, 0.0  ;;  %1160 = vadd.xlane.f32.xlu0 %v1159_v27 }
 0x29f   : > { %3188 = vst.msk [vmem:[%s4770_s26 + $0x20] sm:$0xf] %vm1257_vm0, %v3274_v16  ;;  %1261 = vst.msk [vmem:[%s4770_s26 + $0xc] sm:$0xf] %vm1257_vm0, %v3269_v17  ;;  %v3275_v24 = vpack.c.bf16 %v1686_v21, %v1686_v21  ;;  %1737 = vadd.xlane.f32.xlu1 %v1736_v25  ;;  %v1147_v28 = vmul.f32 %v3620_v15, %v4765_v47  ;;  %v1730_v30 = vsel %vm1152_vm1, %v1722_v23, 0.0  ;;  %v1153_v32 = vsel %vm1152_vm1, %v1144_v18, 0.0 }
 0x2a0   : > { %3191 = vst.msk [vmem:[%s4770_s26 + $0x2c] sm:$0xf] %vm1257_vm0, %v3277_v19  ;;  %1259 = vst.msk [vmem:[%s4770_s26 + $0x4] sm:$0xf] %vm1257_vm0, %v3267_v20  ;;  %v1187_v35 = vmul.f32 %v1146_v50, %v1146_v50  ;;  %v1725_v3 = vmul.f32 %v3716_v26, %v4765_v47  ;;  %v1764_v13 = vmul.f32 %v1724_v54, %v1724_v54 }
 0x2a1   : > { %3189 = vst.msk [vmem:[%s4770_s26 + $0x24] sm:$0xf] %vm1257_vm0, %v3275_v24  ;;  %v1162_v6 = vsel %vm1152_vm1, %v1147_v28, 0.0  ;;  %v1145_v55 = vmul.f32 %v4765_v47, %v1102_v40  ;;  %v1723_v14 = vmul.f32 %v4765_v47, %v1686_v21  ;;  %v1188_v2 = vmul.f32 %v1147_v28, %v1147_v28 }
 0x2a2   : > { %v3623_v29 = vpop.f32.mrb[4].mxu0  ;;  %1154 = vadd.xlane.f32.xlu0 %v1153_v32  ;;  %v1199_v38 = vsel %vm1152_vm1, %v1187_v35, 0.0  ;;  %v1776_v9 = vsel %vm1152_vm1, %v1764_v13, 0.0  ;;  %v1739_v61 = vsel %vm1152_vm1, %v1725_v3, 0.0  ;;  %v1185_v5 = vmul.f32 %v1144_v18, %v1144_v18 }
 0x2a3   : > { %v3719_v31 = vpop.f32.mrb[4].mxu1  ;;  %v3272_v33 = vpack.c.bf16 %v3623_v29, %v3623_v29  ;;  %v1115_v34 = vpop.f32.mrb[5].mxu0  ;;  %1731 = vadd.xlane.f32.xlu1 %v1730_v30  ;;  %v1733_v62 = vsel %vm1152_vm1, %v1723_v14, 0.0  ;;  %v1156_v1 = vsel %vm1152_vm1, %v1145_v55, 0.0  ;;  %v1202_v7 = vsel %vm1152_vm1, %v1188_v2, 0.0 }
 0x2a4   : > { %v3280_v36 = vpack.c.bf16 %v3719_v31, %v3719_v31  ;;  %v1699_v37 = vpop.f32.mrb[5].mxu1  ;;  %v3624_v39 = vpop.f32.mrb[6].mxu0  ;;  %v3270_v58 = vpack.c.bf16 %v1115_v34, %v1115_v34  ;;  %v1193_v41 = vsel %vm1152_vm1, %v1185_v5, 0.0  ;;  %v1765_v11 = vmul.f32 %v1725_v3, %v1725_v3 }
 0x2a5   : > { %1264 = vst.msk [vmem:[%s4770_s26 + $0x18] sm:$0xf] %vm1257_vm0, %v3272_v33  ;;  %v3278_v60 = vpack.c.bf16 %v1699_v37, %v1699_v37  ;;  %v3720_v63 = vpop.f32.mrb[6].mxu1  ;;  %v1118_v0 = vpop.f32.mrb[7].mxu0  ;;  %v3273_v4 = vpack.c.bf16 %v3624_v39, %v3624_v39  ;;  %v1762_v48 = vmul.f32 %v1722_v23, %v1722_v23  ;;  %v1150_v42 = vmul.f32 %v3623_v29, %v4765_v47 }
 0x2a6   : > { %3194 = vst.msk [vmem:[%s4770_s26 + $0x38] sm:$0xf] %vm1257_vm0, %v3280_v36  ;;  %v3281_v59 = vpack.c.bf16 %v3720_v63, %v3720_v63  ;;  %v1702_v8 = vpop.f32.mrb[7].mxu1  ;;  %1262 = vst.msk [vmem:[%s4770_s26 + $0x10] sm:$0xf] %vm1257_vm0, %v3270_v58  ;;  %v3271_v10 = vpack.c.bf16 %v1118_v0, %v1118_v0  ;;  %1163 = vadd.xlane.f32.xlu0 %v1162_v6  ;;  %v1779_v43 = vsel %vm1152_vm1, %v1765_v11, 0.0 }
 0x2a7   : > { %3192 = vst.msk [vmem:[%s4770_s26 + $0x30] sm:$0xf] %vm1257_vm0, %v3278_v60  ;;  %v3279_v22 = vpack.c.bf16 %v1702_v8, %v1702_v8  ;;  %1265 = vst.msk [vmem:[%s4770_s26 + $0x1c] sm:$0xf] %vm1257_vm0, %v3273_v4  ;;  %1200 = vadd.xlane.f32.xlu1 %v1199_v38  ;;  %v1770_v44 = vsel %vm1152_vm1, %v1762_v48, 0.0  ;;  %v1186_v45 = vmul.f32 %v1145_v55, %v1145_v55  ;;  %v1171_v50 = vsel %vm1152_vm1, %v1150_v42, 0.0 }
 0x2a8   : > { %3195 = vst.msk [vmem:[%s4770_s26 + $0x3c] sm:$0xf] %vm1257_vm0, %v3281_v59  ;;  %1263 = vst.msk [vmem:[%s4770_s26 + $0x14] sm:$0xf] %vm1257_vm0, %v3271_v10  ;;  %v1728_v46 = vmul.f32 %v3719_v31, %v4765_v47  ;;  %v1763_v51 = vmul.f32 %v1723_v14, %v1723_v14  ;;  %v1148_v52 = vmul.f32 %v4765_v47, %v1115_v34 }
 0x2a9   : > { %3193 = vst.msk [vmem:[%s4770_s26 + $0x34] sm:$0xf] %vm1257_vm0, %v3279_v22  ;;  %v1196_v49 = vsel %vm1152_vm1, %v1186_v45, 0.0  ;;  %v1151_v53 = vmul.f32 %v3624_v39, %v4765_v47  ;;  %v1726_v57 = vmul.f32 %v4765_v47, %v1699_v37  ;;  %v1729_v12 = vmul.f32 %v3720_v63, %v4765_v47 }
 0x2aa   : > { %1740 = vadd.xlane.f32.xlu0 %v1739_v61  ;;  %v1773_v54 = vsel %vm1152_vm1, %v1763_v51, 0.0  ;;  %v1748_v56 = vsel %vm1152_vm1, %v1728_v46, 0.0  ;;  %v1165_v15 = vsel %vm1152_vm1, %v1148_v52, 0.0  ;;  %v1149_v17 = vmul.f32 %v4765_v47, %v1118_v0 }
 0x2ab   : > { %1777 = vadd.xlane.f32.xlu1 %v1776_v9  ;;  %v1174_v16 = vsel %vm1152_vm1, %v1151_v53, 0.0  ;;  %v1742_v26 = vsel %vm1152_vm1, %v1726_v57, 0.0  ;;  %v1751_v40 = vsel %vm1152_vm1, %v1729_v12, 0.0  ;;  %v1191_v18 = vmul.f32 %v1150_v42, %v1150_v42 }
 0x2ac   : > { %v1727_v19 = vmul.f32 %v4765_v47, %v1702_v8  ;;  %v1168_v21 = vsel %vm1152_vm1, %v1149_v17, 0.0  ;;  %v1768_v23 = vmul.f32 %v1728_v46, %v1728_v46  ;;  %v1189_v27 = vmul.f32 %v1148_v52, %v1148_v52 }
 0x2ad   : > { %v1211_v20 = vsel %vm1152_vm1, %v1191_v18, 0.0  ;;  %v1192_v28 = vmul.f32 %v1151_v53, %v1151_v53  ;;  %v1766_v31 = vmul.f32 %v1726_v57, %v1726_v57  ;;  %v1769_v32 = vmul.f32 %v1729_v12, %v1729_v12 }
 0x2ae   : > { %1734 = vadd.xlane.f32.xlu0 %v1733_v62  ;;  %v1788_v24 = vsel %vm1152_vm1, %v1768_v23, 0.0  ;;  %v1745_v25 = vsel %vm1152_vm1, %v1727_v19, 0.0  ;;  %v1205_v29 = vsel %vm1152_vm1, %v1189_v27, 0.0  ;;  %v1190_v35 = vmul.f32 %v1149_v17, %v1149_v17 }
 0x2af   : > { %1157 = vadd.xlane.f32.xlu1 %v1156_v1  ;;  %v1214_v30 = vsel %vm1152_vm1, %v1192_v28, 0.0  ;;  %v1782_v33 = vsel %vm1152_vm1, %v1766_v31, 0.0  ;;  %v1791_v34 = vsel %vm1152_vm1, %v1769_v32, 0.0  ;;  %v1767_v37 = vmul.f32 %v1727_v19, %v1727_v19 }
 0x2b0   : > { %v1208_v36 = vsel %vm1152_vm1, %v1190_v35, 0.0 }
 0x2b1   : > { %v1785_v39 = vsel %vm1152_vm1, %v1767_v37, 0.0 }
 0x2b2   : > { %1203 = vadd.xlane.f32.xlu0 %v1202_v7 }
 0x2b3   : > { %1194 = vadd.xlane.f32.xlu1 %v1193_v41 }
 0x2b6   : > { %1780 = vadd.xlane.f32.xlu0 %v1779_v43 }
 0x2b7   : > { %1771 = vadd.xlane.f32.xlu1 %v1770_v44 }
 0x2ba   : > { %1197 = vadd.xlane.f32.xlu0 %v1196_v49 }
 0x2bb   : > { %1172 = vadd.xlane.f32.xlu1 %v1171_v50 }
 0x2be   : > { %1774 = vadd.xlane.f32.xlu0 %v1773_v54 }
 0x2bf   : > { %1749 = vadd.xlane.f32.xlu1 %v1748_v56 }
 0x2c2   : > { %1175 = vadd.xlane.f32.xlu0 %v1174_v16 }
 0x2c3   : > { %1166 = vadd.xlane.f32.xlu1 %v1165_v15 }
 0x2c6   : > { %1752 = vadd.xlane.f32.xlu0 %v1751_v40 }
 0x2c7   : > { %1743 = vadd.xlane.f32.xlu1 %v1742_v26 }
 0x2ca   : > { %1169 = vadd.xlane.f32.xlu0 %v1168_v21 }
 0x2cb   : > { %1212 = vadd.xlane.f32.xlu1 %v1211_v20 }
 0x2ce   : > { %1746 = vadd.xlane.f32.xlu0 %v1745_v25 }
 0x2cf   : > { %1789 = vadd.xlane.f32.xlu1 %v1788_v24 }
 0x2d2   : > { %1215 = vadd.xlane.f32.xlu0 %v1214_v30 }
 0x2d3   : > { %1206 = vadd.xlane.f32.xlu1 %v1205_v29 }
 0x2d6   : > { %1792 = vadd.xlane.f32.xlu0 %v1791_v34 }
 0x2d7   : > { %1783 = vadd.xlane.f32.xlu1 %v1782_v33 }
 0x2da   : > { %1209 = vadd.xlane.f32.xlu0 %v1208_v36 }
 0x2de   : > { %1786 = vadd.xlane.f32.xlu0 %v1785_v39 }
 0x31a   : > { %v3811_v58 = vpop.f32.mrb[8].mxu0 }
 0x31b   : > { %v4853_v60 = vmul.f32 %v3811_v58, %v4765_v47  ;;  %v3284_v63 = vpack.c.bf16 %v3811_v58, %v3811_v58  ;;  %v3907_v0 = vpop.f32.mrb[8].mxu1  ;;  %v2260_v3 = vpop.f32.mrb[9].mxu0 }
 0x31c   : > { %v3292_v4 = vpack.c.bf16 %v3907_v0, %v3907_v0  ;;  %v3282_v59 = vpack.c.bf16 %v2260_v3, %v2260_v3  ;;  %v2813_v8 = vpop.f32.mrb[9].mxu1  ;;  %v3812_v6 = vpop.f32.mrb[10].mxu0  ;;  %v2854_v62 = vmul.f32 %v3907_v0, %v4765_v47  ;;  %v2299_v11 = vmul.f32 %v4765_v47, %v2260_v3 }
 0x31d   : > { %3222 = vst.msk [vmem:[%s4770_s26 + $0x48] sm:$0xf] %vm1257_vm0, %v3284_v63  ;;  %v3290_v10 = vpack.c.bf16 %v2813_v8, %v2813_v8  ;;  %v2302_v22 = vmul.f32 %v3812_v6, %v4765_v47  ;;  %v3285_v38 = vpack.c.bf16 %v3812_v6, %v3812_v6  ;;  %v3908_v13 = vpop.f32.mrb[10].mxu1  ;;  %v2263_v55 = vpop.f32.mrb[11].mxu0  ;;  %v2313_v2 = vsel %vm1152_vm1, %v4853_v60, 0.0 }
 0x31e   : > { %3254 = vst.msk [vmem:[%s4770_s26 + $0x68] sm:$0xf] %vm1257_vm0, %v3292_v4  ;;  %3220 = vst.msk [vmem:[%s4770_s26 + $0x40] sm:$0xf] %vm1257_vm0, %v3282_v59  ;;  %v3293_v14 = vpack.c.bf16 %v3908_v13, %v3908_v13  ;;  %v3283_v9 = vpack.c.bf16 %v2263_v55, %v2263_v55  ;;  %v2816_v61 = vpop.f32.mrb[11].mxu1  ;;  %v2855_v7 = vmul.f32 %v3908_v13, %v4765_v47  ;;  %2314 = vadd.xlane.f32.xlu1 %v2313_v2 }
 0x31f   : > { %3252 = vst.msk [vmem:[%s4770_s26 + $0x60] sm:$0xf] %vm1257_vm0, %v3290_v10  ;;  %3223 = vst.msk [vmem:[%s4770_s26 + $0x4c] sm:$0xf] %vm1257_vm0, %v3285_v38  ;;  %v3291_v1 = vpack.c.bf16 %v2816_v61, %v2816_v61  ;;  %v2316_v5 = vsel %vm1152_vm1, %v2302_v22, 0.0  ;;  %v2866_v42 = vsel %vm1152_vm1, %v2854_v62, 0.0  ;;  %v2300_v45 = vmul.f32 %v4765_v47, %v2263_v55 }
 0x320   : > { %3255 = vst.msk [vmem:[%s4770_s26 + $0x6c] sm:$0xf] %vm1257_vm0, %v3293_v14  ;;  %3221 = vst.msk [vmem:[%s4770_s26 + $0x44] sm:$0xf] %vm1257_vm0, %v3283_v9  ;;  %2317 = vadd.xlane.f32.xlu0 %v2316_v5  ;;  %v2869_v52 = vsel %vm1152_vm1, %v2855_v7, 0.0  ;;  %v2852_v17 = vmul.f32 %v4765_v47, %v2813_v8  ;;  %v2307_v40 = vsel %vm1152_vm1, %v2299_v11, 0.0  ;;  %v2853_v18 = vmul.f32 %v4765_v47, %v2816_v61 }
 0x321   : > { %3253 = vst.msk [vmem:[%s4770_s26 + $0x64] sm:$0xf] %vm1257_vm0, %v3291_v1  ;;  %v2310_v19 = vsel %vm1152_vm1, %v2300_v45, 0.0  ;;  %v2341_v21 = vmul.f32 %v4853_v60, %v4853_v60  ;;  %v2342_v24 = vmul.f32 %v2302_v22, %v2302_v22  ;;  %v2894_v29 = vmul.f32 %v2854_v62, %v2854_v62 }
 0x322   : > { %v4877_v41 = vpop.f32.mrb[12].mxu0  ;;  %2867 = vadd.xlane.f32.xlu1 %v2866_v42  ;;  %v2860_v20 = vsel %vm1152_vm1, %v2852_v17, 0.0  ;;  %v2863_v23 = vsel %vm1152_vm1, %v2853_v18, 0.0  ;;  %v2895_v31 = vmul.f32 %v2855_v7, %v2855_v7  ;;  %v2339_v36 = vmul.f32 %v2299_v11, %v2299_v11 }
 0x323   : > { %v3288_v48 = vpack.c.bf16 %v4877_v41, %v4877_v41  ;;  %v4883_v43 = vpop.f32.mrb[12].mxu1  ;;  %v4885_v44 = vpop.f32.mrb[13].mxu0  ;;  %v2353_v28 = vsel %vm1152_vm1, %v2341_v21, 0.0  ;;  %v2356_v30 = vsel %vm1152_vm1, %v2342_v24, 0.0  ;;  %v2906_v35 = vsel %vm1152_vm1, %v2894_v29, 0.0 }
 0x324   : > { %v3296_v46 = vpack.c.bf16 %v4883_v43, %v4883_v43  ;;  %v3286_v49 = vpack.c.bf16 %v4885_v44, %v4885_v44  ;;  %v4892_v50 = vpop.f32.mrb[13].mxu1  ;;  %v3816_v51 = vpop.f32.mrb[14].mxu0  ;;  %2870 = vadd.xlane.f32.xlu0 %v2869_v52  ;;  %v2909_v37 = vsel %vm1152_vm1, %v2895_v31, 0.0  ;;  %v2340_v39 = vmul.f32 %v2300_v45, %v2300_v45 }
 0x325   : > { %3226 = vst.msk [vmem:[%s4770_s26 + $0x58] sm:$0xf] %vm1257_vm0, %v3288_v48  ;;  %v3294_v53 = vpack.c.bf16 %v4892_v50, %v4892_v50  ;;  %v3289_v54 = vpack.c.bf16 %v3816_v51, %v3816_v51  ;;  %v4899_v56 = vpop.f32.mrb[14].mxu1  ;;  %v4901_v57 = vpop.f32.mrb[15].mxu0  ;;  %v2347_v63 = vsel %vm1152_vm1, %v2339_v36, 0.0  ;;  %v2892_v0 = vmul.f32 %v2852_v17, %v2852_v17 }
 0x326   : > { %3258 = vst.msk [vmem:[%s4770_s26 + $0x78] sm:$0xf] %vm1257_vm0, %v3296_v46  ;;  %3224 = vst.msk [vmem:[%s4770_s26 + $0x50] sm:$0xf] %vm1257_vm0, %v3286_v49  ;;  %v3297_v12 = vpack.c.bf16 %v4899_v56, %v4899_v56  ;;  %v3287_v15 = vpack.c.bf16 %v4901_v57, %v4901_v57  ;;  %v4911_v16 = vpop.f32.mrb[15].mxu1  ;;  %2308 = vadd.xlane.f32.xlu1 %v2307_v40  ;;  %v2350_v3 = vsel %vm1152_vm1, %v2340_v39, 0.0 }
 0x327   : > { %3256 = vst.msk [vmem:[%s4770_s26 + $0x70] sm:$0xf] %vm1257_vm0, %v3294_v53  ;;  %3227 = vst.msk [vmem:[%s4770_s26 + $0x5c] sm:$0xf] %vm1257_vm0, %v3289_v54  ;;  %v3295_v26 = vpack.c.bf16 %v4911_v16, %v4911_v16  ;;  %v2893_v4 = vmul.f32 %v2853_v18, %v2853_v18  ;;  %v2305_v10 = vmul.f32 %v4877_v41, %v4765_v47  ;;  %v2900_v22 = vsel %vm1152_vm1, %v2892_v0, 0.0 }
 0x328   : > { %3259 = vst.msk [vmem:[%s4770_s26 + $0x7c] sm:$0xf] %vm1257_vm0, %v3297_v12  ;;  %3225 = vst.msk [vmem:[%s4770_s26 + $0x54] sm:$0xf] %vm1257_vm0, %v3287_v15  ;;  %2311 = vadd.xlane.f32.xlu0 %v2310_v19  ;;  %v2306_v38 = vmul.f32 %v3816_v51, %v4765_v47  ;;  %v2858_v9 = vmul.f32 %v4883_v43, %v4765_v47  ;;  %v2859_v62 = vmul.f32 %v4899_v56, %v4765_v47 }
 0x329   : > { %3257 = vst.msk [vmem:[%s4770_s26 + $0x74] sm:$0xf] %vm1257_vm0, %v3295_v26  ;;  %v2903_v13 = vsel %vm1152_vm1, %v2893_v4, 0.0  ;;  %v2325_v61 = vsel %vm1152_vm1, %v2305_v10, 0.0  ;;  %v2303_v7 = vmul.f32 %v4765_v47, %v4885_v44  ;;  %v2304_v11 = vmul.f32 %v4765_v47, %v4901_v57 }
 0x32a   : > { %2861 = vadd.xlane.f32.xlu1 %v2860_v20  ;;  %v2328_v1 = vsel %vm1152_vm1, %v2306_v38, 0.0  ;;  %v2878_v41 = vsel %vm1152_vm1, %v2858_v9, 0.0  ;;  %v2881_v48 = vsel %vm1152_vm1, %v2859_v62, 0.0  ;;  %v2856_v45 = vmul.f32 %v4765_v47, %v4892_v50 }
 0x32b   : > { %v4935_v27 = vpop.xlane.xlu0 %1160  ;;  %v2319_v46 = vsel %vm1152_vm1, %v2303_v7, 0.0  ;;  %v2857_v44 = vmul.f32 %v4765_v47, %v4911_v16  ;;  %v2322_v49 = vsel %vm1152_vm1, %v2304_v11, 0.0  ;;  %v2345_v54 = vmul.f32 %v2305_v10, %v2305_v10 }
 0x32c   : > { %v4933_v25 = vpop.xlane.xlu1 %1737  ;;  %2864 = vadd.xlane.f32.xlu0 %v2863_v23  ;;  %v2872_v53 = vsel %vm1152_vm1, %v2856_v45, 0.0  ;;  %v2346_v50 = vmul.f32 %v2306_v38, %v2306_v38  ;;  %v2343_v15 = vmul.f32 %v2303_v7, %v2303_v7  ;;  %v2344_v16 = vmul.f32 %v2304_v11, %v2304_v11 }
 0x32d   : > { %v2875_v56 = vsel %vm1152_vm1, %v2857_v44, 0.0  ;;  %v2365_v47 = vsel %vm1152_vm1, %v2345_v54, 0.0  ;;  %v2896_v19 = vmul.f32 %v2856_v45, %v2856_v45  ;;  %v2897_v20 = vmul.f32 %v2857_v44, %v2857_v44 }
 0x32e   : > { %2354 = vadd.xlane.f32.xlu1 %v2353_v28  ;;  %v2368_v17 = vsel %vm1152_vm1, %v2346_v50, 0.0  ;;  %v2359_v18 = vsel %vm1152_vm1, %v2343_v15, 0.0  ;;  %v2362_v21 = vsel %vm1152_vm1, %v2344_v16, 0.0  ;;  %v2898_v29 = vmul.f32 %v2858_v9, %v2858_v9 }
 0x32f   : > { %v1155_v33 = vpop.xlane.xlu0 %1154  ;;  %v2912_v28 = vsel %vm1152_vm1, %v2896_v19, 0.0  ;;  %v2899_v31 = vmul.f32 %v2859_v62, %v2859_v62  ;;  %v1756_v9 = vadd.f32 %v4933_v25, %v4935_v27 }
 0x330   : > { %v1732_v32 = vpop.xlane.xlu1 %1731  ;;  %2357 = vadd.xlane.f32.xlu0 %v2356_v30  ;;  %v2915_v30 = vsel %vm1152_vm1, %v2897_v20, 0.0 }
 0x331   : > { %v4939_v34 = vadd.f32 %v1732_v32, %v1155_v33  ;;  %v2921_v36 = vsel %vm1152_vm1, %v2899_v31, 0.0 }
 0x332   : > { %2907 = vadd.xlane.f32.xlu1 %v2906_v35  ;;  %v2918_v35 = vsel %vm1152_vm1, %v2898_v29, 0.0 }
 0x333   : > { %v4943_v60 = vpop.xlane.xlu0 %1163 }
 0x334   : > { %v1201_v58 = vpop.xlane.xlu1 %1200  ;;  %2910 = vadd.xlane.f32.xlu0 %v2909_v37 }
 0x336   : > { %2348 = vadd.xlane.f32.xlu1 %v2347_v63 }
 0x337   : > { %v4947_v8 = vpop.xlane.xlu0 %1740 }
 0x338   : > { %v1778_v59 = vpop.xlane.xlu1 %1777  ;;  %2351 = vadd.xlane.f32.xlu0 %v2350_v3 }
 0x339   : > { %v4949_v6 = vadd.f32 %v1778_v59, %v1201_v58 }
 0x33a   : > { %2901 = vadd.xlane.f32.xlu1 %v2900_v22 }
 0x33b   : > { %v4958_v14 = vpop.xlane.xlu0 %1734 }
 0x33c   : > { %v4956_v55 = vpop.xlane.xlu1 %1157  ;;  %2904 = vadd.xlane.f32.xlu0 %v2903_v13 }
 0x33e   : > { %2326 = vadd.xlane.f32.xlu1 %v2325_v61  ;;  %v1757_v61 = vadd.f32 %v4947_v8, %v4943_v60  ;;  %v1755_v60 = vadd.f32 %v4958_v14, %v4956_v55 }
 0x33f   : > { %v4968_v5 = vpop.xlane.xlu0 %1203 }
 0x340   : > { %v4966_v2 = vpop.xlane.xlu1 %1194  ;;  %2329 = vadd.xlane.f32.xlu0 %v2328_v1 }
 0x342   : > { %2879 = vadd.xlane.f32.xlu1 %v2878_v41 }
 0x343   : > { %v4978_v43 = vpop.xlane.xlu0 %1780 }
 0x344   : > { %v4976_v42 = vpop.xlane.xlu1 %1771  ;;  %2882 = vadd.xlane.f32.xlu0 %v2881_v48  ;;  %v1797_v50 = vadd.f32 %v4978_v43, %v4968_v5 }
 0x346   : > { %2320 = vadd.xlane.f32.xlu1 %v2319_v46 }
 0x347   : > { %v4988_v52 = vpop.xlane.xlu0 %1197 }
 0x348   : > { %v4986_v51 = vpop.xlane.xlu1 %1172  ;;  %2323 = vadd.xlane.f32.xlu0 %v2322_v49 }
 0x34a   : > { %2873 = vadd.xlane.f32.xlu1 %v2872_v53 }
 0x34b   : > { %v4994_v12 = vpop.xlane.xlu0 %1774 }
 0x34c   : > { %v4992_v57 = vpop.xlane.xlu1 %1749  ;;  %2876 = vadd.xlane.f32.xlu0 %v2875_v56 }
 0x34e   : > { %2366 = vadd.xlane.f32.xlu1 %v2365_v47 }
 0x34f   : > { %v5000_v40 = vpop.xlane.xlu0 %1175 }
 0x350   : > { %v4998_v26 = vpop.xlane.xlu1 %1166  ;;  %2369 = vadd.xlane.f32.xlu0 %v2368_v17  ;;  %v1795_v17 = vadd.f32 %v4994_v12, %v4988_v52 }
 0x352   : > { %2360 = vadd.xlane.f32.xlu1 %v2359_v18 }
 0x353   : > { %v5006_v24 = vpop.xlane.xlu0 %1752 }
 0x354   : > { %v5004_v23 = vpop.xlane.xlu1 %1743  ;;  %2363 = vadd.xlane.f32.xlu0 %v2362_v21  ;;  %v1761_v52 = vadd.f32 %v5006_v24, %v5000_v40 }
 0x356   : > { %2913 = vadd.xlane.f32.xlu1 %v2912_v28 }
 0x357   : > { %v5010_v33 = vpop.xlane.xlu0 %1169 }
 0x358   : > { %v1213_v32 = vpop.xlane.xlu1 %1212  ;;  %2916 = vadd.xlane.f32.xlu0 %v2915_v30 }
 0x35a   : > { %2919 = vadd.xlane.f32.xlu1 %v2918_v35 }
 0x35b   : > { %v5014_v39 = vpop.xlane.xlu0 %1746 }
 0x35c   : > { %v1790_v37 = vpop.xlane.xlu1 %1789  ;;  %2922 = vadd.xlane.f32.xlu0 %v2921_v36  ;;  %v1759_v40 = vadd.f32 %v5014_v39, %v5010_v33 }
 0x35d   : > { %v5016_v58 = vadd.f32 %v1790_v37, %v1213_v32 }
 0x35f   : > { %v1216_v63 = vpop.xlane.xlu0 %1215 }
 0x360   : > { %v5020_v4 = vpop.xlane.xlu1 %1206 }
 0x363   : > { %v1793_v0 = vpop.xlane.xlu0 %1792 }
 0x364   : > { %v5018_v3 = vadd.f32 %v1793_v0, %v1216_v63  ;;  %v5024_v10 = vpop.xlane.xlu1 %1783 }
 0x367   : > { %v5022_v59 = vpop.xlane.xlu0 %1209 }
 0x36b   : > { %v5026_v22 = vpop.xlane.xlu0 %1786 }
 0x36c   : > { %v1799_v33 = vadd.f32 %v5026_v22, %v5022_v59 }
 0x3ab   : > { %v2315_v38 = vpop.xlane.xlu1 %2314 }
 0x3ac   : > { %v2333_v62 = vadd.f32 %v2315_v38, %v1756_v9 }
 0x3ad   : > { %v2318_v13 = vpop.xlane.xlu0 %2317 }
 0x3ae   : > { %v2334_v1 = vadd.f32 %v2318_v13, %v1757_v61 }
 0x3af   : > { %v2868_v7 = vpop.xlane.xlu1 %2867 }
 0x3b0   : > { %v2886_v41 = vadd.f32 %v2868_v7, %v2333_v62 }
 0x3b1   : > { %v2871_v11 = vpop.xlane.xlu0 %2870 }
 0x3b2   : > { %v2887_v48 = vadd.f32 %v2871_v11, %v2334_v1  ;;  %2976 = vst.msk [vmem:[%s5036_s9 + $0x10] sm:$0xff] %vm2973_vm2, %v2886_v41 }
 0x3b3   : > { %v2309_v25 = vpop.xlane.xlu1 %2308 }
 0x3b4   : > { %2977 = vst.msk [vmem:[%s5036_s9 + $0x18] sm:$0xff] %vm2973_vm2, %v2887_v48  ;;  %v2331_v8 = vadd.f32 %v2309_v25, %v4939_v34 }
 0x3b5   : > { %v2312_v27 = vpop.xlane.xlu0 %2311 }
 0x3b6   : > { %v2332_v45 = vadd.f32 %v2312_v27, %v1755_v60 }
 0x3b7   : > { %v2862_v46 = vpop.xlane.xlu1 %2861 }
 0x3b8   : > { %v2884_v44 = vadd.f32 %v2862_v46, %v2331_v8 }
 0x3b9   : > { %v2865_v49 = vpop.xlane.xlu0 %2864 }
 0x3ba   : > { %v2885_v53 = vadd.f32 %v2865_v49, %v2332_v45  ;;  %2974 = vst.msk [vmem:[%s5036_s9] sm:$0xff] %vm2973_vm2, %v2884_v44 }
 0x3bb   : > { %v2355_v54 = vpop.xlane.xlu1 %2354 }
 0x3bc   : > { %2975 = vst.msk [vmem:[%s5036_s9 + $0x8] sm:$0xff] %vm2973_vm2, %v2885_v53  ;;  %v2373_v47 = vadd.f32 %v2355_v54, %v4949_v6  ;;  %v1794_v6 = vadd.f32 %v4976_v42, %v4966_v2  ;;  %v1760_v2 = vadd.f32 %v4992_v57, %v4986_v51  ;;  %v1758_v51 = vadd.f32 %v5004_v23, %v4998_v26 }
 0x3bd   : > { %v2358_v56 = vpop.xlane.xlu0 %2357  ;;  %v1798_v26 = vadd.f32 %v5024_v10, %v5020_v4 }
 0x3be   : > { %v2374_v15 = vadd.f32 %v2358_v56, %v1797_v50 }
 0x3bf   : > { %v2908_v34 = vpop.xlane.xlu1 %2907 }
 0x3c0   : > { %v2926_v55 = vadd.f32 %v2908_v34, %v2373_v47 }
 0x3c1   : > { %v2911_v14 = vpop.xlane.xlu0 %2910 }
 0x3c2   : > { %v2927_v16 = vadd.f32 %v2911_v14, %v2374_v15  ;;  %2984 = vst.msk [vmem:[%s5056_s12 + $0x10] sm:$0xff] %vm2973_vm2, %v2926_v55 }
 0x3c3   : > { %v2349_v5 = vpop.xlane.xlu1 %2348 }
 0x3c4   : > { %2985 = vst.msk [vmem:[%s5056_s12 + $0x18] sm:$0xff] %vm2973_vm2, %v2927_v16  ;;  %v2371_v18 = vadd.f32 %v2349_v5, %v1794_v6 }
 0x3c5   : > { %v2352_v43 = vpop.xlane.xlu0 %2351 }
 0x3c6   : > { %v2372_v19 = vadd.f32 %v2352_v43, %v1795_v17 }
 0x3c7   : > { %v2902_v20 = vpop.xlane.xlu1 %2901 }
 0x3c8   : > { %v2924_v21 = vadd.f32 %v2902_v20, %v2371_v18 }
 0x3c9   : > { %v2905_v28 = vpop.xlane.xlu0 %2904 }
 0x3ca   : > { %v2925_v29 = vadd.f32 %v2905_v28, %v2372_v19  ;;  %2982 = vst.msk [vmem:[%s5056_s12] sm:$0xff] %vm2973_vm2, %v2924_v21 }
 0x3cb   : > { %v2327_v30 = vpop.xlane.xlu1 %2326 }
 0x3cc   : > { %2983 = vst.msk [vmem:[%s5056_s12 + $0x8] sm:$0xff] %vm2973_vm2, %v2925_v29  ;;  %v2337_v12 = vadd.f32 %v2327_v30, %v1760_v2 }
 0x3cd   : > { %v2330_v42 = vpop.xlane.xlu0 %2329 }
 0x3ce   : > { %v2338_v31 = vadd.f32 %v2330_v42, %v1761_v52 }
 0x3cf   : > { %v2880_v32 = vpop.xlane.xlu1 %2879 }
 0x3d0   : > { %v2890_v35 = vadd.f32 %v2880_v32, %v2337_v12 }
 0x3d1   : > { %v2883_v36 = vpop.xlane.xlu0 %2882 }
 0x3d2   : > { %v2891_v37 = vadd.f32 %v2883_v36, %v2338_v31  ;;  %2980 = vst.msk [vmem:[%s5036_s9 + $0x30] sm:$0xff] %vm2973_vm2, %v2890_v35 }
 0x3d3   : > { %v2321_v63 = vpop.xlane.xlu1 %2320 }
 0x3d4   : > { %2981 = vst.msk [vmem:[%s5036_s9 + $0x38] sm:$0xff] %vm2973_vm2, %v2891_v37  ;;  %v2335_v24 = vadd.f32 %v2321_v63, %v1758_v51 }
 0x3d5   : > { %v2324_v57 = vpop.xlane.xlu0 %2323 }
 0x3d6   : > { %v2336_v0 = vadd.f32 %v2324_v57, %v1759_v40 }
 0x3d7   : > { %v2874_v38 = vpop.xlane.xlu1 %2873 }
 0x3d8   : > { %v2888_v13 = vadd.f32 %v2874_v38, %v2335_v24 }
 0x3d9   : > { %v2877_v9 = vpop.xlane.xlu0 %2876 }
 0x3da   : > { %v2889_v61 = vadd.f32 %v2877_v9, %v2336_v0  ;;  %2978 = vst.msk [vmem:[%s5036_s9 + $0x20] sm:$0xff] %vm2973_vm2, %v2888_v13 }
 0x3db   : > { %v2367_v62 = vpop.xlane.xlu1 %2366 }
 0x3dc   : > { %2979 = vst.msk [vmem:[%s5036_s9 + $0x28] sm:$0xff] %vm2973_vm2, %v2889_v61  ;;  %v2377_v60 = vadd.f32 %v2367_v62, %v5016_v58 }
 0x3dd   : > { %v2370_v1 = vpop.xlane.xlu0 %2369 }
 0x3de   : > { %v2378_v8 = vadd.f32 %v2370_v1, %v5018_v3 }
 0x3df   : > { %v2361_v7 = vpop.xlane.xlu1 %2360 }
 0x3e0   : > { %v2375_v39 = vadd.f32 %v2361_v7, %v1798_v26 }
 0x3e1   : > { %v2364_v23 = vpop.xlane.xlu0 %2363 }
 0x3e2   : > { %v2376_v41 = vadd.f32 %v2364_v23, %v1799_v33 }
 0x3e3   : > { %v2914_v11 = vpop.xlane.xlu1 %2913 }
 0x3e4   : > { %v2928_v48 = vadd.f32 %v2914_v11, %v2375_v39 }
 0x3e5   : > { %v2917_v25 = vpop.xlane.xlu0 %2916 }
 0x3e6   : > { %v2929_v27 = vadd.f32 %v2917_v25, %v2376_v41  ;;  %2986 = vst.msk [vmem:[%s5056_s12 + $0x20] sm:$0xff] %vm2973_vm2, %v2928_v48 }
 0x3e7   : > { %v2920_v4 = vpop.xlane.xlu1 %2919 }
 0x3e8   : > { %2987 = vst.msk [vmem:[%s5056_s12 + $0x28] sm:$0xff] %vm2973_vm2, %v2929_v27  ;;  %v2930_v10 = vadd.f32 %v2920_v4, %v2377_v60 }
 0x3e9   : > { %v2923_v45 = vpop.xlane.xlu0 %2922 }
 0x3ea   : > { %v2931_v46 = vadd.f32 %v2923_v45, %v2378_v8  ;;  %2988 = vst.msk [vmem:[%s5056_s12 + $0x30] sm:$0xff] %vm2973_vm2, %v2930_v10 }
 0x3ec   : > { %2989 = vst.msk [vmem:[%s5056_s12 + $0x38] sm:$0xff] %vm2973_vm2, %v2931_v46 }
 0x3ed PF: > { %s20_s27 = sadd.s32 1, %s4143_s27  }
 0x3ee   : > { %p17_p3 = scmp.ge.s32.totalorder %s20_s27, 4  }
 0x3f0   :  { %19 = sbr.rel (!%p17_p3) target bundleno = 1 (0x1), region = 121 }
 0x3f7   :  { %3043 = vsyncpa [#allocation3], 1 }
 0x3f8   :  { %3045 = vsyncpa [#allocation3 + $0x1], 1 }

// kernel: generator_forward.8
= control target key start
LH: loop header
LB: loop body
LE: loop exit
PB: predicated region body
PF: predicated region fallthrough
CT: control target
= control target key end

     0   :  { %s3128_s27 = smov 0   ;;  %s3672_s0 = inlined_call_operand.vmem [shape: bf16[2,32,326], index: 0, kind: input, shape index: {}]   ;;  %s3673_s1 = inlined_call_operand.vmem [shape: f32[32,1], index: 1, kind: input, shape index: {}]   ;;  %s3674_s2 = inlined_call_operand.vmem [shape: f32[32,1], index: 2, kind: input, shape index: {}]   ;;  %s3675_s3 = inlined_call_operand.vmem [shape: f32[1,326], index: 3, kind: input, shape index: {}]   ;;  %s3676_s4 = inlined_call_operand.vmem [shape: f32[1,288], index: 4, kind: input, shape index: {}]   ;;  %s3677_s5 = inlined_call_operand.vmem [shape: bf16[16,16,32], index: 5, kind: input, shape index: {}]   ;;  %s3678_s6 = inlined_call_operand.vmem [shape: bf16[2,4,16,288], index: 6, kind: output, shape index: {0}]   ;;  %s3679_s7 = inlined_call_operand.vmem [shape: f32[2,16,1], index: 7, kind: output, shape index: {1}]   ;;  %s3680_s8 = inlined_call_operand.vmem [shape: f32[2,16,1], index: 8, kind: output, shape index: {2}]  }
   0x1 LB: > { %s2616_s28 = sadd.s32 4294967295, %s3070_s27   ;;  %p2620_p0 = scmp.ge.s32.totalorder %s3070_s27, 1  ;;  %s3070_s27 = sphi %s3128_s27, %s19_s27  }
   0x2   : > { %p267_p1 = scmp.lt.s32.totalorder %s3070_s27, 3 }
   0x4   : > { %p268_p2 = pnand %p2620_p0, %p267_p1 }
   0x5   : > { %v388_v0 = vld [vmem:[%s3674_s2] sm:$0xff] (!%p268_p2)  ;;  %v3072_v2 = vmov (!%p268_p2), 0   ;;  %v389_v3 = vld [vmem:[%s3674_s2 + $0x8] sm:$0xff] (!%p268_p2)  ;;  %v355_v5 = vld [vmem:[%s3673_s1 + $0x18] sm:$0xff] (!%p268_p2)  ;;  %p311_p3 = scmp.lt.s32.totalorder (!%p268_p2), %s2616_s28, 1  ;;  %v3073_v9 = vmov (!%p268_p2), 0.0   ;;  %v438_v10 = vlaneseq (!%p268_p2) }
   0x6   : > { %271 = sbr.rel (%p268_p2) target bundleno = 817 (0x331), region = 44  ;;  %v352_v1 = vld [vmem:[%s3673_s1] sm:$0xff] (!%p268_p2)  ;;  %3047 = vset.pattern.permute.xlu1 (!%p268_p2), %v3072_v2  ;;  %3046 = vset.pattern.permute.xlu0 (!%p268_p2), %v3072_v2  ;;  %v353_v4 = vld [vmem:[%s3673_s1 + $0x8] sm:$0xff] (!%p268_p2)  ;;  %v354_v6 = vld [vmem:[%s3673_s1 + $0x10] sm:$0xff] (!%p268_p2)  ;;  %vm3074_vm0 = vmmov (!%p268_p2), 0   ;;  %s3075_s9 = smov (!%p268_p2), 110  }
   0x7   : > { %394 = vperm.xlu1 (!%p268_p2), %3047, %v388_v0   ;;  %358 = vperm.xlu0 (!%p268_p2), %3046, %v352_v1   ;;  %v391_v7 = vld [vmem:[%s3674_s2 + $0x18] sm:$0xff] (!%p268_p2)  ;;  %v390_v8 = vld [vmem:[%s3674_s2 + $0x10] sm:$0xff] (!%p268_p2)  ;;  %v3170_v13 = vshrl.u32 (!%p268_p2), %v438_v10, 7  ;;  %v436_v22 = vld [vmem:[%s3675_s3] sm:$0x7] (!%p268_p2)  ;;  %s3076_s10 = smov (!%p268_p2), 109  }
   0x8   : > { %547 = vmatprep.mubr.bf16.mxu0 (!%p268_p2), %v3072_v2  ;;  %2801 = vmatprep.subr.bf16.mxu1 (!%p268_p2), %v3073_v9  ;;  %s3077_s11 = smov (!%p268_p2), 127   ;;  %s3078_s12 = smov (!%p268_p2), 108   ;;  %vm500_vm1 = vcmask (!%p268_p2), 900096   ;;  %vm511_vm2 = vcmask (!%p268_p2), 261120   ;;  %vm616_vm3 = vcmask (!%p268_p2), 891904   ;;  %vm734_vm4 = vcmask (!%p268_p2), 1039360  }
   0x9   : > { %v444_v19 = vsub.s32 (!%p268_p2), 1, %v3170_v13  ;;  %v448_v20 = vsub.s32 (!%p268_p2), 2, %v3170_v13  ;;  %v440_v32 = vsub.s32 (!%p268_p2), 0, %v3170_v13  ;;  %2805 = vmatprep.mubr.msk.bf16.mxu1 (!%p268_p2), %vm3074_vm0, %v3073_v9  ;;  %s3079_s13 = smov (!%p268_p2), 126   ;;  %s3080_s14 = smov (!%p268_p2), 92   ;;  %vm1131_vm5 = vcmask (!%p268_p2), 883712  }
   0xa   : > { %s3081_s15 = smov (!%p268_p2), 91   ;;  %s3082_s16 = smov (!%p268_p2), 90   ;;  %vm1249_vm6 = vcmask (!%p268_p2), 1031168   ;;  %vm1538_vm7 = vcmask (!%p268_p2), 752640   ;;  %vm1653_vm8 = vcmask (!%p268_p2), 744448   ;;  %vm2129_vm9 = vcmask (!%p268_p2), 736256  }
   0xb   : > { %399 = vperm.xlu1 (!%p268_p2), %3047, %v389_v3   ;;  %363 = vperm.xlu0 (!%p268_p2), %3046, %v353_v4   ;;  %v3180_v33 = vrot.slane (!%p268_p2), %v436_v22, %v444_v19  ;;  %v3184_v34 = vrot.slane (!%p268_p2), %v436_v22, %v448_v20  ;;  %v441_v51 = vrot.slane (!%p268_p2), %v436_v22, %v440_v32  ;;  %vm1012_vm10 = vcmask (!%p268_p2), 257024  }
   0xc   : > { %vm2490_vm11 = vcmask (!%p268_p2), 7168  }
   0xd   : > { %s3682_s28 = smov (!%p311_p3, %s2616_s28), 1 }
   0xe   : > { %s3025_s23 = smul.u32 48, %s3682_s28 }
   0xf   : > { %373 = vperm.xlu1 %3047, %v355_v5   ;;  %368 = vperm.xlu0 %3046, %v354_v6  }
  0x10   : > { %s315_s26 = scalar_lea.vmem %s3672_s0, %s3025_s23 }
  0x11   : > { %v332_v11 = vld [vmem:[%s315_s26] sm:$0xff]  ;;  %v333_v12 = vld [vmem:[%s315_s26 + $0x8] ss:$12 sps:$4 sm:$0xff]   ;;  %v334_v17 = vld [vmem:[%s315_s26 + $0xc] sm:$0xff] }
  0x12   : > { %v340_v14 = vunpack.c.l.bf16 %v332_v11  ;;  %v341_v15 = vunpack.c.h.bf16 %v332_v11  ;;  %v342_v16 = vunpack.c.l.bf16 %v333_v12  ;;  %v343_v26 = vunpack.c.l.bf16 %v334_v17  ;;  %v338_v29 = vld [vmem:[%s315_s26 + $0x24] sm:$0xff]  ;;  %v339_v37 = vld [vmem:[%s315_s26 + $0x20] ss:$12 sps:$4 sm:$0xff]   ;;  %v336_v38 = vld [vmem:[%s315_s26 + $0x18] sm:$0xff] }
  0x13   : > { %409 = vperm.xlu1 %3047, %v391_v7   ;;  %404 = vperm.xlu0 %3046, %v390_v8   ;;  %v344_v27 = vunpack.c.h.bf16 %v334_v17  ;;  %v345_v28 = vunpack.c.h.bf16 %v333_v12  ;;  %v349_v42 = vunpack.c.l.bf16 %v338_v29  ;;  %v350_v46 = vunpack.c.h.bf16 %v338_v29 }
  0x14   : > { %v351_v48 = vunpack.c.h.bf16 %v339_v37  ;;  %v346_v49 = vunpack.c.l.bf16 %v336_v38  ;;  %v347_v50 = vunpack.c.h.bf16 %v336_v38  ;;  %v348_v59 = vunpack.c.l.bf16 %v339_v37 }
  0x86   : > { %v395_v18 = vpop.permute.xlu1 %394  ;;  %v359_v21 = vpop.permute.xlu0 %358 }
  0x87   : > { %v376_v23 = vmul.f32 %v359_v21, %v340_v14  ;;  %v377_v24 = vmul.f32 %v359_v21, %v341_v15  ;;  %v378_v25 = vmul.f32 %v359_v21, %v342_v16 }
  0x89   : > { %v413_v30 = vadd.f32 %v395_v18, %v377_v24  ;;  %v414_v31 = vadd.f32 %v395_v18, %v378_v25  ;;  %v412_v39 = vadd.f32 %v395_v18, %v376_v23 }
  0x8a   : > { %v400_v35 = vpop.permute.xlu1 %399  ;;  %v364_v36 = vpop.permute.xlu0 %363 }
  0x8b   : > { %v425_v40 = vmax.f32 %v413_v30, 0.0  ;;  %v379_v41 = vmul.f32 %v364_v36, %v343_v26  ;;  %v426_v43 = vmax.f32 %v414_v31, 0.0  ;;  %v380_v44 = vmul.f32 %v364_v36, %v344_v27 }
  0x8c   : > { %v381_v45 = vmul.f32 %v364_v36, %v345_v28  ;;  %v424_v56 = vmax.f32 %v412_v39, 0.0 }
  0x8d   : > { %v415_v47 = vadd.f32 %v400_v35, %v379_v41  ;;  %v416_v52 = vadd.f32 %v400_v35, %v380_v44  ;;  %v454_v57 = vmul.f32 %v3180_v33, %v425_v40  ;;  %v455_v60 = vmul.f32 %v3184_v34, %v426_v43 }
  0x8e   : > { %v417_v53 = vadd.f32 %v400_v35, %v381_v45  ;;  %v374_v54 = vpop.permute.xlu1 %373  ;;  %v369_v55 = vpop.permute.xlu0 %368  ;;  %v453_v25 = vmul.f32 %v441_v51, %v424_v56 }
  0x8f   : > { %v427_v58 = vmax.f32 %v415_v47, 0.0  ;;  %v428_v61 = vmax.f32 %v416_v52, 0.0  ;;  %v385_v63 = vmul.f32 %v374_v54, %v349_v42  ;;  %v386_v0 = vmul.f32 %v374_v54, %v350_v46 }
  0x90   : > { %v429_v62 = vmax.f32 %v417_v53, 0.0  ;;  %v387_v1 = vmul.f32 %v374_v54, %v351_v48  ;;  %v382_v3 = vmul.f32 %v369_v55, %v346_v49  ;;  %v383_v4 = vmul.f32 %v369_v55, %v347_v50  ;;  %v3048_v48 = vld [vmem:[%s3677_s5 + $0x8] sm:$0xff]  }
  0x91   : > { %v456_v5 = vmul.f32 %v441_v51, %v427_v58  ;;  %v457_v6 = vmul.f32 %v3180_v33, %v428_v61  ;;  %v384_v11 = vmul.f32 %v369_v55, %v348_v59  ;;  %v3049_v59 = vld [vmem:[%s3677_s5] sm:$0xff]  }
  0x92   : > { %v458_v7 = vmul.f32 %v3184_v34, %v429_v62  ;;  %v410_v8 = vpop.permute.xlu1 %409  ;;  %v405_v10 = vpop.permute.xlu0 %404 }
  0x93   : > { %v421_v12 = vadd.f32 %v410_v8, %v385_v63  ;;  %v422_v14 = vadd.f32 %v410_v8, %v386_v0  ;;  %v423_v15 = vadd.f32 %v410_v8, %v387_v1  ;;  %v3194_v16 = vpack.c.bf16 %v457_v6, %v454_v57 }
  0x94   : > { %v3196_v17 = vpack.c.bf16 %v458_v7, %v455_v60  ;;  %v418_v18 = vadd.f32 %v405_v10, %v382_v3  ;;  %v419_v21 = vadd.f32 %v405_v10, %v383_v4  ;;  %v420_v24 = vadd.f32 %v405_v10, %v384_v11  ;;  %v3050_v7 = vld [vmem:[%s3677_s5 + $0x10] sm:$0xff]  }
  0x95   : > { %v434_v22 = vmax.f32 %v422_v14, 0.0  ;;  %v435_v23 = vmax.f32 %v423_v15, 0.0  ;;  %v433_v26 = vmax.f32 %v421_v12, 0.0  ;;  %490 = vrot.lane.b32.xlu0 %v3194_v16, %s3075_s9  ;;  %v3201_v31 = vpack.c.bf16 %v456_v5, %v453_v25 }
  0x96   : > { %v430_v27 = vmax.f32 %v418_v18, 0.0  ;;  %v431_v28 = vmax.f32 %v419_v21, 0.0  ;;  %492 = vrot.lane.b32.xlu1 %v3196_v17, %s3075_s9  ;;  %v432_v30 = vmax.f32 %v420_v24, 0.0 }
  0x97   : > { %v463_v29 = vmul.f32 %v3180_v33, %v434_v22  ;;  %v464_v35 = vmul.f32 %v3184_v34, %v435_v23  ;;  %v462_v38 = vmul.f32 %v441_v51, %v433_v26  ;;  %v3052_v22 = vld [vmem:[%s3677_s5 + $0x28] sm:$0xff]  }
  0x98   : > { %v460_v36 = vmul.f32 %v3180_v33, %v431_v28  ;;  %v461_v37 = vmul.f32 %v3184_v34, %v432_v30  ;;  %v459_v39 = vmul.f32 %v441_v51, %v430_v27 }
  0x99   : > { %488 = vrot.lane.b32.xlu0 %v3201_v31, %s3075_s9 }
  0x9a   : > { %v3206_v40 = vpack.c.bf16 %v463_v29, %v460_v36  ;;  %v3209_v41 = vpack.c.bf16 %v464_v35, %v461_v37  ;;  %v3212_v42 = vpack.c.bf16 %v462_v38, %v459_v39  ;;  %v3053_v35 = vld [vmem:[%s3677_s5 + $0x20] sm:$0xff]  }
  0x9c   : > { %496 = vrot.lane.b32.xlu1 %v3206_v40, %s3075_s9 }
  0x9d   : > { %498 = vrot.lane.b32.xlu0 %v3209_v41, %s3075_s9 }
  0xa0   : > { %494 = vrot.lane.b32.xlu1 %v3212_v42, %s3075_s9 }
  0xa1   : > { %606 = vrot.lane.b32.xlu0 %v3194_v16, %s3076_s10 }
  0xa4   : > { %608 = vrot.lane.b32.xlu1 %v3196_v17, %s3076_s10 }
  0xa5   : > { %604 = vrot.lane.b32.xlu0 %v3201_v31, %s3076_s10 }
  0xa8   : > { %612 = vrot.lane.b32.xlu1 %v3206_v40, %s3076_s10 }
  0xa9   : > { %614 = vrot.lane.b32.xlu0 %v3209_v41, %s3076_s10 }
  0xac   : > { %610 = vrot.lane.b32.xlu1 %v3212_v42, %s3076_s10 }
  0xad   : > { %724 = vrot.lane.b32.xlu0 %v3194_v16, %s3077_s11 }
  0xb0   : > { %726 = vrot.lane.b32.xlu1 %v3196_v17, %s3077_s11 }
  0xb1   : > { %722 = vrot.lane.b32.xlu0 %v3201_v31, %s3077_s11 }
  0xb4   : > { %730 = vrot.lane.b32.xlu1 %v3206_v40, %s3077_s11 }
  0xb5   : > { %732 = vrot.lane.b32.xlu0 %v3209_v41, %s3077_s11 }
  0xb8   : > { %728 = vrot.lane.b32.xlu1 %v3212_v42, %s3077_s11  ;;  %s3026_s11 = smul.u32 96, %s3682_s28 }
  0xb9   : > { %1121 = vrot.lane.b32.xlu0 %v3194_v16, %s3078_s12 }
  0xbc   : > { %1123 = vrot.lane.b32.xlu1 %v3196_v17, %s3078_s12 }
  0xbd   : > { %1119 = vrot.lane.b32.xlu0 %v3201_v31, %s3078_s12 }
  0xc0   : > { %1127 = vrot.lane.b32.xlu1 %v3206_v40, %s3078_s12 }
  0xc1   : > { %1129 = vrot.lane.b32.xlu0 %v3209_v41, %s3078_s12 }
  0xc4   : > { %1125 = vrot.lane.b32.xlu1 %v3212_v42, %s3078_s12 }
  0xc5   : > { %1239 = vrot.lane.b32.xlu0 %v3194_v16, %s3079_s13 }
  0xc8   : > { %1241 = vrot.lane.b32.xlu1 %v3196_v17, %s3079_s13 }
  0xc9   : > { %1237 = vrot.lane.b32.xlu0 %v3201_v31, %s3079_s13 }
  0xcc   : > { %1245 = vrot.lane.b32.xlu1 %v3206_v40, %s3079_s13 }
  0xcd   : > { %1247 = vrot.lane.b32.xlu0 %v3209_v41, %s3079_s13 }
  0xd0   : > { %1243 = vrot.lane.b32.xlu1 %v3212_v42, %s3079_s13 }
  0xd1   : > { %1528 = vrot.lane.b32.xlu0 %v3194_v16, %s3080_s14 }
  0xd4   : > { %1530 = vrot.lane.b32.xlu1 %v3196_v17, %s3080_s14 }
  0xd5   : > { %1526 = vrot.lane.b32.xlu0 %v3201_v31, %s3080_s14 }
  0xd8   : > { %1534 = vrot.lane.b32.xlu1 %v3206_v40, %s3080_s14 }
  0xd9   : > { %1536 = vrot.lane.b32.xlu0 %v3209_v41, %s3080_s14 }
  0xdc   : > { %1532 = vrot.lane.b32.xlu1 %v3212_v42, %s3080_s14  ;;  %s3588_s14 = scalar_lea.vmem %s3678_s6, %s3026_s11 }
  0xdd   : > { %1643 = vrot.lane.b32.xlu0 %v3194_v16, %s3081_s15 }
  0xe0   : > { %1645 = vrot.lane.b32.xlu1 %v3196_v17, %s3081_s15 }
  0xe1   : > { %1641 = vrot.lane.b32.xlu0 %v3201_v31, %s3081_s15 }
  0xe4   : > { %1649 = vrot.lane.b32.xlu1 %v3206_v40, %s3081_s15 }
  0xe5   : > { %1651 = vrot.lane.b32.xlu0 %v3209_v41, %s3081_s15 }
  0xe8   : > { %1647 = vrot.lane.b32.xlu1 %v3212_v42, %s3081_s15  ;;  %s2735_s15 = sshll.u32 %s3682_s28, 4 }
  0xe9   : > { %2119 = vrot.lane.b32.xlu0 %v3194_v16, %s3082_s16  ;;  %s325_s18 = scalar_lea.vmem %s3679_s7, %s2735_s15  ;;  %s330_s20 = scalar_lea.vmem %s3680_s8, %s2735_s15 }
  0xec   : > { %2121 = vrot.lane.b32.xlu1 %v3196_v17, %s3082_s16 }
  0xed   : > { %2117 = vrot.lane.b32.xlu0 %v3201_v31, %s3082_s16 }
  0xf0   : > { %2125 = vrot.lane.b32.xlu1 %v3206_v40, %s3082_s16 }
  0xf1   : > { %2127 = vrot.lane.b32.xlu0 %v3209_v41, %s3082_s16 }
  0xf4   : > { %2123 = vrot.lane.b32.xlu1 %v3212_v42, %s3082_s16 }
 0x107   : > { %v491_v34 = vpop.permute.xlu0 %490 }
 0x108   : > { %v3258_v33 = vpop.permute.xlu1 %492 }
 0x109   : > { %2802 = vmatpush3.bf16.msra.mxu1 %v3258_v33  ;;  %v3263_v43 = vsel %vm500_vm1, %v491_v34, %v3258_v33 }
 0x10a   : > { %515 = vmatprep.subr.bf16.mxu0 %v3263_v43  ;;  %2803 = vmatprep.subr.bf16.mxu1 %v3073_v9 }
 0x10b   : > { %v489_v44 = vpop.permute.xlu0 %488 }
 0x10c   : > { %v3268_v45 = vsel %vm500_vm1, %v489_v44, %v491_v34  ;;  %v3054_v34 = vld [vmem:[%s3677_s5 + $0x30] sm:$0xff]  }
 0x10d   : > { %516 = vmatpush1.bf16.msra.mxu0 %v3268_v45 }
 0x10e   : > { %v497_v46 = vpop.permute.xlu1 %496 }
 0x10f   : > { %v3271_v47 = vpop.permute.xlu0 %498 }
 0x110   : > { %2804 = vmatpush3.bf16.msra.mxu1 %v3271_v47  ;;  %v3279_v49 = vsel %vm500_vm1, %v497_v46, %v3271_v47 }
 0x111   : > { %517 = vmatprep.subr.bf16.mxu0 %v3279_v49  ;;  %2809 = vmatprep.subr.bf16.mxu1 %v3073_v9 }
 0x112   : > { %v495_v50 = vpop.permute.xlu1 %494 }
 0x113   : > { %v3284_v51 = vsel %vm500_vm1, %v495_v50, %v497_v46  ;;  %2806 = vmatmul.mubr.msk.bf16.vlgmr.msra.gmra.mrb[0].mxu1 %vm511_vm2, %v3048_v48  ;;  %v607_v52 = vpop.permute.xlu0 %606 }
 0x114   : > { %518 = vmatpush1.bf16.msra.mxu0 %v3284_v51  ;;  %2813 = vmatprep.mubr.msk.bf16.mxu1 %vm3074_vm0, %v3073_v9 }
 0x116   : > { %v3290_v53 = vpop.permute.xlu1 %608 }
 0x117   : > { %2630 = vmatmul.mubr.msk.bf16.vlgmr.msra.gmra.mrb[0].mxu0 %vm511_vm2, %v3048_v48  ;;  %2810 = vmatpush3.bf16.msra.mxu1 %v3290_v53  ;;  %v3296_v54 = vsel %vm616_vm3, %v607_v52, %v3290_v53  ;;  %v605_v55 = vpop.permute.xlu0 %604 }
 0x118   : > { %630 = vmatprep.subr.bf16.mxu0 %v3296_v54  ;;  %2811 = vmatprep.subr.bf16.mxu1 %v3073_v9  ;;  %v3301_v56 = vsel %vm616_vm3, %v605_v55, %v607_v52  ;;  %v3055_v55 = vld [vmem:[%s3677_s5 + $0x38] sm:$0xff]  }
 0x119   : > { %662 = vmatprep.mubr.bf16.mxu0 %v3072_v2  ;;  %631 = vmatpush1.bf16.msra.mxu0 %v3301_v56 }
 0x11a   : > { %v613_v57 = vpop.permute.xlu1 %612 }
 0x11b   : > { %v3305_v58 = vpop.permute.xlu0 %614 }
 0x11c   : > { %2812 = vmatpush3.bf16.msra.mxu1 %v3305_v58  ;;  %v3313_v60 = vsel %vm616_vm3, %v613_v57, %v3305_v58 }
 0x11d   : > { %632 = vmatprep.subr.bf16.mxu0 %v3313_v60  ;;  %2817 = vmatprep.subr.bf16.mxu1 %v3073_v9 }
 0x11e   : > { %v611_v61 = vpop.permute.xlu1 %610 }
 0x11f   : > { %v3318_v62 = vsel %vm616_vm3, %v611_v61, %v613_v57  ;;  %2814 = vmatmul.mubr.msk.bf16.vlgmr.msra.gmra.mrb[0].mxu1 %vm511_vm2, %v3049_v59  ;;  %v725_v63 = vpop.permute.xlu0 %724 }
 0x120   : > { %633 = vmatpush1.bf16.msra.mxu0 %v3318_v62  ;;  %2821 = vmatprep.mubr.msk.bf16.mxu1 %vm3074_vm0, %v3073_v9 }
 0x122   : > { %v3324_v0 = vpop.permute.xlu1 %726 }
 0x123   : > { %2633 = vmatmul.mubr.msk.bf16.vlgmr.msra.gmra.mrb[0].mxu0 %vm511_vm2, %v3049_v59  ;;  %2818 = vmatpush3.bf16.msra.mxu1 %v3324_v0  ;;  %v3330_v1 = vsel %vm734_vm4, %v725_v63, %v3324_v0  ;;  %v723_v3 = vpop.permute.xlu0 %722 }
 0x124   : > { %748 = vmatprep.subr.bf16.mxu0 %v3330_v1  ;;  %2819 = vmatprep.subr.bf16.mxu1 %v3073_v9  ;;  %v3335_v4 = vsel %vm734_vm4, %v723_v3, %v725_v63 }
 0x125   : > { %780 = vmatprep.mubr.bf16.mxu0 %v3072_v2  ;;  %749 = vmatpush1.bf16.msra.mxu0 %v3335_v4 }
 0x126   : > { %v731_v5 = vpop.permute.xlu1 %730 }
 0x127   : > { %v3339_v6 = vpop.permute.xlu0 %732 }
 0x128   : > { %2820 = vmatpush3.bf16.msra.mxu1 %v3339_v6  ;;  %v3347_v8 = vsel %vm734_vm4, %v731_v5, %v3339_v6 }
 0x129   : > { %750 = vmatprep.subr.bf16.mxu0 %v3347_v8  ;;  %2825 = vmatprep.subr.bf16.mxu1 %v3073_v9 }
 0x12a   : > { %v729_v10 = vpop.permute.xlu1 %728 }
 0x12b   : > { %v3352_v11 = vsel %vm734_vm4, %v729_v10, %v731_v5  ;;  %2822 = vmatmul.mubr.msk.bf16.vlgmr.msra.gmra.mrb[0].mxu1 %vm511_vm2, %v3050_v7  ;;  %v1122_v12 = vpop.permute.xlu0 %1121 }
 0x12c   : > { %751 = vmatpush1.bf16.msra.mxu0 %v3352_v11  ;;  %2826 = vmatpush3.bf16.msra.mxu1 %v3196_v17  ;;  %v3051_v17 = vld [vmem:[%s3677_s5 + $0x18] sm:$0xff]  }
 0x12d   : > { %849 = vmatprep.subr.bf16.mxu0 %v3194_v16  ;;  %2827 = vmatprep.subr.bf16.mxu1 %v3073_v9 }
 0x12e   : > { %v3358_v14 = vpop.permute.xlu1 %1123  ;;  %2829 = vmatprep.mubr.msk.bf16.mxu1 %vm3074_vm0, %v3073_v9 }
 0x12f   : > { %2638 = vmatmul.mubr.msk.bf16.vlgmr.msra.gmra.mrb[0].mxu0 %vm511_vm2, %v3050_v7  ;;  %v1120_v15 = vpop.permute.xlu0 %1119  ;;  %v3394_v25 = vsel %vm1131_vm5, %v1122_v12, %v3358_v14 }
 0x130   : > { %850 = vmatpush1.bf16.msra.mxu0 %v3201_v31  ;;  %881 = vmatprep.mubr.bf16.mxu0 %v3072_v2  ;;  %v3402_v26 = vsel %vm1131_vm5, %v1120_v15, %v1122_v12  ;;  %v3057_v12 = vld [vmem:[%s3677_s5 + $0x40] sm:$0xff]   ;;  %v3058_v15 = vld [vmem:[%s3677_s5 + $0x50] sm:$0xff]  }
 0x131   : > { %851 = vmatprep.subr.bf16.mxu0 %v3206_v40  ;;  %2828 = vmatpush3.bf16.msra.mxu1 %v3209_v41 }
 0x132   : > { %2833 = vmatprep.subr.bf16.mxu1 %v3073_v9  ;;  %v1128_v16 = vpop.permute.xlu1 %1127 }
 0x133   : > { %v3374_v18 = vpop.permute.xlu0 %1129 }
 0x134   : > { %852 = vmatpush1.bf16.msra.mxu0 %v3212_v42  ;;  %v3408_v28 = vsel %vm1131_vm5, %v1128_v16, %v3374_v18 }
 0x135   : > { %1030 = vmatprep.subr.bf16.mxu0 %v3296_v54 }
 0x136   : > { %v1126_v21 = vpop.permute.xlu1 %1125 }
 0x137   : > { %2830 = vmatmul.mubr.msk.bf16.vlgmr.msra.gmra.mrb[0].mxu1 %vm511_vm2, %v3051_v17  ;;  %v1240_v23 = vpop.permute.xlu0 %1239  ;;  %v3415_v30 = vsel %vm1131_vm5, %v1126_v21, %v1128_v16 }
 0x138   : > { %2834 = vmatpush3.bf16.msra.mxu1 %v3290_v53  ;;  %2837 = vmatprep.mubr.msk.bf16.mxu1 %vm3074_vm0, %v3073_v9 }
 0x139   : > { %2835 = vmatprep.subr.bf16.mxu1 %v3073_v9 }
 0x13a   : > { %v1242_v24 = vpop.permute.xlu1 %1241 }
 0x13b   : > { %2643 = vmatmul.mubr.msk.bf16.vlgmr.msra.gmra.mrb[0].mxu0 %vm511_vm2, %v3051_v17  ;;  %v1238_v27 = vpop.permute.xlu0 %1237  ;;  %v1251_v31 = vsel %vm1249_vm6, %v1240_v23, %v1242_v24 }
 0x13c   : > { %1031 = vmatpush1.bf16.msra.mxu0 %v3301_v56  ;;  %1062 = vmatprep.mubr.bf16.mxu0 %v3072_v2  ;;  %v1250_v38 = vsel %vm1249_vm6, %v1238_v27, %v1240_v23  ;;  %v3061_v27 = vld [vmem:[%s3677_s5 + $0x60] sm:$0xff]  }
 0x13d   : > { %1032 = vmatprep.subr.bf16.mxu0 %v3313_v60  ;;  %2836 = vmatpush3.bf16.msra.mxu1 %v3305_v58 }
 0x13e   : > { %2841 = vmatprep.subr.bf16.mxu1 %v3073_v9  ;;  %v1246_v29 = vpop.permute.xlu1 %1245 }
 0x13f   : > { %v1248_v36 = vpop.permute.xlu0 %1247 }
 0x140   : > { %1033 = vmatpush1.bf16.msra.mxu0 %v3318_v62  ;;  %2838 = vmatmul.mubr.msk.bf16.vlgmr.msra.gmra.mrb[4].mxu1 %vm511_vm2, %v3052_v22  ;;  %v1253_v40 = vsel %vm1249_vm6, %v1246_v29, %v1248_v36 }
 0x141   : > { %1145 = vmatprep.subr.bf16.mxu0 %v3394_v25  ;;  %2842 = vmatpush3.bf16.msra.mxu1 %v3358_v14 }
 0x142   : > { %2843 = vmatprep.subr.bf16.mxu1 %v3073_v9  ;;  %2845 = vmatprep.mubr.msk.bf16.mxu1 %vm3074_vm0, %v3073_v9  ;;  %v1244_v37 = vpop.permute.xlu1 %1243 }
 0x143   : > { %2654 = vmatmul.mubr.msk.bf16.vlgmr.msra.gmra.mrb[4].mxu0 %vm511_vm2, %v3052_v22  ;;  %v1529_v39 = vpop.permute.xlu0 %1528  ;;  %v1252_v42 = vsel %vm1249_vm6, %v1244_v37, %v1246_v29 }
 0x144   : > { %1146 = vmatpush1.bf16.msra.mxu0 %v3402_v26  ;;  %1177 = vmatprep.mubr.bf16.mxu0 %v3072_v2 }
 0x145   : > { %1147 = vmatprep.subr.bf16.mxu0 %v3408_v28  ;;  %2844 = vmatpush3.bf16.msra.mxu1 %v3374_v18 }
 0x146   : > { %2849 = vmatprep.subr.bf16.mxu1 %v3073_v9  ;;  %v1531_v41 = vpop.permute.xlu1 %1530 }
 0x147   : > { %v1527_v44 = vpop.permute.xlu0 %1526  ;;  %v1540_v52 = vsel %vm1538_vm7, %v1529_v39, %v1531_v41 }
 0x148   : > { %1148 = vmatpush1.bf16.msra.mxu0 %v3415_v30  ;;  %v1539_v61 = vsel %vm1538_vm7, %v1527_v44, %v1529_v39 }
 0x149   : > { %1263 = vmatprep.subr.bf16.mxu0 %v1251_v31 }
 0x14a   : > { %v1535_v46 = vpop.permute.xlu1 %1534 }
 0x14b   : > { %v1537_v48 = vpop.permute.xlu0 %1536 }
 0x14c   : > { %2846 = vmatmul.mubr.msk.bf16.vlgmr.msra.gmra.mrb[4].mxu1 %vm511_vm2, %v3053_v35 }
 0x14d   : > { %2850 = vmatpush3.bf16.msra.mxu1 %v1242_v24  ;;  %2853 = vmatprep.mubr.msk.bf16.mxu1 %vm3074_vm0, %v3073_v9 }
 0x14e   : > { %2851 = vmatprep.subr.bf16.mxu1 %v3073_v9  ;;  %v1533_v50 = vpop.permute.xlu1 %1532 }
 0x14f   : > { %2657 = vmatmul.mubr.msk.bf16.vlgmr.msra.gmra.mrb[4].mxu0 %vm511_vm2, %v3053_v35  ;;  %v1644_v57 = vpop.permute.xlu0 %1643 }
 0x150   : > { %1264 = vmatpush1.bf16.msra.mxu0 %v1250_v38  ;;  %1295 = vmatprep.mubr.bf16.mxu0 %v3072_v2 }
 0x151   : > { %1265 = vmatprep.subr.bf16.mxu0 %v1253_v40  ;;  %2852 = vmatpush3.bf16.msra.mxu1 %v1248_v36 }
 0x152   : > { %2857 = vmatprep.subr.bf16.mxu1 %v3073_v9  ;;  %v3452_v59 = vpop.permute.xlu1 %1645 }
 0x153   : > { %v1642_v63 = vpop.permute.xlu0 %1641  ;;  %v1655_v5 = vsel %vm1653_vm8, %v1644_v57, %v3452_v59 }
 0x154   : > { %1266 = vmatpush1.bf16.msra.mxu0 %v1252_v42  ;;  %v1654_v7 = vsel %vm1653_vm8, %v1642_v63, %v1644_v57 }
 0x155   : > { %1364 = vmatprep.subr.bf16.mxu0 %v3330_v1  ;;  %v3056_v1 = vld [vmem:[%s3677_s5 + $0x48] sm:$0xff]  }
 0x156   : > { %v1650_v3 = vpop.permute.xlu1 %1649 }
 0x158   : > { %2854 = vmatmul.mubr.msk.bf16.vlgmr.msra.gmra.mrb[4].mxu1 %vm511_vm2, %v3054_v34 }
 0x159   : > { %2858 = vmatpush3.bf16.msra.mxu1 %v3324_v0  ;;  %2861 = vmatprep.mubr.msk.bf16.mxu1 %vm3074_vm0, %v3073_v9  ;;  %v1542_v0 = vsel %vm1538_vm7, %v1535_v46, %v1537_v48 }
 0x15a   : > { %2859 = vmatprep.subr.bf16.mxu1 %v3073_v9 }
 0x15b   : > { %2662 = vmatmul.mubr.msk.bf16.vlgmr.msra.gmra.mrb[4].mxu0 %vm511_vm2, %v3054_v34 }
 0x15c   : > { %1365 = vmatpush1.bf16.msra.mxu0 %v3335_v4  ;;  %1396 = vmatprep.mubr.bf16.mxu0 %v3072_v2  ;;  %v1541_v4 = vsel %vm1538_vm7, %v1533_v50, %v1535_v46 }
 0x15d   : > { %1366 = vmatprep.subr.bf16.mxu0 %v3347_v8  ;;  %2860 = vmatpush3.bf16.msra.mxu1 %v3339_v6  ;;  %v1652_v6 = vpop.permute.xlu0 %1651  ;;  %v1648_v8 = vpop.permute.xlu1 %1647 }
 0x15e   : > { %2865 = vmatprep.subr.bf16.mxu1 %v3073_v9  ;;  %v1657_v10 = vsel %vm1653_vm8, %v1650_v3, %v1652_v6 }
 0x160   : > { %1367 = vmatpush1.bf16.msra.mxu0 %v3352_v11  ;;  %v1656_v11 = vsel %vm1653_vm8, %v1648_v8, %v1650_v3 }
 0x161   : > { %1552 = vmatprep.subr.bf16.mxu0 %v1540_v52  ;;  %v2122_v16 = vpop.permute.xlu1 %2121 }
 0x164   : > { %2862 = vmatmul.mubr.msk.bf16.vlgmr.msra.gmra.mrb[4].mxu1 %vm511_vm2, %v3055_v55 }
 0x165   : > { %2866 = vmatpush3.bf16.msra.mxu1 %v1531_v41  ;;  %2869 = vmatprep.mubr.msk.bf16.mxu1 %vm3074_vm0, %v3073_v9 }
 0x166   : > { %2867 = vmatprep.subr.bf16.mxu1 %v3073_v9 }
 0x167   : > { %2667 = vmatmul.mubr.msk.bf16.vlgmr.msra.gmra.mrb[4].mxu0 %vm511_vm2, %v3055_v55 }
 0x168   : > { %1553 = vmatpush1.bf16.msra.mxu0 %v1539_v61  ;;  %1584 = vmatprep.mubr.bf16.mxu0 %v3072_v2 }
 0x169   : > { %1554 = vmatprep.subr.bf16.mxu0 %v1542_v0  ;;  %2868 = vmatpush3.bf16.msra.mxu1 %v1537_v48 }
 0x16a   : > { %2873 = vmatprep.subr.bf16.mxu1 %v3073_v9 }
 0x16c   : > { %1555 = vmatpush1.bf16.msra.mxu0 %v1541_v4  ;;  %2870 = vmatmul.mubr.msk.bf16.vlgmr.msra.gmra.mrb[8].mxu1 %vm511_vm2, %v3056_v1 }
 0x16d   : > { %1667 = vmatprep.subr.bf16.mxu0 %v1655_v5  ;;  %2874 = vmatpush3.bf16.msra.mxu1 %v3452_v59 }
 0x16e   : > { %2875 = vmatprep.subr.bf16.mxu1 %v3073_v9  ;;  %2877 = vmatprep.mubr.msk.bf16.mxu1 %vm3074_vm0, %v3073_v9 }
 0x16f   : > { %2682 = vmatmul.mubr.msk.bf16.vlgmr.msra.gmra.mrb[8].mxu0 %vm511_vm2, %v3056_v1 }
 0x170   : > { %1668 = vmatpush1.bf16.msra.mxu0 %v1654_v7  ;;  %1699 = vmatprep.mubr.bf16.mxu0 %v3072_v2 }
 0x171   : > { %1669 = vmatprep.subr.bf16.mxu0 %v1657_v10  ;;  %2876 = vmatpush3.bf16.msra.mxu1 %v1652_v6 }
 0x172   : > { %2881 = vmatprep.subr.bf16.mxu1 %v3073_v9 }
 0x174   : > { %1670 = vmatpush1.bf16.msra.mxu0 %v1656_v11 }
 0x175   : > { %1762 = vmatprep.subr.bf16.mxu0 %v3296_v54 }
 0x178   : > { %2878 = vmatmul.mubr.msk.bf16.vlgmr.msra.gmra.mrb[8].mxu1 %vm511_vm2, %v3057_v12 }
 0x179   : > { %2882 = vmatpush3.bf16.msra.mxu1 %v3290_v53  ;;  %2885 = vmatprep.mubr.msk.bf16.mxu1 %vm3074_vm0, %v3073_v9 }
 0x17a   : > { %2883 = vmatprep.subr.bf16.mxu1 %v3073_v9 }
 0x17b   : > { %2685 = vmatmul.mubr.msk.bf16.vlgmr.msra.gmra.mrb[8].mxu0 %vm511_vm2, %v3057_v12 }
 0x17c   : > { %1763 = vmatpush1.bf16.msra.mxu0 %v3301_v56  ;;  %1794 = vmatprep.mubr.bf16.mxu0 %v3072_v2 }
 0x17d   : > { %1764 = vmatprep.subr.bf16.mxu0 %v3313_v60  ;;  %2884 = vmatpush3.bf16.msra.mxu1 %v3305_v58 }
 0x17e   : > { %2889 = vmatprep.subr.bf16.mxu1 %v3073_v9 }
 0x180   : > { %1765 = vmatpush1.bf16.msra.mxu0 %v3318_v62 }
 0x181   : > { %1863 = vmatprep.subr.bf16.mxu0 %v3263_v43  ;;  %v2120_v43 = vpop.permute.xlu0 %2119 }
 0x184   : > { %2886 = vmatmul.mubr.msk.bf16.vlgmr.msra.gmra.mrb[8].mxu1 %vm511_vm2, %v3058_v15 }
 0x185   : > { %2890 = vmatpush3.bf16.msra.mxu1 %v3258_v33  ;;  %2893 = vmatprep.mubr.msk.bf16.mxu1 %vm3074_vm0, %v3073_v9  ;;  %v3059_v33 = vld [vmem:[%s3677_s5 + $0x58] sm:$0xff]  }
 0x186   : > { %2891 = vmatprep.subr.bf16.mxu1 %v3073_v9 }
 0x187   : > { %2690 = vmatmul.mubr.msk.bf16.vlgmr.msra.gmra.mrb[8].mxu0 %vm511_vm2, %v3058_v15 }
 0x188   : > { %1864 = vmatpush1.bf16.msra.mxu0 %v3268_v45  ;;  %1895 = vmatprep.mubr.bf16.mxu0 %v3072_v2  ;;  %v2118_v45 = vpop.permute.xlu0 %2117 }
 0x189   : > { %1865 = vmatprep.subr.bf16.mxu0 %v3279_v49  ;;  %2892 = vmatpush3.bf16.msra.mxu1 %v3271_v47  ;;  %v3060_v47 = vld [vmem:[%s3677_s5 + $0x68] sm:$0xff]   ;;  %v2126_v49 = vpop.permute.xlu1 %2125  ;;  %v2130_v21 = vsel %vm2129_vm9, %v2118_v45, %v2120_v43 }
 0x18a   : > { %2897 = vmatprep.subr.bf16.mxu1 %v3073_v9 }
 0x18c   : > { %1866 = vmatpush1.bf16.msra.mxu0 %v3284_v51  ;;  %v2131_v51 = vsel %vm2129_vm9, %v2120_v43, %v2122_v16  ;;  %v2128_v17 = vpop.permute.xlu0 %2127 }
 0x18d   : > { %2028 = vmatprep.subr.bf16.mxu0 %v1655_v5  ;;  %v2124_v22 = vpop.permute.xlu1 %2123  ;;  %v2133_v23 = vsel %vm2129_vm9, %v2126_v49, %v2128_v17 }
 0x18e   : > { %v2132_v24 = vsel %vm2129_vm9, %v2124_v22, %v2126_v49 }
 0x190   : > { %2894 = vmatmul.mubr.msk.bf16.vlgmr.msra.gmra.mrb[8].mxu1 %vm511_vm2, %v3059_v33 }
 0x191   : > { %2898 = vmatpush3.bf16.msra.mxu1 %v3452_v59  ;;  %2901 = vmatprep.mubr.msk.bf16.mxu1 %vm3074_vm0, %v3073_v9 }
 0x192   : > { %2899 = vmatprep.subr.bf16.mxu1 %v3073_v9 }
 0x193   : > { %2695 = vmatmul.mubr.msk.bf16.vlgmr.msra.gmra.mrb[8].mxu0 %vm511_vm2, %v3059_v33 }
 0x194   : > { %2029 = vmatpush1.bf16.msra.mxu0 %v1654_v7  ;;  %2060 = vmatprep.mubr.bf16.mxu0 %v3072_v2 }
 0x195   : > { %2030 = vmatprep.subr.bf16.mxu0 %v1657_v10  ;;  %2900 = vmatpush3.bf16.msra.mxu1 %v1652_v6 }
 0x196   : > { %2905 = vmatprep.subr.bf16.mxu1 %v3073_v9 }
 0x198   : > { %2031 = vmatpush1.bf16.msra.mxu0 %v1656_v11  ;;  %2902 = vmatmul.mubr.msk.bf16.vlgmr.msra.gmra.mrb[12].mxu1 %vm511_vm2, %v3060_v47 }
 0x199   : > { %2143 = vmatprep.subr.bf16.mxu0 %v2131_v51  ;;  %2906 = vmatpush3.bf16.msra.mxu1 %v2122_v16 }
 0x19a   : > { %2907 = vmatprep.subr.bf16.mxu1 %v3073_v9  ;;  %2909 = vmatprep.mubr.msk.bf16.mxu1 %vm3074_vm0, %v3073_v9 }
 0x19b   : > { %2710 = vmatmul.mubr.msk.bf16.vlgmr.msra.gmra.mrb[12].mxu0 %vm511_vm2, %v3060_v47 }
 0x19c   : > { %2144 = vmatpush1.bf16.msra.mxu0 %v2130_v21  ;;  %2175 = vmatprep.mubr.bf16.mxu0 %v3072_v2 }
 0x19d   : > { %2145 = vmatprep.subr.bf16.mxu0 %v2133_v23  ;;  %2908 = vmatpush3.bf16.msra.mxu1 %v2128_v17 }
 0x19e   : > { %2913 = vmatprep.subr.bf16.mxu1 %v3073_v9 }
 0x1a0   : > { %2146 = vmatpush1.bf16.msra.mxu0 %v2132_v24 }
 0x1a1   : > { %2238 = vmatprep.subr.bf16.mxu0 %v3394_v25 }
 0x1a4   : > { %2910 = vmatmul.mubr.msk.bf16.vlgmr.msra.gmra.mrb[12].mxu1 %vm511_vm2, %v3061_v27 }
 0x1a5   : > { %2914 = vmatpush3.bf16.msra.mxu1 %v3358_v14  ;;  %2917 = vmatprep.mubr.msk.bf16.mxu1 %vm3074_vm0, %v3073_v9  ;;  %v3062_v14 = vld [vmem:[%s3677_s5 + $0x70] sm:$0xff]  }
 0x1a6   : > { %2915 = vmatprep.subr.bf16.mxu1 %v3073_v9 }
 0x1a7   : > { %2713 = vmatmul.mubr.msk.bf16.vlgmr.msra.gmra.mrb[12].mxu0 %vm511_vm2, %v3061_v27 }
 0x1a8   : > { %2239 = vmatpush1.bf16.msra.mxu0 %v3402_v26  ;;  %2270 = vmatprep.mubr.bf16.mxu0 %v3072_v2 }
 0x1a9   : > { %2240 = vmatprep.subr.bf16.mxu0 %v3408_v28  ;;  %2916 = vmatpush3.bf16.msra.mxu1 %v3374_v18 }
 0x1aa   : > { %2921 = vmatprep.subr.bf16.mxu1 %v3073_v9 }
 0x1ac   : > { %2241 = vmatpush1.bf16.msra.mxu0 %v3415_v30 }
 0x1ad   : > { %2339 = vmatprep.subr.bf16.mxu0 %v3296_v54 }
 0x1b0   : > { %2918 = vmatmul.mubr.msk.bf16.vlgmr.msra.gmra.mrb[12].mxu1 %vm511_vm2, %v3062_v14 }
 0x1b1   : > { %2922 = vmatpush3.bf16.msra.mxu1 %v3290_v53  ;;  %2925 = vmatprep.mubr.msk.bf16.mxu1 %vm3074_vm0, %v3073_v9  ;;  %v3063_v53 = vld [vmem:[%s3677_s5 + $0x78] sm:$0xff]  }
 0x1b2   : > { %2923 = vmatprep.subr.bf16.mxu1 %v3073_v9  ;;  %v471_v9 = vld [vmem:[%s3676_s4] sm:$0x7] }
 0x1b3   : > { %2718 = vmatmul.mubr.msk.bf16.vlgmr.msra.gmra.mrb[12].mxu0 %vm511_vm2, %v3062_v14  ;;  %v3583_v54 = vrot.slane %v471_v9, %v440_v32 }
 0x1b4   : > { %2340 = vmatpush1.bf16.msra.mxu0 %v3301_v56  ;;  %2371 = vmatprep.mubr.bf16.mxu0 %v3072_v2  ;;  %v3579_v2 = vrot.slane %v471_v9, %v448_v20 }
 0x1b5   : > { %2341 = vmatprep.subr.bf16.mxu0 %v3313_v60  ;;  %2924 = vmatpush3.bf16.msra.mxu1 %v3305_v58  ;;  %v3592_v58 = vrot.slane %v471_v9, %v444_v19 }
 0x1b8   : > { %2342 = vmatpush1.bf16.msra.mxu0 %v3318_v62 }
 0x1bc   : > { %2926 = vmatmul.mubr.msk.bf16.vlgmr.msra.gmra.mrb[12].mxu1 %vm511_vm2, %v3063_v53 }
 0x1bf   : > { %2723 = vmatmul.mubr.msk.bf16.vlgmr.msra.gmra.mrb[12].mxu0 %vm511_vm2, %v3063_v53 }
 0x20a   : > { %v926_v56 = vpop.f32.mrb[0].mxu1 }
 0x20b   : > { %v2738_v60 = vpack.c.bf16 %v926_v56, %v926_v56  ;;  %v2831_v20 = vpop.f32.mrb[1].mxu1  ;;  %v957_v62 = vmul.f32 %v3579_v2, %v926_v56 }
 0x20c   : > { %v929_v18 = vpop.f32.mrb[2].mxu1 }
 0x20d   : > { %1013 = vst.msk [vmem:[%s3588_s14 + $0x8] sm:$0xf] %vm1012_vm10, %v2738_v60  ;;  %v2740_v32 = vpack.c.bf16 %v929_v18, %v929_v18  ;;  %v2832_v26 = vpop.f32.mrb[3].mxu1  ;;  %v960_v28 = vmul.f32 %v3579_v2, %v929_v18  ;;  %v975_v35 = vmul.f32 %v957_v62, %v957_v62  ;;  %v962_v46 = vsel %vm511_vm2, %v957_v62, 0.0 }
 0x20e   : > { %v883_v25 = vpop.f32.mrb[0].mxu0 }
 0x20f   : > { %v955_v29 = vmul.f32 %v3583_v54, %v883_v25  ;;  %v885_v30 = vpop.f32.mrb[1].mxu0  ;;  %1015 = vst.msk [vmem:[%s3588_s14 + $0x14] sm:$0xf] %vm1012_vm10, %v2740_v32  ;;  %v978_v34 = vmul.f32 %v960_v28, %v960_v28  ;;  %v967_v57 = vsel %vm511_vm2, %v960_v28, 0.0  ;;  %v980_v59 = vsel %vm511_vm2, %v975_v35, 0.0 }
 0x210   : > { %v956_v13 = vmul.f32 %v3592_v58, %v885_v30  ;;  %v2737_v19 = vpack.c.bf16 %v885_v30, %v883_v25  ;;  %v887_v31 = vpop.f32.mrb[2].mxu0 }
 0x211   : > { %v973_v36 = vmul.f32 %v955_v29, %v955_v29  ;;  %v958_v37 = vmul.f32 %v3583_v54, %v887_v31  ;;  %v889_v38 = vpop.f32.mrb[3].mxu0  ;;  %v985_v1 = vsel %vm511_vm2, %v978_v34, 0.0 }
 0x212   : > { %v974_v39 = vmul.f32 %v956_v13, %v956_v13  ;;  %1011 = vst [vmem:[%s3588_s14] sm:$0xff] %v2737_v19  ;;  %v959_v40 = vmul.f32 %v3592_v58, %v889_v38  ;;  %v2739_v41 = vpack.c.bf16 %v889_v38, %v887_v31  ;;  %v961_v42 = vadd.f32 %v956_v13, %v955_v29 }
 0x213   : > { %v976_v44 = vmul.f32 %v958_v37, %v958_v37 }
 0x214   : > { %v977_v48 = vmul.f32 %v959_v40, %v959_v40  ;;  %1014 = vst [vmem:[%s3588_s14 + $0xc] sm:$0xff] %v2739_v41  ;;  %v963_v50 = vadd.f32 %v962_v46, %v961_v42  ;;  %v966_v52 = vadd.f32 %v959_v40, %v958_v37  ;;  %v979_v55 = vadd.f32 %v974_v39, %v973_v36 }
 0x216   : > { %964 = vadd.xlane.f32.xlu0 %v963_v50  ;;  %v968_v61 = vadd.f32 %v967_v57, %v966_v52  ;;  %v981_v63 = vadd.f32 %v980_v59, %v979_v55  ;;  %v984_v0 = vadd.f32 %v977_v48, %v976_v44 }
 0x218   : > { %969 = vadd.xlane.f32.xlu1 %v968_v61  ;;  %v986_v3 = vadd.f32 %v985_v1, %v984_v0 }
 0x21a   : > { %982 = vadd.xlane.f32.xlu0 %v981_v63 }
 0x21e   : > { %987 = vadd.xlane.f32.xlu0 %v986_v3 }
 0x237   : > { %v1441_v4 = vpop.f32.mrb[4].mxu1 }
 0x238   : > { %v2742_v5 = vpack.c.bf16 %v1441_v4, %v1441_v4  ;;  %v2863_v6 = vpop.f32.mrb[5].mxu1  ;;  %v1456_v7 = vmul.f32 %v1441_v4, %v3579_v2 }
 0x239   : > { %v1444_v8 = vpop.f32.mrb[6].mxu1 }
 0x23a   : > { %2674 = vst.msk [vmem:[%s3588_s14 + $0x20] sm:$0xf] %vm1012_vm10, %v2742_v5  ;;  %v2744_v10 = vpack.c.bf16 %v1444_v8, %v1444_v8  ;;  %v1398_v11 = vpop.f32.mrb[4].mxu0  ;;  %v2864_v12 = vpop.f32.mrb[7].mxu1  ;;  %v1459_v15 = vmul.f32 %v1444_v8, %v3579_v2  ;;  %v1474_v49 = vmul.f32 %v1456_v7, %v1456_v7  ;;  %v1461_v9 = vsel %vm511_vm2, %v1456_v7, 0.0 }
 0x23b   : > { %v1454_v33 = vmul.f32 %v1398_v11, %v3583_v54  ;;  %v1400_v43 = vpop.f32.mrb[5].mxu0 }
 0x23c   : > { %2676 = vst.msk [vmem:[%s3588_s14 + $0x2c] sm:$0xf] %vm1012_vm10, %v2744_v10  ;;  %v1455_v16 = vmul.f32 %v1400_v43, %v3592_v58  ;;  %v2741_v45 = vpack.c.bf16 %v1400_v43, %v1398_v11  ;;  %v1402_v47 = vpop.f32.mrb[6].mxu0  ;;  %v1477_v14 = vmul.f32 %v1459_v15, %v1459_v15  ;;  %v1466_v18 = vsel %vm511_vm2, %v1459_v15, 0.0 }
 0x23d   : > { %v1472_v51 = vmul.f32 %v1454_v33, %v1454_v33  ;;  %v1457_v17 = vmul.f32 %v1402_v47, %v3583_v54  ;;  %v1404_v21 = vpop.f32.mrb[7].mxu0  ;;  %v1479_v32 = vsel %vm511_vm2, %v1474_v49, 0.0 }
 0x23e   : > { %v1473_v22 = vmul.f32 %v1455_v16, %v1455_v16  ;;  %2673 = vst [vmem:[%s3588_s14 + $0x18] sm:$0xff] %v2741_v45  ;;  %v1458_v23 = vmul.f32 %v1404_v21, %v3592_v58  ;;  %v2743_v24 = vpack.c.bf16 %v1404_v21, %v1402_v47  ;;  %v1460_v27 = vadd.f32 %v1455_v16, %v1454_v33 }
 0x23f   : > { %v1475_v53 = vmul.f32 %v1457_v17, %v1457_v17  ;;  %v1484_v29 = vsel %vm511_vm2, %v1477_v14, 0.0 }
 0x240   : > { %v1476_v56 = vmul.f32 %v1458_v23, %v1458_v23  ;;  %2675 = vst [vmem:[%s3588_s14 + $0x24] sm:$0xff] %v2743_v24  ;;  %v1462_v60 = vadd.f32 %v1461_v9, %v1460_v27  ;;  %v1465_v20 = vadd.f32 %v1458_v23, %v1457_v17  ;;  %v1478_v62 = vadd.f32 %v1473_v22, %v1472_v51 }
 0x242   : > { %1463 = vadd.xlane.f32.xlu1 %v1462_v60  ;;  %v1467_v25 = vadd.f32 %v1466_v18, %v1465_v20  ;;  %v1480_v26 = vadd.f32 %v1479_v32, %v1478_v62  ;;  %v1483_v28 = vadd.f32 %v1476_v56, %v1475_v53 }
 0x244   : > { %1468 = vadd.xlane.f32.xlu0 %v1467_v25  ;;  %v1485_v30 = vadd.f32 %v1484_v29, %v1483_v28 }
 0x246   : > { %1481 = vadd.xlane.f32.xlu1 %v1480_v26 }
 0x248   : > { %1486 = vadd.xlane.f32.xlu0 %v1485_v30 }
 0x263   : > { %v1940_v13 = vpop.f32.mrb[8].mxu1 }
 0x264   : > { %v2746_v19 = vpack.c.bf16 %v1940_v13, %v1940_v13  ;;  %v2895_v31 = vpop.f32.mrb[9].mxu1  ;;  %v1955_v35 = vmul.f32 %v1940_v13, %v3579_v2 }
 0x265   : > { %v1943_v36 = vpop.f32.mrb[10].mxu1 }
 0x266   : > { %2702 = vst.msk [vmem:[%s3588_s14 + $0x38] sm:$0xf] %vm1012_vm10, %v2746_v19  ;;  %v2748_v37 = vpack.c.bf16 %v1943_v36, %v1943_v36  ;;  %v1897_v38 = vpop.f32.mrb[8].mxu0  ;;  %v2896_v39 = vpop.f32.mrb[11].mxu1  ;;  %v1958_v40 = vmul.f32 %v1943_v36, %v3579_v2  ;;  %v1973_v48 = vmul.f32 %v1955_v35, %v1955_v35  ;;  %v1960_v3 = vsel %vm511_vm2, %v1955_v35, 0.0 }
 0x267   : > { %v1953_v41 = vmul.f32 %v1897_v38, %v3583_v54  ;;  %v1899_v42 = vpop.f32.mrb[9].mxu0 }
 0x268   : > { %2704 = vst.msk [vmem:[%s3588_s14 + $0x44] sm:$0xf] %vm1012_vm10, %v2748_v37  ;;  %v1954_v34 = vmul.f32 %v1899_v42, %v3592_v58  ;;  %v2745_v44 = vpack.c.bf16 %v1899_v42, %v1897_v38  ;;  %v1901_v46 = vpop.f32.mrb[10].mxu0  ;;  %v1976_v0 = vmul.f32 %v1958_v40, %v1958_v40  ;;  %v1965_v8 = vsel %vm511_vm2, %v1958_v40, 0.0 }
 0x269   : > { %v1971_v50 = vmul.f32 %v1953_v41, %v1953_v41  ;;  %v1956_v52 = vmul.f32 %v1901_v46, %v3583_v54  ;;  %v1903_v55 = vpop.f32.mrb[11].mxu0  ;;  %v1978_v10 = vsel %vm511_vm2, %v1973_v48, 0.0 }
 0x26a   : > { %v1972_v57 = vmul.f32 %v1954_v34, %v1954_v34  ;;  %2701 = vst [vmem:[%s3588_s14 + $0x30] sm:$0xff] %v2745_v44  ;;  %v1957_v59 = vmul.f32 %v1903_v55, %v3592_v58  ;;  %v2747_v61 = vpack.c.bf16 %v1903_v55, %v1901_v46  ;;  %v1959_v63 = vadd.f32 %v1954_v34, %v1953_v41 }
 0x26b   : > { %v1974_v1 = vmul.f32 %v1956_v52, %v1956_v52  ;;  %v1983_v33 = vsel %vm511_vm2, %v1976_v0, 0.0 }
 0x26c   : > { %v1975_v4 = vmul.f32 %v1957_v59, %v1957_v59  ;;  %2703 = vst [vmem:[%s3588_s14 + $0x3c] sm:$0xff] %v2747_v61  ;;  %v1961_v5 = vadd.f32 %v1960_v3, %v1959_v63  ;;  %v1964_v6 = vadd.f32 %v1957_v59, %v1956_v52  ;;  %v1977_v7 = vadd.f32 %v1972_v57, %v1971_v50 }
 0x26e   : > { %1962 = vadd.xlane.f32.xlu1 %v1961_v5  ;;  %v1966_v11 = vadd.f32 %v1965_v8, %v1964_v6  ;;  %v1979_v12 = vadd.f32 %v1978_v10, %v1977_v7  ;;  %v1982_v15 = vadd.f32 %v1975_v4, %v1974_v1 }
 0x270   : > { %1967 = vadd.xlane.f32.xlu0 %v1966_v11  ;;  %v1984_v43 = vadd.f32 %v1983_v33, %v1982_v15 }
 0x272   : > { %1980 = vadd.xlane.f32.xlu1 %v1979_v12 }
 0x274   : > { %1985 = vadd.xlane.f32.xlu0 %v1984_v43 }
 0x28f   : > { %v2416_v16 = vpop.f32.mrb[12].mxu1 }
 0x290   : > { %v2750_v45 = vpack.c.bf16 %v2416_v16, %v2416_v16  ;;  %v2927_v47 = vpop.f32.mrb[13].mxu1  ;;  %v2431_v49 = vmul.f32 %v2416_v16, %v3579_v2 }
 0x291   : > { %v2419_v51 = vpop.f32.mrb[14].mxu1 }
 0x292   : > { %2730 = vst.msk [vmem:[%s3588_s14 + $0x50] sm:$0xf] %vm1012_vm10, %v2750_v45  ;;  %v2752_v17 = vpack.c.bf16 %v2419_v51, %v2419_v51  ;;  %v2373_v21 = vpop.f32.mrb[12].mxu0  ;;  %v2928_v22 = vpop.f32.mrb[15].mxu1  ;;  %v2434_v23 = vmul.f32 %v2419_v51, %v3579_v2  ;;  %v2449_v56 = vmul.f32 %v2431_v49, %v2431_v49  ;;  %v2436_v29 = vsel %vm511_vm2, %v2431_v49, 0.0 }
 0x293   : > { %v2429_v24 = vmul.f32 %v2373_v21, %v3583_v54  ;;  %v2375_v27 = vpop.f32.mrb[13].mxu0 }
 0x294   : > { %2732 = vst.msk [vmem:[%s3588_s14 + $0x5c] sm:$0xf] %vm1012_vm10, %v2752_v17  ;;  %v2430_v14 = vmul.f32 %v2375_v27, %v3592_v58  ;;  %v2749_v53 = vpack.c.bf16 %v2375_v27, %v2373_v21  ;;  %v2377_v9 = vpop.f32.mrb[14].mxu0  ;;  %v2452_v26 = vmul.f32 %v2434_v23, %v2434_v23  ;;  %v2441_v35 = vsel %vm511_vm2, %v2434_v23, 0.0 }
 0x295   : > { %v2447_v60 = vmul.f32 %v2429_v24, %v2429_v24  ;;  %v2432_v20 = vmul.f32 %v2377_v9, %v3583_v54  ;;  %v2379_v62 = vpop.f32.mrb[15].mxu0  ;;  %v2454_v54 = vsel %vm511_vm2, %v2449_v56, 0.0 }
 0x296   : > { %v2448_v18 = vmul.f32 %v2430_v14, %v2430_v14  ;;  %2729 = vst [vmem:[%s3588_s14 + $0x48] sm:$0xff] %v2749_v53  ;;  %v2433_v32 = vmul.f32 %v2379_v62, %v3592_v58  ;;  %v2751_v2 = vpack.c.bf16 %v2379_v62, %v2377_v9  ;;  %v2435_v25 = vadd.f32 %v2430_v14, %v2429_v24 }
 0x297   : > { %v2450_v28 = vmul.f32 %v2432_v20, %v2432_v20  ;;  %v2459_v58 = vsel %vm511_vm2, %v2452_v26, 0.0 }
 0x298   : > { %v2440_v30 = vadd.f32 %v2433_v32, %v2432_v20  ;;  %v2451_v13 = vmul.f32 %v2433_v32, %v2433_v32  ;;  %2731 = vst [vmem:[%s3588_s14 + $0x54] sm:$0xff] %v2751_v2  ;;  %v2437_v19 = vadd.f32 %v2436_v29, %v2435_v25  ;;  %v2453_v31 = vadd.f32 %v2448_v18, %v2447_v60 }
 0x29a   : > { %2438 = vadd.xlane.f32.xlu1 %v2437_v19  ;;  %v2442_v36 = vadd.f32 %v2441_v35, %v2440_v30  ;;  %v2455_v37 = vadd.f32 %v2454_v54, %v2453_v31  ;;  %v2458_v38 = vadd.f32 %v2451_v13, %v2450_v28 }
 0x29c   : > { %2443 = vadd.xlane.f32.xlu0 %v2442_v36  ;;  %v2460_v39 = vadd.f32 %v2459_v58, %v2458_v38 }
 0x29e   : > { %2456 = vadd.xlane.f32.xlu1 %v2455_v37 }
 0x2a0   : > { %2461 = vadd.xlane.f32.xlu0 %v2460_v39 }
 0x2a3   : > { %v965_v40 = vpop.xlane.xlu0 %964 }
 0x2a5   : > { %v970_v42 = vpop.xlane.xlu1 %969 }
 0x2a7   : > { %v983_v41 = vpop.xlane.xlu0 %982 }
 0x2ab   : > { %v988_v34 = vpop.xlane.xlu0 %987 }
 0x2cf   : > { %v1464_v44 = vpop.xlane.xlu1 %1463 }
 0x2d0   : > { %v1470_v59 = vadd.f32 %v1464_v44, %v965_v40 }
 0x2d1   : > { %v1469_v46 = vpop.xlane.xlu0 %1468 }
 0x2d2   : > { %v1471_v63 = vadd.f32 %v1469_v46, %v970_v42 }
 0x2d3   : > { %v1482_v48 = vpop.xlane.xlu1 %1481 }
 0x2d4   : > { %v1488_v3 = vadd.f32 %v1482_v48, %v983_v41 }
 0x2d5   : > { %v1487_v50 = vpop.xlane.xlu0 %1486 }
 0x2d6   : > { %v1489_v7 = vadd.f32 %v1487_v50, %v988_v34 }
 0x2fb   : > { %v1963_v52 = vpop.xlane.xlu1 %1962 }
 0x2fc   : > { %v1969_v0 = vadd.f32 %v1963_v52, %v1470_v59 }
 0x2fd   : > { %v1968_v55 = vpop.xlane.xlu0 %1967 }
 0x2fe   : > { %v1970_v4 = vadd.f32 %v1968_v55, %v1471_v63 }
 0x2ff   : > { %v1981_v57 = vpop.xlane.xlu1 %1980 }
 0x300   : > { %v1987_v8 = vadd.f32 %v1981_v57, %v1488_v3 }
 0x301   : > { %v1986_v61 = vpop.xlane.xlu0 %1985 }
 0x302   : > { %v1988_v12 = vadd.f32 %v1986_v61, %v1489_v7 }
 0x327   : > { %v2439_v1 = vpop.xlane.xlu1 %2438 }
 0x328   : > { %v2445_v5 = vadd.f32 %v2439_v1, %v1969_v0 }
 0x329   : > { %v2444_v6 = vpop.xlane.xlu0 %2443 }
 0x32a   : > { %2491 = vst.msk [vmem:[%s325_s18] sm:$0xff] %vm2490_vm11, %v2445_v5  ;;  %v2446_v10 = vadd.f32 %v2444_v6, %v1970_v4 }
 0x32b   : > { %v2457_v11 = vpop.xlane.xlu1 %2456 }
 0x32c   : > { %2492 = vst.msk [vmem:[%s325_s18 + $0x8] sm:$0xff] %vm2490_vm11, %v2446_v10  ;;  %v2463_v15 = vadd.f32 %v2457_v11, %v1987_v8 }
 0x32d   : > { %v2462_v33 = vpop.xlane.xlu0 %2461 }
 0x32e   : > { %2493 = vst.msk [vmem:[%s330_s20] sm:$0xff] %vm2490_vm11, %v2463_v15  ;;  %v2464_v43 = vadd.f32 %v2462_v33, %v1988_v12 }
 0x330   : > { %2494 = vst.msk [vmem:[%s330_s20 + $0x8] sm:$0xff] %vm2490_vm11, %v2464_v43 }
 0x331 PF: > { %s19_s27 = sadd.s32 1, %s3070_s27  }
 0x332   : > { %p16_p4 = scmp.ge.s32.totalorder %s19_s27, 4  }
 0x334   :  { %18 = sbr.rel (!%p16_p4) target bundleno = 1 (0x1), region = 116 }

// kernel: generator_forward.9
= control target key start
LH: loop header
LB: loop body
LE: loop exit
PB: predicated region body
PF: predicated region fallthrough
CT: control target
= control target key end

     0   :  { %s6803_s0 = inlined_call_operand.vmem [shape: bf16[2,16,1158], index: 0, kind: input, shape index: {}]   ;;  %s6804_s1 = inlined_call_operand.vmem [shape: f32[16,1], index: 1, kind: input, shape index: {}]   ;;  %s6805_s2 = inlined_call_operand.vmem [shape: f32[16,1], index: 2, kind: input, shape index: {}]   ;;  %s6806_s3 = inlined_call_operand.vmem [shape: f32[1,1158], index: 3, kind: input, shape index: {}]   ;;  %s6807_s4 = inlined_call_operand.vmem [shape: f32[1,1088], index: 4, kind: input, shape index: {}]   ;;  %s6808_s5 = inlined_call_operand.vmem [shape: bf16[16,8,16], index: 5, kind: input, shape index: {}]   ;;  %s6809_s6 = inlined_call_operand.vmem [shape: bf16[2,4,8,1088], index: 6, kind: output, shape index: {0}]   ;;  %s6810_s7 = inlined_call_operand.hbm [shape: f32[2,8,1], index: 7, kind: output, shape index: {1}]   ;;  %s6811_s8 = inlined_call_operand.hbm [shape: f32[2,8,1], index: 8, kind: output, shape index: {2}]  }
   0x1   :  { %6812 = sst [smem:[#allocation8_spill]] %s6803_s0 }
   0x2   :  { %14 = vsyncpa [#allocation3], 0 }
   0x3   :  { %16 = vsyncpa [#allocation3 + $0x1], 0 }
   0x4   :  { %17 = vsyncpa [#allocation5], 0 }
   0x5   :  { %19 = vsyncpa [#allocation5 + $0x1], 0  ;;  %s5648_s27 = smov 0   ;;  %s5650_s28 = smov 0  }
   0x6   :  { %s5652_s29 = smov 0   ;;  %s5654_s30 = smov 0  }
   0x7 LB: > { %s5669_s9 = sadd.s32 4294967295, %s5588_s30   ;;  %s4834_s10 = sadd.s32 4294967294, %s5588_s30   ;;  %s5588_s30 = sphi %s5654_s30, %s6819_s30   ;;  %s5584_s29 = sphi %s5652_s29, %s6818_s29   ;;  %s5580_s28 = sphi %s5650_s28, %s6817_s28   ;;  %s5576_s27 = sphi %s5648_s27, %s6816_s27  }
   0x8   : > { %s5673_s11 = sadd.s32 1, %s5588_s30   ;;  %s189_s12 = sadd.s32 1, %s5584_s29 }
   0x9   : > { %s186_s13 = ssub.s32 %s5588_s30, %s5673_s11  ;;  %p199_p0 = scmp.ne.s32.totalorder %s5584_s29, %s5580_s28 }
   0xa   : > { %p187_p1 = scmp.eq.s32.totalorder %s186_s13, 0  ;;  %p200_p2 = scmp.eq.s32.totalorder %s5669_s9, 1 }
   0xb   : > { %p205_p3 = scmp.ne.s32.totalorder %s5580_s28, %s5576_s27  ;;  %p206_p4 = scmp.eq.s32.totalorder %s4834_s10, 1 }
   0xc   : > { %s5684_s14 = scalar_select %p187_p1, %s5584_s29, %s189_s12  }
   0xd   : > { %p5686_p5 = por %p200_p2, %p199_p0  ;;  %p5690_p6 = por %p206_p4, %p205_p3 }
   0xe   : > { %p4837_p7 = scmp.ge.s32.totalorder %s5588_s30, 1  ;;  %p273_p8 = scmp.lt.s32.totalorder %s5588_s30, 3 }
  0x10   : > { %p274_p9 = pnand %p4837_p7, %p273_p8 }
  0x11   : > { %v390_v0 = vld [vmem:[%s6805_s2] sm:$0xff] (!%p274_p9)  ;;  %v5590_v2 = vmov (!%p274_p9), 0   ;;  %v391_v3 = vld [vmem:[%s6805_s2 + $0x8] sm:$0xff] (!%p274_p9)  ;;  %p317_p10 = scmp.lt.s32.totalorder (!%p274_p9), %s5669_s9, 1  ;;  %v446_v5 = vlaneseq (!%p274_p9)  ;;  %s6815_s0 = sld [smem:[#allocation8_spill]] (!%p274_p9)  ;;  %vm558_vm0 = vcmask (!%p274_p9), 769024  }
  0x12   : > { %277 = sbr.rel (%p274_p9) target bundleno = 1012 (0x3f4), region = 44  ;;  %v358_v1 = vld [vmem:[%s6804_s1] sm:$0xff] (!%p274_p9)  ;;  %5421 = vset.pattern.permute.xlu1 (!%p274_p9), %v5590_v2  ;;  %5420 = vset.pattern.permute.xlu0 (!%p274_p9), %v5590_v2  ;;  %v359_v4 = vld [vmem:[%s6804_s1 + $0x8] sm:$0xff] (!%p274_p9)  ;;  %s5591_s21 = smov (!%p274_p9), 94   ;;  %vm576_vm1 = vcmask (!%p274_p9), 130048   ;;  %vm1047_vm2 = vcmask (!%p274_p9), 1039360  }
  0x13   : > { %394 = vperm.xlu1 (!%p274_p9), %5421, %v390_v0   ;;  %362 = vperm.xlu0 (!%p274_p9), %5420, %v358_v1   ;;  %v5722_v6 = vshrl.u32 (!%p274_p9), %v446_v5, 7  ;;  %v5732_v10 = vld [vmem:[%s6806_s3] sm:$0xff] (!%p274_p9)  ;;  %s5592_s22 = smov (!%p274_p9), 127   ;;  %s5593_s23 = smov (!%p274_p9), 93   ;;  %vm802_vm3 = vcmask (!%p274_p9), 760832   ;;  %vm5600_vm4 = vmmov (!%p274_p9), 0  }
  0x14   : > { %612 = vmatprep.mubr.bf16.mxu0 (!%p274_p9), %v5590_v2  ;;  %1141 = vmatprep.mubr.bf16.mxu1 (!%p274_p9), %v5590_v2  ;;  %s5594_s24 = smov (!%p274_p9), 92   ;;  %s5596_s10 = smov (!%p274_p9), 60   ;;  %vm1870_vm5 = vcmask (!%p274_p9), 752640   ;;  %vm2115_vm6 = vcmask (!%p274_p9), 1031168   ;;  %vm2686_vm7 = vcmask (!%p274_p9), 490496   ;;  %vm2932_vm8 = vcmask (!%p274_p9), 482304  }
  0x15   : > { %v5727_v9 = vsub.s32 (!%p274_p9), 0, %v5722_v6  ;;  %v5735_v11 = vsub.s32 (!%p274_p9), 1, %v5722_v6  ;;  %v456_v12 = vsub.s32 (!%p274_p9), 2, %v5722_v6  ;;  %v460_v16 = vsub.s32 (!%p274_p9), 3, %v5722_v6  ;;  %s5597_s12 = smov (!%p274_p9), 59   ;;  %s5598_s18 = smov (!%p274_p9), 58  }
  0x16   : > { %v464_v21 = vsub.s32 (!%p274_p9), 4, %v5722_v6  ;;  %v468_v22 = vsub.s32 (!%p274_p9), 5, %v5722_v6  ;;  %vm3919_vm9 = vcmask (!%p274_p9), 474112   ;;  %vm1562_vm10 = vcmask (!%p274_p9), 523264   ;;  %s6718_s20 = sand.u32 (!%p274_p9), 1, %s5580_s28  }
  0x17   : > { %399 = vperm.xlu1 (!%p274_p9), %5421, %v391_v3   ;;  %367 = vperm.xlu0 (!%p274_p9), %5420, %v359_v4   ;;  %v5745_v20 = vrot.slane (!%p274_p9), %v5732_v10, %v5727_v9  ;;  %v453_v27 = vrot.slane (!%p274_p9), %v5732_v10, %v5735_v11  ;;  %v457_v28 = vrot.slane (!%p274_p9), %v5732_v10, %v456_v12  ;;  %vm1639_vm11 = vcmask (!%p274_p9), 519168   ;;  %s4684_s19 = scalar_lea.sflag (!%p274_p9), [#allocation3], %s6718_s20 }
  0x18   : > { %v461_v37 = vrot.slane (!%p274_p9), %v5732_v10, %v460_v16  ;;  %v5778_v42 = vrot.slane (!%p274_p9), %v5732_v10, %v464_v21  ;;  %vm4675_vm12 = vcmask (!%p274_p9), 7168  }
  0x19   : > { %s5714_s25 = scalar_select %p317_p10, %s5669_s9, 1 }
  0x1b   : > { %s5363_s26 = smul.u32 80, %s5714_s25 }
  0x1d   : > { %s5720_s13 = scalar_lea.vmem %s6815_s0, %s5363_s26  ;;  %s5595_s26 = smov 126  }
  0x1e   : > { %v328_v7 = vld [vmem:[%s5720_s13] sm:$0xff]  ;;  %v329_v8 = vld [vmem:[%s5720_s13 + $0x8] sm:$0xff]  ;;  %v334_v19 = vld [vmem:[%s5720_s13 + $0x30] sm:$0xff] }
  0x1f   : > { %v339_v14 = vunpack.c.h.bf16 %v328_v7  ;;  %v340_v15 = vunpack.c.l.bf16 %v329_v8  ;;  %v338_v17 = vunpack.c.l.bf16 %v328_v7  ;;  %v333_v18 = vld [vmem:[%s5720_s13 + $0x28] sm:$0xff]  ;;  %v5750_v23 = vld [vmem:[%s5720_s13 + $0x10] sm:$0xff]  ;;  %v341_v24 = vunpack.c.h.bf16 %v329_v8  ;;  %v335_v25 = vld [vmem:[%s5720_s13 + $0x38] sm:$0xff] }
  0x20   : > { %v5761_v29 = vld [vmem:[%s5720_s13 + $0x18] sm:$0xff]  ;;  %v5766_v32 = vld [vmem:[%s5720_s13 + $0x20] sm:$0xff]  ;;  %v348_v33 = vunpack.c.l.bf16 %v333_v18  ;;  %v349_v34 = vunpack.c.h.bf16 %v333_v18  ;;  %v350_v35 = vunpack.c.l.bf16 %v334_v19  ;;  %v351_v36 = vunpack.c.h.bf16 %v334_v19  ;;  %v337_v58 = vld [vmem:[%s5720_s13 + $0x48] sm:$0xff] }
  0x21   : > { %v342_v38 = vunpack.c.l.bf16 %v5750_v23  ;;  %v352_v41 = vunpack.c.l.bf16 %v335_v25  ;;  %v343_v43 = vunpack.c.h.bf16 %v5750_v23  ;;  %v344_v44 = vunpack.c.l.bf16 %v5761_v29  ;;  %v336_v50 = vld [vmem:[%s5720_s13 + $0x40] sm:$0xff] }
  0x22   : > { %v345_v46 = vunpack.c.h.bf16 %v5761_v29  ;;  %v346_v47 = vunpack.c.l.bf16 %v5766_v32  ;;  %v353_v59 = vunpack.c.h.bf16 %v335_v25  ;;  %v354_v4 = vunpack.c.l.bf16 %v336_v50 }
  0x23   : > { %v355_v7 = vunpack.c.h.bf16 %v336_v50  ;;  %v356_v8 = vunpack.c.l.bf16 %v337_v58 }
  0x92   : > { %v5738_v13 = vpop.permute.xlu0 %362  ;;  %v5753_v26 = vpop.permute.xlu1 %394 }
  0x93   : > { %v371_v30 = vmul.f32 %v5738_v13, %v339_v14  ;;  %v372_v31 = vmul.f32 %v5738_v13, %v340_v15  ;;  %v370_v39 = vmul.f32 %v5738_v13, %v338_v17  ;;  %v373_v45 = vmul.f32 %v5738_v13, %v341_v24  ;;  %v5807_v17 = vld [vmem:[%s6806_s3 + $0x8] sm:$0x3] }
  0x94   : > { %v374_v55 = vmul.f32 %v5738_v13, %v342_v38  ;;  %v347_v24 = vunpack.c.h.bf16 %v5766_v32 }
  0x95   : > { %v403_v48 = vadd.f32 %v5753_v26, %v371_v30  ;;  %v404_v49 = vadd.f32 %v5753_v26, %v372_v31  ;;  %v402_v56 = vadd.f32 %v5753_v26, %v370_v39  ;;  %v405_v61 = vadd.f32 %v5753_v26, %v373_v45 }
  0x96   : > { %v5773_v40 = vpop.permute.xlu0 %367  ;;  %v5794_v57 = vpop.permute.xlu1 %399  ;;  %v406_v25 = vadd.f32 %v5753_v26, %v374_v55 }
  0x97   : > { %v380_v51 = vmul.f32 %v5773_v40, %v348_v33  ;;  %v381_v52 = vmul.f32 %v5773_v40, %v349_v34  ;;  %v382_v53 = vmul.f32 %v5773_v40, %v350_v35  ;;  %v383_v54 = vmul.f32 %v5773_v40, %v351_v36 }
  0x98   : > { %v384_v60 = vmul.f32 %v5773_v40, %v352_v41  ;;  %v423_v1 = vmax.f32 %v403_v48, 0.0  ;;  %v424_v3 = vmax.f32 %v404_v49, 0.0  ;;  %v422_v30 = vmax.f32 %v402_v56, 0.0 }
  0x99   : > { %v412_v62 = vadd.f32 %v5794_v57, %v380_v51  ;;  %v413_v63 = vadd.f32 %v5794_v57, %v381_v52  ;;  %v414_v0 = vadd.f32 %v5794_v57, %v382_v53  ;;  %v415_v5 = vadd.f32 %v5794_v57, %v383_v54 }
  0x9a   : > { %v416_v14 = vadd.f32 %v5794_v57, %v384_v60  ;;  %v425_v31 = vmax.f32 %v405_v61, 0.0  ;;  %v357_v33 = vunpack.c.h.bf16 %v337_v58  ;;  %v497_v34 = vmul.f32 %v453_v27, %v423_v1 }
  0x9b   : > { %v433_v15 = vmax.f32 %v413_v63, 0.0  ;;  %v432_v18 = vmax.f32 %v412_v62, 0.0  ;;  %v434_v19 = vmax.f32 %v414_v0, 0.0  ;;  %v435_v23 = vmax.f32 %v415_v5, 0.0 }
  0x9c   : > { %v498_v35 = vmul.f32 %v457_v28, %v424_v3  ;;  %v385_v39 = vmul.f32 %v5773_v40, %v353_v59  ;;  %v386_v41 = vmul.f32 %v5773_v40, %v354_v4  ;;  %v436_v45 = vmax.f32 %v416_v14, 0.0 }
  0x9d   : > { %v507_v36 = vmul.f32 %v453_v27, %v433_v15  ;;  %v508_v38 = vmul.f32 %v457_v28, %v434_v19  ;;  %v485_v48 = vrot.slane %v5807_v17, %v5735_v11  ;;  %v506_v49 = vmul.f32 %v5745_v20, %v432_v18 }
  0x9e   : > { %v509_v50 = vmul.f32 %v461_v37, %v435_v23  ;;  %v375_v53 = vmul.f32 %v5738_v13, %v343_v43  ;;  %v376_v27 = vmul.f32 %v5738_v13, %v344_v44  ;;  %v496_v28 = vmul.f32 %v5745_v20, %v422_v30 }
  0x9f   : > { %v5816_v51 = vpack.c.bf16 %v507_v36, %v497_v34  ;;  %v5818_v52 = vpack.c.bf16 %v508_v38, %v498_v35  ;;  %v499_v54 = vmul.f32 %v461_v37, %v425_v31  ;;  %v426_v55 = vmax.f32 %v406_v25, 0.0 }
  0xa0   : > { %v387_v56 = vmul.f32 %v5773_v40, %v355_v7  ;;  %v379_v58 = vmul.f32 %v5738_v13, %v347_v24  ;;  %v389_v59 = vmul.f32 %v5773_v40, %v357_v33  ;;  %v388_v43 = vmul.f32 %v5773_v40, %v356_v8 }
  0xa1   : > { %544 = vrot.lane.b32.xlu1 %v5818_v52, %s5591_s21  ;;  %542 = vrot.lane.b32.xlu0 %v5816_v51, %s5591_s21  ;;  %v417_v44 = vadd.f32 %v5794_v57, %v385_v39  ;;  %v418_v20 = vadd.f32 %v5794_v57, %v386_v41  ;;  %v510_v37 = vmul.f32 %v5778_v42, %v436_v45  ;;  %v472_v0 = vsub.s32 6, %v5722_v6 }
  0xa2   : > { %v5834_v60 = vpack.c.bf16 %v506_v49, %v496_v28  ;;  %v5836_v61 = vpack.c.bf16 %v509_v50, %v499_v54  ;;  %v411_v62 = vadd.f32 %v5753_v26, %v379_v58  ;;  %v421_v63 = vadd.f32 %v5794_v57, %v389_v59 }
  0xa3   : > { %v377_v40 = vmul.f32 %v5738_v13, %v345_v46  ;;  %v378_v1 = vmul.f32 %v5738_v13, %v346_v47  ;;  %v407_v3 = vadd.f32 %v5753_v26, %v375_v53  ;;  %v408_v4 = vadd.f32 %v5753_v26, %v376_v27 }
  0xa4   : > { %v500_v5 = vmul.f32 %v5778_v42, %v426_v55  ;;  %v431_v7 = vmax.f32 %v411_v62, 0.0  ;;  %v441_v29 = vmax.f32 %v421_v63, 0.0  ;;  %v419_v46 = vadd.f32 %v5794_v57, %v387_v56 }
  0xa5   : > { %546 = vrot.lane.b32.xlu1 %v5836_v61, %s5591_s21  ;;  %540 = vrot.lane.b32.xlu0 %v5834_v60, %s5591_s21  ;;  %v420_v32 = vadd.f32 %v5794_v57, %v388_v43  ;;  %v437_v8 = vmax.f32 %v417_v44, 0.0  ;;  %v438_v13 = vmax.f32 %v418_v20, 0.0  ;;  %v469_v42 = vrot.slane %v5732_v10, %v468_v22  ;;  %v5980_v44 = vld [vmem:[%s6808_s5 + $0x4] sm:$0xf] }
  0xa6   : > { %v5856_v47 = vpack.c.bf16 %v510_v37, %v500_v5  ;;  %v505_v14 = vmul.f32 %v485_v48, %v431_v7  ;;  %v515_v15 = vmul.f32 %v485_v48, %v441_v29  ;;  %v473_v18 = vrot.slane %v5732_v10, %v472_v0 }
  0xa7   : > { %v476_v19 = vsub.s32 7, %v5722_v6  ;;  %v409_v23 = vadd.f32 %v5753_v26, %v377_v40  ;;  %v410_v57 = vadd.f32 %v5753_v26, %v378_v1  ;;  %v427_v24 = vmax.f32 %v407_v3, 0.0 }
  0xa8   : > { %v428_v25 = vmax.f32 %v408_v4, 0.0  ;;  %v5871_v30 = vpack.c.bf16 %v515_v15, %v505_v14  ;;  %v439_v31 = vmax.f32 %v419_v46, 0.0  ;;  %v440_v33 = vmax.f32 %v420_v32, 0.0  ;;  %v6028_v32 = vld [vmem:[%s6808_s5 + $0x8] sm:$0xf] }
  0xa9   : > { %1035 = vrot.lane.b32.xlu1 %v5836_v61, %s5592_s22  ;;  %548 = vrot.lane.b32.xlu0 %v5856_v47, %s5591_s21  ;;  %v511_v34 = vmul.f32 %v469_v42, %v437_v8  ;;  %v512_v35 = vmul.f32 %v473_v18, %v438_v13  ;;  %v477_v36 = vrot.slane %v5732_v10, %v476_v19  ;;  %v429_v38 = vmax.f32 %v409_v23, 0.0 }
  0xaa   : > { %v481_v26 = vrot.slane %v5807_v17, %v5727_v9  ;;  %v430_v39 = vmax.f32 %v410_v57, 0.0  ;;  %v501_v41 = vmul.f32 %v469_v42, %v427_v24  ;;  %v502_v45 = vmul.f32 %v473_v18, %v428_v25 }
  0xab   : > { %v513_v48 = vmul.f32 %v477_v36, %v439_v31  ;;  %v503_v10 = vmul.f32 %v477_v36, %v429_v38 }
  0xac   : > { %v514_v49 = vmul.f32 %v481_v26, %v440_v33  ;;  %v5882_v50 = vpack.c.bf16 %v511_v34, %v501_v41  ;;  %v5884_v53 = vpack.c.bf16 %v512_v35, %v502_v45  ;;  %v504_v27 = vmul.f32 %v481_v26, %v430_v39  ;;  %v6090_v34 = vld [vmem:[%s6808_s5 + $0xc] sm:$0xf] }
  0xad   : > { %1033 = vrot.lane.b32.xlu1 %v5818_v52, %s5592_s22  ;;  %1037 = vrot.lane.b32.xlu0 %v5856_v47, %s5592_s22  ;;  %v5890_v17 = vpack.c.bf16 %v513_v48, %v503_v10  ;;  %v5599_v33 = vmov 0.0   ;;  %v528_v48 = vld [vmem:[%s6808_s5] sm:$0xf] }
  0xae   : > { %v5892_v28 = vpack.c.bf16 %v514_v49, %v504_v27  ;;  %v6134_v49 = vld [vmem:[%s6808_s5 + $0x14] sm:$0xf] }
  0xb1   : > { %552 = vrot.lane.b32.xlu1 %v5884_v53, %s5591_s21  ;;  %550 = vrot.lane.b32.xlu0 %v5882_v50, %s5591_s21 }
  0xb5   : > { %1045 = vrot.lane.b32.xlu1 %v5892_v28, %s5592_s22  ;;  %1043 = vrot.lane.b32.xlu0 %v5890_v17, %s5592_s22 }
  0xb9   : > { %554 = vrot.lane.b32.xlu1 %v5890_v17, %s5591_s21  ;;  %1041 = vrot.lane.b32.xlu0 %v5884_v53, %s5592_s22 }
  0xbd   : > { %786 = vrot.lane.b32.xlu1 %v5816_v51, %s5593_s23  ;;  %556 = vrot.lane.b32.xlu0 %v5892_v28, %s5591_s21  ;;  %s5364_s21 = smul.u32 144, %s5714_s25 }
  0xc1   : > { %784 = vrot.lane.b32.xlu1 %v5834_v60, %s5593_s23  ;;  %788 = vrot.lane.b32.xlu0 %v5818_v52, %s5593_s23 }
  0xc5   : > { %792 = vrot.lane.b32.xlu1 %v5856_v47, %s5593_s23  ;;  %790 = vrot.lane.b32.xlu0 %v5836_v61, %s5593_s23 }
  0xc9   : > { %796 = vrot.lane.b32.xlu1 %v5884_v53, %s5593_s23  ;;  %794 = vrot.lane.b32.xlu0 %v5882_v50, %s5593_s23 }
  0xcd   : > { %800 = vrot.lane.b32.xlu1 %v5892_v28, %s5593_s23  ;;  %798 = vrot.lane.b32.xlu0 %v5890_v17, %s5593_s23 }
  0xd1   : > { %1856 = vrot.lane.b32.xlu1 %v5818_v52, %s5594_s24  ;;  %1854 = vrot.lane.b32.xlu0 %v5816_v51, %s5594_s24 }
  0xd5   : > { %1031 = vrot.lane.b32.xlu1 %v5816_v51, %s5592_s22  ;;  %1852 = vrot.lane.b32.xlu0 %v5834_v60, %s5594_s24 }
  0xd9   : > { %1858 = vrot.lane.b32.xlu1 %v5836_v61, %s5594_s24  ;;  %1029 = vrot.lane.b32.xlu0 %v5834_v60, %s5592_s22 }
  0xdd   : > { %1039 = vrot.lane.b32.xlu1 %v5882_v50, %s5592_s22  ;;  %1860 = vrot.lane.b32.xlu0 %v5856_v47, %s5594_s24  ;;  %s4975_s22 = sshll.u32 %s5669_s9, 7 }
  0xde   : > { %s6728_s13 = scalar_lea.hbm %s6810_s7, %s4975_s22 }
  0xe1   : > { %1864 = vrot.lane.b32.xlu1 %v5884_v53, %s5594_s24  ;;  %1862 = vrot.lane.b32.xlu0 %v5882_v50, %s5594_s24 }
  0xe5   : > { %1868 = vrot.lane.b32.xlu1 %v5892_v28, %s5594_s24  ;;  %1866 = vrot.lane.b32.xlu0 %v5890_v17, %s5594_s24  ;;  %s6534_s24 = scalar_lea.vmem %s6809_s6, %s5364_s21  ;;  %s4838_s21 = sshll.u32 %s6718_s20, 3 }
  0xe6   : > { %s309_s23 = scalar_lea.vmem [#allocation2], %s4838_s21 }
  0xe7   : > { %s4705_s25 = sshll.u32 %s309_s23, 4  ;;  %s6730_s25 = int_to_ptr.vmem [resolvable:$true] %s4705_s25 }
  0xe9   : > { %2101 = vrot.lane.b32.xlu1 %v5818_v52, %s5595_s26  ;;  %2099 = vrot.lane.b32.xlu0 %v5816_v51, %s5595_s26 }
  0xed   : > { %2103 = vrot.lane.b32.xlu1 %v5836_v61, %s5595_s26  ;;  %2097 = vrot.lane.b32.xlu0 %v5834_v60, %s5595_s26 }
  0xf1   : > { %2107 = vrot.lane.b32.xlu1 %v5882_v50, %s5595_s26  ;;  %2105 = vrot.lane.b32.xlu0 %v5856_v47, %s5595_s26 }
  0xf5   : > { %2111 = vrot.lane.b32.xlu1 %v5890_v17, %s5595_s26  ;;  %2109 = vrot.lane.b32.xlu0 %v5884_v53, %s5595_s26 }
  0xf9   : > { %2668 = vrot.lane.b32.xlu1 %v5816_v51, %s5596_s10  ;;  %2113 = vrot.lane.b32.xlu0 %v5892_v28, %s5595_s26 }
  0xfd   : > { %2666 = vrot.lane.b32.xlu1 %v5834_v60, %s5596_s10  ;;  %2670 = vrot.lane.b32.xlu0 %v5818_v52, %s5596_s10 }
 0x101   : > { %2916 = vrot.lane.b32.xlu1 %v5818_v52, %s5597_s12  ;;  %2914 = vrot.lane.b32.xlu0 %v5816_v51, %s5597_s12 }
 0x105   : > { %2672 = vrot.lane.b32.xlu1 %v5836_v61, %s5596_s10  ;;  %2912 = vrot.lane.b32.xlu0 %v5834_v60, %s5597_s12 }
 0x109   : > { %2918 = vrot.lane.b32.xlu1 %v5836_v61, %s5597_s12  ;;  %2674 = vrot.lane.b32.xlu0 %v5856_v47, %s5596_s10 }
 0x10d   : > { %2676 = vrot.lane.b32.xlu1 %v5882_v50, %s5596_s10  ;;  %2920 = vrot.lane.b32.xlu0 %v5856_v47, %s5597_s12 }
 0x111   : > { %2922 = vrot.lane.b32.xlu1 %v5882_v50, %s5597_s12  ;;  %2678 = vrot.lane.b32.xlu0 %v5884_v53, %s5596_s10 }
 0x113   : > { %v545_v54 = vpop.permute.xlu1 %544  ;;  %v543_v55 = vpop.permute.xlu0 %542 }
 0x114   : > { %v5964_v56 = vsel %vm558_vm0, %v543_v55, %v545_v54 }
 0x115   : > { %580 = vmatprep.subr.bf16.mxu0 %v5964_v56  ;;  %2680 = vrot.lane.b32.xlu1 %v5890_v17, %s5596_s10 }
 0x116   : > { %2924 = vrot.lane.b32.xlu0 %v5884_v53, %s5597_s12 }
 0x117   : > { %v547_v58 = vpop.permute.xlu1 %546  ;;  %v541_v59 = vpop.permute.xlu0 %540 }
 0x118   : > { %v5972_v43 = vsel %vm558_vm0, %v541_v59, %v543_v55  ;;  %v5990_v63 = vsel %vm558_vm0, %v545_v54, %v547_v58 }
 0x119   : > { %2926 = vrot.lane.b32.xlu1 %v5890_v17, %s5597_s12  ;;  %581 = vmatpush1.bf16.msra.mxu0 %v5972_v43 }
 0x11a   : > { %2682 = vrot.lane.b32.xlu0 %v5892_v28, %s5596_s10 }
 0x11b   : > { %v1036_v20 = vpop.permute.xlu1 %1035  ;;  %v549_v37 = vpop.permute.xlu0 %548 }
 0x11c   : > { %4843 = vmatmul.mubr.msk.bf16.vlgmr.msra.gmra.mrb[0].mxu0 %vm576_vm1, %v5980_v44  ;;  %v5987_v62 = vsel %vm558_vm0, %v547_v58, %v549_v37 }
 0x11d   : > { %2684 = vrot.lane.b32.xlu1 %v5871_v30, %s5596_s10  ;;  %621 = vmatprep.subr.bf16.mxu0 %v5987_v62  ;;  %s5601_s10 = smov [#allocation2]  }
 0x11e   : > { %2928 = vrot.lane.b32.xlu0 %v5892_v28, %s5597_s12  ;;  %622 = vmatpush1.bf16.msra.mxu0 %v5990_v63 }
 0x11f   : > { %v5998_v40 = vpop.permute.xlu1 %1033  ;;  %v6000_v1 = vpop.permute.xlu0 %1037  ;;  %653 = vmatprep.mubr.bf16.mxu0 %v5590_v2 }
 0x120   : > { %v6005_v3 = vsel %vm1047_vm2, %v1036_v20, %v6000_v1  ;;  %v6009_v4 = vsel %vm1047_vm2, %v5998_v40, %v1036_v20 }
 0x121   : > { %3901 = vrot.lane.b32.xlu1 %v5816_v51, %s5598_s18  ;;  %1109 = vmatprep.subr.bf16.mxu1 %v6005_v3 }
 0x122   : > { %2930 = vrot.lane.b32.xlu0 %v5871_v30, %s5597_s12  ;;  %1110 = vmatpush1.bf16.msra.mxu1 %v6009_v4  ;;  %s5498_s12 = sshll.u32 %s5601_s10, 4  ;;  %s5499_s12 = int_to_ptr.vmem [resolvable:$false] %s5498_s12 }
 0x123   : > { %v553_v5 = vpop.permute.xlu1 %552  ;;  %v551_v7 = vpop.permute.xlu0 %550  ;;  %s5500_s0 = scalar_lea.vmem %s5499_s12, 256  ;;  %p5501_p0 = scmp.lt.s32.totalorder %s6730_s25, %s5499_s12 }
 0x124   : > { %v6018_v29 = vsel %vm558_vm0, %v549_v37, %v551_v7  ;;  %4844 = vmatmul.mubr.msk.bf16.vlgmr.msra.gmra.mrb[4].mxu0 %vm576_vm1, %v5980_v44  ;;  %v6023_v46 = vsel %vm558_vm0, %v551_v7, %v553_v5 }
 0x125   : > { %3899 = vrot.lane.b32.xlu1 %v5834_v60, %s5598_s18  ;;  %662 = vmatprep.subr.bf16.mxu0 %v6023_v46 }
 0x126   : > { %3903 = vrot.lane.b32.xlu0 %v5818_v52, %s5598_s18  ;;  %663 = vmatpush1.bf16.msra.mxu0 %v6018_v29 }
 0x127   : > { %v6036_v8 = vpop.permute.xlu1 %1045  ;;  %v1044_v13 = vpop.permute.xlu0 %1043  ;;  %4855 = vmatmul.mubr.msk.bf16.vlgmr.msra.gmra.mrb[0].mxu1 %vm576_vm1, %v6028_v32  ;;  %694 = vmatprep.mubr.bf16.mxu0 %v5590_v2 }
 0x128   : > { %v6043_v14 = vsel %vm1047_vm2, %v1044_v13, %v6036_v8  ;;  %1223 = vmatprep.mubr.bf16.mxu1 %v5590_v2 }
 0x129   : > { %3907 = vrot.lane.b32.xlu1 %v5856_v47, %s5598_s18  ;;  %1191 = vmatprep.subr.bf16.mxu1 %v6043_v14 }
 0x12a   : > { %3905 = vrot.lane.b32.xlu0 %v5836_v61, %s5598_s18 }
 0x12b   : > { %v555_v15 = vpop.permute.xlu1 %554  ;;  %v6051_v42 = vpop.permute.xlu0 %1041 }
 0x12c   : > { %v6055_v18 = vsel %vm1047_vm2, %v6051_v42, %v1044_v13  ;;  %4845 = vmatmul.mubr.msk.bf16.vlgmr.msra.gmra.mrb[8].mxu0 %vm576_vm1, %v5980_v44  ;;  %v6078_v25 = vsel %vm558_vm0, %v553_v5, %v555_v15 }
 0x12d   : > { %3911 = vrot.lane.b32.xlu1 %v5884_v53, %s5598_s18  ;;  %1192 = vmatpush1.bf16.msra.mxu1 %v6055_v18 }
 0x12e   : > { %3909 = vrot.lane.b32.xlu0 %v5882_v50, %s5598_s18  ;;  %1327 = vmatprep.subr.bf16.mxu1 %v5836_v61 }
 0x12f   : > { %v787_v23 = vpop.permute.xlu1 %786  ;;  %v6065_v57 = vpop.permute.xlu0 %556  ;;  %735 = vmatprep.mubr.bf16.mxu0 %v5590_v2 }
 0x130   : > { %4857 = vmatmul.mubr.msk.bf16.vlgmr.msra.gmra.mrb[4].mxu1 %vm576_vm1, %v6028_v32  ;;  %v6072_v24 = vsel %vm558_vm0, %v555_v15, %v6065_v57 }
 0x131   : > { %3915 = vrot.lane.b32.xlu1 %v5892_v28, %s5598_s18  ;;  %703 = vmatprep.subr.bf16.mxu0 %v6072_v24 }
 0x132   : > { %3913 = vrot.lane.b32.xlu0 %v5890_v17, %s5598_s18  ;;  %1328 = vmatpush1.bf16.msra.mxu1 %v5818_v52 }
 0x133   : > { %704 = vmatpush1.bf16.msra.mxu0 %v6078_v25  ;;  %1409 = vmatprep.subr.bf16.mxu1 %v5890_v17  ;;  %v785_v61 = vpop.permute.xlu1 %784  ;;  %v789_v31 = vpop.permute.xlu0 %788 }
 0x134   : > { %5031 = vmatprep.subr.bf16.mxu0 %v5599_v33  ;;  %1359 = vmatprep.mubr.bf16.mxu1 %v5590_v2  ;;  %v6097_v52 = vsel %vm802_vm3, %v787_v23, %v789_v31  ;;  %v6109_v26 = vsel %vm802_vm3, %v785_v61, %v787_v23 }
 0x136   : > { %3917 = vrot.lane.b32.xlu0 %v5871_v30, %s5598_s18  ;;  %4846 = vmatmul.mubr.msk.bf16.vlgmr.msra.gmra.mrb[12].mxu0 %vm576_vm1, %v5980_v44  ;;  %s6736_s18 = scalar_lea.hbm %s6811_s8, %s4975_s22 }
 0x137   : > { %5032 = vmatpush3.bf16.msra.mxu0 %v6065_v57  ;;  %v793_v35 = vpop.permute.xlu1 %792  ;;  %5033 = vmatprep.mubr.msk.bf16.mxu0 %vm5600_vm4, %v5599_v33  ;;  %v791_v30 = vpop.permute.xlu0 %790 }
 0x138   : > { %823 = vmatprep.subr.bf16.mxu0 %v6097_v52  ;;  %4861 = vmatmul.mubr.msk.bf16.vlgmr.msra.gmra.mrb[0].mxu1 %vm576_vm1, %v6090_v34  ;;  %v6114_v38 = vsel %vm802_vm3, %v791_v30, %v793_v35 }
 0x139   : > { %1410 = vmatpush1.bf16.msra.mxu1 %v5884_v53  ;;  %1441 = vmatprep.mubr.bf16.mxu1 %v5590_v2  ;;  %v6137_v53 = vsel %vm802_vm3, %v789_v31, %v791_v30 }
 0x13a   : > { %1648 = vmatprep.subr.bf16.mxu1 %v6097_v52 }
 0x13b   : > { %v797_v36 = vpop.permute.xlu1 %796  ;;  %v795_v41 = vpop.permute.xlu0 %794 }
 0x13c   : > { %v6141_v27 = vsel %vm802_vm3, %v795_v41, %v797_v36  ;;  %v6152_v58 = vsel %vm802_vm3, %v793_v35, %v795_v41 }
 0x13e   : > { %5034 = vmatmul.mubr.msk.bf16.vlgmr.msra.gmra.mrb[16].mxu0 %vm576_vm1, %v5980_v44 }
 0x13f   : > { %824 = vmatpush1.bf16.msra.mxu0 %v6109_v26  ;;  %v6117_v39 = vpop.permute.xlu1 %800  ;;  %855 = vmatprep.mubr.bf16.mxu0 %v5590_v2  ;;  %v799_v10 = vpop.permute.xlu0 %798 }
 0x140   : > { %864 = vmatprep.subr.bf16.mxu0 %v6114_v38  ;;  %4863 = vmatmul.mubr.msk.bf16.vlgmr.msra.gmra.mrb[4].mxu1 %vm576_vm1, %v6090_v34  ;;  %v6157_v59 = vsel %vm802_vm3, %v799_v10, %v6117_v39  ;;  %v6172_v5 = vsel %vm802_vm3, %v797_v36, %v799_v10 }
 0x141   : > { %1649 = vmatpush1.bf16.msra.mxu1 %v6109_v26  ;;  %1680 = vmatprep.mubr.bf16.mxu1 %v5590_v2 }
 0x142   : > { %1689 = vmatprep.subr.bf16.mxu1 %v6114_v38 }
 0x143   : > { %v6126_v45 = vpop.permute.xlu1 %1856  ;;  %v1855_v55 = vpop.permute.xlu0 %1854 }
 0x144   : > { %v6183_v7 = vsel %vm1870_vm5, %v1855_v55, %v6126_v45 }
 0x146   : > { %4848 = vmatmul.mubr.msk.bf16.vlgmr.msra.gmra.mrb[0].mxu0 %vm576_vm1, %v528_v48 }
 0x147   : > { %865 = vmatpush1.bf16.msra.mxu0 %v6137_v53  ;;  %v1032_v17 = vpop.permute.xlu1 %1031  ;;  %896 = vmatprep.mubr.bf16.mxu0 %v5590_v2  ;;  %v1853_v37 = vpop.permute.xlu0 %1852 }
 0x148   : > { %905 = vmatprep.subr.bf16.mxu0 %v6141_v27  ;;  %4873 = vmatmul.mubr.msk.bf16.vlgmr.msra.gmra.mrb[8].mxu1 %vm576_vm1, %v6134_v49  ;;  %v6191_v15 = vsel %vm1047_vm2, %v1032_v17, %v5998_v40  ;;  %v6196_v23 = vsel %vm1870_vm5, %v1853_v37, %v1855_v55  ;;  %v6210_v40 = vld [vmem:[%s6808_s5 + $0x10] sm:$0xf] }
 0x149   : > { %1690 = vmatpush1.bf16.msra.mxu1 %v6137_v53  ;;  %1721 = vmatprep.mubr.bf16.mxu1 %v5590_v2 }
 0x14a   : > { %1730 = vmatprep.subr.bf16.mxu1 %v6141_v27 }
 0x14b   : > { %v1859_v54 = vpop.permute.xlu1 %1858 }
 0x14c   : > { %v6224_v41 = vsel %vm1870_vm5, %v6126_v45, %v1859_v54 }
 0x14e   : > { %4849 = vmatmul.mubr.msk.bf16.vlgmr.msra.gmra.mrb[4].mxu0 %vm576_vm1, %v528_v48 }
 0x14f   : > { %906 = vmatpush1.bf16.msra.mxu0 %v6152_v58  ;;  %v1040_v44 = vpop.permute.xlu1 %1039  ;;  %937 = vmatprep.mubr.bf16.mxu0 %v5590_v2 }
 0x150   : > { %946 = vmatprep.subr.bf16.mxu0 %v6157_v59  ;;  %v6164_v20 = vsel %vm1047_vm2, %v6000_v1, %v1040_v44  ;;  %4874 = vmatmul.mubr.msk.bf16.vlgmr.msra.gmra.mrb[12].mxu1 %vm576_vm1, %v6134_v49  ;;  %v1030_v1 = vpop.permute.xlu0 %1029  ;;  %v6219_v36 = vsel %vm1047_vm2, %v1040_v44, %v6051_v42 }
 0x151   : > { %1731 = vmatpush1.bf16.msra.mxu1 %v6152_v58  ;;  %1762 = vmatprep.mubr.bf16.mxu1 %v5590_v2  ;;  %v6213_v31 = vsel %vm1047_vm2, %v1030_v1, %v1032_v17 }
 0x152   : > { %1771 = vmatprep.subr.bf16.mxu1 %v6157_v59 }
 0x153   : > { %v1865_v35 = vpop.permute.xlu1 %1864 }
 0x154   : > { %v1861_v13 = vpop.permute.xlu0 %1860 }
 0x155   : > { %v6203_v61 = vsel %vm1870_vm5, %v1859_v54, %v1861_v13 }
 0x156   : > { %4850 = vmatmul.mubr.msk.bf16.vlgmr.msra.gmra.mrb[8].mxu0 %vm576_vm1, %v528_v48 }
 0x157   : > { %947 = vmatpush1.bf16.msra.mxu0 %v6172_v5  ;;  %978 = vmatprep.mubr.bf16.mxu0 %v5590_v2  ;;  %v6235_v10 = vpop.permute.xlu1 %1868 }
 0x158   : > { %4875 = vmatmul.mubr.msk.bf16.vlgmr.msra.gmra.mrb[16].mxu1 %vm576_vm1, %v6134_v49  ;;  %5037 = vmatprep.subr.bf16.mxu0 %v5599_v33  ;;  %v1863_v30 = vpop.permute.xlu0 %1862 }
 0x159   : > { %1772 = vmatpush1.bf16.msra.mxu1 %v6172_v5  ;;  %1803 = vmatprep.mubr.bf16.mxu1 %v5590_v2  ;;  %v6242_v45 = vsel %vm1870_vm5, %v1861_v13, %v1863_v30 }
 0x15a   : > { %1891 = vmatprep.subr.bf16.mxu1 %v6183_v7 }
 0x15b   : > { %v2102_v55 = vpop.permute.xlu1 %2101 }
 0x15c   : > { %v1867_v42 = vpop.permute.xlu0 %1866 }
 0x15d   : > { %v6250_v17 = vsel %vm1870_vm5, %v1867_v42, %v6235_v10  ;;  %v6260_v44 = vsel %vm1870_vm5, %v1865_v35, %v1867_v42 }
 0x15e   : > { %4851 = vmatmul.mubr.msk.bf16.vlgmr.msra.gmra.mrb[12].mxu0 %vm576_vm1, %v528_v48 }
 0x15f   : > { %5038 = vmatpush3.bf16.msra.mxu0 %v6117_v39  ;;  %5039 = vmatprep.mubr.msk.bf16.mxu0 %vm5600_vm4, %v5599_v33 }
 0x160   : > { %1068 = vmatprep.subr.bf16.mxu0 %v6191_v15  ;;  %4876 = vmatmul.mubr.msk.bf16.vlgmr.msra.gmra.mrb[20].mxu1 %vm576_vm1, %v6134_v49  ;;  %v2100_v54 = vpop.permute.xlu0 %2099 }
 0x161   : > { %1892 = vmatpush1.bf16.msra.mxu1 %v6196_v23  ;;  %1923 = vmatprep.mubr.bf16.mxu1 %v5590_v2  ;;  %v2117_v1 = vsel %vm2115_vm6, %v2100_v54, %v2102_v55 }
 0x162   : > { %1932 = vmatprep.subr.bf16.mxu1 %v6203_v61 }
 0x164   : > { %v2098_v37 = vpop.permute.xlu0 %2097 }
 0x166   : > { %5040 = vmatmul.mubr.msk.bf16.vlgmr.msra.gmra.mrb[16].mxu0 %vm576_vm1, %v528_v48  ;;  %v6231_v48 = vsel %vm1870_vm5, %v1863_v30, %v1865_v35  ;;  %v2104_v35 = vpop.permute.xlu1 %2103 }
 0x167   : > { %1069 = vmatpush1.bf16.msra.mxu0 %v6213_v31  ;;  %1100 = vmatprep.mubr.bf16.mxu0 %v5590_v2 }
 0x168   : > { %1150 = vmatprep.subr.bf16.mxu0 %v6219_v36  ;;  %4878 = vmatmul.mubr.msk.bf16.vlgmr.msra.gmra.mrb[8].mxu1 %vm576_vm1, %v6210_v40  ;;  %v2106_v13 = vpop.permute.xlu0 %2105 }
 0x169   : > { %1933 = vmatpush1.bf16.msra.mxu1 %v6224_v41  ;;  %1964 = vmatprep.mubr.bf16.mxu1 %v5590_v2  ;;  %v2119_v30 = vsel %vm2115_vm6, %v2104_v35, %v2106_v13 }
 0x16a   : > { %1973 = vmatprep.subr.bf16.mxu1 %v6231_v48  ;;  %v2108_v42 = vpop.permute.xlu1 %2107 }
 0x16e   : > { %4854 = vmatmul.mubr.msk.bf16.vlgmr.msra.gmra.mrb[0].mxu0 %vm576_vm1, %v6028_v32 }
 0x16f   : > { %1151 = vmatpush1.bf16.msra.mxu0 %v6164_v20  ;;  %1182 = vmatprep.mubr.bf16.mxu0 %v5590_v2 }
 0x170   : > { %4879 = vmatmul.mubr.msk.bf16.vlgmr.msra.gmra.mrb[12].mxu1 %vm576_vm1, %v6210_v40  ;;  %5043 = vmatprep.subr.bf16.mxu0 %v5599_v33 }
 0x171   : > { %1974 = vmatpush1.bf16.msra.mxu1 %v6242_v45  ;;  %2005 = vmatprep.mubr.bf16.mxu1 %v5590_v2 }
 0x172   : > { %2014 = vmatprep.subr.bf16.mxu1 %v6250_v17 }
 0x176   : > { %4856 = vmatmul.mubr.msk.bf16.vlgmr.msra.gmra.mrb[8].mxu0 %vm576_vm1, %v6028_v32 }
 0x177   : > { %5044 = vmatpush3.bf16.msra.mxu0 %v6036_v8  ;;  %5045 = vmatprep.mubr.msk.bf16.mxu0 %vm5600_vm4, %v5599_v33 }
 0x178   : > { %1286 = vmatprep.subr.bf16.mxu0 %v5816_v51  ;;  %4880 = vmatmul.mubr.msk.bf16.vlgmr.msra.gmra.mrb[16].mxu1 %vm576_vm1, %v6210_v40  ;;  %v2116_v51 = vsel %vm2115_vm6, %v2098_v37, %v2100_v54 }
 0x179   : > { %2015 = vmatpush1.bf16.msra.mxu1 %v6260_v44  ;;  %2046 = vmatprep.mubr.bf16.mxu1 %v5590_v2 }
 0x17a   : > { %2136 = vmatprep.subr.bf16.mxu1 %v2117_v1 }
 0x17e   : > { %5046 = vmatmul.mubr.msk.bf16.vlgmr.msra.gmra.mrb[16].mxu0 %vm576_vm1, %v6028_v32  ;;  %v2110_v32 = vpop.permute.xlu0 %2109 }
 0x17f   : > { %1287 = vmatpush1.bf16.msra.mxu0 %v5834_v60  ;;  %1318 = vmatprep.mubr.bf16.mxu0 %v5590_v2  ;;  %v6281_v60 = vld [vmem:[%s6808_s5 + $0x18] sm:$0xf]  ;;  %v2121_v54 = vsel %vm2115_vm6, %v2108_v42, %v2110_v32 }
 0x180   : > { %1368 = vmatprep.subr.bf16.mxu0 %v5882_v50  ;;  %4881 = vmatmul.mubr.msk.bf16.vlgmr.msra.gmra.mrb[20].mxu1 %vm576_vm1, %v6210_v40  ;;  %v2118_v50 = vsel %vm2115_vm6, %v2102_v55, %v2104_v35  ;;  %v2112_v55 = vpop.permute.xlu1 %2111 }
 0x181   : > { %2137 = vmatpush1.bf16.msra.mxu1 %v2116_v51  ;;  %2168 = vmatprep.mubr.bf16.mxu1 %v5590_v2 }
 0x182   : > { %2177 = vmatprep.subr.bf16.mxu1 %v2119_v30  ;;  %v2114_v37 = vpop.permute.xlu0 %2113 }
 0x183   : > { %v2123_v1 = vsel %vm2115_vm6, %v2112_v55, %v2114_v37 }
 0x186   : > { %4860 = vmatmul.mubr.msk.bf16.vlgmr.msra.gmra.mrb[0].mxu0 %vm576_vm1, %v6090_v34  ;;  %v6315_v35 = vpop.permute.xlu0 %2670 }
 0x187   : > { %1369 = vmatpush1.bf16.msra.mxu0 %v5856_v47  ;;  %1400 = vmatprep.mubr.bf16.mxu0 %v5590_v2  ;;  %v2120_v47 = vsel %vm2115_vm6, %v2106_v13, %v2108_v42  ;;  %v2669_v13 = vpop.permute.xlu1 %2668 }
 0x188   : > { %4884 = vmatmul.mubr.msk.bf16.vlgmr.msra.gmra.mrb[8].mxu1 %vm576_vm1, %v6281_v60  ;;  %5049 = vmatprep.subr.bf16.mxu0 %v5599_v33 }
 0x189   : > { %2178 = vmatpush1.bf16.msra.mxu1 %v2118_v50  ;;  %2209 = vmatprep.mubr.bf16.mxu1 %v5590_v2 }
 0x18a   : > { %2218 = vmatprep.subr.bf16.mxu1 %v2121_v54 }
 0x18e   : > { %4862 = vmatmul.mubr.msk.bf16.vlgmr.msra.gmra.mrb[8].mxu0 %vm576_vm1, %v6090_v34 }
 0x18f   : > { %5050 = vmatpush3.bf16.msra.mxu0 %v5892_v28  ;;  %5051 = vmatprep.mubr.msk.bf16.mxu0 %vm5600_vm4, %v5599_v33  ;;  %v2122_v28 = vsel %vm2115_vm6, %v2110_v32, %v2112_v55 }
 0x190   : > { %4885 = vmatmul.mubr.msk.bf16.vlgmr.msra.gmra.mrb[12].mxu1 %vm576_vm1, %v6281_v60  ;;  %5055 = vmatprep.subr.bf16.mxu0 %v5599_v33 }
 0x191   : > { %2219 = vmatpush1.bf16.msra.mxu1 %v2120_v47  ;;  %2250 = vmatprep.mubr.bf16.mxu1 %v5590_v2  ;;  %v6378_v47 = vld [vmem:[%s6808_s5 + $0x24] sm:$0xf] }
 0x192   : > { %2259 = vmatprep.subr.bf16.mxu1 %v2123_v1 }
 0x196   : > { %5052 = vmatmul.mubr.msk.bf16.vlgmr.msra.gmra.mrb[16].mxu0 %vm576_vm1, %v6090_v34  ;;  %v2667_v34 = vpop.permute.xlu1 %2666 }
 0x197   : > { %5056 = vmatpush3.bf16.msra.mxu0 %v6117_v39  ;;  %5057 = vmatprep.mubr.msk.bf16.mxu0 %vm5600_vm4, %v5599_v33 }
 0x198   : > { %4886 = vmatmul.mubr.msk.bf16.vlgmr.msra.gmra.mrb[16].mxu1 %vm576_vm1, %v6281_v60  ;;  %5061 = vmatprep.subr.bf16.mxu0 %v5599_v33 }
 0x199   : > { %2260 = vmatpush1.bf16.msra.mxu1 %v2122_v28  ;;  %2291 = vmatprep.mubr.bf16.mxu1 %v5590_v2 }
 0x19a   : > { %2354 = vmatprep.subr.bf16.mxu1 %v6191_v15  ;;  %v2915_v15 = vpop.permute.xlu0 %2914  ;;  %v2917_v51 = vpop.permute.xlu1 %2916 }
 0x19e   : > { %5058 = vmatmul.mubr.msk.bf16.vlgmr.msra.gmra.mrb[20].mxu0 %vm576_vm1, %v6134_v49  ;;  %v4889_v49 = vld [vmem:[%s6808_s5 + $0x1c] sm:$0xf]  ;;  %v2913_v30 = vpop.permute.xlu0 %2912 }
 0x19f   : > { %5062 = vmatpush3.bf16.msra.mxu0 %v6235_v10  ;;  %5063 = vmatprep.mubr.msk.bf16.mxu0 %vm5600_vm4, %v5599_v33 }
 0x1a0   : > { %4887 = vmatmul.mubr.msk.bf16.vlgmr.msra.gmra.mrb[20].mxu1 %vm576_vm1, %v6281_v60  ;;  %5067 = vmatprep.subr.bf16.mxu0 %v5599_v33 }
 0x1a1   : > { %2355 = vmatpush1.bf16.msra.mxu1 %v6213_v31  ;;  %2386 = vmatprep.mubr.bf16.mxu1 %v5590_v2 }
 0x1a2   : > { %2395 = vmatprep.subr.bf16.mxu1 %v6005_v3  ;;  %v2673_v3 = vpop.permute.xlu1 %2672  ;;  %v2675_v31 = vpop.permute.xlu0 %2674 }
 0x1a3   : > { %v2690_v54 = vsel %vm2686_vm7, %v2673_v3, %v2675_v31 }
 0x1a8   : > { %4890 = vmatmul.mubr.msk.bf16.vlgmr.msra.gmra.mrb[8].mxu1 %vm576_vm1, %v4889_v49 }
 0x1a9   : > { %2396 = vmatpush1.bf16.msra.mxu1 %v6009_v4  ;;  %2427 = vmatprep.mubr.bf16.mxu1 %v5590_v2  ;;  %v2919_v4 = vpop.permute.xlu1 %2918 }
 0x1aa   : > { %5064 = vmatmul.mubr.msk.bf16.vlgmr.msra.gmra.mrb[20].mxu0 %vm576_vm1, %v6210_v40  ;;  %2436 = vmatprep.subr.bf16.mxu1 %v6219_v36  ;;  %v2921_v40 = vpop.permute.xlu0 %2920  ;;  %v2688_v36 = vsel %vm2686_vm7, %v2669_v13, %v6315_v35  ;;  %v6381_v55 = vsel %vm2932_vm8, %v2917_v51, %v2919_v4 }
 0x1ab   : > { %5068 = vmatpush3.bf16.msra.mxu0 %v2114_v37  ;;  %5069 = vmatprep.mubr.msk.bf16.mxu0 %vm5600_vm4, %v5599_v33  ;;  %v6364_v32 = vsel %vm2932_vm8, %v2919_v4, %v2921_v40  ;;  %v4940_v37 = vld [vmem:[%s6808_s5 + $0x34] sm:$0xf] }
 0x1ac   : > { %5073 = vmatprep.subr.bf16.mxu0 %v5599_v33 }
 0x1b0   : > { %4891 = vmatmul.mubr.msk.bf16.vlgmr.msra.gmra.mrb[12].mxu1 %vm576_vm1, %v4889_v49 }
 0x1b1   : > { %2437 = vmatpush1.bf16.msra.mxu1 %v6164_v20  ;;  %2468 = vmatprep.mubr.bf16.mxu1 %v5590_v2  ;;  %v2677_v20 = vpop.permute.xlu1 %2676 }
 0x1b2   : > { %2477 = vmatprep.subr.bf16.mxu1 %v6043_v14  ;;  %v6354_v14 = vsel %vm2932_vm8, %v2915_v15, %v2917_v51 }
 0x1b5   : > { %v2923_v50 = vpop.permute.xlu1 %2922 }
 0x1b6   : > { %5070 = vmatmul.mubr.msk.bf16.vlgmr.msra.gmra.mrb[20].mxu0 %vm576_vm1, %v6281_v60  ;;  %v6359_v60 = vsel %vm2932_vm8, %v2913_v30, %v2915_v15  ;;  %v6397_v30 = vsel %vm2932_vm8, %v2921_v40, %v2923_v50 }
 0x1b7   : > { %5074 = vmatpush3.bf16.msra.mxu0 %v6036_v8  ;;  %5075 = vmatprep.mubr.msk.bf16.mxu0 %vm5600_vm4, %v5599_v33  ;;  %v2679_v8 = vpop.permute.xlu0 %2678 }
 0x1b8   : > { %2708 = vmatprep.subr.bf16.mxu0 %v2688_v36  ;;  %4892 = vmatmul.mubr.msk.bf16.vlgmr.msra.gmra.mrb[16].mxu1 %vm576_vm1, %v4889_v49  ;;  %v2692_v15 = vsel %vm2686_vm7, %v2677_v20, %v2679_v8 }
 0x1b9   : > { %2478 = vmatpush1.bf16.msra.mxu1 %v6055_v18  ;;  %2509 = vmatprep.mubr.bf16.mxu1 %v5590_v2  ;;  %v2687_v18 = vsel %vm2686_vm7, %v2667_v34, %v2669_v13  ;;  %v2681_v1 = vpop.permute.xlu1 %2680  ;;  %v2689_v34 = vsel %vm2686_vm7, %v6315_v35, %v2673_v3  ;;  %v2691_v3 = vsel %vm2686_vm7, %v2675_v31, %v2677_v20 }
 0x1ba   : > { %3695 = vmatprep.subr.bf16.mxu1 %v6354_v14  ;;  %v2693_v31 = vsel %vm2686_vm7, %v2679_v8, %v2681_v1 }
 0x1bb   : > { %v2925_v42 = vpop.permute.xlu0 %2924 }
 0x1bc   : > { %v6386_v13 = vsel %vm2932_vm8, %v2923_v50, %v2925_v42 }
 0x1bf   : > { %v2683_v28 = vpop.permute.xlu0 %2682 }
 0x1c0   : > { %4893 = vmatmul.mubr.msk.bf16.vlgmr.msra.gmra.mrb[20].mxu1 %vm576_vm1, %v4889_v49  ;;  %v2694_v4 = vsel %vm2686_vm7, %v2681_v1, %v2683_v28 }
 0x1c1   : > { %3696 = vmatpush1.bf16.msra.mxu1 %v6359_v60  ;;  %3727 = vmatprep.mubr.bf16.mxu1 %v5590_v2 }
 0x1c2   : > { %5076 = vmatmul.mubr.msk.bf16.vlgmr.msra.gmra.mrb[20].mxu0 %vm576_vm1, %v4889_v49  ;;  %3736 = vmatprep.subr.bf16.mxu1 %v6364_v32  ;;  %v2927_v49 = vpop.permute.xlu1 %2926 }
 0x1c3   : > { %2709 = vmatpush1.bf16.msra.mxu0 %v2687_v18  ;;  %2740 = vmatprep.mubr.bf16.mxu0 %v5590_v2  ;;  %v2929_v51 = vpop.permute.xlu0 %2928  ;;  %v6412_v36 = vsel %vm2932_vm8, %v2925_v42, %v2927_v49 }
 0x1c4   : > { %2749 = vmatprep.subr.bf16.mxu0 %v2690_v54  ;;  %v6402_v35 = vsel %vm2932_vm8, %v2927_v49, %v2929_v51 }
 0x1c6   : > { %v2685_v40 = vpop.permute.xlu1 %2684 }
 0x1c7   : > { %v2931_v18 = vpop.permute.xlu0 %2930  ;;  %v2695_v1 = vsel %vm2686_vm7, %v2683_v28, %v2685_v40 }
 0x1c8   : > { %4941 = vmatmul.mubr.msk.bf16.vlgmr.msra.gmra.mrb[24].mxu1 %vm576_vm1, %v4940_v37  ;;  %v6424_v42 = vsel %vm2932_vm8, %v2929_v51, %v2931_v18 }
 0x1c9   : > { %3737 = vmatpush1.bf16.msra.mxu1 %v6381_v55  ;;  %3768 = vmatprep.mubr.bf16.mxu1 %v5590_v2 }
 0x1ca   : > { %4907 = vmatmul.mubr.msk.bf16.vlgmr.msra.gmra.mrb[24].mxu0 %vm576_vm1, %v6378_v47  ;;  %3777 = vmatprep.subr.bf16.mxu1 %v6386_v13  ;;  %v3902_v20 = vpop.permute.xlu1 %3901 }
 0x1cb   : > { %2750 = vmatpush1.bf16.msra.mxu0 %v2689_v34  ;;  %2781 = vmatprep.mubr.bf16.mxu0 %v5590_v2  ;;  %v3904_v50 = vpop.permute.xlu0 %3903 }
 0x1cc   : > { %2790 = vmatprep.subr.bf16.mxu0 %v2692_v15  ;;  %v3921_v8 = vsel %vm3919_vm9, %v3902_v20, %v3904_v50 }
 0x1ce   : > { %v3900_v54 = vpop.permute.xlu1 %3899 }
 0x1cf   : > { %v3906_v15 = vpop.permute.xlu0 %3905  ;;  %v3920_v49 = vsel %vm3919_vm9, %v3900_v54, %v3902_v20  ;;  %v4951_v54 = vld [vmem:[%s6808_s5 + $0x38] sm:$0xf] }
 0x1d0   : > { %4942 = vmatmul.mubr.msk.bf16.vlgmr.msra.gmra.mrb[28].mxu1 %vm576_vm1, %v4940_v37 }
 0x1d1   : > { %3778 = vmatpush1.bf16.msra.mxu1 %v6397_v30  ;;  %3809 = vmatprep.mubr.bf16.mxu1 %v5590_v2 }
 0x1d2   : > { %4908 = vmatmul.mubr.msk.bf16.vlgmr.msra.gmra.mrb[28].mxu0 %vm576_vm1, %v6378_v47  ;;  %3818 = vmatprep.subr.bf16.mxu1 %v6402_v35  ;;  %v3908_v34 = vpop.permute.xlu1 %3907 }
 0x1d3   : > { %2791 = vmatpush1.bf16.msra.mxu0 %v2691_v3  ;;  %2822 = vmatprep.mubr.bf16.mxu0 %v5590_v2  ;;  %v3923_v51 = vsel %vm3919_vm9, %v3906_v15, %v3908_v34  ;;  %v3910_v28 = vpop.permute.xlu0 %3909  ;;  %v4905_v3 = vld [vmem:[%s6808_s5 + $0x20] sm:$0xf] }
 0x1d4   : > { %2831 = vmatprep.subr.bf16.mxu0 %v2694_v4  ;;  %v3922_v4 = vsel %vm3919_vm9, %v3904_v50, %v3906_v15  ;;  %v3924_v40 = vsel %vm3919_vm9, %v3908_v34, %v3910_v28 }
 0x1d8   : > { %4943 = vmatmul.mubr.msk.bf16.vlgmr.msra.gmra.mrb[32].mxu1 %vm576_vm1, %v4940_v37 }
 0x1d9   : > { %3819 = vmatpush1.bf16.msra.mxu1 %v6412_v36  ;;  %3850 = vmatprep.mubr.bf16.mxu1 %v5590_v2 }
 0x1da   : > { %4909 = vmatmul.mubr.msk.bf16.vlgmr.msra.gmra.mrb[32].mxu0 %vm576_vm1, %v6378_v47  ;;  %5103 = vmatprep.subr.bf16.mxu1 %v5599_v33 }
 0x1db   : > { %2832 = vmatpush1.bf16.msra.mxu0 %v2693_v31  ;;  %2863 = vmatprep.mubr.bf16.mxu0 %v5590_v2 }
 0x1dc   : > { %5079 = vmatprep.subr.bf16.mxu0 %v5599_v33 }
 0x1e0   : > { %4944 = vmatmul.mubr.msk.bf16.vlgmr.msra.gmra.mrb[36].mxu1 %vm576_vm1, %v4940_v37 }
 0x1e1   : > { %5104 = vmatpush3.bf16.msra.mxu1 %v6424_v42  ;;  %5105 = vmatprep.mubr.msk.bf16.mxu1 %vm5600_vm4, %v5599_v33 }
 0x1e2   : > { %4910 = vmatmul.mubr.msk.bf16.vlgmr.msra.gmra.mrb[36].mxu0 %vm576_vm1, %v6378_v47  ;;  %3941 = vmatprep.subr.bf16.mxu1 %v3921_v8  ;;  %v4917_v8 = vld [vmem:[%s6808_s5 + $0x28] sm:$0xf] }
 0x1e3   : > { %5080 = vmatpush3.bf16.msra.mxu0 %v2695_v1  ;;  %5081 = vmatprep.mubr.msk.bf16.mxu0 %vm5600_vm4, %v5599_v33 }
 0x1e4   : > { %2954 = vmatprep.subr.bf16.mxu0 %v6354_v14  ;;  %v4939_v14 = vld [vmem:[%s6808_s5 + $0x30] sm:$0xf] }
 0x1e8   : > { %5106 = vmatmul.mubr.msk.bf16.vlgmr.msra.gmra.mrb[40].mxu1 %vm576_vm1, %v4940_v37  ;;  %v3912_v37 = vpop.permute.xlu1 %3911 }
 0x1e9   : > { %3942 = vmatpush1.bf16.msra.mxu1 %v3920_v49  ;;  %3973 = vmatprep.mubr.bf16.mxu1 %v5590_v2 }
 0x1ea   : > { %5082 = vmatmul.mubr.msk.bf16.vlgmr.msra.gmra.mrb[40].mxu0 %vm576_vm1, %v6378_v47  ;;  %3982 = vmatprep.subr.bf16.mxu1 %v3923_v51  ;;  %v3914_v47 = vpop.permute.xlu0 %3913 }
 0x1eb   : > { %2955 = vmatpush1.bf16.msra.mxu0 %v6359_v60  ;;  %2986 = vmatprep.mubr.bf16.mxu0 %v5590_v2  ;;  %v3925_v60 = vsel %vm3919_vm9, %v3910_v28, %v3912_v37 }
 0x1ec   : > { %2995 = vmatprep.subr.bf16.mxu0 %v6364_v32  ;;  %v3916_v32 = vpop.permute.xlu1 %3915 }
 0x1ed   : > { %v3927_v18 = vsel %vm3919_vm9, %v3914_v47, %v3916_v32 }
 0x1f0   : > { %4946 = vmatmul.mubr.msk.bf16.vlgmr.msra.gmra.mrb[24].mxu1 %vm576_vm1, %v4939_v14 }
 0x1f1   : > { %3983 = vmatpush1.bf16.msra.mxu1 %v3922_v4  ;;  %4014 = vmatprep.mubr.bf16.mxu1 %v5590_v2 }
 0x1f2   : > { %4912 = vmatmul.mubr.msk.bf16.vlgmr.msra.gmra.mrb[24].mxu0 %vm576_vm1, %v4905_v3  ;;  %4023 = vmatprep.subr.bf16.mxu1 %v3925_v60 }
 0x1f3   : > { %2996 = vmatpush1.bf16.msra.mxu0 %v6381_v55  ;;  %3027 = vmatprep.mubr.bf16.mxu0 %v5590_v2  ;;  %v3926_v55 = vsel %vm3919_vm9, %v3912_v37, %v3914_v47 }
 0x1f4   : > { %3036 = vmatprep.subr.bf16.mxu0 %v6386_v13  ;;  %v3918_v13 = vpop.permute.xlu0 %3917 }
 0x1f8   : > { %4947 = vmatmul.mubr.msk.bf16.vlgmr.msra.gmra.mrb[28].mxu1 %vm576_vm1, %v4939_v14 }
 0x1f9   : > { %4024 = vmatpush1.bf16.msra.mxu1 %v3924_v40  ;;  %4055 = vmatprep.mubr.bf16.mxu1 %v5590_v2 }
 0x1fa   : > { %4913 = vmatmul.mubr.msk.bf16.vlgmr.msra.gmra.mrb[28].mxu0 %vm576_vm1, %v4905_v3  ;;  %4064 = vmatprep.subr.bf16.mxu1 %v3927_v18 }
 0x1fb   : > { %3037 = vmatpush1.bf16.msra.mxu0 %v6397_v30  ;;  %3068 = vmatprep.mubr.bf16.mxu0 %v5590_v2  ;;  %v3928_v30 = vsel %vm3919_vm9, %v3916_v32, %v3918_v13 }
 0x1fc   : > { %3077 = vmatprep.subr.bf16.mxu0 %v6402_v35 }
 0x200   : > { %4948 = vmatmul.mubr.msk.bf16.vlgmr.msra.gmra.mrb[32].mxu1 %vm576_vm1, %v4939_v14 }
 0x201   : > { %4065 = vmatpush1.bf16.msra.mxu1 %v3926_v55  ;;  %4096 = vmatprep.mubr.bf16.mxu1 %v5590_v2 }
 0x202   : > { %4914 = vmatmul.mubr.msk.bf16.vlgmr.msra.gmra.mrb[32].mxu0 %vm576_vm1, %v4905_v3  ;;  %5109 = vmatprep.subr.bf16.mxu1 %v5599_v33 }
 0x203   : > { %3078 = vmatpush1.bf16.msra.mxu0 %v6412_v36  ;;  %3109 = vmatprep.mubr.bf16.mxu0 %v5590_v2 }
 0x204   : > { %5085 = vmatprep.subr.bf16.mxu0 %v5599_v33 }
 0x208   : > { %4949 = vmatmul.mubr.msk.bf16.vlgmr.msra.gmra.mrb[36].mxu1 %vm576_vm1, %v4939_v14 }
 0x209   : > { %5110 = vmatpush3.bf16.msra.mxu1 %v3928_v30  ;;  %5111 = vmatprep.mubr.msk.bf16.mxu1 %vm5600_vm4, %v5599_v33 }
 0x20a   : > { %4915 = vmatmul.mubr.msk.bf16.vlgmr.msra.gmra.mrb[36].mxu0 %vm576_vm1, %v4905_v3  ;;  %4150 = vmatprep.subr.bf16.mxu1 %v6183_v7 }
 0x20b   : > { %5086 = vmatpush3.bf16.msra.mxu0 %v6424_v42  ;;  %v1361_v35 = vpop.f32.mrb[0].mxu1  ;;  %5087 = vmatprep.mubr.msk.bf16.mxu0 %vm5600_vm4, %v5599_v33 }
 0x20c   : > { %3163 = vmatprep.subr.bf16.mxu0 %v6097_v52  ;;  %v1363_v36 = vpop.f32.mrb[1].mxu1 }
 0x20d   : > { %v1365_v31 = vpop.f32.mrb[2].mxu1 }
 0x20e   : > { %v1366_v20 = vpop.f32.mrb[3].mxu1 }
 0x210   : > { %5112 = vmatmul.mubr.msk.bf16.vlgmr.msra.gmra.mrb[40].mxu1 %vm576_vm1, %v4939_v14 }
 0x211   : > { %4151 = vmatpush1.bf16.msra.mxu1 %v6196_v23  ;;  %4182 = vmatprep.mubr.bf16.mxu1 %v5590_v2 }
 0x212   : > { %5088 = vmatmul.mubr.msk.bf16.vlgmr.msra.gmra.mrb[40].mxu0 %vm576_vm1, %v4905_v3  ;;  %4191 = vmatprep.subr.bf16.mxu1 %v6203_v61 }
 0x213   : > { %3164 = vmatpush1.bf16.msra.mxu0 %v6109_v26  ;;  %v1443_v7 = vpop.f32.mrb[4].mxu1  ;;  %3195 = vmatprep.mubr.bf16.mxu0 %v5590_v2 }
 0x214   : > { %3204 = vmatprep.subr.bf16.mxu0 %v6114_v38  ;;  %v1445_v50 = vpop.f32.mrb[5].mxu1 }
 0x215   : > { %v1447_v42 = vpop.f32.mrb[6].mxu1 }
 0x216   : > { %v1448_v23 = vpop.f32.mrb[7].mxu1 }
 0x218   : > { %4952 = vmatmul.mubr.msk.bf16.vlgmr.msra.gmra.mrb[24].mxu1 %vm576_vm1, %v4951_v54 }
 0x219   : > { %4192 = vmatpush1.bf16.msra.mxu1 %v6224_v41  ;;  %4223 = vmatprep.mubr.bf16.mxu1 %v5590_v2 }
 0x21a   : > { %4918 = vmatmul.mubr.msk.bf16.vlgmr.msra.gmra.mrb[24].mxu0 %vm576_vm1, %v4917_v8  ;;  %4232 = vmatprep.subr.bf16.mxu1 %v6231_v48 }
 0x21b   : > { %3205 = vmatpush1.bf16.msra.mxu0 %v6137_v53  ;;  %3236 = vmatprep.mubr.bf16.mxu0 %v5590_v2 }
 0x21c   : > { %3245 = vmatprep.subr.bf16.mxu0 %v6141_v27 }
 0x220   : > { %4953 = vmatmul.mubr.msk.bf16.vlgmr.msra.gmra.mrb[28].mxu1 %vm576_vm1, %v4951_v54 }
 0x221   : > { %v898_v61 = vpop.f32.mrb[4].mxu0  ;;  %4233 = vmatpush1.bf16.msra.mxu1 %v6242_v45  ;;  %4264 = vmatprep.mubr.bf16.mxu1 %v5590_v2 }
 0x222   : > { %v6511_v41 = vadd.f32 %v1361_v35, %v898_v61  ;;  %v900_v1 = vpop.f32.mrb[5].mxu0  ;;  %4919 = vmatmul.mubr.msk.bf16.vlgmr.msra.gmra.mrb[28].mxu0 %vm576_vm1, %v4917_v8  ;;  %4273 = vmatprep.subr.bf16.mxu1 %v6250_v17 }
 0x223   : > { %v6515_v48 = vadd.f32 %v1363_v36, %v900_v1  ;;  %3246 = vmatpush1.bf16.msra.mxu0 %v6152_v58  ;;  %v902_v34 = vpop.f32.mrb[6].mxu0  ;;  %3277 = vmatprep.mubr.bf16.mxu0 %v5590_v2 }
 0x224   : > { %5422 = vtanh.f32 %v6511_v41  ;;  %3286 = vmatprep.subr.bf16.mxu0 %v6157_v59  ;;  %v903_v45 = vpop.f32.mrb[7].mxu0 }
 0x225   : > { %5424 = vtanh.f32 %v6515_v48 }
 0x228   : > { %4954 = vmatmul.mubr.msk.bf16.vlgmr.msra.gmra.mrb[32].mxu1 %vm576_vm1, %v4951_v54 }
 0x229   : > { %4274 = vmatpush1.bf16.msra.mxu1 %v6260_v44  ;;  %4305 = vmatprep.mubr.bf16.mxu1 %v5590_v2 }
 0x22a   : > { %4920 = vmatmul.mubr.msk.bf16.vlgmr.msra.gmra.mrb[32].mxu0 %vm576_vm1, %v4917_v8  ;;  %5115 = vmatprep.subr.bf16.mxu1 %v5599_v33 }
 0x22b   : > { %3287 = vmatpush1.bf16.msra.mxu0 %v6172_v5  ;;  %3318 = vmatprep.mubr.bf16.mxu0 %v5590_v2 }
 0x22c   : > { %5091 = vmatprep.subr.bf16.mxu0 %v5599_v33 }
 0x22e   : > { %v5423_v17 = vpop.eup %5422 }
 0x22f   : > { %v5425_v15 = vpop.eup %5424 }
 0x230   : > { %v4980_v44 = vpack.c.bf16 %v5425_v15, %v5423_v17  ;;  %4955 = vmatmul.mubr.msk.bf16.vlgmr.msra.gmra.mrb[36].mxu1 %vm576_vm1, %v4951_v54 }
 0x231   : > { %v980_v49 = vpop.f32.mrb[12].mxu0  ;;  %5116 = vmatpush3.bf16.msra.mxu1 %v6235_v10  ;;  %5117 = vmatprep.mubr.msk.bf16.mxu1 %vm5600_vm4, %v5599_v33 }
 0x232   : > { %1636 = vst [vmem:[%s6534_s24 + $0x8] sm:$0xff] %v4980_v44  ;;  %v6541_v51 = vadd.f32 %v1443_v7, %v980_v49  ;;  %v982_v14 = vpop.f32.mrb[13].mxu0  ;;  %4921 = vmatmul.mubr.msk.bf16.vlgmr.msra.gmra.mrb[36].mxu0 %vm576_vm1, %v4917_v8  ;;  %4368 = vmatprep.subr.bf16.mxu1 %v6097_v52 }
 0x233   : > { %v6545_v37 = vadd.f32 %v1445_v50, %v982_v14  ;;  %5092 = vmatpush3.bf16.msra.mxu0 %v6117_v39  ;;  %v984_v28 = vpop.f32.mrb[14].mxu0  ;;  %5093 = vmatprep.mubr.msk.bf16.mxu0 %vm5600_vm4, %v5599_v33 }
 0x234   : > { %5426 = vtanh.f32 %v6541_v51  ;;  %3381 = vmatprep.subr.bf16.mxu0 %v5964_v56  ;;  %v985_v10 = vpop.f32.mrb[15].mxu0  ;;  %v4957_v56 = vld [vmem:[%s6808_s5 + $0x3c] sm:$0xf] }
 0x235   : > { %5428 = vtanh.f32 %v6545_v37 }
 0x238   : > { %5118 = vmatmul.mubr.msk.bf16.vlgmr.msra.gmra.mrb[40].mxu1 %vm576_vm1, %v4951_v54 }
 0x239   : > { %4369 = vmatpush1.bf16.msra.mxu1 %v6109_v26  ;;  %4400 = vmatprep.mubr.bf16.mxu1 %v5590_v2  ;;  %v6567_v26 = vld [vmem:[%s6808_s5 + $0x2c] sm:$0xf] }
 0x23a   : > { %5094 = vmatmul.mubr.msk.bf16.vlgmr.msra.gmra.mrb[40].mxu0 %vm576_vm1, %v4917_v8  ;;  %4409 = vmatprep.subr.bf16.mxu1 %v6114_v38  ;;  %v6657_v8 = vld [vmem:[%s6807_s4 + $0x8] ss:$0 sm:$0xff] }
 0x23b   : > { %3382 = vmatpush1.bf16.msra.mxu0 %v5972_v43  ;;  %3413 = vmatprep.mubr.bf16.mxu0 %v5590_v2  ;;  %v526_v43 = vld [vmem:[%s6807_s4] sm:$0xff] }
 0x23c   : > { %3422 = vmatprep.subr.bf16.mxu0 %v5987_v62  ;;  %v6601_v62 = vrot.slane %v526_v43, %v5727_v9  ;;  %v6644_v47 = vrot.slane %v526_v43, %v476_v19 }
 0x23e   : > { %v5427_v52 = vpop.eup %5426  ;;  %v1553_v7 = vmul.f32 %v6545_v37, %v6644_v47 }
 0x23f   : > { %v5429_v3 = vpop.eup %5428 }
 0x240   : > { %v4982_v4 = vpack.c.bf16 %v5429_v3, %v5427_v52  ;;  %4958 = vmatmul.mubr.msk.bf16.vlgmr.msra.gmra.mrb[24].mxu1 %vm576_vm1, %v4957_v56 }
 0x241   : > { %4410 = vmatpush1.bf16.msra.mxu1 %v6137_v53  ;;  %4441 = vmatprep.mubr.bf16.mxu1 %v5590_v2 }
 0x242   : > { %1638 = vst [vmem:[%s6534_s24 + $0x18] sm:$0xff] %v4982_v4  ;;  %4924 = vmatmul.mubr.msk.bf16.vlgmr.msra.gmra.mrb[24].mxu0 %vm576_vm1, %v6567_v26  ;;  %4450 = vmatprep.subr.bf16.mxu1 %v6141_v27 }
 0x243   : > { %3423 = vmatpush1.bf16.msra.mxu0 %v5990_v63  ;;  %3454 = vmatprep.mubr.bf16.mxu0 %v5590_v2  ;;  %v6605_v63 = vrot.slane %v526_v43, %v456_v12 }
 0x244   : > { %3463 = vmatprep.subr.bf16.mxu0 %v6023_v46 }
 0x248   : > { %4959 = vmatmul.mubr.msk.bf16.vlgmr.msra.gmra.mrb[28].mxu1 %vm576_vm1, %v4957_v56 }
 0x249   : > { %4451 = vmatpush1.bf16.msra.mxu1 %v6152_v58  ;;  %4482 = vmatprep.mubr.bf16.mxu1 %v5590_v2  ;;  %v6631_v58 = vrot.slane %v526_v43, %v464_v21 }
 0x24a   : > { %4925 = vmatmul.mubr.msk.bf16.vlgmr.msra.gmra.mrb[28].mxu0 %vm576_vm1, %v6567_v26  ;;  %4491 = vmatprep.subr.bf16.mxu1 %v6157_v59 }
 0x24b   : > { %3464 = vmatpush1.bf16.msra.mxu0 %v6018_v29  ;;  %3495 = vmatprep.mubr.bf16.mxu0 %v5590_v2  ;;  %v6608_v29 = vrot.slane %v526_v43, %v5735_v11  ;;  %v1548_v11 = vmul.f32 %v6511_v41, %v6605_v63 }
 0x24c   : > { %3504 = vmatprep.subr.bf16.mxu0 %v6072_v24 }
 0x24d   : > { %v1570_v59 = vmul.f32 %v1548_v11, %v1548_v11 }
 0x250   : > { %4960 = vmatmul.mubr.msk.bf16.vlgmr.msra.gmra.mrb[32].mxu1 %vm576_vm1, %v4957_v56 }
 0x251   : > { %4492 = vmatpush1.bf16.msra.mxu1 %v6172_v5  ;;  %4523 = vmatprep.mubr.bf16.mxu1 %v5590_v2 }
 0x252   : > { %4926 = vmatmul.mubr.msk.bf16.vlgmr.msra.gmra.mrb[32].mxu0 %vm576_vm1, %v6567_v26  ;;  %5121 = vmatprep.subr.bf16.mxu1 %v5599_v33 }
 0x253   : > { %3505 = vmatpush1.bf16.msra.mxu0 %v6078_v25  ;;  %3536 = vmatprep.mubr.bf16.mxu0 %v5590_v2  ;;  %v6613_v2 = vrot.slane %v526_v43, %v460_v16 }
 0x254   : > { %5097 = vmatprep.subr.bf16.mxu0 %v5599_v33 }
 0x258   : > { %4961 = vmatmul.mubr.msk.bf16.vlgmr.msra.gmra.mrb[36].mxu1 %vm576_vm1, %v4957_v56 }
 0x259   : > { %v1320_v46 = vpop.f32.mrb[0].mxu0  ;;  %5122 = vmatpush3.bf16.msra.mxu1 %v6117_v39  ;;  %5123 = vmatprep.mubr.msk.bf16.mxu1 %vm5600_vm4, %v5599_v33  ;;  %v1549_v39 = vmul.f32 %v6515_v48, %v6613_v2  ;;  %v1575_v48 = vmul.f32 %v1553_v7, %v1553_v7 }
 0x25a   : > { %v1546_v9 = vmul.f32 %v6601_v62, %v1320_v46  ;;  %5430 = vtanh.f32 %v1320_v46  ;;  %v1322_v12 = vpop.f32.mrb[1].mxu0  ;;  %4927 = vmatmul.mubr.msk.bf16.vlgmr.msra.gmra.mrb[36].mxu0 %vm576_vm1, %v6567_v26 }
 0x25b   : > { %v1547_v24 = vmul.f32 %v6608_v29, %v1322_v12  ;;  %5432 = vtanh.f32 %v1322_v12  ;;  %5098 = vmatpush3.bf16.msra.mxu0 %v6065_v57  ;;  %v1324_v16 = vpop.f32.mrb[2].mxu0  ;;  %5099 = vmatprep.mubr.msk.bf16.mxu0 %vm5600_vm4, %v5599_v33  ;;  %v6635_v57 = vrot.slane %v526_v43, %v468_v22  ;;  %v6639_v33 = vrot.slane %v526_v43, %v472_v0 }
 0x25c   : > { %v1568_v25 = vmul.f32 %v1546_v9, %v1546_v9  ;;  %v1325_v38 = vpop.f32.mrb[3].mxu0  ;;  %v1571_v32 = vmul.f32 %v1549_v39, %v1549_v39 }
 0x25d   : > { %v1555_v53 = vadd.f32 %v1547_v24, %v1546_v9  ;;  %v1569_v27 = vmul.f32 %v1547_v24, %v1547_v24  ;;  %v1552_v6 = vmul.f32 %v6541_v51, %v6639_v33 }
 0x25f   : > { %v1556_v5 = vadd.f32 %v1555_v53, %v1548_v11  ;;  %v1577_v60 = vadd.f32 %v1569_v27, %v1568_v25  ;;  %v1574_v61 = vmul.f32 %v1552_v6, %v1552_v6 }
 0x260   : > { %5124 = vmatmul.mubr.msk.bf16.vlgmr.msra.gmra.mrb[40].mxu1 %vm576_vm1, %v4957_v56 }
 0x261   : > { %v1578_v21 = vadd.f32 %v1577_v60, %v1570_v59  ;;  %v1402_v40 = vpop.f32.mrb[8].mxu0  ;;  %v1557_v18 = vadd.f32 %v1556_v5, %v1549_v39 }
 0x262   : > { %v1550_v55 = vmul.f32 %v6631_v58, %v1402_v40  ;;  %5434 = vtanh.f32 %v1402_v40  ;;  %v1404_v13 = vpop.f32.mrb[9].mxu0  ;;  %5100 = vmatmul.mubr.msk.bf16.vlgmr.msra.gmra.mrb[40].mxu0 %vm576_vm1, %v6567_v26 }
 0x263   : > { %v1579_v22 = vadd.f32 %v1578_v21, %v1571_v32  ;;  %v1551_v0 = vmul.f32 %v6635_v57, %v1404_v13  ;;  %5436 = vtanh.f32 %v1404_v13  ;;  %v1406_v30 = vpop.f32.mrb[10].mxu0 }
 0x264   : > { %v5431_v35 = vpop.eup %5430  ;;  %v1558_v19 = vadd.f32 %v1557_v18, %v1550_v55  ;;  %v1572_v36 = vmul.f32 %v1550_v55, %v1550_v55  ;;  %v1407_v31 = vpop.f32.mrb[11].mxu0 }
 0x265   : > { %v5433_v20 = vpop.eup %5432  ;;  %v1573_v50 = vmul.f32 %v1551_v0, %v1551_v0 }
 0x266   : > { %v4979_v42 = vpack.c.bf16 %v5433_v20, %v5431_v35  ;;  %v1580_v54 = vadd.f32 %v1579_v22, %v1572_v36  ;;  %v1559_v23 = vadd.f32 %v1558_v19, %v1551_v0 }
 0x268   : > { %1635 = vst [vmem:[%s6534_s24] sm:$0xff] %v4979_v42  ;;  %v1581_v41 = vadd.f32 %v1580_v54, %v1573_v50  ;;  %v1560_v1 = vadd.f32 %v1559_v23, %v1552_v6 }
 0x269   : > { %v1484_v34 = vpop.f32.mrb[16].mxu0 }
 0x26a   : > { %v1554_v45 = vmul.f32 %v6657_v8, %v1484_v34  ;;  %5438 = vtanh.f32 %v1484_v34  ;;  %v5053_v17 = vpop.f32.mrb[17].mxu0  ;;  %v1561_v15 = vadd.f32 %v1560_v1, %v1553_v7  ;;  %v1582_v44 = vadd.f32 %v1581_v41, %v1574_v61 }
 0x26b   : > { %v1487_v49 = vpop.f32.mrb[18].mxu0 }
 0x26c   : > { %v5435_v51 = vpop.eup %5434  ;;  %v1576_v14 = vmul.f32 %v1554_v45, %v1554_v45  ;;  %v5054_v37 = vpop.f32.mrb[19].mxu0  ;;  %v1563_v28 = vsel %vm1562_vm10, %v1554_v45, 0.0  ;;  %v1583_v10 = vadd.f32 %v1582_v44, %v1575_v48 }
 0x26d   : > { %v5437_v56 = vpop.eup %5436  ;;  %v1564_v52 = vadd.f32 %v1563_v28, %v1561_v15 }
 0x26e   : > { %v4981_v3 = vpack.c.bf16 %v5437_v56, %v5435_v51  ;;  %v1584_v26 = vsel %vm1562_vm10, %v1576_v14, 0.0 }
 0x26f   : > { %1565 = vadd.xlane.f32.xlu1 %v1564_v52  ;;  %v1585_v4 = vadd.f32 %v1584_v26, %v1583_v10 }
 0x270   : > { %1637 = vst [vmem:[%s6534_s24 + $0x10] sm:$0xff] %v4981_v3 }
 0x271   : > { %1586 = vadd.xlane.f32.xlu0 %v1585_v4 }
 0x274   : > { %v5439_v43 = vpop.eup %5438 }
 0x275   : > { %v4983_v46 = vpack.c.bf16 %v5439_v43, %v5439_v43 }
 0x277   : > { %1640 = vst.msk [vmem:[%s6534_s24 + $0x20] sm:$0xf] %vm1639_vm11, %v4983_v46 }
 0x27b   : > { %v2388_v9 = vpop.f32.mrb[8].mxu1 }
 0x27c   : > { %v2567_v12 = vmul.f32 %v2388_v9, %v6601_v62  ;;  %5440 = vtanh.f32 %v2388_v9  ;;  %v2390_v11 = vpop.f32.mrb[9].mxu1 }
 0x27d   : > { %v2568_v24 = vmul.f32 %v2390_v11, %v6608_v29  ;;  %5442 = vtanh.f32 %v2390_v11  ;;  %v2392_v16 = vpop.f32.mrb[10].mxu1 }
 0x27e   : > { %v2588_v25 = vmul.f32 %v2567_v12, %v2567_v12  ;;  %v2393_v38 = vpop.f32.mrb[11].mxu1 }
 0x27f   : > { %v2576_v39 = vadd.f32 %v2568_v24, %v2567_v12  ;;  %v2589_v53 = vmul.f32 %v2568_v24, %v2568_v24 }
 0x281   : > { %v2597_v27 = vadd.f32 %v2589_v53, %v2588_v25 }
 0x283   : > { %v2429_v59 = vpop.f32.mrb[12].mxu1 }
 0x284   : > { %v2569_v5 = vmul.f32 %v2429_v59, %v6605_v63  ;;  %5444 = vtanh.f32 %v2429_v59  ;;  %v2431_v60 = vpop.f32.mrb[13].mxu1 }
 0x285   : > { %v2570_v32 = vmul.f32 %v2431_v60, %v6613_v2  ;;  %5446 = vtanh.f32 %v2431_v60  ;;  %v2433_v21 = vpop.f32.mrb[14].mxu1 }
 0x286   : > { %v5441_v40 = vpop.eup %5440  ;;  %v2577_v18 = vadd.f32 %v2576_v39, %v2569_v5  ;;  %v2590_v55 = vmul.f32 %v2569_v5, %v2569_v5  ;;  %v2434_v13 = vpop.f32.mrb[15].mxu1 }
 0x287   : > { %v5443_v22 = vpop.eup %5442  ;;  %v2591_v0 = vmul.f32 %v2570_v32, %v2570_v32 }
 0x288   : > { %v4984_v30 = vpack.c.bf16 %v5443_v22, %v5441_v40  ;;  %v2598_v35 = vadd.f32 %v2597_v27, %v2590_v55  ;;  %v2578_v6 = vadd.f32 %v2577_v18, %v2570_v32 }
 0x28a   : > { %4900 = vst [vmem:[%s6534_s24 + $0x24] sm:$0xff] %v4984_v30  ;;  %v2599_v19 = vadd.f32 %v2598_v35, %v2591_v0 }
 0x28b   : > { %v2470_v36 = vpop.f32.mrb[16].mxu1 }
 0x28c   : > { %v2571_v31 = vmul.f32 %v2470_v36, %v6631_v58  ;;  %5448 = vtanh.f32 %v2470_v36  ;;  %v2472_v20 = vpop.f32.mrb[17].mxu1 }
 0x28d   : > { %v2572_v7 = vmul.f32 %v2472_v20, %v6635_v57  ;;  %5450 = vtanh.f32 %v2472_v20  ;;  %v2474_v50 = vpop.f32.mrb[18].mxu1 }
 0x28e   : > { %v5445_v42 = vpop.eup %5444  ;;  %v2579_v54 = vadd.f32 %v2578_v6, %v2571_v31  ;;  %v2592_v23 = vmul.f32 %v2571_v31, %v2571_v31  ;;  %v2475_v61 = vpop.f32.mrb[19].mxu1 }
 0x28f   : > { %v5447_v41 = vpop.eup %5446  ;;  %v2593_v1 = vmul.f32 %v2572_v7, %v2572_v7 }
 0x290   : > { %v4985_v48 = vpack.c.bf16 %v5447_v41, %v5445_v42  ;;  %v2600_v34 = vadd.f32 %v2599_v19, %v2592_v23  ;;  %v2580_v45 = vadd.f32 %v2579_v54, %v2572_v7 }
 0x292   : > { %4901 = vst [vmem:[%s6534_s24 + $0x2c] sm:$0xff] %v4985_v48  ;;  %v2601_v17 = vadd.f32 %v2600_v34, %v2593_v1 }
 0x293   : > { %v2511_v15 = vpop.f32.mrb[20].mxu1 }
 0x294   : > { %v2573_v44 = vmul.f32 %v2511_v15, %v6639_v33  ;;  %5452 = vtanh.f32 %v2511_v15  ;;  %v2513_v49 = vpop.f32.mrb[21].mxu1 }
 0x295   : > { %v2574_v51 = vmul.f32 %v2513_v49, %v6644_v47  ;;  %5454 = vtanh.f32 %v2513_v49  ;;  %v2552_v14 = vpop.f32.mrb[20].mxu0  ;;  %v2515_v37 = vpop.f32.mrb[22].mxu1 }
 0x296   : > { %v5449_v28 = vpop.eup %5448  ;;  %v2581_v10 = vadd.f32 %v2580_v45, %v2573_v44  ;;  %v2594_v56 = vmul.f32 %v2573_v44, %v2573_v44  ;;  %v2575_v52 = vmul.f32 %v6657_v8, %v2552_v14  ;;  %5456 = vtanh.f32 %v2552_v14  ;;  %v5077_v3 = vpop.f32.mrb[21].mxu0 }
 0x297   : > { %v2516_v26 = vpop.f32.mrb[23].mxu1  ;;  %v5451_v4 = vpop.eup %5450  ;;  %v2595_v43 = vmul.f32 %v2574_v51, %v2574_v51 }
 0x298   : > { %v2555_v46 = vpop.f32.mrb[22].mxu0  ;;  %v4986_v9 = vpack.c.bf16 %v5451_v4, %v5449_v28  ;;  %v2596_v12 = vmul.f32 %v2575_v52, %v2575_v52  ;;  %v2582_v24 = vadd.f32 %v2581_v10, %v2574_v51  ;;  %v2583_v16 = vsel %vm1562_vm10, %v2575_v52, 0.0 }
 0x299   : > { %v5078_v11 = vpop.f32.mrb[23].mxu0  ;;  %v2602_v25 = vadd.f32 %v2601_v17, %v2594_v56 }
 0x29a   : > { %4902 = vst [vmem:[%s6534_s24 + $0x34] sm:$0xff] %v4986_v9  ;;  %v2584_v38 = vadd.f32 %v2583_v16, %v2582_v24  ;;  %v2604_v53 = vsel %vm1562_vm10, %v2596_v12, 0.0 }
 0x29b   : > { %v2603_v39 = vadd.f32 %v2602_v25, %v2595_v43 }
 0x29c   : > { %2585 = vadd.xlane.f32.xlu0 %v2584_v38 }
 0x29d   : > { %v2605_v27 = vadd.f32 %v2604_v53, %v2603_v39 }
 0x29e   : > { %v5453_v59 = vpop.eup %5452 }
 0x29f   : > { %v5455_v5 = vpop.eup %5454  ;;  %2606 = vadd.xlane.f32.xlu1 %v2605_v27 }
 0x2a0   : > { %v5457_v60 = vpop.eup %5456  ;;  %v4987_v32 = vpack.c.bf16 %v5455_v5, %v5453_v59 }
 0x2a1   : > { %v4988_v21 = vpack.c.bf16 %v5457_v60, %v5457_v60 }
 0x2a2   : > { %4903 = vst [vmem:[%s6534_s24 + $0x3c] sm:$0xff] %v4987_v32 }
 0x2a3   : > { %4904 = vst.msk [vmem:[%s6534_s24 + $0x44] sm:$0xf] %vm1639_vm11, %v4988_v21 }
 0x313   : > { %v4402_v40 = vpop.f32.mrb[24].mxu1 }
 0x314   : > { %v4581_v18 = vmul.f32 %v4402_v40, %v6601_v62  ;;  %5458 = vtanh.f32 %v4402_v40  ;;  %v4404_v55 = vpop.f32.mrb[25].mxu1 }
 0x315   : > { %v3415_v13 = vpop.f32.mrb[24].mxu0  ;;  %v4582_v22 = vmul.f32 %v4404_v55, %v6608_v29  ;;  %5460 = vtanh.f32 %v4404_v55  ;;  %v4406_v0 = vpop.f32.mrb[26].mxu1 }
 0x316   : > { %v4602_v30 = vmul.f32 %v4581_v18, %v4581_v18  ;;  %v3594_v35 = vmul.f32 %v3415_v13, %v6601_v62  ;;  %5462 = vtanh.f32 %v3415_v13  ;;  %v3417_v6 = vpop.f32.mrb[25].mxu0  ;;  %v4407_v19 = vpop.f32.mrb[27].mxu1 }
 0x317   : > { %v4590_v36 = vadd.f32 %v4582_v22, %v4581_v18  ;;  %v4603_v31 = vmul.f32 %v4582_v22, %v4582_v22  ;;  %v3595_v20 = vmul.f32 %v3417_v6, %v6608_v29  ;;  %5464 = vtanh.f32 %v3417_v6  ;;  %v3419_v7 = vpop.f32.mrb[26].mxu0 }
 0x318   : > { %v3615_v50 = vmul.f32 %v3594_v35, %v3594_v35  ;;  %v3420_v42 = vpop.f32.mrb[27].mxu0 }
 0x319   : > { %v4611_v54 = vadd.f32 %v4603_v31, %v4602_v30  ;;  %v3603_v23 = vadd.f32 %v3595_v20, %v3594_v35  ;;  %v3616_v61 = vmul.f32 %v3595_v20, %v3595_v20 }
 0x31b   : > { %v3624_v41 = vadd.f32 %v3616_v61, %v3615_v50  ;;  %v4443_v1 = vpop.f32.mrb[28].mxu1 }
 0x31c   : > { %v4583_v48 = vmul.f32 %v4443_v1, %v6605_v63  ;;  %5466 = vtanh.f32 %v4443_v1  ;;  %v4445_v62 = vpop.f32.mrb[29].mxu1 }
 0x31d   : > { %v3456_v34 = vpop.f32.mrb[28].mxu0  ;;  %v4584_v45 = vmul.f32 %v4445_v62, %v6613_v2  ;;  %5468 = vtanh.f32 %v4445_v62  ;;  %v4447_v17 = vpop.f32.mrb[30].mxu1 }
 0x31e   : > { %v5459_v15 = vpop.eup %5458  ;;  %v4591_v29 = vadd.f32 %v4590_v36, %v4583_v48  ;;  %v4604_v44 = vmul.f32 %v4583_v48, %v4583_v48  ;;  %v3596_v49 = vmul.f32 %v3456_v34, %v6605_v63  ;;  %5470 = vtanh.f32 %v3456_v34  ;;  %v3458_v51 = vpop.f32.mrb[29].mxu0 }
 0x31f   : > { %v4448_v14 = vpop.f32.mrb[31].mxu1  ;;  %v5461_v37 = vpop.eup %5460  ;;  %v4605_v28 = vmul.f32 %v4584_v45, %v4584_v45  ;;  %v3597_v10 = vmul.f32 %v3458_v51, %v6613_v2  ;;  %5472 = vtanh.f32 %v3458_v51 }
 0x320   : > { %v3460_v56 = vpop.f32.mrb[30].mxu0  ;;  %v5463_v52 = vpop.eup %5462  ;;  %v4994_v3 = vpack.c.bf16 %v5461_v37, %v5459_v15  ;;  %v4612_v26 = vadd.f32 %v4611_v54, %v4604_v44  ;;  %v3604_v4 = vadd.f32 %v3603_v23, %v3596_v49  ;;  %v3617_v43 = vmul.f32 %v3596_v49, %v3596_v49 }
 0x321   : > { %v3461_v46 = vpop.f32.mrb[31].mxu0  ;;  %v5465_v9 = vpop.eup %5464  ;;  %v4592_v12 = vadd.f32 %v4591_v29, %v4584_v45  ;;  %v3618_v63 = vmul.f32 %v3597_v10, %v3597_v10 }
 0x322   : > { %4968 = vst [vmem:[%s6534_s24 + $0x6c] sm:$0xff] %v4994_v3  ;;  %v4989_v11 = vpack.c.bf16 %v5465_v9, %v5463_v52  ;;  %v3625_v24 = vadd.f32 %v3624_v41, %v3617_v43  ;;  %v4613_v16 = vadd.f32 %v4612_v26, %v4605_v28  ;;  %v3605_v25 = vadd.f32 %v3604_v4, %v3597_v10 }
 0x323   : > { %v4484_v38 = vpop.f32.mrb[32].mxu1 }
 0x324   : > { %4934 = vst [vmem:[%s6534_s24 + $0x48] sm:$0xff] %v4989_v11  ;;  %v3626_v2 = vadd.f32 %v3625_v24, %v3618_v63  ;;  %v4585_v39 = vmul.f32 %v4484_v38, %v6631_v58  ;;  %5474 = vtanh.f32 %v4484_v38  ;;  %v4486_v53 = vpop.f32.mrb[33].mxu1 }
 0x325   : > { %v3497_v27 = vpop.f32.mrb[32].mxu0  ;;  %v4586_v59 = vmul.f32 %v4486_v53, %v6635_v57  ;;  %5476 = vtanh.f32 %v4486_v53  ;;  %v4488_v5 = vpop.f32.mrb[34].mxu1 }
 0x326   : > { %v5467_v60 = vpop.eup %5466  ;;  %v4593_v32 = vadd.f32 %v4592_v12, %v4585_v39  ;;  %v4606_v21 = vmul.f32 %v4585_v39, %v4585_v39  ;;  %v3598_v40 = vmul.f32 %v3497_v27, %v6631_v58  ;;  %5478 = vtanh.f32 %v3497_v27  ;;  %v3499_v18 = vpop.f32.mrb[33].mxu0 }
 0x327   : > { %v4489_v55 = vpop.f32.mrb[35].mxu1  ;;  %v5469_v13 = vpop.eup %5468  ;;  %v4607_v22 = vmul.f32 %v4586_v59, %v4586_v59  ;;  %v3599_v0 = vmul.f32 %v3499_v18, %v6635_v57  ;;  %5480 = vtanh.f32 %v3499_v18 }
 0x328   : > { %v3501_v30 = vpop.f32.mrb[34].mxu0  ;;  %v5471_v35 = vpop.eup %5470  ;;  %v4995_v6 = vpack.c.bf16 %v5469_v13, %v5467_v60  ;;  %v4614_v19 = vadd.f32 %v4613_v16, %v4606_v21  ;;  %v3606_v36 = vadd.f32 %v3605_v25, %v3598_v40  ;;  %v3619_v31 = vmul.f32 %v3598_v40, %v3598_v40 }
 0x329   : > { %v3502_v20 = vpop.f32.mrb[35].mxu0  ;;  %v5473_v7 = vpop.eup %5472  ;;  %v4594_v50 = vadd.f32 %v4593_v32, %v4586_v59  ;;  %v3620_v58 = vmul.f32 %v3599_v0, %v3599_v0 }
 0x32a   : > { %4969 = vst [vmem:[%s6534_s24 + $0x74] sm:$0xff] %v4995_v6  ;;  %v4990_v42 = vpack.c.bf16 %v5473_v7, %v5471_v35  ;;  %v3627_v54 = vadd.f32 %v3626_v2, %v3619_v31  ;;  %v4615_v23 = vadd.f32 %v4614_v19, %v4607_v22  ;;  %v3607_v61 = vadd.f32 %v3606_v36, %v3599_v0 }
 0x32b   : > { %v4525_v41 = vpop.f32.mrb[36].mxu1 }
 0x32c   : > { %4935 = vst [vmem:[%s6534_s24 + $0x50] sm:$0xff] %v4990_v42  ;;  %v3628_v57 = vadd.f32 %v3627_v54, %v3620_v58  ;;  %v4587_v1 = vmul.f32 %v4525_v41, %v6639_v33  ;;  %5482 = vtanh.f32 %v4525_v41  ;;  %v4527_v48 = vpop.f32.mrb[37].mxu1  ;;  %v1587_v54 = vpop.xlane.xlu0 %1586 }
 0x32d   : > { %v3538_v62 = vpop.f32.mrb[36].mxu0  ;;  %v4588_v34 = vmul.f32 %v4527_v48, %v6644_v47  ;;  %5484 = vtanh.f32 %v4527_v48  ;;  %v4529_v45 = vpop.f32.mrb[38].mxu1 }
 0x32e   : > { %v5475_v17 = vpop.eup %5474  ;;  %v4595_v15 = vadd.f32 %v4594_v50, %v4587_v1  ;;  %v4608_v29 = vmul.f32 %v4587_v1, %v4587_v1  ;;  %v3600_v44 = vmul.f32 %v3538_v62, %v6639_v33  ;;  %5486 = vtanh.f32 %v3538_v62  ;;  %v3540_v49 = vpop.f32.mrb[37].mxu0 }
 0x32f   : > { %v4530_v51 = vpop.f32.mrb[39].mxu1  ;;  %v5477_v14 = vpop.eup %5476  ;;  %v4609_v37 = vmul.f32 %v4588_v34, %v4588_v34  ;;  %v3601_v28 = vmul.f32 %v3540_v49, %v6644_v47  ;;  %5488 = vtanh.f32 %v3540_v49 }
 0x330   : > { %v3542_v10 = vpop.f32.mrb[38].mxu0  ;;  %v5479_v56 = vpop.eup %5478  ;;  %v4996_v52 = vpack.c.bf16 %v5477_v14, %v5475_v17  ;;  %v3608_v3 = vadd.f32 %v3607_v61, %v3600_v44  ;;  %v3621_v26 = vmul.f32 %v3600_v44, %v3600_v44  ;;  %v4596_v43 = vadd.f32 %v4595_v15, %v4588_v34 }
 0x331   : > { %v3543_v4 = vpop.f32.mrb[39].mxu0  ;;  %v5481_v46 = vpop.eup %5480  ;;  %v3622_v9 = vmul.f32 %v3601_v28, %v3601_v28  ;;  %v4616_v33 = vadd.f32 %v4615_v23, %v4608_v29 }
 0x332   : > { %4970 = vst [vmem:[%s6534_s24 + $0x7c] sm:$0xff] %v4996_v52  ;;  %v4991_v12 = vpack.c.bf16 %v5481_v46, %v5479_v56  ;;  %v3609_v63 = vadd.f32 %v3608_v3, %v3601_v28  ;;  %v3629_v11 = vadd.f32 %v3628_v57, %v3621_v26  ;;  %v1566_v23 = vpop.xlane.xlu1 %1565  ;;  %v2586_v61 = vpop.xlane.xlu0 %2585 }
 0x333   : > { %v4566_v24 = vpop.f32.mrb[40].mxu1  ;;  %v4617_v16 = vadd.f32 %v4616_v33, %v4609_v37  ;;  %v2587_v1 = vadd.f32 %v2586_v61, %v1566_v23 }
 0x334   : > { %4936 = vst [vmem:[%s6534_s24 + $0x58] sm:$0xff] %v4991_v12  ;;  %v4589_v47 = vmul.f32 %v6657_v8, %v4566_v24  ;;  %5490 = vtanh.f32 %v4566_v24  ;;  %v5125_v25 = vpop.f32.mrb[41].mxu1  ;;  %v3630_v38 = vadd.f32 %v3629_v11, %v3622_v9 }
 0x335   : > { %v3579_v2 = vpop.f32.mrb[40].mxu0  ;;  %v4569_v39 = vpop.f32.mrb[42].mxu1 }
 0x336   : > { %v5483_v53 = vpop.eup %5482  ;;  %v4610_v27 = vmul.f32 %v4589_v47, %v4589_v47  ;;  %v3602_v59 = vmul.f32 %v6657_v8, %v3579_v2  ;;  %5492 = vtanh.f32 %v3579_v2  ;;  %v5101_v5 = vpop.f32.mrb[41].mxu0  ;;  %v4597_v32 = vsel %vm1562_vm10, %v4589_v47, 0.0 }
 0x337   : > { %v5126_v60 = vpop.f32.mrb[43].mxu1  ;;  %v5485_v21 = vpop.eup %5484  ;;  %v4598_v18 = vadd.f32 %v4597_v32, %v4596_v43 }
 0x338   : > { %v3582_v40 = vpop.f32.mrb[42].mxu0  ;;  %v5487_v55 = vpop.eup %5486  ;;  %v4997_v13 = vpack.c.bf16 %v5485_v21, %v5483_v53  ;;  %v3623_v22 = vmul.f32 %v3602_v59, %v3602_v59  ;;  %v3610_v30 = vsel %vm1562_vm10, %v3602_v59, 0.0  ;;  %v4618_v35 = vsel %vm1562_vm10, %v4610_v27, 0.0 }
 0x339   : > { %v5102_v0 = vpop.f32.mrb[43].mxu0  ;;  %v5489_v8 = vpop.eup %5488  ;;  %v3611_v6 = vadd.f32 %v3610_v30, %v3609_v63  ;;  %v4619_v19 = vadd.f32 %v4618_v35, %v4617_v16 }
 0x33a   : > { %4971 = vst [vmem:[%s6534_s24 + $0x84] sm:$0xff] %v4997_v13  ;;  %v4992_v36 = vpack.c.bf16 %v5489_v8, %v5487_v55  ;;  %v3631_v31 = vsel %vm1562_vm10, %v3623_v22, 0.0  ;;  %v2607_v41 = vpop.xlane.xlu1 %2606 }
 0x33b   : > { %3612 = vadd.xlane.f32.xlu0 %v3611_v6  ;;  %v3632_v20 = vadd.f32 %v3631_v31, %v3630_v38  ;;  %v2608_v62 = vadd.f32 %v2607_v41, %v1587_v54 }
 0x33c   : > { %4937 = vst [vmem:[%s6534_s24 + $0x60] sm:$0xff] %v4992_v36 }
 0x33d   : > { %3633 = vadd.xlane.f32.xlu1 %v3632_v20 }
 0x33e   : > { %v5491_v7 = vpop.eup %5490 }
 0x33f   : > { %v4998_v50 = vpack.c.bf16 %v5491_v7, %v5491_v7  ;;  %4599 = vadd.xlane.f32.xlu0 %v4598_v18 }
 0x340   : > { %v5493_v58 = vpop.eup %5492 }
 0x341   : > { %4972 = vst.msk [vmem:[%s6534_s24 + $0x8c] sm:$0xf] %vm1639_vm11, %v4998_v50  ;;  %v4993_v42 = vpack.c.bf16 %v5493_v58, %v5493_v58  ;;  %4620 = vadd.xlane.f32.xlu1 %v4619_v19 }
 0x343   : > { %4938 = vst.msk [vmem:[%s6534_s24 + $0x68] sm:$0xf] %vm1639_vm11, %v4993_v42  ;;  %s6722_s24 = scalar_lea.vmem [#allocation4], %s4838_s21  ;;  %s5494_s21 = scalar_lea.vmem %s6730_s25, 128 }
 0x344   : > { %s4718_s26 = sshll.u32 %s6722_s24, 4  ;;  %p5495_p11 = scmp.ne.s32.totalorder %s6730_s25, %s5494_s21  ;;  %s6738_s26 = int_to_ptr.vmem [resolvable:$true] %s4718_s26 }
 0x345   : > { %p5502_p1 = scmp.lt.s32.totalorder %s5500_s0, %s5494_s21 }
 0x346   : > { %p5496_p12 = pnand %p5495_p11, %p5686_p5 }
 0x347   : > { %p5503_p2 = por %p5502_p1, %p5501_p0 }
 0x348   : > { %p5497_p13 = pneg %p5496_p12 }
 0x34a   : > { %p5504_p3 = pnand %p5503_p2, %p5497_p13 }
 0x3c8   : > { %v3613_v57 = vpop.xlane.xlu0 %3612 }
 0x3c9   : > { %v3614_v34 = vadd.f32 %v3613_v57, %v2587_v1 }
 0x3ca   : > { %v3634_v48 = vpop.xlane.xlu1 %3633 }
 0x3cb   : > { %v3635_v17 = vadd.f32 %v3634_v48, %v2608_v62 }
 0x3cc   : > { %v4600_v45 = vpop.xlane.xlu0 %4599 }
 0x3cd   : > { %v4601_v15 = vadd.f32 %v4600_v45, %v3614_v34 }
 0x3ce   : > { %v4621_v29 = vpop.xlane.xlu1 %4620 }
 0x3cf   : > { %v4622_v44 = vadd.f32 %v4621_v29, %v3635_v17  ;;  %4676 = vst.msk [vmem:[%s309_s23] sm:$0xff] %vm4675_vm12, %v4601_v15 }
 0x3d0   : > { %5507 = shalt.err (!%p5504_p3)
}
 0x3d1   : > { %s5508_s22 = scalar_lea.hbm %s6728_s13, 128  ;;  %s5512_s17 = scalar_lea.hbm %s6810_s7, 256 }
 0x3d2   : > { %p5509_p4 = scmp.ne.s32.totalorder %s6728_s13, %s5508_s22  ;;  %p5513_p9 = scmp.lt.u32.totalorder %s6728_s13, %s6810_s7 }
 0x3d3   : > { %p5514_p10 = scmp.lt.u32.totalorder %s5512_s17, %s5508_s22  ;;  %p5516_p12 = scmp.lt.u32.totalorder %s5508_s22, %s6728_s13 }
 0x3d4   : > { %p5510_p7 = pnand %p5509_p4, %p5686_p5 }
 0x3d5   : > { %p5515_p11 = por %p5514_p10, %p5513_p9 }
 0x3d6   : > { %p5511_p8 = pneg %p5510_p7 }
 0x3d7   : > { %p5517_p13 = por %p5516_p12, %p5515_p11 }
 0x3d9   : > { %p5518_p0 = pnand %p5517_p13, %p5511_p8 }
 0x3db   : > { %5521 = shalt.err (!%p5518_p0)
}
 0x3dc   : > { %5365 = dma.vmem_to_hbm [thread:$0]  (%p5686_p5), %s6730_s25, 128, %s6728_s13, %s4684_s19   ;;  %4677 = vst.msk [vmem:[%s6722_s24] sm:$0xff] %vm4675_vm12, %v4622_v44 }
 0x3dd   : > { %s4689_s0 = scalar_lea.sflag [#allocation5], %s6718_s20  ;;  %s5522_s21 = scalar_lea.vmem %s6738_s26, 128 }
 0x3de   : > { %p5523_p1 = scmp.ne.s32.totalorder %s6738_s26, %s5522_s21  ;;  %s5602_s22 = smov [#allocation4]  }
 0x3df   : > { %s5526_s23 = sshll.u32 %s5602_s22, 4  ;;  %s5527_s23 = int_to_ptr.vmem [resolvable:$false] %s5526_s23 }
 0x3e0   : > { %p5524_p2 = pnand %p5523_p1, %p5686_p5  ;;  %s5528_s9 = scalar_lea.vmem %s5527_s23, 256 }
 0x3e1   : > { %p5529_p4 = scmp.lt.s32.totalorder %s6738_s26, %s5527_s23  ;;  %p5530_p7 = scmp.lt.s32.totalorder %s5528_s9, %s5522_s21 }
 0x3e2   : > { %p5525_p3 = pneg %p5524_p2 }
 0x3e3   : > { %p5531_p8 = por %p5530_p7, %p5529_p4 }
 0x3e5   : > { %p5532_p9 = pnand %p5531_p8, %p5525_p3 }
 0x3e7   : > { %5535 = shalt.err (!%p5532_p9)
}
 0x3e8   : > { %s5536_s20 = scalar_lea.hbm %s6736_s18, 128  ;;  %s5540_s13 = scalar_lea.hbm %s6811_s8, 256 }
 0x3e9   : > { %p5537_p10 = scmp.ne.s32.totalorder %s6736_s18, %s5536_s20  ;;  %p5541_p13 = scmp.lt.u32.totalorder %s6736_s18, %s6811_s8 }
 0x3ea   : > { %p5542_p0 = scmp.lt.u32.totalorder %s5540_s13, %s5536_s20  ;;  %p5544_p2 = scmp.lt.u32.totalorder %s5536_s20, %s6736_s18 }
 0x3eb   : > { %p5538_p11 = pnand %p5537_p10, %p5686_p5 }
 0x3ec   : > { %p5543_p1 = por %p5542_p0, %p5541_p13 }
 0x3ed   : > { %p5539_p12 = pneg %p5538_p11 }
 0x3ee   : > { %p5545_p3 = por %p5544_p2, %p5543_p1 }
 0x3f0   : > { %p5546_p4 = pnand %p5545_p3, %p5539_p12 }
 0x3f2   : > { %5549 = shalt.err (!%p5546_p4)
}
 0x3f3   : > { %5366 = dma.vmem_to_hbm [thread:$0]  (%p5686_p5), %s6738_s26, 128, %s6736_s18, %s4689_s0  }
 0x3f4 PF: > { %p5376_p7 = scmp.ge.s32.totalorder %s5588_s30, 2  ;;  %s4738_s10 = sand.u32 1, %s5576_s27  }
 0x3f5   : > { %s4739_s12 = scalar_lea.sflag [#allocation3], %s4738_s10 }
 0x3f6   : > { %p5370_p8 = pnand %p5376_p7, %p5690_p6 }
 0x3f8   : > { %5567 = dma.done.wait (!%p5370_p8), %s4739_s12, 128  }
 0x3f9   : > { %5569 = vsyncadd (!%p5370_p8), %s4739_s12, 4294967168  ;;  %s4748_s21 = scalar_lea.sflag [#allocation5], %s4738_s10 }
 0x3fa   : > { %5571 = dma.done.wait (!%p5370_p8), %s4748_s21, 128  }
 0x3fb   : > { %5573 = vsyncadd (!%p5370_p8), %s4748_s21, 4294967168  ;;  %p22_p5 = scmp.ge.s32.totalorder %s5673_s11, 4   ;;  %s6816_s27 = smov %s5580_s28 }
 0x3fc   : > { %s6817_s28 = smov %s5584_s29  ;;  %s6818_s29 = smov %s5684_s14 }
 0x3fd   : > { %s6819_s30 = smov %s5673_s11  ;;  %24 = sbr.rel (!%p22_p5) target bundleno = 7 (0x7), region = 126 }
 0x404   :  { %4753 = vsyncpa [#allocation3], 1 }
 0x405   :  { %4755 = vsyncpa [#allocation3 + $0x1], 1 }
 0x406   :  { %4756 = vsyncpa [#allocation5], 1 }
 0x407   :  { %4758 = vsyncpa [#allocation5 + $0x1], 1 }

</bundles_post_ra>
